<compile_context>
chip_gen: v7x
topology: tpu7x:2x2x1
jax: 0.10.0
libtpu: 0.0.40
codegen_flags: <defaults>
</compile_context>

<pallas_src>
import functools

import jax
import jax.numpy as jnp
from jax.experimental import pallas as pl
from jax.experimental.pallas import tpu as pltpu


# ----------------------------------------------------------------------------
# Fused kernel: up2x + concat -> conv3x3+bias+ReLU -> conv3x3+bias+ReLU
# (one batch element per grid step; BN scale pre-folded into the weights)
# ----------------------------------------------------------------------------
def _decoder_block_kernel(*refs, has_skip, use_im2col1, use_im2col2):
    if has_skip:
        (x_ref, skip_ref, w1_ref, b1_ref, w2_ref, b2_ref,
         o_ref, pad1_ref, pad2_ref) = refs
    else:
        (x_ref, w1_ref, b1_ref, w2_ref, b2_ref,
         o_ref, pad1_ref, pad2_ref) = refs
        skip_ref = None

    hx, wx, cx = x_ref.shape[1], x_ref.shape[2], x_ref.shape[3]
    H, W = 2 * hx, 2 * wx
    cin = pad1_ref.shape[-1]
    cmid = pad2_ref.shape[-1]

    # --- re-zero only the 1-px halo strips (interior fully overwritten below).
    def zero_halo(pad_ref, c):
        row = jnp.zeros((1, W + 2, c), pad_ref.dtype)
        col = jnp.zeros((H + 2, 1, c), pad_ref.dtype)
        pad_ref[0:1, :, :] = row
        pad_ref[H + 1:H + 2, :, :] = row
        pad_ref[:, 0:1, :] = col
        pad_ref[:, W + 1:W + 2, :] = col

    zero_halo(pad1_ref, cin)
    zero_halo(pad2_ref, cmid)

    # --- conv1 input: nearest-2x upsample of x computed purely in VMEM and
    # --- written (with skip) directly into its channel range of pad1 (bf16).
    xb = x_ref[0]                                              # (hx, wx, cx)
    xup = jnp.repeat(jnp.repeat(xb, 2, axis=0), 2, axis=1)     # (H, W, cx)
    pad1_ref[1:H + 1, 1:W + 1, 0:cx] = xup
    if has_skip:
        pad1_ref[1:H + 1, 1:W + 1, cx:cin] = skip_ref[0]

    def conv3x3(pad_ref, w_ref, c, use_im2col, channel_major_out):
        # 3x3 conv from a zero-padded bf16 HWC tile, f32 accumulation.
        #   channel_major_out=False -> (H*W, Cout)   (canonical matmul)
        #   channel_major_out=True  -> (Cout, H*W)   (lane-dense, NCHW-ready)
        taps = [pad_ref[ky:ky + H, kx:kx + W, :].reshape(H * W, c)
                for ky in range(3) for kx in range(3)]
        if channel_major_out:
            # TODO(synk): verify with pl.lower_as_mlir that this (M,K)x(N,K)
            # dot_general does not insert an XLU transpose of the patch.
            dn = (((1,), (1,)), ((), ()))
            if use_im2col:
                p = jnp.concatenate(taps, axis=-1)             # (H*W, 9c)
                return jax.lax.dot_general(
                    w_ref[...], p, dn, preferred_element_type=jnp.float32)
            acc = None
            for t, xs in enumerate(taps):
                part = jax.lax.dot_general(
                    w_ref[:, t * c:(t + 1) * c], xs, dn,
                    preferred_element_type=jnp.float32)
                acc = part if acc is None else acc + part
            return acc
        if use_im2col:
            p = jnp.concatenate(taps, axis=-1)                 # (H*W, 9c)
            return jnp.dot(p, w_ref[...], preferred_element_type=jnp.float32)
        acc = None
        for t, xs in enumerate(taps):
            part = jnp.dot(xs, w_ref[t * c:(t + 1) * c, :],
                           preferred_element_type=jnp.float32)
            acc = part if acc is None else acc + part
        return acc

    # --- conv1 (BN scale pre-folded) + bias + ReLU; single bf16 cast into pad2.
    y1 = conv3x3(pad1_ref, w1_ref, cin, use_im2col1, channel_major_out=False)
    y1 = jnp.maximum(y1 + b1_ref[...], 0.0)                    # (H*W, cmid) f32
    pad2_ref[1:H + 1, 1:W + 1, :] = y1.astype(jnp.bfloat16).reshape(H, W, cmid)

    # --- conv2: channel-major output -> lane-dense store, already NCHW-ordered.
    y2 = conv3x3(pad2_ref, w2_ref, cmid, use_im2col2, channel_major_out=True)
    y2 = jnp.maximum(y2 + b2_ref[...], 0.0)                    # (cout, H*W) f32
    o_ref[...] = y2[None].astype(o_ref.dtype)


def _fold_bn(gamma, beta, mean, var, eps):
    scale = gamma / jnp.sqrt(var + eps)
    return scale, beta - mean * scale


# ----------------------------------------------------------------------------
# DecoderBlock.forward((x, skip)) -- NCHW in / NCHW out, eval-mode BN
# ----------------------------------------------------------------------------
def decoder_block_forward(x_nchw, skip_nchw, params, eps=1e-5):
    N, cx, hx, wx = x_nchw.shape
    H, W = 2 * hx, 2 * wx

    # Low-res x (and skip) go in as bf16 NHWC; the upsample itself happens
    # inside the kernel so the 4x tensor is never materialized in HBM.
    imgs = [jnp.transpose(x_nchw, (0, 2, 3, 1)).astype(jnp.bfloat16)]
    if skip_nchw is not None:
        assert skip_nchw.shape[0] == N
        assert skip_nchw.shape[2] == H and skip_nchw.shape[3] == W
        imgs.append(jnp.transpose(skip_nchw, (0, 2, 3, 1)).astype(jnp.bfloat16))
    cs = imgs[1].shape[-1] if skip_nchw is not None else 0
    cin = cx + cs

    w1, w2 = params["w1"], params["w2"]
    cmid, cout = w1.shape[0], w2.shape[0]
    assert w1.shape[1] == cin and w2.shape[1] == cmid

    # Fold eval-mode BN into the weights in f32, then cast to bf16.
    s1, b1 = _fold_bn(params["g1"], params["b1"], params["m1"], params["v1"], eps)
    s2, b2 = _fold_bn(params["g2"], params["b2"], params["m2"], params["v2"], eps)
    # conv1 weights: tap-major K -> (9*cin, cmid), columns scaled by s1.
    w1_km = (jnp.transpose(w1, (2, 3, 1, 0)).reshape(9 * cin, cmid)
             * s1[None, :]).astype(jnp.bfloat16)
    # conv2 weights: channel-major M -> (cout, 9*cmid), rows scaled by s2.
    w2_cm = (jnp.transpose(w2, (0, 2, 3, 1)).reshape(cout, 9 * cmid)
             * s2[:, None]).astype(jnp.bfloat16)
    b1 = b1.reshape(1, cmid).astype(jnp.float32)
    b2 = b2.reshape(cout, 1).astype(jnp.float32)

    img_specs = [pl.BlockSpec((1, hx, wx, cx), lambda n: (n, 0, 0, 0))]
    if skip_nchw is not None:
        img_specs.append(pl.BlockSpec((1, H, W, cs), lambda n: (n, 0, 0, 0)))
    param_specs = [
        pl.BlockSpec((9 * cin, cmid), lambda n: (0, 0)),
        pl.BlockSpec((1, cmid), lambda n: (0, 0)),
        pl.BlockSpec((cout, 9 * cmid), lambda n: (0, 0)),
        pl.BlockSpec((cout, 1), lambda n: (0, 0)),
    ]

    # Single big-K im2col only when 9*C exceeds the MXU K tile; otherwise use
    # 9 shift-and-accumulate matmuls (no 9x patch materialization in VMEM).
    use_im2col1 = (9 * cin) >= 256
    use_im2col2 = (9 * cmid) >= 256

    # Explicit scoped-VMEM limit: scratch + double-buffered blocks + headroom,
    # capped at 56 MiB so it also leaves headroom on v7x (64 MiB per TC).
    scratch_bytes = (H + 2) * (W + 2) * (cin + cmid) * 2
    block_bytes = ((hx * wx * cx + H * W * cs) * 2
                   + (9 * cin * cmid + cout * 9 * cmid) * 2
                   + (cmid + cout) * 4
                   + cout * H * W * jnp.dtype(x_nchw.dtype).itemsize)
    vmem_limit = int(min(max(scratch_bytes + 2 * block_bytes + (8 << 20),
                             32 << 20), 56 << 20))

    out = pl.pallas_call(
        functools.partial(_decoder_block_kernel,
                          has_skip=skip_nchw is not None,
                          use_im2col1=use_im2col1,
                          use_im2col2=use_im2col2),
        out_shape=jax.ShapeDtypeStruct((N, cout, H * W), x_nchw.dtype),
        grid=(N,),
        in_specs=img_specs + param_specs,
        out_specs=pl.BlockSpec((1, cout, H * W), lambda n: (n, 0, 0)),
        scratch_shapes=[
            pltpu.VMEM((H + 2, W + 2, cin), jnp.bfloat16),   # padded conv1 in
            pltpu.VMEM((H + 2, W + 2, cmid), jnp.bfloat16),  # padded conv2 in
        ],
        compiler_params=pltpu.CompilerParams(
            dimension_semantics=("parallel",),
            vmem_limit_bytes=vmem_limit),
    )(*imgs, w1_km, b1, w2_cm, b2)

    # (N, Cout, H*W) -> (N, Cout, H, W): free reshape, already channel-major.
    return out.reshape(N, cout, H, W)


# ----------------------------------------------------------------------------
# Pure-JAX reference (eval-mode BN; bf16 conv operands, f32 accumulation)
# ----------------------------------------------------------------------------
def _ref_forward(x, skip, params, eps=1e-5):
    x = jnp.repeat(jnp.repeat(x, 2, axis=2), 2, axis=3)
    if skip is not None:
        x = jnp.concatenate([x, skip], axis=1)

    def cbr(x, w, g, b, m, v):
        y = jax.lax.conv_general_dilated(
            x.astype(jnp.bfloat16), w.astype(jnp.bfloat16),
            window_strides=(1, 1), padding=((1, 1), (1, 1)),
            dimension_numbers=("NCHW", "OIHW", "NCHW"),
            preferred_element_type=jnp.float32)
        scale = (g / jnp.sqrt(v + eps)).reshape(1, -1, 1, 1)
        shift = (b - m * g / jnp.sqrt(v + eps)).reshape(1, -1, 1, 1)
        return jnp.maximum(y * scale + shift, 0.0)

    x = cbr(x, params["w1"], params["g1"], params["b1"], params["m1"], params["v1"])
    x = cbr(x, params["w2"], params["g2"], params["b2"], params["m2"], params["v2"])
    return x


if __name__ == "__main__":
    key = jax.random.PRNGKey(0)
    kx, ks, kw1, kw2, kbn = jax.random.split(key, 5)

    # x is the low-res feature map, skip the encoder feature at 2x resolution.
    N, Cx, Hx, Wx = 2, 4, 8, 8          # x:    (2, 4, 8, 8)
    Cs, Hs, Ws = 4, 16, 16              # skip: (2, 4, 16, 16)
    in_channels = Cx + Cs               # 8 after upsample + concat
    out_channels = 8

    x = jax.random.normal(kx, (N, Cx, Hx, Wx), jnp.float32)
    skip = jax.random.normal(ks, (N, Cs, Hs, Ws), jnp.float32)

    kb1, kb2, kb3, kb4, kb5, kb6, kb7, kb8 = jax.random.split(kbn, 8)
    params = {
        "w1": 0.1 * jax.random.normal(kw1, (out_channels, in_channels, 3, 3), jnp.float32),
        "g1": 1.0 + 0.1 * jax.random.normal(kb1, (out_channels,), jnp.float32),
        "b1": 0.1 * jax.random.normal(kb2, (out_channels,), jnp.float32),
        "m1": 0.1 * jax.random.normal(kb3, (out_channels,), jnp.float32),
        "v1": jax.random.uniform(kb4, (out_channels,), jnp.float32, 0.5, 1.5),
        "w2": 0.1 * jax.random.normal(kw2, (out_channels, out_channels, 3, 3), jnp.float32),
        "g2": 1.0 + 0.1 * jax.random.normal(kb5, (out_channels,), jnp.float32),
        "b2": 0.1 * jax.random.normal(kb6, (out_channels,), jnp.float32),
        "m2": 0.1 * jax.random.normal(kb7, (out_channels,), jnp.float32),
        "v2": jax.random.uniform(kb8, (out_channels,), jnp.float32, 0.5, 1.5),
    }

    out = jax.block_until_ready(decoder_block_forward(x, skip, params))
    ref = jax.block_until_ready(_ref_forward(x, skip, params))

    assert out.shape == (N, out_channels, Hs, Ws), out.shape
    # Slightly looser than before: BN scale is folded into the bf16 weights
    # (one extra bf16 rounding vs. the reference's conv-then-scale).
    assert jnp.allclose(out, ref, atol=1e-2, rtol=1e-2), \
        float(jnp.max(jnp.abs(out - ref)))
    print("KERNEL_OK")
</pallas_src>

<mosaic_0001>
module attributes {stable_mosaic.version = 11 : i64} {
  func.func @_decoder_block_kernel(%arg0: i32, %arg1: memref<1x8x8x4xbf16, #tpu.memory_space<vmem>>, %arg2: memref<1x16x16x4xbf16, #tpu.memory_space<vmem>>, %arg3: memref<72x8xbf16, #tpu.memory_space<vmem>>, %arg4: memref<1x8xf32, #tpu.memory_space<vmem>>, %arg5: memref<8x72xbf16, #tpu.memory_space<vmem>>, %arg6: memref<8x1xf32, #tpu.memory_space<vmem>>, %arg7: memref<1x8x256xf32, #tpu.memory_space<vmem>>, %arg8: memref<18x18x8xbf16, #tpu.memory_space<vmem>>, %arg9: memref<18x18x8xbf16, #tpu.memory_space<vmem>>) attributes {dimension_semantics = [#tpu.dimension_semantics<parallel>], iteration_bounds = array<i64: 2>, scalar_prefetch = 0 : i64, scratch_operands = 2 : i64, tpu.core_type = #tpu.core_type<tc>, window_params = [{transform_indices = @transform_0, window_bounds = array<i64: 1, 8, 8, 4>}, {transform_indices = @transform_1, window_bounds = array<i64: 1, 16, 16, 4>}, {pipeline_mode = #tpu.pipeline_mode<synchronous>, transform_indices = @transform_2, window_bounds = array<i64: 72, 8>}, {pipeline_mode = #tpu.pipeline_mode<synchronous>, transform_indices = @transform_3, window_bounds = array<i64: 1, 8>}, {pipeline_mode = #tpu.pipeline_mode<synchronous>, transform_indices = @transform_4, window_bounds = array<i64: 8, 72>}, {pipeline_mode = #tpu.pipeline_mode<synchronous>, transform_indices = @transform_5, window_bounds = array<i64: 8, 1>}, {transform_indices = @transform_6, window_bounds = array<i64: 1, 8, 256>}]} {
    %cst = arith.constant 0.000000e+00 : bf16
    %0 = vector.broadcast %cst : bf16 to vector<1x18x8xbf16>
    %cst_0 = arith.constant 0.000000e+00 : bf16
    %1 = vector.broadcast %cst_0 : bf16 to vector<18x1x8xbf16>
    %c0 = arith.constant 0 : index
    %c0_1 = arith.constant 0 : index
    %c0_2 = arith.constant 0 : index
    %2 = vector.load %arg8[%c0, %c0_1, %c0_2] : memref<18x18x8xbf16, #tpu.memory_space<vmem>>, vector<1x18x8xbf16>
    tpu.vector_store %arg8[%c0, %c0_1, %c0_2], %0 {strides = array<i32>} : memref<18x18x8xbf16, #tpu.memory_space<vmem>>, vector<1x18x8xbf16>,
    %c17 = arith.constant 17 : index
    %c0_3 = arith.constant 0 : index
    %c0_4 = arith.constant 0 : index
    %3 = vector.load %arg8[%c17, %c0_3, %c0_4] : memref<18x18x8xbf16, #tpu.memory_space<vmem>>, vector<1x18x8xbf16>
    tpu.vector_store %arg8[%c17, %c0_3, %c0_4], %0 {strides = array<i32>} : memref<18x18x8xbf16, #tpu.memory_space<vmem>>, vector<1x18x8xbf16>,
    %c0_5 = arith.constant 0 : index
    %c0_6 = arith.constant 0 : index
    %c0_7 = arith.constant 0 : index
    %4 = vector.load %arg8[%c0_5, %c0_6, %c0_7] : memref<18x18x8xbf16, #tpu.memory_space<vmem>>, vector<18x1x8xbf16>
    tpu.vector_store %arg8[%c0_5, %c0_6, %c0_7], %1 {strides = array<i32>} : memref<18x18x8xbf16, #tpu.memory_space<vmem>>, vector<18x1x8xbf16>,
    %c0_8 = arith.constant 0 : index
    %c17_9 = arith.constant 17 : index
    %c0_10 = arith.constant 0 : index
    %5 = vector.load %arg8[%c0_8, %c17_9, %c0_10] : memref<18x18x8xbf16, #tpu.memory_space<vmem>>, vector<18x1x8xbf16>
    tpu.vector_store %arg8[%c0_8, %c17_9, %c0_10], %1 {strides = array<i32>} : memref<18x18x8xbf16, #tpu.memory_space<vmem>>, vector<18x1x8xbf16>,
    %cst_11 = arith.constant 0.000000e+00 : bf16
    %6 = vector.broadcast %cst_11 : bf16 to vector<1x18x8xbf16>
    %cst_12 = arith.constant 0.000000e+00 : bf16
    %7 = vector.broadcast %cst_12 : bf16 to vector<18x1x8xbf16>
    %c0_13 = arith.constant 0 : index
    %c0_14 = arith.constant 0 : index
    %c0_15 = arith.constant 0 : index
    %8 = vector.load %arg9[%c0_13, %c0_14, %c0_15] : memref<18x18x8xbf16, #tpu.memory_space<vmem>>, vector<1x18x8xbf16>
    tpu.vector_store %arg9[%c0_13, %c0_14, %c0_15], %6 {strides = array<i32>} : memref<18x18x8xbf16, #tpu.memory_space<vmem>>, vector<1x18x8xbf16>,
    %c17_16 = arith.constant 17 : index
    %c0_17 = arith.constant 0 : index
    %c0_18 = arith.constant 0 : index
    %9 = vector.load %arg9[%c17_16, %c0_17, %c0_18] : memref<18x18x8xbf16, #tpu.memory_space<vmem>>, vector<1x18x8xbf16>
    tpu.vector_store %arg9[%c17_16, %c0_17, %c0_18], %6 {strides = array<i32>} : memref<18x18x8xbf16, #tpu.memory_space<vmem>>, vector<1x18x8xbf16>,
    %c0_19 = arith.constant 0 : index
    %c0_20 = arith.constant 0 : index
    %c0_21 = arith.constant 0 : index
    %10 = vector.load %arg9[%c0_19, %c0_20, %c0_21] : memref<18x18x8xbf16, #tpu.memory_space<vmem>>, vector<18x1x8xbf16>
    tpu.vector_store %arg9[%c0_19, %c0_20, %c0_21], %7 {strides = array<i32>} : memref<18x18x8xbf16, #tpu.memory_space<vmem>>, vector<18x1x8xbf16>,
    %c0_22 = arith.constant 0 : index
    %c17_23 = arith.constant 17 : index
    %c0_24 = arith.constant 0 : index
    %11 = vector.load %arg9[%c0_22, %c17_23, %c0_24] : memref<18x18x8xbf16, #tpu.memory_space<vmem>>, vector<18x1x8xbf16>
    tpu.vector_store %arg9[%c0_22, %c17_23, %c0_24], %7 {strides = array<i32>} : memref<18x18x8xbf16, #tpu.memory_space<vmem>>, vector<18x1x8xbf16>,
    %c0_25 = arith.constant 0 : index
    %c0_26 = arith.constant 0 : index
    %c0_27 = arith.constant 0 : index
    %c0_28 = arith.constant 0 : index
    %12 = vector.load %arg1[%c0_25, %c0_26, %c0_27, %c0_28] : memref<1x8x8x4xbf16, #tpu.memory_space<vmem>>, vector<1x8x8x4xbf16>
    %13 = vector.shape_cast %12 : vector<1x8x8x4xbf16> to vector<8x8x4xbf16>
    %14 = vector.shape_cast %13 : vector<8x8x4xbf16> to vector<8x1x8x4xbf16>
    %15 = vector.broadcast %14 : vector<8x1x8x4xbf16> to vector<8x2x8x4xbf16>
    %16 = vector.shape_cast %15 : vector<8x2x8x4xbf16> to vector<16x8x4xbf16>
    %17 = vector.shape_cast %16 : vector<16x8x4xbf16> to vector<16x8x1x4xbf16>
    %18 = vector.broadcast %17 : vector<16x8x1x4xbf16> to vector<16x8x2x4xbf16>
    %19 = vector.shape_cast %18 : vector<16x8x2x4xbf16> to vector<16x16x4xbf16>
    %c1 = arith.constant 1 : index
    %c1_29 = arith.constant 1 : index
    %c0_30 = arith.constant 0 : index
    %20 = vector.load %arg8[%c1, %c1_29, %c0_30] : memref<18x18x8xbf16, #tpu.memory_space<vmem>>, vector<16x16x4xbf16>
    tpu.vector_store %arg8[%c1, %c1_29, %c0_30], %19 {strides = array<i32>} : memref<18x18x8xbf16, #tpu.memory_space<vmem>>, vector<16x16x4xbf16>,
    %c0_31 = arith.constant 0 : index
    %c0_32 = arith.constant 0 : index
    %c0_33 = arith.constant 0 : index
    %c0_34 = arith.constant 0 : index
    %21 = vector.load %arg2[%c0_31, %c0_32, %c0_33, %c0_34] : memref<1x16x16x4xbf16, #tpu.memory_space<vmem>>, vector<1x16x16x4xbf16>
    %22 = vector.shape_cast %21 : vector<1x16x16x4xbf16> to vector<16x16x4xbf16>
    %c1_35 = arith.constant 1 : index
    %c1_36 = arith.constant 1 : index
    %c4 = arith.constant 4 : index
    %23 = vector.load %arg8[%c1_35, %c1_36, %c4] : memref<18x18x8xbf16, #tpu.memory_space<vmem>>, vector<16x16x4xbf16>
    tpu.vector_store %arg8[%c1_35, %c1_36, %c4], %22 {strides = array<i32>} : memref<18x18x8xbf16, #tpu.memory_space<vmem>>, vector<16x16x4xbf16>,
    %c0_37 = arith.constant 0 : index
    %c0_38 = arith.constant 0 : index
    %c0_39 = arith.constant 0 : index
    %24 = vector.load %arg8[%c0_37, %c0_38, %c0_39] : memref<18x18x8xbf16, #tpu.memory_space<vmem>>, vector<16x16x8xbf16>
    %25 = vector.shape_cast %24 : vector<16x16x8xbf16> to vector<256x8xbf16>
    %c0_40 = arith.constant 0 : index
    %c1_41 = arith.constant 1 : index
    %c0_42 = arith.constant 0 : index
    %26 = vector.load %arg8[%c0_40, %c1_41, %c0_42] : memref<18x18x8xbf16, #tpu.memory_space<vmem>>, vector<16x16x8xbf16>
    %27 = vector.shape_cast %26 : vector<16x16x8xbf16> to vector<256x8xbf16>
    %c0_43 = arith.constant 0 : index
    %c2 = arith.constant 2 : index
    %c0_44 = arith.constant 0 : index
    %28 = vector.load %arg8[%c0_43, %c2, %c0_44] : memref<18x18x8xbf16, #tpu.memory_space<vmem>>, vector<16x16x8xbf16>
    %29 = vector.shape_cast %28 : vector<16x16x8xbf16> to vector<256x8xbf16>
    %c1_45 = arith.constant 1 : index
    %c0_46 = arith.constant 0 : index
    %c0_47 = arith.constant 0 : index
    %30 = vector.load %arg8[%c1_45, %c0_46, %c0_47] : memref<18x18x8xbf16, #tpu.memory_space<vmem>>, vector<16x16x8xbf16>
    %31 = vector.shape_cast %30 : vector<16x16x8xbf16> to vector<256x8xbf16>
    %c1_48 = arith.constant 1 : index
    %c1_49 = arith.constant 1 : index
    %c0_50 = arith.constant 0 : index
    %32 = vector.load %arg8[%c1_48, %c1_49, %c0_50] : memref<18x18x8xbf16, #tpu.memory_space<vmem>>, vector<16x16x8xbf16>
    %33 = vector.shape_cast %32 : vector<16x16x8xbf16> to vector<256x8xbf16>
    %c1_51 = arith.constant 1 : index
    %c2_52 = arith.constant 2 : index
    %c0_53 = arith.constant 0 : index
    %34 = vector.load %arg8[%c1_51, %c2_52, %c0_53] : memref<18x18x8xbf16, #tpu.memory_space<vmem>>, vector<16x16x8xbf16>
    %35 = vector.shape_cast %34 : vector<16x16x8xbf16> to vector<256x8xbf16>
    %c2_54 = arith.constant 2 : index
    %c0_55 = arith.constant 0 : index
    %c0_56 = arith.constant 0 : index
    %36 = vector.load %arg8[%c2_54, %c0_55, %c0_56] : memref<18x18x8xbf16, #tpu.memory_space<vmem>>, vector<16x16x8xbf16>
    %37 = vector.shape_cast %36 : vector<16x16x8xbf16> to vector<256x8xbf16>
    %c2_57 = arith.constant 2 : index
    %c1_58 = arith.constant 1 : index
    %c0_59 = arith.constant 0 : index
    %38 = vector.load %arg8[%c2_57, %c1_58, %c0_59] : memref<18x18x8xbf16, #tpu.memory_space<vmem>>, vector<16x16x8xbf16>
    %39 = vector.shape_cast %38 : vector<16x16x8xbf16> to vector<256x8xbf16>
    %c2_60 = arith.constant 2 : index
    %c2_61 = arith.constant 2 : index
    %c0_62 = arith.constant 0 : index
    %40 = vector.load %arg8[%c2_60, %c2_61, %c0_62] : memref<18x18x8xbf16, #tpu.memory_space<vmem>>, vector<16x16x8xbf16>
    %41 = vector.shape_cast %40 : vector<16x16x8xbf16> to vector<256x8xbf16>
    %c0_63 = arith.constant 0 : index
    %c0_64 = arith.constant 0 : index
    %42 = vector.load %arg3[%c0_63, %c0_64] : memref<72x8xbf16, #tpu.memory_space<vmem>>, vector<8x8xbf16>
    %cst_65 = arith.constant dense<0.000000e+00> : vector<256x8xf32>
    %43 = tpu.matmul %25, %42, %cst_65 {dimension_numbers = #tpu.dot_dimension_numbers<[1], [0], [0], [1], [0, 0, 1, 1], [], []>} : vector<256x8xbf16>, vector<8x8xbf16>, vector<256x8xf32> -> vector<256x8xf32>
    %c8 = arith.constant 8 : index
    %c0_66 = arith.constant 0 : index
    %44 = vector.load %arg3[%c8, %c0_66] : memref<72x8xbf16, #tpu.memory_space<vmem>>, vector<8x8xbf16>
    %cst_67 = arith.constant dense<0.000000e+00> : vector<256x8xf32>
    %45 = tpu.matmul %27, %44, %cst_67 {dimension_numbers = #tpu.dot_dimension_numbers<[1], [0], [0], [1], [0, 0, 1, 1], [], []>} : vector<256x8xbf16>, vector<8x8xbf16>, vector<256x8xf32> -> vector<256x8xf32>
    %46 = arith.addf %43, %45 : vector<256x8xf32>
    %c16 = arith.constant 16 : index
    %c0_68 = arith.constant 0 : index
    %47 = vector.load %arg3[%c16, %c0_68] : memref<72x8xbf16, #tpu.memory_space<vmem>>, vector<8x8xbf16>
    %cst_69 = arith.constant dense<0.000000e+00> : vector<256x8xf32>
    %48 = tpu.matmul %29, %47, %cst_69 {dimension_numbers = #tpu.dot_dimension_numbers<[1], [0], [0], [1], [0, 0, 1, 1], [], []>} : vector<256x8xbf16>, vector<8x8xbf16>, vector<256x8xf32> -> vector<256x8xf32>
    %49 = arith.addf %46, %48 : vector<256x8xf32>
    %c24 = arith.constant 24 : index
    %c0_70 = arith.constant 0 : index
    %50 = vector.load %arg3[%c24, %c0_70] : memref<72x8xbf16, #tpu.memory_space<vmem>>, vector<8x8xbf16>
    %cst_71 = arith.constant dense<0.000000e+00> : vector<256x8xf32>
    %51 = tpu.matmul %31, %50, %cst_71 {dimension_numbers = #tpu.dot_dimension_numbers<[1], [0], [0], [1], [0, 0, 1, 1], [], []>} : vector<256x8xbf16>, vector<8x8xbf16>, vector<256x8xf32> -> vector<256x8xf32>
    %52 = arith.addf %49, %51 : vector<256x8xf32>
    %c32 = arith.constant 32 : index
    %c0_72 = arith.constant 0 : index
    %53 = vector.load %arg3[%c32, %c0_72] : memref<72x8xbf16, #tpu.memory_space<vmem>>, vector<8x8xbf16>
    %cst_73 = arith.constant dense<0.000000e+00> : vector<256x8xf32>
    %54 = tpu.matmul %33, %53, %cst_73 {dimension_numbers = #tpu.dot_dimension_numbers<[1], [0], [0], [1], [0, 0, 1, 1], [], []>} : vector<256x8xbf16>, vector<8x8xbf16>, vector<256x8xf32> -> vector<256x8xf32>
    %55 = arith.addf %52, %54 : vector<256x8xf32>
    %c40 = arith.constant 40 : index
    %c0_74 = arith.constant 0 : index
    %56 = vector.load %arg3[%c40, %c0_74] : memref<72x8xbf16, #tpu.memory_space<vmem>>, vector<8x8xbf16>
    %cst_75 = arith.constant dense<0.000000e+00> : vector<256x8xf32>
    %57 = tpu.matmul %35, %56, %cst_75 {dimension_numbers = #tpu.dot_dimension_numbers<[1], [0], [0], [1], [0, 0, 1, 1], [], []>} : vector<256x8xbf16>, vector<8x8xbf16>, vector<256x8xf32> -> vector<256x8xf32>
    %58 = arith.addf %55, %57 : vector<256x8xf32>
    %c48 = arith.constant 48 : index
    %c0_76 = arith.constant 0 : index
    %59 = vector.load %arg3[%c48, %c0_76] : memref<72x8xbf16, #tpu.memory_space<vmem>>, vector<8x8xbf16>
    %cst_77 = arith.constant dense<0.000000e+00> : vector<256x8xf32>
    %60 = tpu.matmul %37, %59, %cst_77 {dimension_numbers = #tpu.dot_dimension_numbers<[1], [0], [0], [1], [0, 0, 1, 1], [], []>} : vector<256x8xbf16>, vector<8x8xbf16>, vector<256x8xf32> -> vector<256x8xf32>
    %61 = arith.addf %58, %60 : vector<256x8xf32>
    %c56 = arith.constant 56 : index
    %c0_78 = arith.constant 0 : index
    %62 = vector.load %arg3[%c56, %c0_78] : memref<72x8xbf16, #tpu.memory_space<vmem>>, vector<8x8xbf16>
    %cst_79 = arith.constant dense<0.000000e+00> : vector<256x8xf32>
    %63 = tpu.matmul %39, %62, %cst_79 {dimension_numbers = #tpu.dot_dimension_numbers<[1], [0], [0], [1], [0, 0, 1, 1], [], []>} : vector<256x8xbf16>, vector<8x8xbf16>, vector<256x8xf32> -> vector<256x8xf32>
    %64 = arith.addf %61, %63 : vector<256x8xf32>
    %c64 = arith.constant 64 : index
    %c0_80 = arith.constant 0 : index
    %65 = vector.load %arg3[%c64, %c0_80] : memref<72x8xbf16, #tpu.memory_space<vmem>>, vector<8x8xbf16>
    %cst_81 = arith.constant dense<0.000000e+00> : vector<256x8xf32>
    %66 = tpu.matmul %41, %65, %cst_81 {dimension_numbers = #tpu.dot_dimension_numbers<[1], [0], [0], [1], [0, 0, 1, 1], [], []>} : vector<256x8xbf16>, vector<8x8xbf16>, vector<256x8xf32> -> vector<256x8xf32>
    %67 = arith.addf %64, %66 : vector<256x8xf32>
    %c0_82 = arith.constant 0 : index
    %c0_83 = arith.constant 0 : index
    %68 = vector.load %arg4[%c0_82, %c0_83] : memref<1x8xf32, #tpu.memory_space<vmem>>, vector<1x8xf32>
    %69 = vector.broadcast %68 : vector<1x8xf32> to vector<256x8xf32>
    %70 = arith.addf %67, %69 : vector<256x8xf32>
    %cst_84 = arith.constant 0.000000e+00 : f32
    %71 = vector.broadcast %cst_84 : f32 to vector<256x8xf32>
    %72 = arith.maximumf %70, %71 : vector<256x8xf32>
    %73 = arith.truncf %72 : vector<256x8xf32> to vector<256x8xbf16>
    %74 = vector.shape_cast %73 : vector<256x8xbf16> to vector<16x16x8xbf16>
    %c1_85 = arith.constant 1 : index
    %c1_86 = arith.constant 1 : index
    %c0_87 = arith.constant 0 : index
    %75 = vector.load %arg9[%c1_85, %c1_86, %c0_87] : memref<18x18x8xbf16, #tpu.memory_space<vmem>>, vector<16x16x8xbf16>
    tpu.vector_store %arg9[%c1_85, %c1_86, %c0_87], %74 {strides = array<i32>} : memref<18x18x8xbf16, #tpu.memory_space<vmem>>, vector<16x16x8xbf16>,
    %c0_88 = arith.constant 0 : index
    %c0_89 = arith.constant 0 : index
    %c0_90 = arith.constant 0 : index
    %76 = vector.load %arg9[%c0_88, %c0_89, %c0_90] : memref<18x18x8xbf16, #tpu.memory_space<vmem>>, vector<16x16x8xbf16>
    %77 = vector.shape_cast %76 : vector<16x16x8xbf16> to vector<256x8xbf16>
    %c0_91 = arith.constant 0 : index
    %c1_92 = arith.constant 1 : index
    %c0_93 = arith.constant 0 : index
    %78 = vector.load %arg9[%c0_91, %c1_92, %c0_93] : memref<18x18x8xbf16, #tpu.memory_space<vmem>>, vector<16x16x8xbf16>
    %79 = vector.shape_cast %78 : vector<16x16x8xbf16> to vector<256x8xbf16>
    %c0_94 = arith.constant 0 : index
    %c2_95 = arith.constant 2 : index
    %c0_96 = arith.constant 0 : index
    %80 = vector.load %arg9[%c0_94, %c2_95, %c0_96] : memref<18x18x8xbf16, #tpu.memory_space<vmem>>, vector<16x16x8xbf16>
    %81 = vector.shape_cast %80 : vector<16x16x8xbf16> to vector<256x8xbf16>
    %c1_97 = arith.constant 1 : index
    %c0_98 = arith.constant 0 : index
    %c0_99 = arith.constant 0 : index
    %82 = vector.load %arg9[%c1_97, %c0_98, %c0_99] : memref<18x18x8xbf16, #tpu.memory_space<vmem>>, vector<16x16x8xbf16>
    %83 = vector.shape_cast %82 : vector<16x16x8xbf16> to vector<256x8xbf16>
    %c1_100 = arith.constant 1 : index
    %c1_101 = arith.constant 1 : index
    %c0_102 = arith.constant 0 : index
    %84 = vector.load %arg9[%c1_100, %c1_101, %c0_102] : memref<18x18x8xbf16, #tpu.memory_space<vmem>>, vector<16x16x8xbf16>
    %85 = vector.shape_cast %84 : vector<16x16x8xbf16> to vector<256x8xbf16>
    %c1_103 = arith.constant 1 : index
    %c2_104 = arith.constant 2 : index
    %c0_105 = arith.constant 0 : index
    %86 = vector.load %arg9[%c1_103, %c2_104, %c0_105] : memref<18x18x8xbf16, #tpu.memory_space<vmem>>, vector<16x16x8xbf16>
    %87 = vector.shape_cast %86 : vector<16x16x8xbf16> to vector<256x8xbf16>
    %c2_106 = arith.constant 2 : index
    %c0_107 = arith.constant 0 : index
    %c0_108 = arith.constant 0 : index
    %88 = vector.load %arg9[%c2_106, %c0_107, %c0_108] : memref<18x18x8xbf16, #tpu.memory_space<vmem>>, vector<16x16x8xbf16>
    %89 = vector.shape_cast %88 : vector<16x16x8xbf16> to vector<256x8xbf16>
    %c2_109 = arith.constant 2 : index
    %c1_110 = arith.constant 1 : index
    %c0_111 = arith.constant 0 : index
    %90 = vector.load %arg9[%c2_109, %c1_110, %c0_111] : memref<18x18x8xbf16, #tpu.memory_space<vmem>>, vector<16x16x8xbf16>
    %91 = vector.shape_cast %90 : vector<16x16x8xbf16> to vector<256x8xbf16>
    %c2_112 = arith.constant 2 : index
    %c2_113 = arith.constant 2 : index
    %c0_114 = arith.constant 0 : index
    %92 = vector.load %arg9[%c2_112, %c2_113, %c0_114] : memref<18x18x8xbf16, #tpu.memory_space<vmem>>, vector<16x16x8xbf16>
    %93 = vector.shape_cast %92 : vector<16x16x8xbf16> to vector<256x8xbf16>
    %c0_115 = arith.constant 0 : index
    %c0_116 = arith.constant 0 : index
    %94 = vector.load %arg5[%c0_115, %c0_116] : memref<8x72xbf16, #tpu.memory_space<vmem>>, vector<8x8xbf16>
    %cst_117 = arith.constant dense<0.000000e+00> : vector<8x256xf32>
    %95 = tpu.matmul %94, %77, %cst_117 {dimension_numbers = #tpu.dot_dimension_numbers<[1], [1], [0], [0], [0, 0, 1, 0], [], []>} : vector<8x8xbf16>, vector<256x8xbf16>, vector<8x256xf32> -> vector<8x256xf32>
    %c0_118 = arith.constant 0 : index
    %c8_119 = arith.constant 8 : index
    %96 = vector.load %arg5[%c0_118, %c8_119] : memref<8x72xbf16, #tpu.memory_space<vmem>>, vector<8x8xbf16>
    %cst_120 = arith.constant dense<0.000000e+00> : vector<8x256xf32>
    %97 = tpu.matmul %96, %79, %cst_120 {dimension_numbers = #tpu.dot_dimension_numbers<[1], [1], [0], [0], [0, 0, 1, 0], [], []>} : vector<8x8xbf16>, vector<256x8xbf16>, vector<8x256xf32> -> vector<8x256xf32>
    %98 = arith.addf %95, %97 : vector<8x256xf32>
    %c0_121 = arith.constant 0 : index
    %c16_122 = arith.constant 16 : index
    %99 = vector.load %arg5[%c0_121, %c16_122] : memref<8x72xbf16, #tpu.memory_space<vmem>>, vector<8x8xbf16>
    %cst_123 = arith.constant dense<0.000000e+00> : vector<8x256xf32>
    %100 = tpu.matmul %99, %81, %cst_123 {dimension_numbers = #tpu.dot_dimension_numbers<[1], [1], [0], [0], [0, 0, 1, 0], [], []>} : vector<8x8xbf16>, vector<256x8xbf16>, vector<8x256xf32> -> vector<8x256xf32>
    %101 = arith.addf %98, %100 : vector<8x256xf32>
    %c0_124 = arith.constant 0 : index
    %c24_125 = arith.constant 24 : index
    %102 = vector.load %arg5[%c0_124, %c24_125] : memref<8x72xbf16, #tpu.memory_space<vmem>>, vector<8x8xbf16>
    %cst_126 = arith.constant dense<0.000000e+00> : vector<8x256xf32>
    %103 = tpu.matmul %102, %83, %cst_126 {dimension_numbers = #tpu.dot_dimension_numbers<[1], [1], [0], [0], [0, 0, 1, 0], [], []>} : vector<8x8xbf16>, vector<256x8xbf16>, vector<8x256xf32> -> vector<8x256xf32>
    %104 = arith.addf %101, %103 : vector<8x256xf32>
    %c0_127 = arith.constant 0 : index
    %c32_128 = arith.constant 32 : index
    %105 = vector.load %arg5[%c0_127, %c32_128] : memref<8x72xbf16, #tpu.memory_space<vmem>>, vector<8x8xbf16>
    %cst_129 = arith.constant dense<0.000000e+00> : vector<8x256xf32>
    %106 = tpu.matmul %105, %85, %cst_129 {dimension_numbers = #tpu.dot_dimension_numbers<[1], [1], [0], [0], [0, 0, 1, 0], [], []>} : vector<8x8xbf16>, vector<256x8xbf16>, vector<8x256xf32> -> vector<8x256xf32>
    %107 = arith.addf %104, %106 : vector<8x256xf32>
    %c0_130 = arith.constant 0 : index
    %c40_131 = arith.constant 40 : index
    %108 = vector.load %arg5[%c0_130, %c40_131] : memref<8x72xbf16, #tpu.memory_space<vmem>>, vector<8x8xbf16>
    %cst_132 = arith.constant dense<0.000000e+00> : vector<8x256xf32>
    %109 = tpu.matmul %108, %87, %cst_132 {dimension_numbers = #tpu.dot_dimension_numbers<[1], [1], [0], [0], [0, 0, 1, 0], [], []>} : vector<8x8xbf16>, vector<256x8xbf16>, vector<8x256xf32> -> vector<8x256xf32>
    %110 = arith.addf %107, %109 : vector<8x256xf32>
    %c0_133 = arith.constant 0 : index
    %c48_134 = arith.constant 48 : index
    %111 = vector.load %arg5[%c0_133, %c48_134] : memref<8x72xbf16, #tpu.memory_space<vmem>>, vector<8x8xbf16>
    %cst_135 = arith.constant dense<0.000000e+00> : vector<8x256xf32>
    %112 = tpu.matmul %111, %89, %cst_135 {dimension_numbers = #tpu.dot_dimension_numbers<[1], [1], [0], [0], [0, 0, 1, 0], [], []>} : vector<8x8xbf16>, vector<256x8xbf16>, vector<8x256xf32> -> vector<8x256xf32>
    %113 = arith.addf %110, %112 : vector<8x256xf32>
    %c0_136 = arith.constant 0 : index
    %c56_137 = arith.constant 56 : index
    %114 = vector.load %arg5[%c0_136, %c56_137] : memref<8x72xbf16, #tpu.memory_space<vmem>>, vector<8x8xbf16>
    %cst_138 = arith.constant dense<0.000000e+00> : vector<8x256xf32>
    %115 = tpu.matmul %114, %91, %cst_138 {dimension_numbers = #tpu.dot_dimension_numbers<[1], [1], [0], [0], [0, 0, 1, 0], [], []>} : vector<8x8xbf16>, vector<256x8xbf16>, vector<8x256xf32> -> vector<8x256xf32>
    %116 = arith.addf %113, %115 : vector<8x256xf32>
    %c0_139 = arith.constant 0 : index
    %c64_140 = arith.constant 64 : index
    %117 = vector.load %arg5[%c0_139, %c64_140] : memref<8x72xbf16, #tpu.memory_space<vmem>>, vector<8x8xbf16>
    %cst_141 = arith.constant dense<0.000000e+00> : vector<8x256xf32>
    %118 = tpu.matmul %117, %93, %cst_141 {dimension_numbers = #tpu.dot_dimension_numbers<[1], [1], [0], [0], [0, 0, 1, 0], [], []>} : vector<8x8xbf16>, vector<256x8xbf16>, vector<8x256xf32> -> vector<8x256xf32>
    %119 = arith.addf %116, %118 : vector<8x256xf32>
    %c0_142 = arith.constant 0 : index
    %c0_143 = arith.constant 0 : index
    %120 = vector.load %arg6[%c0_142, %c0_143] : memref<8x1xf32, #tpu.memory_space<vmem>>, vector<8x1xf32>
    %121 = vector.broadcast %120 : vector<8x1xf32> to vector<8x256xf32>
    %122 = arith.addf %119, %121 : vector<8x256xf32>
    %cst_144 = arith.constant 0.000000e+00 : f32
    %123 = vector.broadcast %cst_144 : f32 to vector<8x256xf32>
    %124 = arith.maximumf %122, %123 : vector<8x256xf32>
    %125 = vector.shape_cast %124 : vector<8x256xf32> to vector<1x8x256xf32>
    %c0_145 = arith.constant 0 : index
    %c0_146 = arith.constant 0 : index
    %c0_147 = arith.constant 0 : index
    %126 = vector.load %arg7[%c0_145, %c0_146, %c0_147] : memref<1x8x256xf32, #tpu.memory_space<vmem>>, vector<1x8x256xf32>
    tpu.vector_store %arg7[%c0_145, %c0_146, %c0_147], %125 {strides = array<i32>} : memref<1x8x256xf32, #tpu.memory_space<vmem>>, vector<1x8x256xf32>,
    return
  }
  func.func @transform_0(%arg0: i32) -> (i32, i32, i32, i32) {
    %c0_i32 = arith.constant 0 : i32
    %c0_i32_0 = arith.constant 0 : i32
    %c0_i32_1 = arith.constant 0 : i32
    %c0_i32_2 = arith.constant 0 : i32
    return %arg0, %c0_i32, %c0_i32_0, %c0_i32_1 : i32, i32, i32, i32
  }
  func.func @transform_1(%arg0: i32) -> (i32, i32, i32, i32) {
    %c0_i32 = arith.constant 0 : i32
    %c0_i32_0 = arith.constant 0 : i32
    %c0_i32_1 = arith.constant 0 : i32
    %c0_i32_2 = arith.constant 0 : i32
    return %arg0, %c0_i32, %c0_i32_0, %c0_i32_1 : i32, i32, i32, i32
  }
  func.func @transform_2(%arg0: i32) -> (i32, i32) {
    %c0_i32 = arith.constant 0 : i32
    %c0_i32_0 = arith.constant 0 : i32
    %c0_i32_1 = arith.constant 0 : i32
    return %c0_i32, %c0_i32_0 : i32, i32
  }
  func.func @transform_3(%arg0: i32) -> (i32, i32) {
    %c0_i32 = arith.constant 0 : i32
    %c0_i32_0 = arith.constant 0 : i32
    %c0_i32_1 = arith.constant 0 : i32
    return %c0_i32, %c0_i32_0 : i32, i32
  }
  func.func @transform_4(%arg0: i32) -> (i32, i32) {
    %c0_i32 = arith.constant 0 : i32
    %c0_i32_0 = arith.constant 0 : i32
    %c0_i32_1 = arith.constant 0 : i32
    return %c0_i32, %c0_i32_0 : i32, i32
  }
  func.func @transform_5(%arg0: i32) -> (i32, i32) {
    %c0_i32 = arith.constant 0 : i32
    %c0_i32_0 = arith.constant 0 : i32
    %c0_i32_1 = arith.constant 0 : i32
    return %c0_i32, %c0_i32_0 : i32, i32
  }
  func.func @transform_6(%arg0: i32) -> (i32, i32, i32) {
    %c0_i32 = arith.constant 0 : i32
    %c0_i32_0 = arith.constant 0 : i32
    %c0_i32_1 = arith.constant 0 : i32
    return %arg0, %c0_i32, %c0_i32_0 : i32, i32, i32
  }
}

</mosaic_0001>

<bundles_post_ra>
// kernel: tpu_custom_call.1
= control target key start
LH: loop header
LB: loop body
LE: loop exit
PB: predicated region body
PF: predicated region fallthrough
CT: control target
= control target key end

     0   :  { %11 = vsyncpa [#allocation5], 0  ;;  %s17696_s0 = inlined_call_operand.vmem [shape: bf16[2,8,8,4], index: 0, kind: input, shape index: {}]   ;;  %s17697_s1 = inlined_call_operand.vmem [shape: bf16[2,16,16,4], index: 1, kind: input, shape index: {}]   ;;  %s17698_s2 = inlined_call_operand.vmem [shape: bf16[72,8], index: 2, kind: input, shape index: {}]   ;;  %s17699_s3 = inlined_call_operand.vmem [shape: f32[1,8], index: 3, kind: input, shape index: {}]   ;;  %s17700_s4 = inlined_call_operand.vmem [shape: bf16[8,72], index: 4, kind: input, shape index: {}]   ;;  %s17701_s5 = inlined_call_operand.vmem [shape: f32[8,1], index: 5, kind: input, shape index: {}]   ;;  %s17702_s6 = inlined_call_operand.hbm [shape: f32[2,8,256], index: 6, kind: output, shape index: {}]  }
   0x1   :  { %13 = vsyncpa [#allocation5 + $0x1], 0  ;;  %s13065_s21 = smov 0   ;;  %s13067_s22 = smov 0  }
   0x2   :  { %s13069_s23 = smov 0   ;;  %s13071_s24 = smov 0  }
   0x3 LB: > { %s13086_s25 = sadd.s32 4294967295, %s13015_s24   ;;  %s11162_s26 = sadd.s32 4294967294, %s13015_s24   ;;  %s13015_s24 = sphi %s13071_s24, %s17898_s24   ;;  %s13011_s23 = sphi %s13069_s23, %s17897_s23   ;;  %s13007_s22 = sphi %s13067_s22, %s17896_s22   ;;  %s13003_s21 = sphi %s13065_s21, %s17895_s21  }
   0x4   : > { %s13090_s27 = sadd.s32 1, %s13015_s24   ;;  %s162_s28 = sadd.s32 1, %s13011_s23 }
   0x5   : > { %s159_s29 = ssub.s32 %s13015_s24, %s13090_s27  ;;  %p172_p0 = scmp.ne.s32.totalorder %s13011_s23, %s13007_s22 }
   0x6   : > { %p160_p1 = scmp.eq.s32.totalorder %s159_s29, 0  ;;  %p173_p2 = scmp.eq.s32.totalorder %s13086_s25, 1 }
   0x7   : > { %p178_p3 = scmp.ne.s32.totalorder %s13007_s22, %s13003_s21  ;;  %p179_p4 = scmp.eq.s32.totalorder %s11162_s26, 1 }
   0x8   : > { %s13101_s30 = scalar_select %p160_p1, %s13011_s23, %s162_s28  }
   0x9   : > { %p13103_p5 = por %p173_p2, %p172_p0  ;;  %p13107_p6 = por %p179_p4, %p178_p3 }
   0xa   : > { %p11165_p7 = scmp.ge.s32.totalorder %s13015_s24, 1  ;;  %p225_p8 = scmp.lt.s32.totalorder %s13015_s24, 3 }
   0xc   : > { %p226_p9 = pnand %p11165_p7, %p225_p8 }
   0xe   : > { %229 = sbr.rel (%p226_p9) target bundleno = 1891 (0x763), region = 44 }
  0x15   : > { %p260_p10 = scmp.lt.s32.totalorder %s13086_s25, 1  ;;  %v535_v0 = vlaneseq  ;;  %vm274_vm0 = vcmask 57344   ;;  %vm337_vm1 = vsmask.f32 7938  ;;  %v342_v1 = vld [vmem:[#allocation2 + $0x14] sm:$0x1] }
  0x16   : > { %vm13119_vm2 = vmand %vm274_vm0, %vm337_vm1  ;;  %v17755_v2 = vmov 0  ;;  %vm271_vm3 = vcmask 60416   ;;  %vm281_vm4 = vsmask.f32 256  ;;  %vm1996_vm5 = vsmask.f32 4368 }
  0x17   : > { %s13115_s9 = scalar_select %p260_p10, %s13086_s25, 1  ;;  %v17756_v2 = vsel %vm13119_vm2, 4294967295, %v17755_v2  ;;  %v343_v3 = vsel %vm13119_vm2, 0, %v342_v1  ;;  %v13125_v4 = vshrl.u32 %v535_v0, 7  ;;  %v13017_v9 = vmov 1966171168   ;;  %vm13161_vm6 = vmor %vm281_vm4, %vm1996_vm5 }
  0x18   : > { %17757 = vst [vmem:[#allocation7_spill] sm:$0xff] %v17756_v2  ;;  %344 = vst [vmem:[#allocation2 + $0x14] sm:$0x1] %v343_v3  ;;  %v13139_v10 = vunpack.c.l.s4 %v13017_v9  ;;  %v13018_v11 = vmov 1935823168   ;;  %v13019_v13 = vmov 0  }
  0x19   : > { %s11788_s10 = sshll.u32 %s13115_s9, 7  ;;  %v13134_v5 = vsub.s32 0, %v13125_v4  ;;  %v13141_v12 = vunpack.c.l.s4 %v13018_v11  ;;  %272 = vst.msk [vmem:[#allocation2] sm:$0xf] %vm271_vm3, %v13019_v13  ;;  %273 = vst.msk [vmem:[#allocation2 + $0x4] sm:$0xf] %vm271_vm3, %v13019_v13  ;;  %12831 = vset.pattern.permute.xlu0 %v13019_v13 }
  0x1a   : > { %s13131_s13 = scalar_lea.vmem %s17697_s1, %s11788_s10  ;;  %275 = vst.msk [vmem:[#allocation2 + $0x8] sm:$0x1] %vm274_vm0, %v13019_v13  ;;  %279 = vst.msk [vmem:[#allocation2 + $0xd4] sm:$0x1] %vm274_vm0, %v13019_v13  ;;  %v17758_v38 = vmov 0  ;;  %v534_v42 = vunpack.c.0.s8 %v13139_v10  ;;  %s13020_s14 = smov 4  }
  0x1b   : > { %v2277_v6 = vld [vmem:[%s13131_s13 + $0x4] sm:$0xf]  ;;  %v2276_v7 = vld [vmem:[%s13131_s13] sm:$0xf]  ;;  %v2278_v8 = vld [vmem:[%s13131_s13 + $0x8] sm:$0xf]  ;;  %v1616_v43 = vunpack.c.0.s8 %v13141_v12 }
  0x1c   : > { %277 = vst.msk [vmem:[#allocation2 + $0xcc] sm:$0xf] %vm271_vm3, %v13019_v13  ;;  %278 = vst.msk [vmem:[#allocation2 + $0xd0] sm:$0xf] %vm271_vm3, %v13019_v13  ;;  %v2317_v14 = vshrl.u32 %v2277_v6, 16  ;;  %v2320_v15 = vshll.u32 %v2277_v6, 16 }
  0x1d   : > { %393 = vst.msk [vmem:[#allocation3] sm:$0xf] %vm271_vm3, %v13019_v13  ;;  %394 = vst.msk [vmem:[#allocation3 + $0x4] sm:$0xf] %vm271_vm3, %v13019_v13  ;;  %v2309_v16 = vshrl.u32 %v2276_v7, 16  ;;  %v2312_v17 = vshll.u32 %v2276_v7, 16 }
  0x1e   : > { %395 = vst.msk [vmem:[#allocation3 + $0x8] sm:$0x1] %vm274_vm0, %v13019_v13  ;;  %399 = vst.msk [vmem:[#allocation3 + $0xd4] sm:$0x1] %vm274_vm0, %v13019_v13  ;;  %v2280_v18 = vld [vmem:[%s13131_s13 + $0x10] sm:$0xf] }
  0x1f   : > { %397 = vst.msk [vmem:[#allocation3 + $0xcc] sm:$0xf] %vm271_vm3, %v13019_v13  ;;  %398 = vst.msk [vmem:[#allocation3 + $0xd0] sm:$0xf] %vm271_vm3, %v13019_v13  ;;  %v2326_v19 = vshrl.u32 %v2278_v8, 16  ;;  %v2329_v20 = vshll.u32 %v2278_v8, 16 }
  0x20   : > { %v2343_v21 = vshrl.u32 %v2280_v18, 16  ;;  %v2346_v22 = vshll.u32 %v2280_v18, 16  ;;  %v2279_v23 = vld [vmem:[%s13131_s13 + $0xc] sm:$0xf]  ;;  %v2319_v24 = vrot.slane %v2317_v14, 7  ;;  %v2311_v25 = vrot.slane %v2309_v16, 7  ;;  %vm13339_vm7 = vmand %vm274_vm0, %vm281_vm4 }
  0x21   : > { %v2334_v26 = vshrl.u32 %v2279_v23, 16  ;;  %v2337_v27 = vshll.u32 %v2279_v23, 16  ;;  %v2281_v28 = vld [vmem:[%s13131_s13 + $0x14] sm:$0xf]  ;;  %v2328_v29 = vrot.slane %v2326_v19, 7  ;;  %v17759_v38 = vsel %vm13161_vm6, 4294967295, %v17758_v38 }
  0x22   : > { %v2345_v30 = vrot.slane %v2343_v21, 7  ;;  %v2351_v31 = vshrl.u32 %v2281_v28, 16  ;;  %v2354_v32 = vshll.u32 %v2281_v28, 16  ;;  %v2282_v33 = vld [vmem:[%s13131_s13 + $0x18] sm:$0xf]  ;;  %v2324_v34 = vrot.slane %v2319_v24, 4 }
  0x23   : > { %v2322_v35 = vor.u32 %v2320_v15, %v2319_v24  ;;  %v2314_v36 = vor.u32 %v2312_v17, %v2311_v25  ;;  %v2315_v37 = vrot.slane %v2311_v25, 4  ;;  %17760 = vst [vmem:[#allocation8_spill] sm:$0xff] %v17759_v38  ;;  %v2284_v39 = vld [vmem:[%s13131_s13 + $0x20] sm:$0xf]  ;;  %v2331_v40 = vor.u32 %v2329_v20, %v2328_v29  ;;  %v2283_v48 = vld [vmem:[%s13131_s13 + $0x1c] sm:$0xf] }
  0x24   : > { %v13166_v41 = vrot.slane %v2334_v26, 7  ;;  %2584 = vrot.lane.b32.xlu1 %v2324_v34, %s13020_s14  ;;  %v2332_v44 = vrot.slane %v2328_v29, 4  ;;  %v2349_v45 = vrot.slane %v2345_v30, 4  ;;  %v13172_v46 = vrot.slane %v2351_v31, 7  ;;  %v2285_v53 = vld [vmem:[%s13131_s13 + $0x24] sm:$0xf] }
  0x25   : > { %2580 = vrot.lane.b32.xlu0 %v2314_v36, %s13020_s14  ;;  %v2360_v47 = vshrl.u32 %v2282_v33, 16  ;;  %v2323_v49 = vsel %vm13161_vm6, %v2315_v37, %v2322_v35  ;;  %v2348_v50 = vor.u32 %v2346_v22, %v2345_v30  ;;  %v2377_v52 = vshrl.u32 %v2284_v39, 16  ;;  %v2286_v58 = vld [vmem:[%s13131_s13 + $0x28] sm:$0xf]  ;;  %v2288_v63 = vld [vmem:[%s13131_s13 + $0x30] sm:$0xf] }
  0x26   : > { %v2339_v51 = vor.u32 %v2337_v27, %v13166_v41  ;;  %v2341_v54 = vrot.slane %v13166_v41, 4  ;;  %v2356_v55 = vor.u32 %v2354_v32, %v13172_v46  ;;  %v2363_v57 = vshll.u32 %v2282_v33, 16  ;;  %v2287_v7 = vld [vmem:[%s13131_s13 + $0x2c] sm:$0xf]  ;;  %v2289_v18 = vld [vmem:[%s13131_s13 + $0x34] sm:$0xf] }
  0x27   : > { %v2362_v56 = vrot.slane %v2360_v47, 7  ;;  %v2358_v59 = vrot.slane %v13172_v46, 4  ;;  %v2379_v60 = vrot.slane %v2377_v52, 7  ;;  %v2368_v61 = vshrl.u32 %v2283_v48, 16  ;;  %v2290_v27 = vld [vmem:[%s13131_s13 + $0x38] sm:$0xf] }
  0x28   : > { %v2371_v62 = vshll.u32 %v2283_v48, 16  ;;  %2586 = vrot.lane.b32.xlu1 %v2331_v40, %s13020_s14  ;;  %v2340_v0 = vsel %vm13161_vm6, %v2332_v44, %v2339_v51  ;;  %v2357_v1 = vsel %vm13161_vm6, %v2349_v45, %v2356_v55  ;;  %v2380_v3 = vshll.u32 %v2284_v39, 16  ;;  %v2292_v32 = vld [vmem:[%s13131_s13 + $0x40] sm:$0xf]  ;;  %v2291_v37 = vld [vmem:[%s13131_s13 + $0x3c] sm:$0xf] }
  0x29   : > { %2582 = vrot.lane.b32.xlu0 %v2323_v49, %s13020_s14  ;;  %v2385_v6 = vshrl.u32 %v2285_v53, 16  ;;  %v2366_v8 = vrot.slane %v2362_v56, 4  ;;  %v13191_v9 = vrot.slane %v2368_v61, 7  ;;  %v2383_v11 = vrot.slane %v2379_v60, 4  ;;  %v2293_v45 = vld [vmem:[%s13131_s13 + $0x44] sm:$0xf] }
  0x2a   : > { %v2388_v13 = vshll.u32 %v2285_v53, 16  ;;  %v2394_v15 = vshrl.u32 %v2286_v58, 16  ;;  %v2397_v16 = vshll.u32 %v2286_v58, 16  ;;  %v2411_v17 = vshrl.u32 %v2288_v63, 16  ;;  %v2294_v51 = vld [vmem:[%s13131_s13 + $0x48] sm:$0xf] }
  0x2b   : > { %v13193_v14 = vrot.slane %v2385_v6, 7  ;;  %v2365_v19 = vor.u32 %v2363_v57, %v2362_v56  ;;  %v2373_v20 = vor.u32 %v2371_v62, %v13191_v9  ;;  %v2414_v21 = vshll.u32 %v2288_v63, 16  ;;  %s11787_s15 = sshll.u32 %s13115_s9, 5  ;;  %s13021_s11 = smov 120  }
  0x2c   : > { %v2402_v22 = vshrl.u32 %v2287_v7, 16  ;;  %2592 = vrot.lane.b32.xlu1 %v2348_v50, %s13020_s14  ;;  %v2382_v23 = vor.u32 %v2380_v3, %v2379_v60  ;;  %v2396_v25 = vrot.slane %v2394_v15, 7  ;;  %v2413_v26 = vrot.slane %v2411_v17, 7  ;;  %s13304_s18 = scalar_lea.vmem %s17696_s0, %s11787_s15  ;;  %s13023_s15 = smov 104  }
  0x2d   : > { %2588 = vrot.lane.b32.xlu0 %v2340_v0, %s13020_s14  ;;  %v2390_v24 = vor.u32 %v2388_v13, %v13193_v14  ;;  %v2375_v28 = vrot.slane %v13191_v9, 4  ;;  %v2405_v30 = vshll.u32 %v2287_v7, 16  ;;  %v2419_v31 = vshrl.u32 %v2289_v18, 16  ;;  %s13025_s19 = smov 88   ;;  %s13026_s20 = smov 80  }
  0x2e   : > { %v13202_v29 = vrot.slane %v2402_v22, 7  ;;  %v2374_v33 = vsel %vm13161_vm6, %v2366_v8, %v2373_v20  ;;  %v13211_v35 = vor.u32 %v2397_v16, %v2396_v25  ;;  %v2392_v36 = vrot.slane %v13193_v14, 4  ;;  %v2297_v20 = vld [vmem:[%s13131_s13 + $0x54] sm:$0xf]  ;;  %s13027_s26 = smov 72   ;;  %s13028_s28 = smov 64  }
  0x2f   : > { %v13209_v34 = vsel %vm13161_vm6, %v2383_v11, %v2390_v24  ;;  %v13215_v39 = vor.u32 %v2414_v21, %v2413_v26  ;;  %v2400_v40 = vrot.slane %v2396_v25, 4  ;;  %v13218_v44 = vrot.slane %v2419_v31, 7  ;;  %v2295_v11 = vld [vmem:[%s13131_s13 + $0x4c] sm:$0xf]  ;;  %s257_s10 = sand.u32 1, %s13007_s22   ;;  %s11821_s12 = sshll.u32 %s13086_s25, 8 }
  0x30   : > { %v2407_v41 = vor.u32 %v2405_v30, %v13202_v29  ;;  %2590 = vrot.lane.b32.xlu1 %v2341_v54, %s13020_s14  ;;  %v2417_v47 = vrot.slane %v2413_v26, 4  ;;  %v2422_v48 = vshll.u32 %v2289_v18, 16  ;;  %v2428_v49 = vshrl.u32 %v2290_v27, 16  ;;  %v2298_v26 = vld [vmem:[%s13131_s13 + $0x58] sm:$0xf]  ;;  %s17654_s17 = scalar_lea.hbm %s17702_s6, %s11821_s12  ;;  %s13029_s25 = smov [#allocation4]  }
  0x31   : > { %2594 = vrot.lane.b32.xlu0 %v2357_v1, %s13020_s14  ;;  %v2445_v50 = vshrl.u32 %v2292_v32, 16  ;;  %v2409_v52 = vrot.slane %v13202_v29, 4  ;;  %v2431_v53 = vshll.u32 %v2290_v27, 16  ;;  %v2448_v55 = vshll.u32 %v2292_v32, 16  ;;  %v2296_v1 = vld [vmem:[%s13131_s13 + $0x50] sm:$0xf] }
  0x32   : > { %v2436_v56 = vshrl.u32 %v2291_v37, 16  ;;  %v2424_v57 = vor.u32 %v2422_v48, %v13218_v44  ;;  %v2430_v58 = vrot.slane %v2428_v49, 7  ;;  %v2439_v61 = vshll.u32 %v2291_v37, 16  ;;  %v2300_v37 = vld [vmem:[%s13131_s13 + $0x60] sm:$0xf] }
  0x33   : > { %v2447_v60 = vrot.slane %v2445_v50, 7  ;;  %v2453_v62 = vshrl.u32 %v2293_v45, 16  ;;  %v2456_v63 = vshll.u32 %v2293_v45, 16  ;;  %v2462_v0 = vshrl.u32 %v2294_v51, 16  ;;  %v2299_v48 = vld [vmem:[%s13131_s13 + $0x5c] sm:$0xf] }
  0x34   : > { %v13226_v54 = vrot.slane %v2436_v56, 7  ;;  %2598 = vrot.lane.b32.xlu1 %v2365_v19, %s13020_s14  ;;  %v13235_v3 = vsel %vm13161_vm6, %v2400_v40, %v2407_v41  ;;  %v13239_v6 = vsel %vm13161_vm6, %v2417_v47, %v2424_v57  ;;  %v2426_v7 = vrot.slane %v13218_v44, 4  ;;  %v2301_v57 = vld [vmem:[%s13131_s13 + $0x64] sm:$0xf] }
  0x35   : > { %2596 = vrot.lane.b32.xlu0 %v2358_v59, %s13020_s14  ;;  %v2434_v8 = vrot.slane %v2430_v58, 4  ;;  %v13243_v13 = vor.u32 %v2431_v53, %v2430_v58  ;;  %v13245_v15 = vor.u32 %v2448_v55, %v2447_v60  ;;  %v13248_v59 = vrot.slane %v2453_v62, 7  ;;  %v11171_v14 = vld.sshfl [vmem:[%s13304_s18] sm:$0x33 pattern:$0x75316420] }
  0x36   : > { %v2441_v46 = vor.u32 %v2439_v61, %v13226_v54  ;;  %v2451_v16 = vrot.slane %v2447_v60, 4  ;;  %v2464_v17 = vrot.slane %v2462_v0, 7  ;;  %v2465_v18 = vshll.u32 %v2294_v51, 16 }
  0x37   : > { %v2479_v19 = vshrl.u32 %v2296_v1, 16  ;;  %v2443_v21 = vrot.slane %v13226_v54, 4  ;;  %v2458_v22 = vor.u32 %v2456_v63, %v13248_v59  ;;  %v2482_v24 = vshll.u32 %v2296_v1, 16 }
  0x38   : > { %v2470_v25 = vshrl.u32 %v2295_v11, 16  ;;  %2604 = vrot.lane.b32.xlu1 %v2382_v23, %s13020_s14  ;;  %v13258_v27 = vsel %vm13161_vm6, %v2434_v8, %v2441_v46  ;;  %v2460_v30 = vrot.slane %v13248_v59, 4  ;;  %v2473_v32 = vshll.u32 %v2295_v11, 16  ;;  %v2304_v8 = vld [vmem:[%s13131_s13 + $0x70] sm:$0xf] }
  0x39   : > { %2600 = vrot.lane.b32.xlu0 %v2374_v33, %s13020_s14  ;;  %v2481_v31 = vrot.slane %v2479_v19, 7  ;;  %v2468_v40 = vrot.slane %v2464_v17, 4  ;;  %v2487_v45 = vshrl.u32 %v2297_v20, 16  ;;  %v2490_v47 = vshll.u32 %v2297_v20, 16 }
  0x3a   : > { %v13262_v41 = vrot.slane %v2470_v25, 7  ;;  %v13267_v23 = vsel %vm13161_vm6, %v2451_v16, %v2458_v22  ;;  %v13269_v33 = vor.u32 %v2465_v18, %v2464_v17  ;;  %v2496_v50 = vshrl.u32 %v2298_v26, 16  ;;  %v2303_v17 = vld [vmem:[%s13131_s13 + $0x6c] sm:$0xf] }
  0x3b   : > { %v2485_v49 = vrot.slane %v2481_v31, 4  ;;  %v13272_v53 = vrot.slane %v2487_v45, 7  ;;  %v2499_v55 = vshll.u32 %v2298_v26, 16  ;;  %v2513_v56 = vshrl.u32 %v2300_v37, 16 }
  0x3c   : > { %v2475_v51 = vor.u32 %v2473_v32, %v13262_v41  ;;  %2602 = vrot.lane.b32.xlu1 %v2375_v28, %s13020_s14  ;;  %v13280_v58 = vor.u32 %v2482_v24, %v2481_v31  ;;  %v2498_v60 = vrot.slane %v2496_v50, 7  ;;  %v2504_v61 = vshrl.u32 %v2299_v48, 16  ;;  %v2302_v28 = vld [vmem:[%s13131_s13 + $0x68] sm:$0xf]  ;;  %v2305_v32 = vld [vmem:[%s13131_s13 + $0x74] sm:$0xf] }
  0x3d   : > { %2606 = vrot.lane.b32.xlu0 %v13209_v34, %s13020_s14  ;;  %v2507_v62 = vshll.u32 %v2299_v48, 16  ;;  %v2477_v0 = vrot.slane %v13262_v41, 4  ;;  %v2492_v1 = vor.u32 %v2490_v47, %v13272_v53  ;;  %v2516_v9 = vshll.u32 %v2300_v37, 16 }
  0x3e   : > { %v13285_v63 = vsel %vm13161_vm6, %v2468_v40, %v2475_v51  ;;  %v2494_v34 = vrot.slane %v13272_v53, 4  ;;  %v2515_v11 = vrot.slane %v2513_v56, 7  ;;  %v13292_v46 = vrot.slane %v2504_v61, 7 }
  0x3f   : > { %v2521_v16 = vshrl.u32 %v2301_v57, 16  ;;  %v13297_v18 = vsel %vm13161_vm6, %v2485_v49, %v2492_v1  ;;  %v13299_v19 = vor.u32 %v2499_v55, %v2498_v60  ;;  %v2502_v20 = vrot.slane %v2498_v60, 4 }
  0x40   : > { %v2524_v22 = vshll.u32 %v2301_v57, 16  ;;  %2610 = vrot.lane.b32.xlu1 %v13211_v35, %s13020_s14  ;;  %v2509_v24 = vor.u32 %v2507_v62, %v13292_v46  ;;  %v2519_v25 = vrot.slane %v2515_v11, 4  ;;  %v2530_v31 = vshrl.u32 %v2302_v28, 16  ;;  %v286_v57 = vld [vmem:[#allocation2 + $0xc] sm:$0x1] }
  0x41   : > { %2608 = vrot.lane.b32.xlu0 %v2392_v36, %s13020_s14  ;;  %v13312_v26 = vrot.slane %v2521_v16, 7  ;;  %v2533_v37 = vshll.u32 %v2302_v28, 16  ;;  %v2547_v40 = vshrl.u32 %v2304_v8, 16  ;;  %v2550_v45 = vshll.u32 %v2304_v8, 16 }
  0x42   : > { %v2538_v47 = vshrl.u32 %v2303_v17, 16  ;;  %v13315_v48 = vor.u32 %v2516_v9, %v2515_v11  ;;  %v2511_v49 = vrot.slane %v13292_v46, 4  ;;  %v2532_v50 = vrot.slane %v2530_v31, 7 }
  0x43   : > { %v2526_v35 = vor.u32 %v2524_v22, %v13312_v26  ;;  %v13320_v36 = vrot.slane %v2547_v40, 7  ;;  %v2541_v55 = vshll.u32 %v2303_v17, 16  ;;  %v2555_v56 = vshrl.u32 %v2305_v32, 16  ;;  %v345_v17 = vld [vmem:[#allocation2 + $0x20] sm:$0x1] }
  0x44   : > { %v13322_v51 = vrot.slane %v2538_v47, 7  ;;  %2616 = vrot.lane.b32.xlu1 %v13215_v39, %s13020_s14  ;;  %v13330_v60 = vsel %vm13161_vm6, %v2502_v20, %v2509_v24  ;;  %v2528_v62 = vrot.slane %v13312_v26, 4  ;;  %v2536_v1 = vrot.slane %v2532_v50, 4  ;;  %v289_v39 = vld [vmem:[#allocation2 + $0x18] sm:$0x1] }
  0x45   : > { %2612 = vrot.lane.b32.xlu0 %v13235_v3, %s13020_s14  ;;  %v13334_v61 = vsel %vm13161_vm6, %v2519_v25, %v2526_v35  ;;  %v17761_v9 = vmov 0  ;;  %v292_v3 = vld [vmem:[#allocation2 + $0x24] sm:$0x1]  ;;  %v13343_v28 = vor.u32 %v2533_v37, %v2532_v50  ;;  %v13346_v8 = vor.u32 %v2550_v45, %v13320_v36  ;;  %v295_v20 = vld [vmem:[#allocation2 + $0x30] sm:$0x1] }
  0x46   : > { %v17762_v9 = vsel %vm13339_vm7, 4294967295, %v17761_v9  ;;  %v2543_v11 = vor.u32 %v2541_v55, %v13322_v51  ;;  %v2558_v16 = vshll.u32 %v2305_v32, 16  ;;  %v2545_v22 = vrot.slane %v13322_v51, 4 }
  0x47   : > { %17763 = vst [vmem:[#allocation9_spill] sm:$0xff] %v17762_v9  ;;  %v13350_v24 = vrot.slane %v2555_v56, 7  ;;  %v13355_v25 = vsub.s32 %v534_v42, %v13125_v4  ;;  %v531_v31 = vcombine.high %v11171_v14, %v11171_v14  ;;  %v11172_v37 = vld.sshfl [vmem:[%s13304_s18 + $0x4] sm:$0x33 pattern:$0x75316420]  ;;  %v13361_v40 = vsub.s32 %v1616_v43, %v13125_v4 }
  0x48   : > { %v287_v32 = vsel %vm13339_vm7, 0, %v286_v57  ;;  %v290_v45 = vsel %vm13339_vm7, 0, %v289_v39  ;;  %v293_v47 = vsel %vm13339_vm7, 0, %v292_v3  ;;  %2614 = vrot.lane.b32.xlu1 %v2409_v52, %s13020_s14  ;;  %v13376_v4 = vsel %vm13161_vm6, %v2536_v1, %v2543_v11 }
  0x49   : > { %2618 = vrot.lane.b32.xlu0 %v13239_v6, %s13020_s14  ;;  %v2553_v10 = vrot.slane %v13320_v36, 4  ;;  %v538_v12 = vrot.slane %v11171_v14, %v13355_v25  ;;  %v545_v42 = vrot.slane %v531_v31, %v13355_v25  ;;  %288 = vst [vmem:[#allocation2 + $0xc] sm:$0x1] %v287_v32  ;;  %291 = vst [vmem:[#allocation2 + $0x18] sm:$0x1] %v290_v45  ;;  %v346_v52 = vsel %vm13119_vm2, 0, %v345_v17 }
  0x4a   : > { %294 = vst [vmem:[#allocation2 + $0x24] sm:$0x1] %v293_v47  ;;  %v13382_v43 = vor.u32 %v2558_v16, %v13350_v24  ;;  %v555_v29 = vcombine.high %v11172_v37, %v11172_v37  ;;  %v296_v6 = vsel %vm13339_vm7, 0, %v295_v20  ;;  %v13389_v14 = vrot.slane %v11172_v37, %v13355_v25  ;;  %347 = vst [vmem:[#allocation2 + $0x20] sm:$0x1] %v346_v52 }
  0x4b   : > { %v546_v35 = vcombine.high %v538_v12, %v538_v12  ;;  %v547_v50 = vcombine.high %v545_v42, %v545_v42  ;;  %v717_v55 = vunpack.i.h.s16 %v538_v12  ;;  %297 = vst [vmem:[#allocation2 + $0x30] sm:$0x1] %v296_v6  ;;  %v719_v56 = vunpack.i.h.s16 %v545_v42 }
  0x4c   : > { %v11179_v57 = vpack.i.b16 %v538_v12, %v538_v12  ;;  %v11180_v1 = vpack.i.b16 %v545_v42, %v545_v42  ;;  %v13392_v39 = vrot.slane %v555_v29, %v13355_v25  ;;  %2622 = vrot.lane.b32.xlu1 %v13243_v13, %s13020_s14  ;;  %vm2166_vm8 = vcmask 24576  }
  0x4d   : > { %2620 = vrot.lane.b32.xlu0 %v2426_v7, %s13020_s14  ;;  %v721_v3 = vunpack.i.h.s16 %v546_v35  ;;  %v723_v11 = vunpack.i.h.s16 %v547_v50  ;;  %v11181_v16 = vpack.i.b16 %v546_v35, %v546_v35  ;;  %v11182_v17 = vpack.i.b16 %v547_v50, %v547_v50  ;;  %vm13470_vm11 = vmand %vm2166_vm8, %vm281_vm4 }
  0x4e   : > { %v781_v20 = vpack.i.b16 %v717_v55, %v717_v55  ;;  %v783_v31 = vpack.i.b16 %v719_v56, %v719_v56  ;;  %v847_v37 = vrot.slane %v11179_v57, %v13134_v5  ;;  %v855_v32 = vrot.slane %v11180_v1, %v13134_v5 }
  0x4f   : > { %v785_v45 = vpack.i.b16 %v721_v3, %v721_v3  ;;  %v787_v47 = vpack.i.b16 %v723_v11, %v723_v11  ;;  %v863_v12 = vrot.slane %v11181_v16, %v13134_v5  ;;  %v871_v13 = vrot.slane %v11182_v17, %v13134_v5  ;;  %v348_v3 = vld [vmem:[#allocation2 + $0x2c] sm:$0x1] }
  0x50   : > { %v851_v42 = vrot.slane %v781_v20, %v13134_v5  ;;  %v859_v44 = vrot.slane %v783_v31, %v13134_v5  ;;  %v1101_v7 = vpack.i.b16 %v847_v37, %v847_v37  ;;  %v1115_v29 = vpack.i.b16 %v855_v32, %v855_v32  ;;  %2628 = vrot.lane.b32.xlu1 %v13245_v15, %s13020_s14  ;;  %v2171_v41 = vld [vmem:[#allocation2 + $0x18] sm:$0xf] }
  0x51   : > { %2624 = vrot.lane.b32.xlu0 %v13258_v27, %s13020_s14  ;;  %v867_v52 = vrot.slane %v785_v45, %v13134_v5  ;;  %v875_v6 = vrot.slane %v787_v47, %v13134_v5  ;;  %v1129_v35 = vpack.i.b16 %v863_v12, %v863_v12  ;;  %v725_v50 = vunpack.i.h.s16 %v13389_v14 }
  0x52   : > { %v1143_v55 = vpack.i.b16 %v871_v13, %v871_v13  ;;  %v1106_v56 = vrot.slane %v1101_v7, %v13134_v5  ;;  %v1108_v57 = vpack.i.b16 %v851_v42, %v851_v42  ;;  %v1120_v1 = vrot.slane %v1115_v29, %v13134_v5 }
  0x53   : > { %v1134_v11 = vrot.slane %v1129_v35, %v13134_v5  ;;  %v1136_v15 = vpack.i.b16 %v867_v52, %v867_v52  ;;  %v1150_v16 = vpack.i.b16 %v875_v6, %v875_v6  ;;  %v1122_v17 = vpack.i.b16 %v859_v44, %v859_v44  ;;  %v13436_v52 = vld [vmem:[%s17698_s2 + $0x4] sm:$0xf] }
  0x54   : > { %v1148_v27 = vrot.slane %v1143_v55, %v13134_v5  ;;  %v1113_v20 = vrot.slane %v1108_v57, %v13134_v5  ;;  %v1612_v31 = vcombine.low %v1106_v56, %v1120_v1  ;;  %v727_v37 = vunpack.i.h.s16 %v13392_v39  ;;  %2626 = vrot.lane.b32.xlu1 %v2443_v21, %s13020_s14 }
  0x55   : > { %2630 = vrot.lane.b32.xlu0 %v13267_v23, %s13020_s14  ;;  %v1141_v32 = vrot.slane %v1136_v15, %v13134_v5  ;;  %v1155_v45 = vrot.slane %v1150_v16, %v13134_v5  ;;  %v1127_v47 = vrot.slane %v1122_v17, %v13134_v5  ;;  %v349_v12 = vsel %vm13119_vm2, 0, %v348_v3 }
  0x56   : > { %v1636_v13 = vcombine.low %v1134_v11, %v1148_v27  ;;  %vm2159_vm9 = vcmask 27648   ;;  %v1620_v42 = vrot.slane %v1612_v31, %v13361_v40  ;;  %v11183_v54 = vpack.i.b16 %v13389_v14, %v13389_v14  ;;  %350 = vst [vmem:[#allocation2 + $0x2c] sm:$0x1] %v349_v12 }
  0x57   : > { %v789_v21 = vpack.i.b16 %v725_v50, %v725_v50  ;;  %v1637_v23 = vcombine.low %v1141_v32, %v1155_v45  ;;  %v1613_v44 = vcombine.low %v1113_v20, %v1127_v47  ;;  %v11184_v7 = vpack.i.b16 %v13392_v39, %v13392_v39  ;;  %vm13482_vm12 = vmand %vm2159_vm9, %vm337_vm1 }
  0x58   : > { %v791_v29 = vpack.i.b16 %v727_v37, %v727_v37  ;;  %v1644_v6 = vrot.slane %v1636_v13, %v13361_v40  ;;  %v879_v35 = vrot.slane %v11183_v54, %v13134_v5  ;;  %v570_v50 = vcombine.high %v13389_v14, %v13389_v14  ;;  %2634 = vrot.lane.b32.xlu1 %v13269_v33, %s13020_s14  ;;  %v298_v33 = vld [vmem:[#allocation2 + $0x3c] sm:$0x1] }
  0x59   : > { %v883_v55 = vrot.slane %v789_v21, %v13134_v5  ;;  %2632 = vrot.lane.b32.xlu0 %v2460_v30, %s13020_s14  ;;  %v1651_v56 = vrot.slane %v1637_v23, %v13361_v40  ;;  %v1627_v57 = vrot.slane %v1613_v44, %v13361_v40  ;;  %v887_v1 = vrot.slane %v11184_v7, %v13134_v5 }
  0x5a   : > { %vm4771_vm10 = vcmask 1043456   ;;  %v891_v3 = vrot.slane %v791_v29, %v13134_v5  ;;  %v1157_v11 = vpack.i.b16 %v879_v35, %v879_v35  ;;  %v571_v14 = vcombine.high %v13392_v39, %v13392_v39 }
  0x5b   : > { %v1164_v15 = vpack.i.b16 %v883_v55, %v883_v55  ;;  %12699 = vmatprep.subr.msk.bf16.mxu0 %vm4771_vm10, %v13436_v52  ;;  %v1652_v59 = vcombine.low %v1644_v6, %v1651_v56  ;;  %v1628_v30 = vcombine.low %v1620_v42, %v1627_v57  ;;  %v1171_v16 = vpack.i.b16 %v887_v1, %v887_v1 }
  0x5c   : > { %v729_v17 = vunpack.i.h.s16 %v570_v50  ;;  %v1162_v27 = vrot.slane %v1157_v11, %v13134_v5  ;;  %v1178_v31 = vpack.i.b16 %v891_v3, %v891_v3  ;;  %v731_v37 = vunpack.i.h.s16 %v571_v14  ;;  %2640 = vrot.lane.b32.xlu1 %v13280_v58, %s13020_s14  ;;  %v2168_v3 = vld [vmem:[#allocation2 + $0x14] sm:$0x1]  ;;  %v2161_v11 = vld [vmem:[#allocation2 + $0xc] sm:$0xf] }
  0x5d   : > { %v1169_v20 = vrot.slane %v1164_v15, %v13134_v5  ;;  %2636 = vrot.lane.b32.xlu0 %v13285_v63, %s13020_s14  ;;  %v1659_v39 = vrot.slane %v1652_v59, %v13361_v40  ;;  %v1635_v32 = vrot.slane %v1628_v30, %v13361_v40  ;;  %v1176_v45 = vrot.slane %v1171_v16, %v13134_v5 }
  0x5e   : > { %v299_v47 = vsel %vm13339_vm7, 0, %v298_v33  ;;  %v1183_v12 = vrot.slane %v1178_v31, %v13134_v5  ;;  %v11185_v13 = vpack.i.b16 %v570_v50, %v570_v50  ;;  %v793_v42 = vpack.i.b16 %v729_v17, %v729_v17  ;;  %v2175_v17 = vld [vmem:[#allocation2 + $0x20] sm:$0x1] }
  0x5f   : > { %v11186_v54 = vpack.i.b16 %v571_v14, %v571_v14  ;;  %300 = vst [vmem:[#allocation2 + $0x3c] sm:$0x1] %v299_v47  ;;  %v2007_v21 = vshrl.u32 %v1659_v39, 16  ;;  %v1999_v58 = vshrl.u32 %v1635_v32, 16  ;;  %v2002_v23 = vshll.u32 %v1635_v32, 16 }
  0x60   : > { %v2010_v44 = vshll.u32 %v1659_v39, 16  ;;  %v1660_v7 = vcombine.low %v1162_v27, %v1176_v45  ;;  %v1661_v29 = vcombine.low %v1169_v20, %v1183_v12  ;;  %v795_v6 = vpack.i.b16 %v731_v37, %v731_v37  ;;  %2638 = vrot.lane.b32.xlu1 %v2477_v0, %s13020_s14  ;;  %v11173_v39 = vld.sshfl [vmem:[%s13304_s18 + $0x8] sm:$0x33 pattern:$0x75316420] }
  0x61   : > { %v895_v35 = vrot.slane %v11185_v13, %v13134_v5  ;;  %2642 = vrot.lane.b32.xlu0 %v13297_v18, %s13020_s14  ;;  %v2009_v55 = vrot.slane %v2007_v21, 7  ;;  %v2001_v56 = vrot.slane %v1999_v58, 7  ;;  %v899_v57 = vrot.slane %v793_v42, %v13134_v5  ;;  %v13496_v32 = vld [vmem:[%s17698_s2] sm:$0xf] }
  0x62   : > { %v903_v1 = vrot.slane %v11186_v54, %v13134_v5  ;;  %v1668_v0 = vrot.slane %v1660_v7, %v13361_v40  ;;  %v1675_v18 = vrot.slane %v1661_v29, %v13361_v40  ;;  %v907_v15 = vrot.slane %v795_v6, %v13134_v5  ;;  %v283_v42 = vld [vmem:[#allocation2] sm:$0x1]  ;;  %v339_v54 = vld [vmem:[#allocation2 + $0x8] sm:$0x1] }
  0x63   : > { %v1185_v14 = vpack.i.b16 %v895_v35, %v895_v35  ;;  %v2014_v33 = vrot.slane %v2009_v55, 4  ;;  %v2004_v59 = vor.u32 %v2002_v23, %v2001_v56  ;;  %v2005_v30 = vrot.slane %v2001_v56, 4 }
  0x64   : > { %v2012_v16 = vor.u32 %v2010_v44, %v2009_v55  ;;  %v1676_v27 = vcombine.low %v1668_v0, %v1675_v18  ;;  %v1192_v31 = vpack.i.b16 %v899_v57, %v899_v57  ;;  %v1199_v37 = vpack.i.b16 %v903_v1, %v903_v1  ;;  %2646 = vrot.lane.b32.xlu1 %v13299_v19, %s13020_s14 }
  0x65   : > { %v1190_v20 = vrot.slane %v1185_v14, %v13134_v5  ;;  %2644 = vrot.lane.b32.xlu0 %v2494_v34, %s13020_s14  ;;  %v2169_v45 = vsel %vm13470_vm11, %v2014_v33, %v2168_v3  ;;  %v2162_v47 = vsel %vm13482_vm12, %v2004_v59, %v2161_v11  ;;  %v2172_v12 = vsel %vm13482_vm12, %v2004_v59, %v2171_v41  ;;  %v2178_v41 = vld [vmem:[#allocation2 + $0x24] sm:$0xf] }
  0x66   : > { %v4773_v13 = vsel %vm4771_vm10, %v13436_v52, 0  ;;  %2170 = vst [vmem:[#allocation2 + $0x14] sm:$0x1] %v2169_v45  ;;  %2163 = vst [vmem:[#allocation2 + $0xc] sm:$0xf] %v2162_v47  ;;  %v2013_v53 = vsel %vm13161_vm6, %v2005_v30, %v2012_v16  ;;  %v1683_v34 = vrot.slane %v1676_v27, %v13361_v40  ;;  %v2176_v19 = vsel %vm13470_vm11, %v2014_v33, %v2175_v17 }
  0x67   : > { %2173 = vst [vmem:[#allocation2 + $0x18] sm:$0xf] %v2172_v12  ;;  %v1197_v21 = vrot.slane %v1192_v31, %v13134_v5  ;;  %12138 = vmatpush3.bf16.msra.mxu0 %v4773_v13  ;;  %2165 = vst.msk [vmem:[#allocation2 + $0x10] sm:$0xf] %vm2159_vm9, %v2013_v53  ;;  %v1204_v52 = vrot.slane %v1199_v37, %v13134_v5  ;;  %v1206_v58 = vpack.i.b16 %v907_v15, %v907_v15  ;;  %v2185_v15 = vld [vmem:[#allocation2 + $0x30] sm:$0xf] }
  0x68   : > { %2174 = vst.msk [vmem:[#allocation2 + $0x1c] sm:$0xf] %vm2159_vm9, %v2013_v53  ;;  %2177 = vst [vmem:[#allocation2 + $0x20] sm:$0x1] %v2176_v19  ;;  %v579_v23 = vcombine.high %v11173_v39, %v11173_v39  ;;  %v13521_v44 = vrot.slane %v11173_v39, %v13355_v25  ;;  %12700 = vmatprep.subr.msk.bf16.mxu0 %vm4771_vm10, %v13496_v32  ;;  %v2016_v7 = vshrl.u32 %v1683_v34, 16  ;;  %v2019_v29 = vshll.u32 %v1683_v34, 16 }
  0x69   : > { %v284_v6 = vsel %vm13339_vm7, 0, %v283_v42  ;;  %v340_v35 = vsel %vm13119_vm2, 0, %v339_v54  ;;  %2652 = vrot.lane.b32.xlu1 %v13315_v48, %s13020_s14  ;;  %2648 = vrot.lane.b32.xlu0 %v13330_v60, %s13020_s14  ;;  %v1211_v55 = vrot.slane %v1206_v58, %v13134_v5  ;;  %v1684_v56 = vcombine.low %v1190_v20, %v1204_v52  ;;  %v2842_v59 = vld [vmem:[#allocation2 + $0x4] sm:$0xf] }
  0x6a   : > { %v13535_v57 = vrot.slane %v579_v23, %v13355_v25  ;;  %v733_v1 = vunpack.i.h.s16 %v13521_v44  ;;  %285 = vst [vmem:[#allocation2] sm:$0x1] %v284_v6  ;;  %341 = vst [vmem:[#allocation2 + $0x8] sm:$0x1] %v340_v35  ;;  %v13543_v3 = vsel %vm13161_vm6, %v2553_v10, %v13382_v43  ;;  %v2562_v48 = vrot.slane %v13350_v24, 4 }
  0x6b   : > { %v13546_v60 = vrot.slane %v2016_v7, 7  ;;  %v11187_v11 = vpack.i.b16 %v13521_v44, %v13521_v44  ;;  %v1685_v0 = vcombine.low %v1197_v21, %v1211_v55  ;;  %v1692_v18 = vrot.slane %v1684_v56, %v13361_v40 }
  0x6c   : > { %v735_v14 = vunpack.i.h.s16 %v13535_v57  ;;  %v797_v33 = vpack.i.b16 %v733_v1, %v733_v1  ;;  %v11188_v10 = vpack.i.b16 %v13535_v57, %v13535_v57  ;;  %vm2889_vm13 = vsmask.f32 3328 }
  0x6d   : > { %v2021_v36 = vor.u32 %v2019_v29, %v13546_v60  ;;  %v911_v43 = vrot.slane %v11187_v11, %v13134_v5  ;;  %2650 = vrot.lane.b32.xlu1 %v2511_v49, %s13020_s14  ;;  %2654 = vrot.lane.b32.xlu0 %v13334_v61, %s13020_s14  ;;  %v1699_v30 = vrot.slane %v1685_v0, %v13361_v40  ;;  %vm2890_vm14 = vsmask.f32 7440  ;;  %v351_v29 = vld [vmem:[#allocation2 + $0x38] sm:$0x1]  ;;  %v301_v0 = vld [vmem:[#allocation2 + $0x48] sm:$0x1] }
  0x6e   : > { %v799_v16 = vpack.i.b16 %v735_v14, %v735_v14  ;;  %v915_v17 = vrot.slane %v797_v33, %v13134_v5  ;;  %v919_v31 = vrot.slane %v11188_v10, %v13134_v5  ;;  %v2902_v39 = vshll.u32 %v2842_v59, 16  ;;  %vm13590_vm0 = vmor %vm2889_vm13, %vm2890_vm14 }
  0x6f   : > { %v2179_v27 = vsel %vm13482_vm12, %v2021_v36, %v2178_v41  ;;  %v2186_v20 = vsel %vm13482_vm12, %v2021_v36, %v2185_v15  ;;  %v1213_v37 = vpack.i.b16 %v911_v43, %v911_v43  ;;  %v1700_v46 = vcombine.low %v1692_v18, %v1699_v30  ;;  %v2182_v18 = vld [vmem:[#allocation2 + $0x2c] sm:$0x1] }
  0x70   : > { %2180 = vst [vmem:[#allocation2 + $0x24] sm:$0xf] %v2179_v27  ;;  %2187 = vst [vmem:[#allocation2 + $0x30] sm:$0xf] %v2186_v20  ;;  %v923_v49 = vrot.slane %v799_v16, %v13134_v5  ;;  %v1220_v61 = vpack.i.b16 %v915_v17, %v915_v17  ;;  %v2022_v45 = vrot.slane %v13546_v60, 4  ;;  %v1227_v12 = vpack.i.b16 %v919_v31, %v919_v31 }
  0x71   : > { %v1218_v47 = vrot.slane %v1213_v37, %v13134_v5  ;;  %v2841_v13 = vld [vmem:[#allocation2] sm:$0xf]  ;;  %v2906_v42 = vshrl.u32 %v2842_v59, 16  ;;  %2658 = vrot.lane.b32.xlu1 %v13343_v28, %s13020_s14  ;;  %2656 = vrot.lane.b32.xlu0 %v2528_v62, %s13020_s14  ;;  %v1707_v54 = vrot.slane %v1700_v46, %v13361_v40  ;;  %v2873_v19 = vld [vmem:[#allocation2 + $0x8] sm:$0x1]  ;;  %v2904_v23 = vrot.slane %v2902_v39, 5 }
  0x72   : > { %v1225_v53 = vrot.slane %v1220_v61, %v13134_v5  ;;  %v1234_v34 = vpack.i.b16 %v923_v49, %v923_v49  ;;  %v2893_v21 = vshrl.u32 %v2841_v13, 16  ;;  %v1232_v52 = vrot.slane %v1227_v12, %v13134_v5  ;;  %v354_v20 = vld [vmem:[#allocation2 + $0x44] sm:$0x1]  ;;  %v304_v46 = vld [vmem:[#allocation2 + $0x54] sm:$0x1] }
  0x73   : > { %v2896_v58 = vshll.u32 %v2841_v13, 16  ;;  %v2908_v7 = vrot.slane %v2906_v42, 4  ;;  %v2024_v6 = vshrl.u32 %v1707_v54, 16  ;;  %v2027_v35 = vshll.u32 %v1707_v54, 16 }
  0x74   : > { %v1239_v28 = vrot.slane %v1234_v34, %v13134_v5  ;;  %v2895_v55 = vrot.slane %v2893_v21, 4  ;;  %v1708_v26 = vcombine.low %v1218_v47, %v1232_v52  ;;  %v2912_v1 = vshll.u32 %v2873_v19, 16  ;;  %v11174_v61 = vld.sshfl [vmem:[%s13304_s18 + $0xc] sm:$0x33 pattern:$0x75316420] }
  0x75   : > { %v2898_v62 = vrot.slane %v2896_v58, 5  ;;  %v2909_v56 = vor.u32 %v2908_v7, %v2904_v23  ;;  %2664 = vrot.lane.b32.xlu1 %v13346_v8, %s13020_s14  ;;  %2660 = vrot.lane.b32.xlu0 %v13376_v4, %s13020_s14  ;;  %v2026_v60 = vrot.slane %v2024_v6, 7  ;;  %vm4722_vm15 = vcmask 64512  }
  0x76   : > { %v1709_v11 = vcombine.low %v1225_v53, %v1239_v28  ;;  %v352_v41 = vsel %vm13119_vm2, 0, %v351_v29  ;;  %v1716_v15 = vrot.slane %v1708_v26, %v13361_v40  ;;  %v2914_v36 = vrot.slane %v2912_v1, 5  ;;  %v2192_v26 = vld [vmem:[#allocation2 + $0x3c] sm:$0xf] }
  0x77   : > { %v2899_v14 = vor.u32 %v2898_v62, %v2895_v55  ;;  %v2910_v33 = vrot.slane %v2909_v56, 4  ;;  %353 = vst [vmem:[#allocation2 + $0x38] sm:$0x1] %v352_v41  ;;  %v2029_v10 = vor.u32 %v2027_v35, %v2026_v60  ;;  %v2031_v43 = vrot.slane %v2026_v60, 4 }
  0x78   : > { %v1723_v8 = vrot.slane %v1709_v11, %v13361_v40  ;;  %v594_v59 = vcombine.high %v13521_v44, %v13521_v44  ;;  %v595_v17 = vcombine.high %v13535_v57, %v13535_v57  ;;  %v302_v27 = vsel %vm13339_vm7, 0, %v301_v0 }
  0x79   : > { %v2900_v30 = vrot.slane %v2899_v14, 4  ;;  %v2915_v16 = vsel %vm13590_vm0, %v2910_v33, %v2914_v36  ;;  %2662 = vrot.lane.b32.xlu1 %v2545_v22, %s13020_s14  ;;  %2666 = vrot.lane.b32.xlu0 %v13543_v3, %s13020_s14  ;;  %v2030_v44 = vsel %vm13161_vm6, %v2022_v45, %v2029_v10  ;;  %v2183_v31 = vsel %vm13470_vm11, %v2031_v43, %v2182_v18 }
  0x7a   : > { %v1724_v37 = vcombine.low %v1716_v15, %v1723_v8  ;;  %v737_v57 = vunpack.i.h.s16 %v594_v59  ;;  %303 = vst [vmem:[#allocation2 + $0x48] sm:$0x1] %v302_v27  ;;  %2181 = vst.msk [vmem:[#allocation2 + $0x28] sm:$0xf] %vm2159_vm9, %v2030_v44  ;;  %v739_v22 = vunpack.i.h.s16 %v595_v17  ;;  %v11189_v3 = vpack.i.b16 %v594_v59, %v594_v59 }
  0x7b   : > { %2188 = vst.msk [vmem:[#allocation2 + $0x34] sm:$0xf] %vm2159_vm9, %v2030_v44  ;;  %2184 = vst [vmem:[#allocation2 + $0x2c] sm:$0x1] %v2183_v31  ;;  %v2905_v51 = vsel %vm13590_vm0, %v2900_v30, %v2904_v23  ;;  %v11190_v49 = vpack.i.b16 %v595_v17, %v595_v17  ;;  %v355_v12 = vsel %vm13119_vm2, 0, %v354_v20  ;;  %v305_v53 = vsel %vm13339_vm7, 0, %v304_v46 }
  0x7c   : > { %v1731_v39 = vrot.slane %v1724_v37, %v13361_v40  ;;  %v11259_v45 = vcombine.low %v2905_v51, %v2915_v16  ;;  %v801_v47 = vpack.i.b16 %v737_v57, %v737_v57  ;;  %v803_v13 = vpack.i.b16 %v739_v22, %v739_v22  ;;  %356 = vst [vmem:[#allocation2 + $0x44] sm:$0x1] %v355_v12  ;;  %v357_v23 = vld [vmem:[#allocation2 + $0x50] sm:$0x1]  ;;  %v307_v16 = vld [vmem:[#allocation2 + $0x60] sm:$0x1] }
  0x7d   : > { %v927_v42 = vrot.slane %v11189_v3, %v13134_v5  ;;  %v935_v54 = vrot.slane %v11190_v49, %v13134_v5  ;;  %2668 = vrot.lane.b32.xlu0 %v2562_v48, %s13020_s14  ;;  %306 = vst [vmem:[#allocation2 + $0x54] sm:$0x1] %v305_v53  ;;  %v603_v58 = vcombine.high %v11174_v61, %v11174_v61  ;;  %v358_v11 = vsel %vm13119_vm2, 0, %v357_v23  ;;  %v360_v53 = vld [vmem:[#allocation2 + $0x5c] sm:$0x1] }
  0x7e   : > { %v2033_v34 = vshrl.u32 %v1731_v39, 16  ;;  %v2036_v19 = vshll.u32 %v1731_v39, 16  ;;  %12139 = vmatprep.mubr.msk.bf16.mxu0 %vm4722_vm15, %v11259_v45  ;;  %v2189_v21 = vld [vmem:[#allocation2 + $0x38] sm:$0x1]  ;;  %v931_v52 = vrot.slane %v801_v47, %v13134_v5  ;;  %v939_v29 = vrot.slane %v803_v13, %v13134_v5  ;;  %359 = vst [vmem:[#allocation2 + $0x50] sm:$0x1] %v358_v11 }
  0x7f   : > { %v2190_v7 = vsel %vm13470_vm11, %v2031_v43, %v2189_v21  ;;  %v1241_v6 = vpack.i.b16 %v927_v42, %v927_v42  ;;  %v1255_v35 = vpack.i.b16 %v935_v54, %v935_v54  ;;  %v610_v48 = vrot.slane %v11174_v61, %v13355_v25 }
  0x80   : > { %v13631_v28 = vrot.slane %v2033_v34, 7  ;;  %2191 = vst [vmem:[#allocation2 + $0x38] sm:$0x1] %v2190_v7  ;;  %v1248_v24 = vpack.i.b16 %v931_v52, %v931_v52  ;;  %v617_v55 = vrot.slane %v603_v58, %v13355_v25  ;;  %v1262_v1 = vpack.i.b16 %v939_v29, %v939_v29 }
  0x81   : > { %v1246_v62 = vrot.slane %v1241_v6, %v13134_v5  ;;  %v1260_v56 = vrot.slane %v1255_v35, %v13134_v5  ;;  %v2199_v60 = vld [vmem:[#allocation2 + $0x48] sm:$0xf]  ;;  %v741_v15 = vunpack.i.h.s16 %v610_v48  ;;  %v11191_v10 = vpack.i.b16 %v610_v48, %v610_v48 }
  0x82   : > { %v2038_v41 = vor.u32 %v2036_v19, %v13631_v28  ;;  %v1253_v0 = vrot.slane %v1248_v24, %v13134_v5  ;;  %v2039_v18 = vrot.slane %v13631_v28, 4  ;;  %v1267_v14 = vrot.slane %v1262_v1, %v13134_v5 }
  0x83   : > { %v1732_v33 = vcombine.low %v1246_v62, %v1260_v56  ;;  %v743_v36 = vunpack.i.h.s16 %v617_v55  ;;  %v805_v59 = vpack.i.b16 %v741_v15, %v741_v15  ;;  %v11192_v30 = vpack.i.b16 %v617_v55, %v617_v55 }
  0x84   : > { %v2193_v43 = vsel %vm13482_vm12, %v2038_v41, %v2192_v26  ;;  %v2200_v8 = vsel %vm13482_vm12, %v2038_v41, %v2199_v60  ;;  %v1733_v17 = vcombine.low %v1253_v0, %v1267_v14  ;;  %v943_v44 = vrot.slane %v11191_v10, %v13134_v5  ;;  %v11175_v60 = vld.sshfl [vmem:[%s13304_s18 + $0x10] sm:$0x33 pattern:$0x75316420] }
  0x85   : > { %2194 = vst [vmem:[#allocation2 + $0x3c] sm:$0xf] %v2193_v43  ;;  %v1740_v27 = vrot.slane %v1732_v33, %v13361_v40  ;;  %2201 = vst [vmem:[#allocation2 + $0x48] sm:$0xf] %v2200_v8  ;;  %v807_v20 = vpack.i.b16 %v743_v36, %v743_v36  ;;  %v947_v31 = vrot.slane %v805_v59, %v13134_v5  ;;  %v308_v49 = vsel %vm13339_vm7, 0, %v307_v16 }
  0x86   : > { %v951_v37 = vrot.slane %v11192_v30, %v13134_v5  ;;  %v618_v57 = vcombine.high %v610_v48, %v610_v48  ;;  %v619_v46 = vcombine.high %v617_v55, %v617_v55  ;;  %v1747_v51 = vrot.slane %v1733_v17, %v13361_v40  ;;  %309 = vst [vmem:[#allocation2 + $0x60] sm:$0x1] %v308_v49  ;;  %v310_v55 = vld [vmem:[#allocation2 + $0x6c] sm:$0x1]  ;;  %v363_v43 = vld [vmem:[#allocation2 + $0x68] sm:$0x1] }
  0x87   : > { %v955_v22 = vrot.slane %v807_v20, %v13134_v5  ;;  %v1269_v3 = vpack.i.b16 %v943_v44, %v943_v44  ;;  %v1276_v61 = vpack.i.b16 %v947_v31, %v947_v31  ;;  %vm2731_vm5 = vcmask 57376   ;;  %v2196_v8 = vld [vmem:[#allocation2 + $0x44] sm:$0x1]  ;;  %v2203_v59 = vld [vmem:[#allocation2 + $0x50] sm:$0x1] }
  0x88   : > { %v1283_v39 = vpack.i.b16 %v951_v37, %v951_v37  ;;  %v745_v45 = vunpack.i.h.s16 %v618_v57  ;;  %v747_v47 = vunpack.i.h.s16 %v619_v46  ;;  %v1748_v12 = vcombine.low %v1740_v27, %v1747_v51  ;;  %vm13693_vm13 = vmand %vm2731_vm5, %vm281_vm4 }
  0x89   : > { %v1274_v13 = vrot.slane %v1269_v3, %v13134_v5  ;;  %v1290_v42 = vpack.i.b16 %v955_v22, %v955_v22  ;;  %v11193_v54 = vpack.i.b16 %v618_v57, %v618_v57  ;;  %v1281_v34 = vrot.slane %v1276_v61, %v13134_v5 }
  0x8a   : > { %v1288_v19 = vrot.slane %v1283_v39, %v13134_v5  ;;  %v809_v21 = vpack.i.b16 %v745_v45, %v745_v45  ;;  %v11194_v52 = vpack.i.b16 %v619_v46, %v619_v46  ;;  %vm2724_vm8 = vcmask 60448  }
  0x8b   : > { %v1755_v58 = vrot.slane %v1748_v12, %v13361_v40  ;;  %v1295_v23 = vrot.slane %v1290_v42, %v13134_v5  ;;  %v811_v7 = vpack.i.b16 %v747_v47, %v747_v47  ;;  %v959_v29 = vrot.slane %v11193_v54, %v13134_v5  ;;  %vm13699_vm14 = vmand %vm2724_vm8, %vm337_vm1 }
  0x8c   : > { %v1756_v6 = vcombine.low %v1274_v13, %v1288_v19  ;;  %v963_v35 = vrot.slane %v809_v21, %v13134_v5  ;;  %v967_v24 = vrot.slane %v11194_v52, %v13134_v5  ;;  %v361_v48 = vsel %vm13119_vm2, 0, %v360_v53  ;;  %v2726_v21 = vld [vmem:[#allocation2 + $0xc] sm:$0xf] }
  0x8d   : > { %v2041_v26 = vshrl.u32 %v1755_v58, 16  ;;  %v2044_v62 = vshll.u32 %v1755_v58, 16  ;;  %v1757_v56 = vcombine.low %v1281_v34, %v1295_v23  ;;  %v971_v1 = vrot.slane %v811_v7, %v13134_v5  ;;  %362 = vst [vmem:[#allocation2 + $0x5c] sm:$0x1] %v361_v48  ;;  %v2733_v34 = vld [vmem:[#allocation2 + $0x14] sm:$0x1] }
  0x8e   : > { %v1764_v11 = vrot.slane %v1756_v6, %v13361_v40  ;;  %v1297_v41 = vpack.i.b16 %v959_v29, %v959_v29  ;;  %v1304_v0 = vpack.i.b16 %v963_v35, %v963_v35  ;;  %v1311_v15 = vpack.i.b16 %v967_v24, %v967_v24 }
  0x8f   : > { %v2043_v14 = vrot.slane %v2041_v26, 7  ;;  %v1771_v33 = vrot.slane %v1757_v56, %v13361_v40  ;;  %v1318_v36 = vpack.i.b16 %v971_v1, %v971_v1  ;;  %v311_v10 = vsel %vm13339_vm7, 0, %v310_v55  ;;  %v2206_v26 = vld [vmem:[#allocation2 + $0x54] sm:$0xf]  ;;  %v2213_v56 = vld [vmem:[#allocation2 + $0x60] sm:$0xf] }
  0x90   : > { %v1302_v30 = vrot.slane %v1297_v41, %v13134_v5  ;;  %v1309_v16 = vrot.slane %v1304_v0, %v13134_v5  ;;  %v1316_v17 = vrot.slane %v1311_v15, %v13134_v5  ;;  %312 = vst [vmem:[#allocation2 + $0x6c] sm:$0x1] %v311_v10  ;;  %v627_v27 = vcombine.high %v11175_v60, %v11175_v60 }
  0x91   : > { %v2046_v20 = vor.u32 %v2044_v62, %v2043_v14  ;;  %v2048_v44 = vrot.slane %v2043_v14, 4  ;;  %v1772_v31 = vcombine.low %v1764_v11, %v1771_v33  ;;  %v1323_v37 = vrot.slane %v1318_v36, %v13134_v5  ;;  %v2736_v14 = vld [vmem:[#allocation2 + $0x18] sm:$0xf] }
  0x92   : > { %v1780_v57 = vcombine.low %v1302_v30, %v1316_v17  ;;  %v634_v46 = vrot.slane %v11175_v60, %v13355_v25  ;;  %v641_v51 = vrot.slane %v627_v27, %v13355_v25  ;;  %v364_v22 = vsel %vm13119_vm2, 0, %v363_v43 }
  0x93   : > { %v2047_v3 = vsel %vm13161_vm6, %v2039_v18, %v2046_v20  ;;  %v2197_v49 = vsel %vm13470_vm11, %v2048_v44, %v2196_v8  ;;  %v1779_v61 = vrot.slane %v1772_v31, %v13361_v40  ;;  %v2204_v39 = vsel %vm13470_vm11, %v2048_v44, %v2203_v59  ;;  %365 = vst [vmem:[#allocation2 + $0x68] sm:$0x1] %v364_v22 }
  0x94   : > { %2195 = vst.msk [vmem:[#allocation2 + $0x40] sm:$0xf] %vm2159_vm9, %v2047_v3  ;;  %2202 = vst.msk [vmem:[#allocation2 + $0x4c] sm:$0xf] %vm2159_vm9, %v2047_v3  ;;  %v1781_v45 = vcombine.low %v1309_v16, %v1323_v37  ;;  %v1788_v28 = vrot.slane %v1780_v57, %v13361_v40  ;;  %v749_v47 = vunpack.i.h.s16 %v634_v46  ;;  %v751_v18 = vunpack.i.h.s16 %v641_v51  ;;  %v2743_v3 = vld [vmem:[#allocation2 + $0x24] sm:$0xf] }
  0x95   : > { %2198 = vst [vmem:[#allocation2 + $0x44] sm:$0x1] %v2197_v49  ;;  %2205 = vst [vmem:[#allocation2 + $0x50] sm:$0x1] %v2204_v39  ;;  %v2050_v13 = vshrl.u32 %v1779_v61, 16  ;;  %v2053_v42 = vshll.u32 %v1779_v61, 16  ;;  %v11195_v54 = vpack.i.b16 %v634_v46, %v634_v46  ;;  %v11196_v53 = vpack.i.b16 %v641_v51, %v641_v51 }
  0x96   : > { %v1795_v52 = vrot.slane %v1781_v45, %v13361_v40  ;;  %v813_v58 = vpack.i.b16 %v749_v47, %v749_v47  ;;  %v815_v23 = vpack.i.b16 %v751_v18, %v751_v18  ;;  %v642_v7 = vcombine.high %v634_v46, %v634_v46  ;;  %v2585_v48 = vpop.permute.xlu1 %2584 }
  0x97   : > { %v13704_v29 = vrot.slane %v2050_v13, 7  ;;  %v975_v6 = vrot.slane %v11195_v54, %v13134_v5  ;;  %v983_v35 = vrot.slane %v11196_v53, %v13134_v5  ;;  %v13708_v24 = vcombine.high %v641_v51, %v641_v51  ;;  %v2581_v55 = vpop.permute.xlu0 %2580 }
  0x98   : > { %v1796_v62 = vcombine.low %v1788_v28, %v1795_v52  ;;  %v979_v1 = vrot.slane %v813_v58, %v13134_v5  ;;  %v987_v60 = vrot.slane %v815_v23, %v13134_v5  ;;  %v2734_v11 = vsel %vm13693_vm13, %v2585_v48, %v2733_v34  ;;  %v2210_v34 = vld [vmem:[#allocation2 + $0x5c] sm:$0x1]  ;;  %v2740_v48 = vld [vmem:[#allocation2 + $0x20] sm:$0x1] }
  0x99   : > { %v2727_v41 = vsel %vm13699_vm14, %v2581_v55, %v2726_v21  ;;  %v2055_v0 = vor.u32 %v2053_v42, %v13704_v29  ;;  %v753_v15 = vunpack.i.h.s16 %v642_v7  ;;  %2735 = vst [vmem:[#allocation2 + $0x14] sm:$0x1] %v2734_v11  ;;  %v1325_v36 = vpack.i.b16 %v975_v6, %v975_v6 }
  0x9a   : > { %2728 = vst [vmem:[#allocation2 + $0xc] sm:$0xf] %v2727_v41  ;;  %v1803_v33 = vrot.slane %v1796_v62, %v13361_v40  ;;  %v1332_v10 = vpack.i.b16 %v979_v1, %v979_v1  ;;  %v1339_v43 = vpack.i.b16 %v983_v35, %v983_v35  ;;  %v1346_v30 = vpack.i.b16 %v987_v60, %v987_v60  ;;  %v2587_v17 = vpop.permute.xlu1 %2586  ;;  %v2217_v21 = vld [vmem:[#allocation2 + $0x68] sm:$0x1] }
  0x9b   : > { %v2207_v8 = vsel %vm13482_vm12, %v2055_v0, %v2206_v26  ;;  %v2214_v59 = vsel %vm13482_vm12, %v2055_v0, %v2213_v56  ;;  %v755_v16 = vunpack.i.h.s16 %v13708_v24  ;;  %v2583_v27 = vpop.permute.xlu0 %2582  ;;  %v1330_v31 = vrot.slane %v1325_v36, %v13134_v5 }
  0x9c   : > { %2208 = vst [vmem:[#allocation2 + $0x54] sm:$0xf] %v2207_v8  ;;  %v2058_v20 = vshrl.u32 %v1803_v33, 16  ;;  %v2061_v44 = vshll.u32 %v1803_v33, 16  ;;  %2215 = vst [vmem:[#allocation2 + $0x60] sm:$0xf] %v2214_v59  ;;  %v1337_v37 = vrot.slane %v1332_v10, %v13134_v5  ;;  %v2737_v57 = vsel %vm13699_vm14, %v2587_v17, %v2736_v14 }
  0x9d   : > { %2730 = vst.msk [vmem:[#allocation2 + $0x10] sm:$0xf] %vm2724_vm8, %v2583_v27  ;;  %v1344_v46 = vrot.slane %v1339_v43, %v13134_v5  ;;  %v1351_v51 = vrot.slane %v1346_v30, %v13134_v5  ;;  %v11197_v22 = vpack.i.b16 %v642_v7, %v642_v7  ;;  %2738 = vst [vmem:[#allocation2 + $0x18] sm:$0xf] %v2737_v57  ;;  %v2056_v45 = vrot.slane %v13704_v29, 4 }
  0x9e   : > { %v2060_v49 = vrot.slane %v2058_v20, 7  ;;  %v817_v61 = vpack.i.b16 %v753_v15, %v753_v15  ;;  %v11198_v39 = vpack.i.b16 %v13708_v24, %v13708_v24  ;;  %v819_v18 = vpack.i.b16 %v755_v16, %v755_v16  ;;  %v2593_v13 = vpop.permute.xlu1 %2592  ;;  %v2750_v17 = vld [vmem:[#allocation2 + $0x30] sm:$0xf]  ;;  %v2747_v27 = vld [vmem:[#allocation2 + $0x2c] sm:$0x1] }
  0x9f   : > { %v1804_v28 = vcombine.low %v1330_v31, %v1344_v46  ;;  %v1805_v47 = vcombine.low %v1337_v37, %v1351_v51  ;;  %v2589_v42 = vpop.permute.xlu0 %2588  ;;  %v991_v52 = vrot.slane %v11197_v22, %v13134_v5  ;;  %v13736_v58 = vsel %vm4771_vm10, %v13496_v32, 0 }
  0xa0   : > { %v2063_v54 = vor.u32 %v2061_v44, %v2060_v49  ;;  %v2065_v53 = vrot.slane %v2060_v49, 4  ;;  %v2744_v23 = vsel %vm13699_vm14, %v2593_v13, %v2743_v3  ;;  %2739 = vst.msk [vmem:[#allocation2 + $0x1c] sm:$0xf] %vm2724_vm8, %v2589_v42  ;;  %v2874_v29 = vld [vmem:[#allocation2 + $0x14] sm:$0x1]  ;;  %v13744_v24 = vrot.slane %v817_v61, %v13134_v5 }
  0xa1   : > { %v2843_v7 = vld [vmem:[#allocation2 + $0xc] sm:$0xf]  ;;  %v1812_v6 = vrot.slane %v1804_v28, %v13361_v40  ;;  %v1819_v35 = vrot.slane %v1805_v47, %v13361_v40  ;;  %2745 = vst [vmem:[#allocation2 + $0x24] sm:$0xf] %v2744_v23  ;;  %v2936_v32 = vshll.u32 %v2874_v29, 16  ;;  %v13747_v62 = vrot.slane %v11198_v39, %v13134_v5 }
  0xa2   : > { %v2917_v55 = vshrl.u32 %v2843_v7, 16  ;;  %v2920_v26 = vshll.u32 %v2843_v7, 16  ;;  %v2064_v56 = vsel %vm13161_vm6, %v2056_v45, %v2063_v54  ;;  %v2211_v1 = vsel %vm13470_vm11, %v2065_v53, %v2210_v34  ;;  %v2591_v41 = vpop.permute.xlu1 %2590  ;;  %v2757_v34 = vld [vmem:[#allocation2 + $0x3c] sm:$0xf] }
  0xa3   : > { %v1820_v60 = vcombine.low %v1812_v6, %v1819_v35  ;;  %v2218_v11 = vsel %vm13470_vm11, %v2065_v53, %v2217_v21  ;;  %v2595_v0 = vpop.permute.xlu0 %2594  ;;  %2209 = vst.msk [vmem:[#allocation2 + $0x58] sm:$0xf] %vm2159_vm9, %v2064_v56  ;;  %2216 = vst.msk [vmem:[#allocation2 + $0x64] sm:$0xf] %vm2159_vm9, %v2064_v56  ;;  %v13758_v36 = vrot.slane %v819_v18, %v13134_v5  ;;  %v2938_v30 = vrot.slane %v2936_v32, 5 }
  0xa4   : > { %v2844_v15 = vld [vmem:[#allocation2 + $0x10] sm:$0xf]  ;;  %v2919_v14 = vrot.slane %v2917_v55, 4  ;;  %v2922_v33 = vrot.slane %v2920_v26, 5  ;;  %2212 = vst [vmem:[#allocation2 + $0x5c] sm:$0x1] %v2211_v1  ;;  %v1353_v10 = vpack.i.b16 %v991_v52, %v991_v52  ;;  %v2741_v43 = vsel %vm13693_vm13, %v2591_v41, %v2740_v48 }
  0xa5   : > { %2219 = vst [vmem:[#allocation2 + $0x68] sm:$0x1] %v2218_v11  ;;  %2746 = vst.msk [vmem:[#allocation2 + $0x28] sm:$0xf] %vm2724_vm8, %v2595_v0  ;;  %v2926_v8 = vshll.u32 %v2844_v15, 16  ;;  %v2930_v59 = vshrl.u32 %v2844_v15, 16  ;;  %v1827_v37 = vrot.slane %v1820_v60, %v13361_v40  ;;  %v1360_v22 = vpack.i.b16 %v13744_v24, %v13744_v24 }
  0xa6   : > { %v2845_v16 = vld [vmem:[#allocation2 + $0x18] sm:$0xf]  ;;  %2742 = vst [vmem:[#allocation2 + $0x20] sm:$0x1] %v2741_v43  ;;  %v2923_v20 = vor.u32 %v2922_v33, %v2919_v14  ;;  %v13765_v51 = vrot.slane %v1353_v10, %v13134_v5  ;;  %v2599_v3 = vpop.permute.xlu1 %2598  ;;  %vm3340_vm4 = vcmask 1042432  }
  0xa7   : > { %v2941_v44 = vshrl.u32 %v2845_v16, 16  ;;  %v2944_v31 = vshll.u32 %v2845_v16, 16  ;;  %v2928_v57 = vrot.slane %v2926_v8, 5  ;;  %v2932_v46 = vrot.slane %v2930_v59, 4  ;;  %v2597_v49 = vpop.permute.xlu0 %2596  ;;  %v2846_v39 = vld [vmem:[#allocation2 + $0x1c] sm:$0xf] }
  0xa8   : > { %v2924_v61 = vrot.slane %v2923_v20, 4  ;;  %v2067_v47 = vshrl.u32 %v1827_v37, 16  ;;  %v2751_v18 = vsel %vm13699_vm14, %v2599_v3, %v2750_v17  ;;  %v2748_v13 = vsel %vm13693_vm13, %v2597_v49, %v2747_v27  ;;  %v2847_v53 = vld [vmem:[#allocation2 + $0x24] sm:$0xf]  ;;  %v2754_v33 = vld [vmem:[#allocation2 + $0x38] sm:$0x1] }
  0xa9   : > { %v2943_v45 = vrot.slane %v2941_v44, 4  ;;  %v2946_v28 = vrot.slane %v2944_v31, 5  ;;  %v2933_v42 = vor.u32 %v2932_v46, %v2928_v57  ;;  %v2950_v54 = vshll.u32 %v2846_v39, 16  ;;  %2752 = vst [vmem:[#allocation2 + $0x30] sm:$0xf] %v2751_v18 }
  0xaa   : > { %2749 = vst [vmem:[#allocation2 + $0x2c] sm:$0x1] %v2748_v13  ;;  %v2929_v21 = vsel %vm13590_vm0, %v2924_v61, %v2928_v57  ;;  %v2954_v23 = vshrl.u32 %v2846_v39, 16  ;;  %v2965_v7 = vshrl.u32 %v2847_v53, 16  ;;  %v2968_v35 = vshll.u32 %v2847_v53, 16  ;;  %v2605_v48 = vpop.permute.xlu1 %2604 }
  0xab   : > { %v2947_v52 = vor.u32 %v2946_v28, %v2943_v45  ;;  %v2934_v29 = vrot.slane %v2933_v42, 4  ;;  %v2952_v6 = vrot.slane %v2950_v54, 5  ;;  %v13775_v24 = vrot.slane %v2067_v47, 7  ;;  %v2601_v55 = vpop.permute.xlu0 %2600  ;;  %v2220_v16 = vld [vmem:[#allocation2 + $0x6c] sm:$0xf] }
  0xac   : > { %v2956_v32 = vrot.slane %v2954_v23, 4  ;;  %v2848_v56 = vld [vmem:[#allocation2 + $0x28] sm:$0xf]  ;;  %v2967_v1 = vrot.slane %v2965_v7, 4  ;;  %v2070_v60 = vshll.u32 %v1827_v37, 16  ;;  %v2758_v11 = vsel %vm13699_vm14, %v2605_v48, %v2757_v34 }
  0xad   : > { %v2948_v26 = vrot.slane %v2947_v52, 4  ;;  %2753 = vst.msk [vmem:[#allocation2 + $0x34] sm:$0xf] %vm2724_vm8, %v2601_v55  ;;  %v2939_v41 = vsel %vm13590_vm0, %v2934_v29, %v2938_v30  ;;  %v2875_v0 = vld [vmem:[#allocation2 + $0x20] sm:$0x1]  ;;  %v2970_v15 = vrot.slane %v2968_v35, 5  ;;  %v13789_v3 = vrot.slane %v1360_v22, %v13134_v5 }
  0xae   : > { %v2974_v14 = vshll.u32 %v2848_v56, 16  ;;  %2759 = vst [vmem:[#allocation2 + $0x3c] sm:$0xf] %v2758_v11  ;;  %v11260_v10 = vcombine.low %v2929_v21, %v2939_v41  ;;  %v2957_v8 = vor.u32 %v2956_v32, %v2952_v6  ;;  %v2960_v59 = vshll.u32 %v2875_v0, 16  ;;  %v2603_v31 = vpop.permute.xlu1 %2602  ;;  %v2764_v37 = vld [vmem:[#allocation2 + $0x48] sm:$0xf] }
  0xaf   : > { %v2953_v43 = vsel %vm13590_vm0, %v2948_v26, %v2952_v6  ;;  %v2971_v17 = vor.u32 %v2970_v15, %v2967_v1  ;;  %v2978_v20 = vshrl.u32 %v2848_v56, 16  ;;  %v13785_v44 = vor.u32 %v2070_v60, %v13775_v24  ;;  %v2607_v30 = vpop.permute.xlu0 %2606  ;;  %v2761_v22 = vld [vmem:[#allocation2 + $0x44] sm:$0x1]  ;;  %v2771_v60 = vld [vmem:[#allocation2 + $0x54] sm:$0xf] }
  0xb0   : > { %v2976_v27 = vrot.slane %v2974_v14, 5  ;;  %12140 = vmatmul.mubr.msk.bf16.vlgmr.msra.gmra.mrb[0].mxu0 %vm4722_vm15, %v11260_v10  ;;  %v2958_v57 = vrot.slane %v2957_v8, 4  ;;  %v2962_v46 = vrot.slane %v2960_v59, 5  ;;  %v1367_v49 = vpack.i.b16 %v13747_v62, %v13747_v62  ;;  %2760 = vst.msk [vmem:[#allocation2 + $0x40] sm:$0xf] %vm2724_vm8, %v2607_v30 }
  0xb1   : > { %v2755_v61 = vsel %vm13693_vm13, %v2603_v31, %v2754_v33  ;;  %v2876_v39 = vld [vmem:[#allocation2 + $0x2c] sm:$0x1]  ;;  %v2972_v45 = vrot.slane %v2971_v17, 4  ;;  %v2980_v28 = vrot.slane %v2978_v20, 4  ;;  %v2849_v47 = vld [vmem:[#allocation2 + $0x30] sm:$0xf]  ;;  %v2221_v18 = vsel %vm13482_vm12, %v13785_v44, %v2220_v16  ;;  %12172 = vmatpush3.bf16.msra.mxu0 %v13736_v58 }
  0xb2   : > { %2756 = vst [vmem:[#allocation2 + $0x38] sm:$0x1] %v2755_v61  ;;  %v2963_v62 = vsel %vm13590_vm0, %v2958_v57, %v2962_v46  ;;  %v2984_v13 = vshll.u32 %v2876_v39, 16  ;;  %v2989_v42 = vshrl.u32 %v2849_v47, 16  ;;  %v2992_v54 = vshll.u32 %v2849_v47, 16  ;;  %v2611_v23 = vpop.permute.xlu1 %2610 }
  0xb3   : > { %2222 = vst [vmem:[#allocation2 + $0x6c] sm:$0xf] %v2221_v18  ;;  %v11261_v53 = vcombine.low %v2953_v43, %v2963_v62  ;;  %v2977_v34 = vsel %vm13590_vm0, %v2972_v45, %v2976_v27  ;;  %v2981_v21 = vor.u32 %v2980_v28, %v2976_v27  ;;  %v1372_v52 = vrot.slane %v1367_v49, %v13134_v5  ;;  %v2609_v7 = vpop.permute.xlu0 %2608  ;;  %v313_v28 = vld [vmem:[#allocation2 + $0x78] sm:$0x1]  ;;  %v14517_v12 = vld [vmem:[#allocation2 + $0x10] sm:$0xf] }
  0xb4   : > { %v2986_v29 = vrot.slane %v2984_v13, 5  ;;  %v2850_v58 = vld [vmem:[#allocation2 + $0x34] sm:$0xf]  ;;  %v2991_v6 = vrot.slane %v2989_v42, 4  ;;  %v2994_v35 = vrot.slane %v2992_v54, 5  ;;  %v1374_v48 = vpack.i.b16 %v13758_v36, %v13758_v36 }
  0xb5   : > { %v2765_v55 = vsel %vm13699_vm14, %v2611_v23, %v2764_v37  ;;  %v2762_v26 = vsel %vm13693_vm13, %v2609_v7, %v2761_v22  ;;  %12143 = vmatprep.mubr.msk.bf16.mxu0 %vm4722_vm15, %v11261_v53  ;;  %v2982_v32 = vrot.slane %v2981_v21, 4  ;;  %v2998_v56 = vshll.u32 %v2850_v58, 16  ;;  %v2851_v1 = vld [vmem:[#allocation2 + $0x3c] sm:$0xf]  ;;  %v366_v13 = vld [vmem:[#allocation2 + $0x74] sm:$0x1] }
  0xb6   : > { %2766 = vst [vmem:[#allocation2 + $0x48] sm:$0xf] %v2765_v55  ;;  %2763 = vst [vmem:[#allocation2 + $0x44] sm:$0x1] %v2762_v26  ;;  %v2995_v11 = vor.u32 %v2994_v35, %v2991_v6  ;;  %v3002_v41 = vshrl.u32 %v2850_v58, 16  ;;  %v3013_v0 = vshrl.u32 %v2851_v1, 16  ;;  %v1379_v33 = vrot.slane %v1374_v48, %v13134_v5  ;;  %v2617_v43 = vpop.permute.xlu1 %2616 }
  0xb7   : > { %v3016_v15 = vshll.u32 %v2851_v1, 16  ;;  %v2987_v36 = vsel %vm13590_vm0, %v2982_v32, %v2986_v29  ;;  %v3000_v14 = vrot.slane %v2998_v56, 5  ;;  %v1828_v10 = vcombine.low %v13765_v51, %v1372_v52  ;;  %v2613_v8 = vpop.permute.xlu0 %2612  ;;  %v2852_v27 = vld [vmem:[#allocation2 + $0x40] sm:$0xf]  ;;  %v2768_v51 = vld [vmem:[#allocation2 + $0x50] sm:$0x1] }
  0xb8   : > { %v11262_v59 = vcombine.low %v2977_v34, %v2987_v36  ;;  %v2996_v16 = vrot.slane %v2995_v11, 4  ;;  %v3004_v17 = vrot.slane %v3002_v41, 4  ;;  %v3015_v20 = vrot.slane %v3013_v0, 4  ;;  %2767 = vst.msk [vmem:[#allocation2 + $0x4c] sm:$0xf] %vm2724_vm8, %v2613_v8 }
  0xb9   : > { %v2772_v31 = vsel %vm13699_vm14, %v2617_v43, %v2771_v60  ;;  %v2877_v30 = vld [vmem:[#allocation2 + $0x38] sm:$0x1]  ;;  %v3018_v37 = vrot.slane %v3016_v15, 5  ;;  %v3022_v57 = vshll.u32 %v2852_v27, 16  ;;  %v1829_v46 = vcombine.low %v13789_v3, %v1379_v33  ;;  %v316_v42 = vld [vmem:[#allocation2 + $0x84] sm:$0x1] }
  0xba   : > { %2773 = vst [vmem:[#allocation2 + $0x54] sm:$0xf] %v2772_v31  ;;  %12144 = vmatmul.mubr.msk.bf16.gmra.mrb[4].mxu0 %vm4722_vm15, %v11262_v59  ;;  %v3001_v49 = vsel %vm13590_vm0, %v2996_v16, %v3000_v14  ;;  %v3005_v61 = vor.u32 %v3004_v17, %v3000_v14  ;;  %v3008_v39 = vshll.u32 %v2877_v30, 16  ;;  %v3026_v45 = vshrl.u32 %v2852_v27, 16  ;;  %v2615_v3 = vpop.permute.xlu1 %2614  ;;  %v2778_v53 = vld [vmem:[#allocation2 + $0x60] sm:$0xf] }
  0xbb   : > { %v3019_v47 = vor.u32 %v3018_v37, %v3015_v20  ;;  %v3024_v18 = vrot.slane %v3022_v57, 5  ;;  %v1836_v22 = vrot.slane %v1828_v10, %v13361_v40  ;;  %v1843_v62 = vrot.slane %v1829_v46, %v13361_v40  ;;  %v2619_v54 = vpop.permute.xlu0 %2618  ;;  %v2775_v55 = vld [vmem:[#allocation2 + $0x5c] sm:$0x1]  ;;  %v5212_v60 = vld [vmem:[%s17698_s2 + $0x8] sm:$0xf] }
  0xbc   : > { %v3006_v34 = vrot.slane %v3005_v61, 4  ;;  %v3010_v21 = vrot.slane %v3008_v39, 5  ;;  %v3028_v52 = vrot.slane %v3026_v45, 4  ;;  %v2073_v23 = vrot.slane %v13775_v24, 4  ;;  %2774 = vst.msk [vmem:[#allocation2 + $0x58] sm:$0xf] %vm2724_vm8, %v2619_v54  ;;  %12701 = vmatprep.subr.msk.bf16.mxu0 %vm4771_vm10, %v5212_v60 }
  0xbd   : > { %v2769_v7 = vsel %vm13693_vm13, %v2615_v3, %v2768_v51  ;;  %v2878_v29 = vld [vmem:[#allocation2 + $0x44] sm:$0x1]  ;;  %v3020_v58 = vrot.slane %v3019_v47, 4  ;;  %v1844_v6 = vcombine.low %v1836_v22, %v1843_v62  ;;  %v314_v35 = vsel %vm13339_vm7, 0, %v313_v28  ;;  %v2853_v48 = vld [vmem:[#allocation2 + $0x48] sm:$0xf] }
  0xbe   : > { %2770 = vst [vmem:[#allocation2 + $0x50] sm:$0x1] %v2769_v7  ;;  %v3011_v26 = vsel %vm13590_vm0, %v3006_v34, %v3010_v21  ;;  %v3029_v32 = vor.u32 %v3028_v52, %v3024_v18  ;;  %v3032_v56 = vshll.u32 %v2878_v29, 16  ;;  %315 = vst [vmem:[#allocation2 + $0x78] sm:$0x1] %v314_v35  ;;  %v367_v1 = vsel %vm13119_vm2, 0, %v366_v13  ;;  %v2623_v14 = vpop.permute.xlu1 %2622 }
  0xbf   : > { %v11263_v11 = vcombine.low %v3001_v49, %v3011_v26  ;;  %v3025_v41 = vsel %vm13590_vm0, %v3020_v58, %v3024_v18  ;;  %v1851_v0 = vrot.slane %v1844_v6, %v13361_v40  ;;  %368 = vst [vmem:[#allocation2 + $0x74] sm:$0x1] %v367_v1  ;;  %v3037_v15 = vshrl.u32 %v2853_v48, 16  ;;  %v2621_v33 = vpop.permute.xlu0 %2620  ;;  %v2854_v8 = vld [vmem:[#allocation2 + $0x4c] sm:$0xf] }
  0xc0   : > { %v11176_v36 = vld.sshfl [vmem:[%s13304_s18 + $0x14] sm:$0x33 pattern:$0x75316420]  ;;  %v3030_v10 = vrot.slane %v3029_v32, 4  ;;  %v3034_v43 = vrot.slane %v3032_v56, 5  ;;  %v2779_v17 = vsel %vm13699_vm14, %v2623_v14, %v2778_v53  ;;  %v2776_v27 = vsel %vm13693_vm13, %v2621_v33, %v2775_v55 }
  0xc1   : > { %v3040_v59 = vshll.u32 %v2853_v48, 16  ;;  %v317_v16 = vsel %vm13339_vm7, 0, %v316_v42  ;;  %12147 = vmatprep.mubr.msk.bf16.mxu0 %vm4722_vm15, %v11263_v11  ;;  %v2075_v20 = vshrl.u32 %v1851_v0, 16  ;;  %v2078_v31 = vshll.u32 %v1851_v0, 16  ;;  %v13850_v30 = vld [vmem:[#allocation2 + $0x54] sm:$0xf] }
  0xc2   : > { %318 = vst [vmem:[#allocation2 + $0x84] sm:$0x1] %v317_v16  ;;  %2780 = vst [vmem:[#allocation2 + $0x60] sm:$0xf] %v2779_v17  ;;  %v2785_v37 = vld [vmem:[#allocation2 + $0x6c] sm:$0xf]  ;;  %v3035_v57 = vsel %vm13590_vm0, %v3030_v10, %v3034_v43  ;;  %v651_v28 = vcombine.high %v11176_v36, %v11176_v36  ;;  %v2629_v47 = vpop.permute.xlu1 %2628  ;;  %v13857_v13 = vrot.slane %v11176_v36, %v13355_v25 }
  0xc3   : > { %2777 = vst [vmem:[#allocation2 + $0x5c] sm:$0x1] %v2776_v27  ;;  %v3039_v46 = vrot.slane %v3037_v15, 4  ;;  %v3042_v51 = vrot.slane %v3040_v59, 5  ;;  %v3046_v49 = vshll.u32 %v2854_v8, 16  ;;  %v11264_v61 = vcombine.low %v3025_v41, %v3035_v57  ;;  %v2625_v18 = vpop.permute.xlu0 %2624 }
  0xc4   : > { %v13854_v39 = vrot.slane %v2075_v20, 7  ;;  %v3050_v45 = vshrl.u32 %v2854_v8, 16  ;;  %v3061_v42 = vshrl.u32 %v13850_v30, 16  ;;  %v2786_v3 = vsel %vm13699_vm14, %v2629_v47, %v2785_v37  ;;  %2781 = vst.msk [vmem:[#allocation2 + $0x64] sm:$0xf] %vm2724_vm8, %v2625_v18 }
  0xc5   : > { %v3043_v22 = vor.u32 %v3042_v51, %v3039_v46  ;;  %v3048_v62 = vrot.slane %v3046_v49, 5  ;;  %12148 = vmatmul.mubr.msk.bf16.gmra.mrb[8].mxu0 %vm4722_vm15, %v11264_v61  ;;  %v2227_v34 = vld [vmem:[#allocation2 + $0x78] sm:$0xf]  ;;  %v2879_v21 = vld [vmem:[#allocation2 + $0x50] sm:$0x1]  ;;  %v13870_v48 = vrot.slane %v651_v28, %v13355_v25  ;;  %v11199_v11 = vpack.i.b16 %v13857_v13, %v13857_v13 }
  0xc6   : > { %v2080_v54 = vor.u32 %v2078_v31, %v13854_v39  ;;  %v2082_v53 = vrot.slane %v13854_v39, 4  ;;  %v3052_v52 = vrot.slane %v3050_v45, 4  ;;  %2787 = vst [vmem:[#allocation2 + $0x6c] sm:$0xf] %v2786_v3  ;;  %v2782_v7 = vld [vmem:[#allocation2 + $0x68] sm:$0x1]  ;;  %v2228_v29 = vsel %vm13482_vm12, %v13785_v44, %v2227_v34  ;;  %v2627_v56 = vpop.permute.xlu1 %2626 }
  0xc7   : > { %v2224_v58 = vld [vmem:[#allocation2 + $0x74] sm:$0x1]  ;;  %v3044_v6 = vrot.slane %v3043_v22, 4  ;;  %v3056_v35 = vshll.u32 %v2879_v21, 16  ;;  %2229 = vst [vmem:[#allocation2 + $0x78] sm:$0xf] %v2228_v29  ;;  %v757_v44 = vunpack.i.h.s16 %v13857_v13  ;;  %v2631_v1 = vpop.permute.xlu0 %2630  ;;  %v759_v60 = vunpack.i.h.s16 %v13870_v48 }
  0xc8   : > { %v2081_v55 = vsel %vm13161_vm6, %v2073_v23, %v2080_v54  ;;  %v2225_v26 = vsel %vm13470_vm11, %v2082_v53, %v2224_v58  ;;  %v3053_v32 = vor.u32 %v3052_v52, %v3048_v62  ;;  %v2856_v41 = vld [vmem:[#allocation2 + $0x58] sm:$0xf]  ;;  %v2783_v0 = vsel %vm13693_vm13, %v2627_v56, %v2782_v7  ;;  %v369_v3 = vld [vmem:[#allocation2 + $0x80] sm:$0x1]  ;;  %v319_v29 = vld [vmem:[#allocation2 + $0x90] sm:$0x1] }
  0xc9   : > { %2223 = vst.msk [vmem:[#allocation2 + $0x70] sm:$0xf] %vm2159_vm9, %v2081_v55  ;;  %2230 = vst.msk [vmem:[#allocation2 + $0x7c] sm:$0xf] %vm2159_vm9, %v2081_v55  ;;  %v3049_v24 = vsel %vm13590_vm0, %v3044_v6, %v3048_v62  ;;  %v3058_v23 = vrot.slane %v3056_v35, 5  ;;  %v821_v36 = vpack.i.b16 %v757_v44, %v757_v44  ;;  %v11200_v14 = vpack.i.b16 %v13870_v48, %v13870_v48 }
  0xca   : > { %2226 = vst [vmem:[#allocation2 + $0x74] sm:$0x1] %v2225_v26  ;;  %2788 = vst.msk [vmem:[#allocation2 + $0x70] sm:$0xf] %vm2724_vm8, %v2631_v1  ;;  %v3054_v15 = vrot.slane %v3053_v32, 4  ;;  %v823_v33 = vpack.i.b16 %v759_v60, %v759_v60  ;;  %v1007_v10 = vrot.slane %v11199_v11, %v13134_v5  ;;  %v3063_v43 = vrot.slane %v3061_v42, 4  ;;  %v2635_v31 = vpop.permute.xlu1 %2634 }
  0xcb   : > { %2784 = vst [vmem:[#allocation2 + $0x68] sm:$0x1] %v2783_v0  ;;  %v3064_v8 = vshll.u32 %v13850_v30, 16  ;;  %v1011_v16 = vrot.slane %v821_v36, %v13134_v5  ;;  %v1015_v17 = vrot.slane %v11200_v14, %v13134_v5  ;;  %v2880_v27 = vld [vmem:[#allocation2 + $0x5c] sm:$0x1]  ;;  %v3070_v20 = vshll.u32 %v2856_v41, 16  ;;  %v2633_v37 = vpop.permute.xlu0 %2632 }
  0xcc   : > { %v3059_v59 = vsel %vm13590_vm0, %v3054_v15, %v3058_v23  ;;  %v1019_v46 = vrot.slane %v823_v33, %v13134_v5  ;;  %v1381_v51 = vpack.i.b16 %v1007_v10, %v1007_v10  ;;  %v3074_v30 = vshrl.u32 %v2856_v41, 16  ;;  %v2857_v0 = vld [vmem:[#allocation2 + $0x60] sm:$0xf] }
  0xcd   : > { %v11265_v57 = vcombine.low %v3049_v24, %v3059_v59  ;;  %v3066_v49 = vrot.slane %v3064_v8, 5  ;;  %v1388_v61 = vpack.i.b16 %v1011_v16, %v1011_v16  ;;  %v1395_v45 = vpack.i.b16 %v1015_v17, %v1015_v17  ;;  %v372_v24 = vld [vmem:[#allocation2 + $0x8c] sm:$0x1]  ;;  %v2858_v17 = vld [vmem:[#allocation2 + $0x64] sm:$0xf] }
  0xce   : > { %v3072_v28 = vrot.slane %v3070_v20, 5  ;;  %v2792_v47 = vld [vmem:[#allocation2 + $0x78] sm:$0xf]  ;;  %v1386_v18 = vrot.slane %v1381_v51, %v13134_v5  ;;  %v1402_v22 = vpack.i.b16 %v1019_v46, %v1019_v46  ;;  %v3080_v42 = vshll.u32 %v2880_v27, 16 }
  0xcf   : > { %12151 = vmatprep.mubr.msk.bf16.mxu0 %vm4722_vm15, %v11265_v57  ;;  %v3067_v62 = vor.u32 %v3066_v49, %v3063_v43  ;;  %v2793_v54 = vsel %vm13699_vm14, %v2635_v31, %v2792_v47  ;;  %v1393_v21 = vrot.slane %v1388_v61, %v13134_v5  ;;  %v1400_v52 = vrot.slane %v1395_v45, %v13134_v5  ;;  %v2637_v35 = vpop.permute.xlu0 %2636 }
  0xd0   : > { %v3076_v7 = vrot.slane %v3074_v30, 4  ;;  %2794 = vst [vmem:[#allocation2 + $0x78] sm:$0xf] %v2793_v54  ;;  %v1407_v6 = vrot.slane %v1402_v22, %v13134_v5  ;;  %v3082_v26 = vrot.slane %v3080_v42, 5  ;;  %2795 = vst.msk [vmem:[#allocation2 + $0x7c] sm:$0xf] %vm2724_vm8, %v2637_v35  ;;  %v666_v1 = vcombine.high %v13857_v13, %v13857_v13 }
  0xd1   : > { %v2789_v34 = vld [vmem:[#allocation2 + $0x74] sm:$0x1]  ;;  %v3068_v55 = vrot.slane %v3067_v62, 4  ;;  %v1852_v32 = vcombine.low %v1386_v18, %v1400_v52  ;;  %v370_v56 = vsel %vm13119_vm2, 0, %v369_v3  ;;  %v667_v11 = vcombine.high %v13870_v48, %v13870_v48 }
  0xd2   : > { %v2790_v58 = vsel %vm13693_vm13, %v2633_v37, %v2789_v34  ;;  %v3077_v44 = vor.u32 %v3076_v7, %v3072_v28  ;;  %v1853_v23 = vcombine.low %v1393_v21, %v1407_v6  ;;  %371 = vst [vmem:[#allocation2 + $0x80] sm:$0x1] %v370_v56  ;;  %v320_v41 = vsel %vm13339_vm7, 0, %v319_v29  ;;  %v2881_v3 = vld [vmem:[#allocation2 + $0x68] sm:$0x1]  ;;  %v13934_v21 = vpop.permute.xlu1 %2640 }
  0xd3   : > { %2791 = vst [vmem:[#allocation2 + $0x74] sm:$0x1] %v2790_v58  ;;  %v3073_v60 = vsel %vm13590_vm0, %v3068_v55, %v3072_v28  ;;  %v1860_v15 = vrot.slane %v1852_v32, %v13361_v40  ;;  %v761_v14 = vunpack.i.h.s16 %v666_v1  ;;  %v11201_v33 = vpack.i.b16 %v666_v1, %v666_v1  ;;  %321 = vst [vmem:[#allocation2 + $0x90] sm:$0x1] %v320_v41  ;;  %v322_v6 = vld [vmem:[#allocation2 + $0x9c] sm:$0x1] }
  0xd4   : > { %v3078_v36 = vrot.slane %v3077_v44, 4  ;;  %v1867_v13 = vrot.slane %v1853_v23, %v13361_v40  ;;  %v763_v10 = vunpack.i.h.s16 %v667_v11  ;;  %v11202_v43 = vpack.i.b16 %v667_v11, %v667_v11  ;;  %v11177_v18 = vld.sshfl [vmem:[%s13304_s18 + $0x18] sm:$0x33 pattern:$0x75316420] }
  0xd5   : > { %v373_v8 = vsel %vm13119_vm2, 0, %v372_v24  ;;  %v825_v59 = vpack.i.b16 %v761_v14, %v761_v14  ;;  %v1023_v16 = vrot.slane %v11201_v33, %v13134_v5  ;;  %v3085_v27 = vshrl.u32 %v2857_v0, 16  ;;  %v2234_v23 = vld [vmem:[#allocation2 + $0x84] sm:$0xf]  ;;  %v13950_v33 = vld [vmem:[#allocation2 + $0x6c] sm:$0xf] }
  0xd6   : > { %v3083_v48 = vsel %vm13590_vm0, %v3078_v36, %v3082_v26  ;;  %374 = vst [vmem:[#allocation2 + $0x8c] sm:$0x1] %v373_v8  ;;  %v1868_v20 = vcombine.low %v1860_v15, %v1867_v13  ;;  %v827_v37 = vpack.i.b16 %v763_v10, %v763_v10  ;;  %v1031_v57 = vrot.slane %v11202_v43, %v13134_v5 }
  0xd7   : > { %v11266_v31 = vcombine.low %v3073_v60, %v3083_v48  ;;  %v1027_v46 = vrot.slane %v825_v59, %v13134_v5  ;;  %v1409_v51 = vpack.i.b16 %v1023_v16, %v1023_v16  ;;  %v3087_v49 = vrot.slane %v3085_v27, 4  ;;  %v2639_v59 = vpop.permute.xlu1 %2638  ;;  %v13959_v16 = vpop.permute.xlu0 %2642 }
  0xd8   : > { %v3088_v61 = vshll.u32 %v2857_v0, 16  ;;  %v1875_v45 = vrot.slane %v1868_v20, %v13361_v40  ;;  %v1035_v28 = vrot.slane %v827_v37, %v13134_v5  ;;  %v1423_v30 = vpack.i.b16 %v1031_v57, %v1031_v57 }
  0xd9   : > { %12152 = vmatmul.mubr.msk.bf16.gmra.mrb[12].mxu0 %vm4722_vm15, %v11266_v31  ;;  %v3094_v47 = vshll.u32 %v2858_v17, 16  ;;  %v2231_v22 = vld [vmem:[#allocation2 + $0x80] sm:$0x1]  ;;  %v1414_v62 = vrot.slane %v1409_v51, %v13134_v5  ;;  %v1416_v42 = vpack.i.b16 %v1027_v46, %v1027_v46  ;;  %v3098_v34 = vshrl.u32 %v2858_v17, 16 }
  0xda   : > { %v3090_v54 = vrot.slane %v3088_v61, 5  ;;  %v2084_v52 = vshrl.u32 %v1875_v45, 16  ;;  %v2087_v7 = vshll.u32 %v1875_v45, 16  ;;  %v2232_v29 = vsel %vm13470_vm11, %v2082_v53, %v2231_v22  ;;  %v2241_v60 = vld [vmem:[#allocation2 + $0x90] sm:$0xf] }
  0xdb   : > { %v1428_v58 = vrot.slane %v1423_v30, %v13134_v5  ;;  %2233 = vst [vmem:[#allocation2 + $0x80] sm:$0x1] %v2232_v29  ;;  %v1421_v35 = vrot.slane %v1416_v42, %v13134_v5  ;;  %v1430_v55 = vpack.i.b16 %v1035_v28, %v1035_v28  ;;  %v3096_v32 = vrot.slane %v3094_v47, 5  ;;  %v13976_v28 = vld [vmem:[#allocation2 + $0x70] sm:$0xf] }
  0xdc   : > { %v3091_v26 = vor.u32 %v3090_v54, %v3087_v49  ;;  %v13942_v44 = vrot.slane %v2084_v52, 7  ;;  %v3100_v1 = vrot.slane %v3098_v34, 4  ;;  %v3104_v24 = vshll.u32 %v2881_v3, 16 }
  0xdd   : > { %v1876_v56 = vcombine.low %v1414_v62, %v1428_v58  ;;  %v1435_v39 = vrot.slane %v1430_v55, %v13134_v5  ;;  %v323_v53 = vsel %vm13339_vm7, 0, %v322_v6  ;;  %v675_v41 = vcombine.high %v11177_v18, %v11177_v18  ;;  %v2647_v6 = vpop.permute.xlu1 %2646 }
  0xde   : > { %v3092_v11 = vrot.slane %v3091_v26, 4  ;;  %v2089_v0 = vor.u32 %v2087_v7, %v13942_v44  ;;  %v2090_v36 = vrot.slane %v13942_v44, 4  ;;  %v3101_v14 = vor.u32 %v3100_v1, %v3096_v32  ;;  %324 = vst [vmem:[#allocation2 + $0x9c] sm:$0x1] %v323_v53 }
  0xdf   : > { %v1884_v15 = vrot.slane %v1876_v56, %v13361_v40  ;;  %v1877_v13 = vcombine.low %v1421_v35, %v1435_v39  ;;  %v3106_v43 = vrot.slane %v3104_v24, 5  ;;  %v13955_v8 = vrot.slane %v11177_v18, %v13355_v25  ;;  %v13987_v35 = vpop.permute.xlu0 %2644  ;;  %v2882_v39 = vld [vmem:[#allocation2 + $0x74] sm:$0x1] }
  0xe0   : > { %v3097_v10 = vsel %vm13590_vm0, %v3092_v11, %v3096_v32  ;;  %v2235_v48 = vsel %vm13482_vm12, %v2089_v0, %v2234_v23  ;;  %v2242_v17 = vsel %vm13482_vm12, %v2089_v0, %v2241_v60  ;;  %v3102_v27 = vrot.slane %v3101_v14, 4  ;;  %v375_v11 = vld [vmem:[#allocation2 + $0x98] sm:$0x1] }
  0xe1   : > { %v13964_v20 = vrot.slane %v675_v41, %v13355_v25  ;;  %2236 = vst [vmem:[#allocation2 + $0x84] sm:$0xf] %v2235_v48  ;;  %v1891_v31 = vrot.slane %v1877_v13, %v13361_v40  ;;  %2243 = vst [vmem:[#allocation2 + $0x90] sm:$0xf] %v2242_v17  ;;  %v765_v37 = vunpack.i.h.s16 %v13955_v8  ;;  %v11203_v57 = vpack.i.b16 %v13955_v8, %v13955_v8  ;;  %v2238_v17 = vld [vmem:[#allocation2 + $0x8c] sm:$0x1] }
  0xe2   : > { %v3109_v46 = vshrl.u32 %v13950_v33, 16  ;;  %v2796_v51 = vld [vmem:[#allocation2 + $0x80] sm:$0x1]  ;;  %v3107_v49 = vsel %vm13590_vm0, %v3102_v27, %v3106_v43  ;;  %v3112_v30 = vshll.u32 %v13950_v33, 16  ;;  %v3118_v58 = vshll.u32 %v13976_v28, 16 }
  0xe3   : > { %v767_v61 = vunpack.i.h.s16 %v13964_v20  ;;  %v11204_v45 = vpack.i.b16 %v13964_v20, %v13964_v20  ;;  %v2797_v47 = vsel %vm13693_vm13, %v2639_v59, %v2796_v51  ;;  %v1892_v18 = vcombine.low %v1884_v15, %v1891_v31 }
  0xe4   : > { %v11267_v22 = vcombine.low %v3097_v10, %v3107_v49  ;;  %v829_v62 = vpack.i.b16 %v765_v37, %v765_v37  ;;  %2798 = vst [vmem:[#allocation2 + $0x80] sm:$0x1] %v2797_v47  ;;  %v1039_v3 = vrot.slane %v11203_v57, %v13134_v5  ;;  %v3111_v34 = vrot.slane %v3109_v46, 4  ;;  %v2649_v47 = vpop.permute.xlu0 %2648 }
  0xe5   : > { %v831_v42 = vpack.i.b16 %v767_v61, %v767_v61  ;;  %v1047_v54 = vrot.slane %v11204_v45, %v13134_v5  ;;  %v1899_v52 = vrot.slane %v1892_v18, %v13361_v40  ;;  %v3114_v29 = vrot.slane %v3112_v30, 5  ;;  %v325_v61 = vld [vmem:[#allocation2 + $0xa8] sm:$0x1] }
  0xe6   : > { %12155 = vmatprep.mubr.msk.bf16.mxu0 %vm4722_vm15, %v11267_v22  ;;  %v1043_v7 = vrot.slane %v829_v62, %v13134_v5  ;;  %v1437_v26 = vpack.i.b16 %v1039_v3, %v1039_v3  ;;  %v3122_v56 = vshrl.u32 %v13976_v28, 16  ;;  %v3120_v13 = vrot.slane %v3118_v58, 5  ;;  %v378_v62 = vld [vmem:[#allocation2 + $0xa4] sm:$0x1] }
  0xe7   : > { %v1051_v55 = vrot.slane %v831_v42, %v13134_v5  ;;  %v1451_v32 = vpack.i.b16 %v1047_v54, %v1047_v54  ;;  %v2092_v1 = vshrl.u32 %v1899_v52, 16  ;;  %v2095_v24 = vshll.u32 %v1899_v52, 16  ;;  %v14009_v42 = vld [vmem:[#allocation2 + $0x78] sm:$0xf] }
  0xe8   : > { %v1444_v23 = vpack.i.b16 %v1043_v7, %v1043_v7  ;;  %v3115_v60 = vor.u32 %v3114_v29, %v3111_v34  ;;  %v2799_v53 = vld [vmem:[#allocation2 + $0x84] sm:$0xf]  ;;  %v2806_v41 = vld [vmem:[#allocation2 + $0x90] sm:$0xf]  ;;  %v1442_v0 = vrot.slane %v1437_v26, %v13134_v5  ;;  %v3124_v57 = vrot.slane %v3122_v56, 4 }
  0xe9   : > { %v1456_v15 = vrot.slane %v1451_v32, %v13134_v5  ;;  %v1458_v14 = vpack.i.b16 %v1051_v55, %v1051_v55  ;;  %v2800_v10 = vsel %vm13699_vm14, %v13934_v21, %v2799_v53  ;;  %v13996_v43 = vrot.slane %v2092_v1, 7  ;;  %v14034_v1 = vld [vmem:[#allocation2 + $0x7c] sm:$0xf] }
  0xea   : > { %v2807_v48 = vsel %vm13699_vm14, %v2647_v6, %v2806_v41  ;;  %v1449_v59 = vrot.slane %v1444_v23, %v13134_v5  ;;  %2801 = vst [vmem:[#allocation2 + $0x84] sm:$0xf] %v2800_v10  ;;  %v3116_v37 = vrot.slane %v3115_v60, 4  ;;  %v3128_v21 = vshll.u32 %v2882_v39, 16 }
  0xeb   : > { %2808 = vst [vmem:[#allocation2 + $0x90] sm:$0xf] %v2807_v48  ;;  %v1463_v27 = vrot.slane %v1458_v14, %v13134_v5  ;;  %v1900_v31 = vcombine.low %v1442_v0, %v1456_v15  ;;  %v2097_v46 = vor.u32 %v2095_v24, %v13996_v43  ;;  %v2099_v51 = vrot.slane %v13996_v43, 4  ;;  %v14044_v43 = vpop.permute.xlu1 %2652 }
  0xec   : > { %v376_v49 = vsel %vm13119_vm2, 0, %v375_v11  ;;  %v3121_v18 = vsel %vm13590_vm0, %v3116_v37, %v3120_v13  ;;  %v3125_v22 = vor.u32 %v3124_v57, %v3120_v13  ;;  %v3130_v34 = vrot.slane %v3128_v21, 5  ;;  %v14050_v21 = vld [vmem:[#allocation2 + $0x80] sm:$0x1] }
  0xed   : > { %v1901_v45 = vcombine.low %v1449_v59, %v1463_v27  ;;  %v1908_v30 = vrot.slane %v1900_v31, %v13361_v40  ;;  %377 = vst [vmem:[#allocation2 + $0x98] sm:$0x1] %v376_v49  ;;  %v2098_v3 = vsel %vm13161_vm6, %v2090_v36, %v2097_v46  ;;  %v2239_v54 = vsel %vm13470_vm11, %v2099_v51, %v2238_v17 }
  0xee   : > { %v690_v52 = vcombine.high %v13955_v8, %v13955_v8  ;;  %2237 = vst.msk [vmem:[#allocation2 + $0x88] sm:$0xf] %vm2159_vm9, %v2098_v3  ;;  %2244 = vst.msk [vmem:[#allocation2 + $0x94] sm:$0xf] %vm2159_vm9, %v2098_v3  ;;  %v3126_v29 = vrot.slane %v3125_v22, 4  ;;  %v691_v44 = vcombine.high %v13964_v20, %v13964_v20  ;;  %v326_v36 = vsel %vm13339_vm7, 0, %v325_v61 }
  0xef   : > { %2240 = vst [vmem:[#allocation2 + $0x8c] sm:$0x1] %v2239_v54  ;;  %v1915_v7 = vrot.slane %v1901_v45, %v13361_v40  ;;  %2802 = vst.msk [vmem:[#allocation2 + $0x88] sm:$0xf] %vm2724_vm8, %v13959_v16  ;;  %v379_v6 = vsel %vm13119_vm2, 0, %v378_v62  ;;  %v3133_v55 = vshrl.u32 %v14009_v42, 16 }
  0xf0   : > { %2809 = vst.msk [vmem:[#allocation2 + $0x94] sm:$0xf] %vm2724_vm8, %v2649_v47  ;;  %v769_v8 = vunpack.i.h.s16 %v690_v52  ;;  %v11205_v58 = vpack.i.b16 %v690_v52, %v690_v52  ;;  %327 = vst [vmem:[#allocation2 + $0xa8] sm:$0x1] %v326_v36  ;;  %v3131_v20 = vsel %vm13590_vm0, %v3126_v29, %v3130_v34  ;;  %v771_v32 = vunpack.i.h.s16 %v691_v44  ;;  %v328_v47 = vld [vmem:[#allocation2 + $0xb4] sm:$0x1] }
  0xf1   : > { %v1916_v26 = vcombine.low %v1908_v30, %v1915_v7  ;;  %v11206_v56 = vpack.i.b16 %v691_v44, %v691_v44  ;;  %380 = vst [vmem:[#allocation2 + $0xa4] sm:$0x1] %v379_v6  ;;  %v11268_v16 = vcombine.low %v3121_v18, %v3131_v20  ;;  %v3135_v39 = vrot.slane %v3133_v55, 4  ;;  %v2248_v18 = vld [vmem:[#allocation2 + $0x9c] sm:$0xf]  ;;  %v2651_v20 = vpop.permute.xlu1 %2650 }
  0xf2   : > { %v833_v24 = vpack.i.b16 %v769_v8, %v769_v8  ;;  %v1055_v23 = vrot.slane %v11205_v58, %v13134_v5  ;;  %v835_v11 = vpack.i.b16 %v771_v32, %v771_v32  ;;  %v3136_v41 = vshll.u32 %v14009_v42, 16  ;;  %v11178_v44 = vld.sshfl [vmem:[%s13304_s18 + $0x1c] sm:$0x33 pattern:$0x75316420]  ;;  %s13024_s18 = smov 96  }
  0xf3   : > { %v1923_v60 = vrot.slane %v1916_v26, %v13361_v40  ;;  %v1063_v53 = vrot.slane %v11206_v56, %v13134_v5  ;;  %12156 = vmatmul.mubr.msk.bf16.gmra.mrb[16].mxu0 %vm4722_vm15, %v11268_v16  ;;  %v3142_v13 = vshll.u32 %v14034_v1, 16  ;;  %v3146_v10 = vshrl.u32 %v14034_v1, 16  ;;  %v14066_v55 = vld [vmem:[#allocation2 + $0x84] sm:$0xf] }
  0xf4   : > { %v2245_v0 = vld [vmem:[#allocation2 + $0x98] sm:$0x1]  ;;  %v1059_v15 = vrot.slane %v833_v24, %v13134_v5  ;;  %v1465_v14 = vpack.i.b16 %v1055_v23, %v1055_v23  ;;  %v1067_v27 = vrot.slane %v835_v11, %v13134_v5  ;;  %v3138_v49 = vrot.slane %v3136_v41, 5  ;;  %v14074_v23 = vpop.permute.xlu0 %2654 }
  0xf5   : > { %v2101_v48 = vshrl.u32 %v1923_v60, 16  ;;  %v2104_v59 = vshll.u32 %v1923_v60, 16  ;;  %v2246_v17 = vsel %vm13470_vm11, %v2099_v51, %v2245_v0  ;;  %v1479_v46 = vpack.i.b16 %v1063_v53, %v1063_v53 }
  0xf6   : > { %v2803_v31 = vld [vmem:[#allocation2 + $0x8c] sm:$0x1]  ;;  %2247 = vst [vmem:[#allocation2 + $0x98] sm:$0x1] %v2246_v17  ;;  %v1470_v37 = vrot.slane %v1465_v14, %v13134_v5  ;;  %v1472_v57 = vpack.i.b16 %v1059_v15, %v1059_v15  ;;  %v1486_v30 = vpack.i.b16 %v1067_v27, %v1067_v27  ;;  %v3144_v51 = vrot.slane %v3142_v13, 5 }
  0xf7   : > { %v2804_v61 = vsel %vm13693_vm13, %v13987_v35, %v2803_v31  ;;  %v14055_v45 = vrot.slane %v2101_v48, 7  ;;  %v1484_v62 = vrot.slane %v1479_v46, %v13134_v5  ;;  %v2255_v3 = vld [vmem:[#allocation2 + $0xa8] sm:$0xf]  ;;  %v3139_v54 = vor.u32 %v3138_v49, %v3135_v39 }
  0xf8   : > { %2805 = vst [vmem:[#allocation2 + $0x8c] sm:$0x1] %v2804_v61  ;;  %v1477_v22 = vrot.slane %v1472_v57, %v13134_v5  ;;  %v3148_v34 = vrot.slane %v3146_v10, 4  ;;  %v1491_v7 = vrot.slane %v1486_v30, %v13134_v5  ;;  %v3152_v29 = vshll.u32 %v14050_v21, 16  ;;  %v14072_v24 = vld [vmem:[#allocation2 + $0x88] sm:$0xf] }
  0xf9   : > { %v2106_v52 = vor.u32 %v2104_v59, %v14055_v45  ;;  %v2107_v35 = vrot.slane %v14055_v45, 4  ;;  %v1924_v36 = vcombine.low %v1470_v37, %v1484_v62  ;;  %v3140_v8 = vrot.slane %v3139_v54, 4  ;;  %v14104_v62 = vpop.permute.xlu0 %2656 }
  0xfa   : > { %v3149_v58 = vor.u32 %v3148_v34, %v3144_v51  ;;  %v329_v6 = vsel %vm13339_vm7, 0, %v328_v47  ;;  %v1925_v32 = vcombine.low %v1477_v22, %v1491_v7  ;;  %v3154_v16 = vrot.slane %v3152_v29, 5 }
  0xfb   : > { %v2249_v26 = vsel %vm13482_vm12, %v2106_v52, %v2248_v18  ;;  %v2256_v56 = vsel %vm13482_vm12, %v2106_v52, %v2255_v3  ;;  %330 = vst [vmem:[#allocation2 + $0xb4] sm:$0x1] %v329_v6  ;;  %v1932_v39 = vrot.slane %v1924_v36, %v13361_v40  ;;  %v3145_v60 = vsel %vm13590_vm0, %v3140_v8, %v3144_v51  ;;  %v2659_v51 = vpop.permute.xlu1 %2658 }
  0xfc   : > { %2250 = vst [vmem:[#allocation2 + $0x9c] sm:$0xf] %v2249_v26  ;;  %2257 = vst [vmem:[#allocation2 + $0xa8] sm:$0xf] %v2256_v56  ;;  %v3150_v11 = vrot.slane %v3149_v58, 4  ;;  %v699_v53 = vcombine.high %v11178_v44, %v11178_v44  ;;  %v1939_v0 = vrot.slane %v1925_v32, %v13361_v40  ;;  %v14081_v15 = vrot.slane %v11178_v44, %v13355_v25 }
  0xfd   : > { %v2810_v41 = vld [vmem:[#allocation2 + $0x98] sm:$0x1]  ;;  %v3157_v14 = vshrl.u32 %v14066_v55, 16  ;;  %v3160_v13 = vshll.u32 %v14066_v55, 16  ;;  %v3166_v17 = vshll.u32 %v14072_v24, 16  ;;  %v3170_v7 = vshrl.u32 %v14072_v24, 16 }
  0xfe   : > { %v2811_v10 = vsel %vm13693_vm13, %v2651_v20, %v2810_v41  ;;  %v3155_v48 = vsel %vm13590_vm0, %v3150_v11, %v3154_v16  ;;  %v14090_v59 = vrot.slane %v699_v53, %v13355_v25  ;;  %v1940_v27 = vcombine.low %v1932_v39, %v1939_v0  ;;  %v2252_v53 = vld [vmem:[#allocation2 + $0xa4] sm:$0x1] }
  0xff   : > { %2812 = vst [vmem:[#allocation2 + $0x98] sm:$0x1] %v2811_v10  ;;  %v11269_v31 = vcombine.low %v3145_v60, %v3155_v48  ;;  %v773_v37 = vunpack.i.h.s16 %v14081_v15  ;;  %v11207_v57 = vpack.i.b16 %v14081_v15, %v14081_v15  ;;  %v3159_v61 = vrot.slane %v3157_v14, 4  ;;  %v14107_v34 = vld [vmem:[#allocation2 + $0x8c] sm:$0x1] }
 0x100   : > { %v775_v46 = vunpack.i.h.s16 %v14090_v59  ;;  %v11208_v49 = vpack.i.b16 %v14090_v59, %v14090_v59  ;;  %v3162_v30 = vrot.slane %v3160_v13, 5  ;;  %v1947_v25 = vrot.slane %v1940_v27, %v13361_v40  ;;  %v381_v13 = vld [vmem:[#allocation2 + $0xb0] sm:$0x1] }
 0x101   : > { %12159 = vmatprep.mubr.msk.bf16.mxu0 %vm4722_vm15, %v11269_v31  ;;  %v837_v47 = vpack.i.b16 %v773_v37, %v773_v37  ;;  %v1071_v18 = vrot.slane %v11207_v57, %v13134_v5  ;;  %v14102_v22 = vrot.slane %v3166_v17, 5  ;;  %v3172_v14 = vrot.slane %v3170_v7, 4  ;;  %v2661_v57 = vpop.permute.xlu0 %2660 }
 0x102   : > { %v839_v3 = vpack.i.b16 %v775_v46, %v775_v46  ;;  %v1079_v54 = vrot.slane %v11208_v49, %v13134_v5  ;;  %v3163_v52 = vor.u32 %v3162_v30, %v3159_v61  ;;  %v2109_v44 = vshrl.u32 %v1947_v25, 16  ;;  %v384_v61 = vld [vmem:[#allocation2 + $0xbc] sm:$0x1]  ;;  %v14130_v30 = vld [vmem:[#allocation2 + $0x90] sm:$0xf] }
 0x103   : > { %v2813_v29 = vld [vmem:[#allocation2 + $0x9c] sm:$0xf]  ;;  %v2112_v36 = vshll.u32 %v1947_v25, 16  ;;  %v2820_v8 = vld [vmem:[#allocation2 + $0xa8] sm:$0xf]  ;;  %v1075_v58 = vrot.slane %v837_v47, %v13134_v5  ;;  %v1493_v6 = vpack.i.b16 %v1071_v18, %v1071_v18  ;;  %v3173_v46 = vor.u32 %v3172_v14, %v14102_v22 }
 0x104   : > { %v2814_v26 = vsel %vm13699_vm14, %v14044_v43, %v2813_v29  ;;  %v2821_v20 = vsel %vm13699_vm14, %v2659_v51, %v2820_v8  ;;  %v1083_v32 = vrot.slane %v839_v3, %v13134_v5  ;;  %v1507_v56 = vpack.i.b16 %v1079_v54, %v1079_v54 }
 0x105   : > { %2815 = vst [vmem:[#allocation2 + $0x9c] sm:$0xf] %v2814_v26  ;;  %v14117_v16 = vrot.slane %v2109_v44, 7  ;;  %2822 = vst [vmem:[#allocation2 + $0xa8] sm:$0xf] %v2821_v20  ;;  %v1498_v39 = vrot.slane %v1493_v6, %v13134_v5  ;;  %v1500_v60 = vpack.i.b16 %v1075_v58, %v1075_v58  ;;  %v3164_v11 = vrot.slane %v3163_v52, 4 }
 0x106   : > { %v1512_v41 = vrot.slane %v1507_v56, %v13134_v5  ;;  %v1514_v0 = vpack.i.b16 %v1083_v32, %v1083_v32  ;;  %v3176_v43 = vshll.u32 %v14107_v34, 16  ;;  %v382_v47 = vsel %vm13119_vm2, 0, %v381_v13  ;;  %v14169_v13 = vld [vmem:[#allocation2 + $0x98] sm:$0x1] }
 0x107   : > { %v2114_v10 = vor.u32 %v2112_v36, %v14117_v16  ;;  %v2116_v48 = vrot.slane %v14117_v16, 4  ;;  %v1505_v17 = vrot.slane %v1500_v60, %v13134_v5  ;;  %v3169_v27 = vsel %vm13590_vm0, %v3164_v11, %v14102_v22  ;;  %383 = vst [vmem:[#allocation2 + $0xb0] sm:$0x1] %v382_v47 }
 0x108   : > { %v1519_v31 = vrot.slane %v1514_v0, %v13134_v5  ;;  %v1948_v37 = vcombine.low %v1498_v39, %v1512_v41  ;;  %v3178_v49 = vrot.slane %v3176_v43, 5  ;;  %v714_v18 = vcombine.high %v14081_v15, %v14081_v15 }
 0x109   : > { %v2115_v25 = vsel %vm13161_vm6, %v2107_v35, %v2114_v10  ;;  %v2253_v51 = vsel %vm13470_vm11, %v2116_v48, %v2252_v53  ;;  %v3174_v35 = vrot.slane %v3173_v46, 4  ;;  %v715_v3 = vcombine.high %v14090_v59, %v14090_v59  ;;  %v14158_v59 = vld [vmem:[#allocation2 + $0x94] sm:$0xf] }
 0x10a   : > { %2251 = vst.msk [vmem:[#allocation2 + $0xa0] sm:$0xf] %vm2159_vm9, %v2115_v25  ;;  %2258 = vst.msk [vmem:[#allocation2 + $0xac] sm:$0xf] %vm2159_vm9, %v2115_v25  ;;  %v1949_v45 = vcombine.low %v1505_v17, %v1519_v31  ;;  %v1956_v22 = vrot.slane %v1948_v37, %v13361_v40  ;;  %v777_v54 = vunpack.i.h.s16 %v714_v18  ;;  %v11209_v15 = vpack.i.b16 %v714_v18, %v714_v18  ;;  %v14177_v25 = vpop.permute.xlu1 %2664 }
 0x10b   : > { %2254 = vst [vmem:[#allocation2 + $0xa4] sm:$0x1] %v2253_v51  ;;  %2816 = vst.msk [vmem:[#allocation2 + $0xa0] sm:$0xf] %vm2724_vm8, %v14074_v23  ;;  %v385_v52 = vsel %vm13119_vm2, 0, %v384_v61  ;;  %v3181_v7 = vshrl.u32 %v14130_v30, 16  ;;  %v3179_v44 = vsel %vm13590_vm0, %v3174_v35, %v3178_v49  ;;  %v779_v36 = vunpack.i.h.s16 %v715_v3 }
 0x10c   : > { %2823 = vst.msk [vmem:[#allocation2 + $0xac] sm:$0xf] %vm2724_vm8, %v2661_v57  ;;  %v1963_v29 = vrot.slane %v1949_v45, %v13361_v40  ;;  %v11210_v8 = vpack.i.b16 %v715_v3, %v715_v3  ;;  %386 = vst [vmem:[#allocation2 + $0xbc] sm:$0x1] %v385_v52  ;;  %v11270_v23 = vcombine.low %v3169_v27, %v3179_v44  ;;  %v3184_v39 = vshll.u32 %v14130_v30, 16 }
 0x10d   : > { %v841_v58 = vpack.i.b16 %v777_v54, %v777_v54  ;;  %v1087_v6 = vrot.slane %v11209_v15, %v13134_v5  ;;  %v3183_v26 = vrot.slane %v3181_v7, 4  ;;  %v843_v32 = vpack.i.b16 %v779_v36, %v779_v36  ;;  %v14171_v17 = vld [vmem:[#allocation2 + $0x9c] sm:$0xf]  ;;  %v2262_v7 = vld [vmem:[#allocation2 + $0xb4] sm:$0xf] }
 0x10e   : > { %v1964_v20 = vcombine.low %v1956_v22, %v1963_v29  ;;  %v1095_v56 = vrot.slane %v11210_v8, %v13134_v5  ;;  %12160 = vmatmul.mubr.msk.bf16.gmra.mrb[20].mxu0 %vm4722_vm15, %v11270_v23  ;;  %v3190_v53 = vshll.u32 %v14158_v59, 16  ;;  %v3194_v41 = vshrl.u32 %v14158_v59, 16  ;;  %v2259_v31 = vld [vmem:[#allocation2 + $0xb0] sm:$0x1] }
 0x10f   : > { %v1091_v60 = vrot.slane %v841_v58, %v13134_v5  ;;  %v1521_v11 = vpack.i.b16 %v1087_v6, %v1087_v6  ;;  %v1099_v14 = vrot.slane %v843_v32, %v13134_v5  ;;  %v3186_v10 = vrot.slane %v3184_v39, 5  ;;  %v14196_v6 = vld [vmem:[#allocation2 + $0xa8] sm:$0xf]  ;;  %v2663_v39 = vpop.permute.xlu1 %2662 }
 0x110   : > { %v1971_v0 = vrot.slane %v1964_v20, %v13361_v40  ;;  %v1535_v43 = vpack.i.b16 %v1095_v56, %v1095_v56  ;;  %v3192_v46 = vrot.slane %v3190_v53, 5  ;;  %v3196_v49 = vrot.slane %v3194_v41, 4 }
 0x111   : > { %v1526_v37 = vrot.slane %v1521_v11, %v13134_v5  ;;  %v1528_v57 = vpack.i.b16 %v1091_v60, %v1091_v60  ;;  %v2260_v18 = vsel %vm13470_vm11, %v2116_v48, %v2259_v31  ;;  %v1542_v35 = vpack.i.b16 %v1099_v14, %v1099_v14 }
 0x112   : > { %v2817_v27 = vld [vmem:[#allocation2 + $0xa4] sm:$0x1]  ;;  %v2118_v51 = vshrl.u32 %v1971_v0, 16  ;;  %v2121_v47 = vshll.u32 %v1971_v0, 16  ;;  %2261 = vst [vmem:[#allocation2 + $0xb0] sm:$0x1] %v2260_v18  ;;  %v1540_v22 = vrot.slane %v1535_v43, %v13134_v5  ;;  %v3187_v3 = vor.u32 %v3186_v10, %v3183_v26 }
 0x113   : > { %v2818_v61 = vsel %vm13693_vm13, %v14104_v62, %v2817_v27  ;;  %v1533_v45 = vrot.slane %v1528_v57, %v13134_v5  ;;  %v3197_v62 = vor.u32 %v3196_v49, %v3192_v46  ;;  %v3200_v15 = vshll.u32 %v14169_v13, 16  ;;  %v14190_v44 = vld [vmem:[#allocation2 + $0xa0] sm:$0xf]  ;;  %v14209_v43 = vld [vmem:[#allocation2 + $0xac] sm:$0xf] }
 0x114   : > { %2819 = vst [vmem:[#allocation2 + $0xa4] sm:$0x1] %v2818_v61  ;;  %v14185_v54 = vrot.slane %v2118_v51, 7  ;;  %v3205_v52 = vshrl.u32 %v14171_v17, 16  ;;  %v1547_v16 = vrot.slane %v1542_v35, %v13134_v5  ;;  %v1972_v29 = vcombine.low %v1526_v37, %v1540_v22 }
 0x115   : > { %v3188_v48 = vrot.slane %v3187_v3, 4  ;;  %v3208_v36 = vshll.u32 %v14171_v17, 16  ;;  %v3198_v23 = vrot.slane %v3197_v62, 4  ;;  %v3202_v58 = vrot.slane %v3200_v15, 5 }
 0x116   : > { %v14194_v8 = vor.u32 %v2121_v47, %v14185_v54  ;;  %v1973_v26 = vcombine.low %v1533_v45, %v1547_v16  ;;  %v1980_v20 = vrot.slane %v1972_v29, %v13361_v40  ;;  %v3207_v5 = vrot.slane %v3205_v52, 4 }
 0x117   : > { %v3193_v32 = vsel %vm13590_vm0, %v3188_v48, %v3192_v46  ;;  %v3203_v60 = vsel %vm13590_vm0, %v3198_v23, %v3202_v58  ;;  %v3210_v11 = vrot.slane %v3208_v36, 5  ;;  %v3214_v53 = vshll.u32 %v14190_v44, 16 }
 0x118   : > { %v2263_v56 = vsel %vm13482_vm12, %v14194_v8, %v2262_v7  ;;  %v1987_v41 = vrot.slane %v1973_v26, %v13361_v40  ;;  %v11271_v0 = vcombine.low %v3193_v32, %v3203_v60  ;;  %v3218_v14 = vshrl.u32 %v14190_v44, 16 }
 0x119   : > { %2264 = vst [vmem:[#allocation2 + $0xb4] sm:$0xf] %v2263_v56  ;;  %v3229_v10 = vshrl.u32 %v14196_v6, 16  ;;  %v2824_v27 = vld [vmem:[#allocation2 + $0xb0] sm:$0x1]  ;;  %v3211_v37 = vor.u32 %v3210_v11, %v3207_v5  ;;  %v3216_v57 = vrot.slane %v3214_v53, 5 }
 0x11a   : > { %v3232_v46 = vshll.u32 %v14196_v6, 16  ;;  %v2825_v49 = vsel %vm13693_vm13, %v2663_v39, %v2824_v27  ;;  %v1988_v61 = vcombine.low %v1980_v20, %v1987_v41  ;;  %12163 = vmatprep.mubr.msk.bf16.mxu0 %vm4722_vm15, %v11271_v0  ;;  %v3220_v51 = vrot.slane %v3218_v14, 4  ;;  %v2266_v39 = vld [vmem:[#allocation2 + $0xbc] sm:$0x1]  ;;  %v2306_v41 = vld [vmem:[%s13131_s13 + $0x78] sm:$0xf]  ;;  %v2667_v0 = vpop.permute.xlu0 %2666 }
 0x11b   : > { %v14212_v31 = vld [vmem:[#allocation2 + $0xa4] sm:$0x1]  ;;  %2826 = vst [vmem:[#allocation2 + $0xb0] sm:$0x1] %v2825_v49  ;;  %v3212_v18 = vrot.slane %v3211_v37, 4  ;;  %v3231_v45 = vrot.slane %v3229_v10, 4  ;;  %v11303_v49 = vcombine.low %v14130_v30, %v14158_v59 }
 0x11c   : > { %v3224_v47 = vshll.u32 %v14212_v31, 16  ;;  %v3234_v22 = vrot.slane %v3232_v46, 5  ;;  %v3238_v35 = vshll.u32 %v14209_v43, 16  ;;  %v1995_v3 = vrot.slane %v1988_v61, %v13361_v40  ;;  %v2307_v27 = vld [vmem:[%s13131_s13 + $0x7c] sm:$0xf] }
 0x11d   : > { %v3221_v62 = vor.u32 %v3220_v51, %v3216_v57  ;;  %v3242_v52 = vshrl.u32 %v14209_v43, 16  ;;  %v2124_v58 = vrot.slane %v14185_v54, 4  ;;  %v3217_v26 = vsel %vm13590_vm0, %v3212_v18, %v3216_v57 }
 0x11e   : > { %v3226_v15 = vrot.slane %v3224_v47, 5  ;;  %v3240_v7 = vrot.slane %v3238_v35, 5  ;;  %v2126_v16 = vshrl.u32 %v1995_v3, 16  ;;  %v2129_v29 = vshll.u32 %v1995_v3, 16 }
 0x11f   : > { %v3222_v48 = vrot.slane %v3221_v62, 4  ;;  %v3244_v36 = vrot.slane %v3242_v52, 4  ;;  %v3235_v20 = vor.u32 %v3234_v22, %v3231_v45  ;;  %v11304_v61 = vcombine.low %v14171_v17, %v14190_v44 }
 0x120   : > { %v2827_v23 = vld [vmem:[#allocation2 + $0xb4] sm:$0xf]  ;;  %v14228_v32 = vrot.slane %v2126_v16, 7  ;;  %v11305_v51 = vcombine.low %v14196_v6, %v14209_v43  ;;  %v2564_v47 = vshrl.u32 %v2306_v41, 16  ;;  %v2567_v18 = vshll.u32 %v2306_v41, 16 }
 0x121   : > { %v2828_v40 = vsel %vm13699_vm14, %v14177_v25, %v2827_v23  ;;  %v3227_v5 = vsel %vm13590_vm0, %v3222_v48, %v3226_v15  ;;  %v3245_v56 = vor.u32 %v3244_v36, %v3240_v7  ;;  %v3236_v25 = vrot.slane %v3235_v20, 4  ;;  %v2669_v48 = vpop.permute.xlu0 %2668 }
 0x122   : > { %2829 = vst [vmem:[#allocation2 + $0xb4] sm:$0xf] %v2828_v40  ;;  %v11272_v60 = vcombine.low %v3217_v26, %v3227_v5  ;;  %v2131_v54 = vor.u32 %v2129_v29, %v14228_v32  ;;  %v2133_v11 = vrot.slane %v14228_v32, 4  ;;  %v14234_v53 = vld [vmem:[#allocation2 + $0xb0] sm:$0x1]  ;;  %v2572_v45 = vshrl.u32 %v2307_v27, 16 }
 0x123   : > { %v3246_v14 = vrot.slane %v3245_v56, 4  ;;  %v3248_v10 = vshll.u32 %v14234_v53, 16  ;;  %v2575_v22 = vshll.u32 %v2307_v27, 16  ;;  %v3241_v35 = vsel %vm13590_vm0, %v3236_v25, %v3240_v7 }
 0x124   : > { %12164 = vmatmul.mubr.msk.bf16.gmra.mrb[24].mxu0 %vm4722_vm15, %v11272_v60  ;;  %v2132_v37 = vsel %vm13161_vm6, %v2124_v58, %v2131_v54  ;;  %v2267_v57 = vsel %vm13470_vm11, %v2133_v11, %v2266_v39  ;;  %v2566_v52 = vrot.slane %v2564_v47, 7  ;;  %v2574_v16 = vrot.slane %v2572_v45, 7 }
 0x125   : > { %2265 = vst.msk [vmem:[#allocation2 + $0xb8] sm:$0xf] %vm2159_vm9, %v2132_v37  ;;  %2272 = vst.msk [vmem:[#allocation2 + $0xc4] sm:$0xf] %vm2159_vm9, %v2132_v37  ;;  %v3250_v46 = vrot.slane %v3248_v10, 5  ;;  %vm3341_vm9 = vcmask 1046532  }
 0x126   : > { %2268 = vst [vmem:[#allocation2 + $0xbc] sm:$0x1] %v2267_v57  ;;  %2830 = vst.msk [vmem:[#allocation2 + $0xb8] sm:$0xf] %vm2724_vm8, %v2667_v0  ;;  %v2569_v23 = vor.u32 %v2567_v18, %v2566_v52  ;;  %v2570_v58 = vrot.slane %v2566_v52, 4  ;;  %v2577_v26 = vor.u32 %v2575_v22, %v2574_v16  ;;  %v2579_v40 = vrot.slane %v2574_v16, 4 }
 0x127   : > { %v3251_v3 = vsel %vm13590_vm0, %v3246_v14, %v3250_v46  ;;  %v3288_v16 = vld [vmem:[#allocation2 + $0x90] sm:$0xe]  ;;  %vm14301_vm5 = vmor %vm3340_vm4, %vm3341_vm9 }
 0x128   : > { %v11273_v62 = vcombine.low %v3241_v35, %v3251_v3  ;;  %2670 = vrot.lane.b32.xlu1 %v2569_v23, %s13020_s14  ;;  %v2578_v7 = vsel %vm13161_vm6, %v2570_v58, %v2577_v26  ;;  %v14281_v35 = vld [vmem:[#allocation2 + $0x4] sm:$0xf]  ;;  %v12918_v3 = vld [vmem:[#allocation2] sm:$0xf]  ;;  %v3432_v23 = vrot.slane %v14169_v13, 5 }
 0x129   : > { %v14259_v15 = vld [vmem:[#allocation2 + $0xb4] sm:$0xf]  ;;  %2672 = vrot.lane.b32.xlu0 %v2578_v7, %s13020_s14  ;;  %v3290_v58 = vld [vmem:[#allocation2 + $0xa8] sm:$0xe]  ;;  %v12919_v26 = vld [vmem:[#allocation2 + $0xc] sm:$0xf] }
 0x12a   : > { %v3253_v29 = vshrl.u32 %v14259_v15, 16  ;;  %12167 = vmatprep.mubr.msk.bf16.mxu0 %vm4722_vm15, %v11273_v62  ;;  %v3256_v36 = vshll.u32 %v14259_v15, 16  ;;  %v11291_v62 = vcombine.low %v12918_v3, %v14281_v35  ;;  %v3446_v3 = vrot.slane %v14234_v53, 5 }
 0x12c   : > { %v3255_v39 = vrot.slane %v3253_v29, 4  ;;  %v3258_v60 = vrot.slane %v3256_v36, 5  ;;  %2674 = vrot.lane.b32.xlu1 %v2579_v40, %s13020_s14  ;;  %v3289_v29 = vld [vmem:[#allocation2 + $0x9c] sm:$0xe]  ;;  %v3429_v36 = vrot.slane %v14158_v59, 5  ;;  %s13022_s14 = smov 112  }
 0x12d   : > { %v2831_v20 = vld [vmem:[#allocation2 + $0xbc] sm:$0x1]  ;;  %v14269_v56 = vld [vmem:[#allocation2 + $0xb8] sm:$0xf]  ;;  %v12921_v40 = vld [vmem:[%s17698_s2 + $0x8] sm:$0xf] }
 0x12e   : > { %v2832_v5 = vsel %vm13693_vm13, %v2669_v48, %v2831_v20  ;;  %v3262_v54 = vshll.u32 %v14269_v56, 16  ;;  %v3266_v41 = vshrl.u32 %v14269_v56, 16  ;;  %v11306_v0 = vcombine.low %v14259_v15, %v14269_v56  ;;  %v14288_v20 = vld [vmem:[#allocation2 + $0x10] sm:$0xf] }
 0x12f   : > { %2833 = vst [vmem:[#allocation2 + $0xbc] sm:$0x1] %v2832_v5  ;;  %v3259_v10 = vor.u32 %v3258_v60, %v3255_v39  ;;  %v11223_v48 = vrot.slane %v3288_v16, 9  ;;  %v11292_v7 = vcombine.low %v12919_v26, %v14288_v20  ;;  %v5310_v5 = vsel %vm4771_vm10, %v12921_v40, 0 }
 0x130   : > { %v3264_v25 = vrot.slane %v3262_v54, 5  ;;  %v3268_v14 = vrot.slane %v3266_v41, 4  ;;  %v11224_v39 = vrot.slane %v3289_v29, 9  ;;  %v3436_v60 = vrot.slane %v14190_v44, 5  ;;  %v3291_v54 = vld [vmem:[#allocation2 + $0xb4] sm:$0xe] }
 0x131   : > { %v3260_v57 = vrot.slane %v3259_v10, 4  ;;  %v12922_v41 = vld [vmem:[#allocation2 + $0x18] sm:$0xf]  ;;  %v14308_v10 = vld [vmem:[%s17698_s2 + $0xc] sm:$0xf] }
 0x132   : > { %v3269_v27 = vor.u32 %v3268_v14, %v3264_v25  ;;  %v17774_v14 = vmov 0  ;;  %v14330_v16 = vsel %vm14301_vm5, %v11224_v39, %v3436_v60  ;;  %v14356_v39 = vld [vmem:[#allocation2 + $0x28] sm:$0xf] }
 0x133   : > { %v3265_v45 = vsel %vm13590_vm0, %v3260_v57, %v3264_v25  ;;  %v14296_v25 = vld [vmem:[#allocation2 + $0x1c] sm:$0xf]  ;;  %v17775_v14 = vsel %vm14301_vm5, 4294967295, %v17774_v14  ;;  %v3439_v57 = vrot.slane %v14212_v31, 5  ;;  %v11226_v31 = vrot.slane %v3291_v54, 9 }
 0x134   : > { %v3270_v46 = vrot.slane %v3269_v27, 4  ;;  %v11293_v13 = vcombine.low %v12922_v41, %v14296_v25  ;;  %17776 = vst [vmem:[#allocation10_spill] sm:$0xff] %v17775_v14  ;;  %v3431_v27 = vrot.slane %v3429_v36, 4  ;;  %v12926_v41 = vld [vmem:[#allocation2 + $0x30] sm:$0xf]  ;;  %v3359_v6 = vrot.slane %v14296_v25, 5 }
 0x136   : > { %v2888_v37 = vld [vmem:[#allocation2 + $0xbc] sm:$0x1]  ;;  %v3361_v32 = vrot.slane %v3359_v6, 4 }
 0x137   : > { %v3272_v47 = vshll.u32 %v2888_v37, 16 }
 0x139   : > { %v3274_v18 = vrot.slane %v3272_v47, 5  ;;  %v3438_v47 = vrot.slane %v3436_v60, 4 }
 0x13b   : > { %v3275_v22 = vsel %vm13590_vm0, %v3270_v46, %v3274_v18  ;;  %v14314_v46 = vsel %vm14301_vm5, %v11223_v48, %v3429_v36  ;;  %v11225_v18 = vrot.slane %v3290_v58, 9  ;;  %v14334_v29 = vsel %vm14301_vm5, %v3438_v47, %v3439_v57  ;;  %v12928_v57 = vld [vmem:[#allocation2 + $0x3c] sm:$0xf]  ;;  %v14366_v47 = vld [vmem:[#allocation2 + $0x40] sm:$0xf] }
 0x13c   : > { %v11274_v52 = vcombine.low %v3265_v45, %v3275_v22  ;;  %v3443_v45 = vrot.slane %v14209_v43, 5  ;;  %v14320_v22 = vsel %vm14301_vm5, %v3431_v27, %v3432_v23  ;;  %v11336_v53 = vcombine.low %v14330_v16, %v14334_v29 }
 0x13d   : > { %v3453_v23 = vrot.slane %v2888_v37, 5  ;;  %v12924_v37 = vld [vmem:[#allocation2 + $0x24] sm:$0xf] }
 0x13e   : > { %12168 = vmatmul.mubr.msk.bf16.gmra.mrb[28].mxu0 %vm4722_vm15, %v11274_v52  ;;  %v11335_v52 = vcombine.low %v14314_v46, %v14320_v22  ;;  %v3445_v48 = vrot.slane %v3443_v45, 4  ;;  %v14340_v58 = vsel %vm14301_vm5, %v11225_v18, %v3443_v45  ;;  %v11294_v60 = vcombine.low %v12924_v37, %v14356_v39  ;;  %v12930_v45 = vld [vmem:[#allocation2 + $0x48] sm:$0xf]  ;;  %v14377_v37 = vld [vmem:[#allocation2 + $0x64] sm:$0xf] }
 0x13f   : > { %12173 = vmatprep.mubr.msk.bf16.mxu0 %vm4722_vm15, %v11291_v62  ;;  %v3450_v62 = vrot.slane %v14269_v56, 5  ;;  %v11296_v18 = vcombine.low %v12928_v57, %v14366_v47  ;;  %v331_v57 = vld [vmem:[#allocation2 + $0xc0] sm:$0x1]  ;;  %v3366_v56 = vrot.slane %v14356_v39, 5  ;;  %v12940_v39 = vld [vmem:[#allocation2 + $0x38] sm:$0x1] }
 0x140   : > { %v14344_v26 = vsel %vm14301_vm5, %v3445_v48, %v3446_v3  ;;  %v14369_v3 = vld [vmem:[#allocation2 + $0x4c] sm:$0xf]  ;;  %v14374_v48 = vld [vmem:[#allocation2 + $0x58] sm:$0xf]  ;;  %v14525_v46 = vld [vmem:[#allocation2 + $0x1c] sm:$0xf] }
 0x141   : > { %v3452_v36 = vrot.slane %v3450_v62, 4  ;;  %v14350_v40 = vsel %vm14301_vm5, %v11226_v31, %v3450_v62  ;;  %v11297_v31 = vcombine.low %v12930_v45, %v14369_v3  ;;  %v12932_v62 = vld [vmem:[#allocation2 + $0x54] sm:$0xf]  ;;  %v11302_v45 = vcombine.low %v14066_v55, %v14072_v24  ;;  %v12936_v55 = vld [vmem:[#allocation2 + $0x8] sm:$0x1]  ;;  %17777 = vst [vmem:[#allocation11_spill] sm:$0xff] %v14525_v46 }
 0x142   : > { %v14527_v22 = vld [vmem:[#allocation2 + $0x28] sm:$0xf] }
 0x143   : > { %17778 = vst [vmem:[#allocation12_spill] sm:$0xff] %v14527_v22 }
 0x146   : > { %12174 = vmatmul.mubr.msk.bf16.vlgmr.msra.gmra.mrb[0].mxu0 %vm4722_vm15, %v11292_v7  ;;  %v11337_v7 = vcombine.low %v14340_v58, %v14344_v26  ;;  %v14542_v26 = vld [vmem:[%s17698_s2 + $0x14] sm:$0xf] }
 0x147   : > { %12206 = vmatpush3.bf16.msra.mxu0 %v5310_v5  ;;  %12177 = vmatprep.mubr.msk.bf16.mxu0 %vm4722_vm15, %v11293_v13  ;;  %v14354_v5 = vsel %vm14301_vm5, %v3452_v36, %v3453_v23  ;;  %v14361_v13 = vld [vmem:[#allocation2 + $0x34] sm:$0xf]  ;;  %v11298_v36 = vcombine.low %v12932_v62, %v14374_v48  ;;  %v12934_v23 = vld [vmem:[#allocation2 + $0x60] sm:$0xf] }
 0x148   : > { %12702 = vmatprep.subr.msk.bf16.mxu0 %vm4771_vm10, %v14308_v10  ;;  %v11338_v54 = vcombine.low %v14350_v40, %v14354_v5  ;;  %v11295_v27 = vcombine.low %v12926_v41, %v14361_v13  ;;  %v11300_v41 = vcombine.low %v13950_v33, %v13976_v28  ;;  %v387_v33 = vld [vmem:[#allocation2 + $0xc8] sm:$0x1]  ;;  %v3345_v28 = vrot.slane %v14281_v35, 5  ;;  %v3276_v62 = vld [vmem:[#allocation2] sm:$0xe] }
 0x149   : > { %v12937_v35 = vld [vmem:[#allocation2 + $0x20] sm:$0x1]  ;;  %v14552_v5 = vld [vmem:[#allocation2 + $0x30] sm:$0xf] }
 0x14a   : > { %v3347_v30 = vrot.slane %v3345_v28, 4  ;;  %v14550_v40 = vld [vmem:[#allocation2 + $0x40] sm:$0xf] }
 0x14b   : > { %17779 = vst [vmem:[#allocation13_spill] sm:$0xff] %v14550_v40 }
 0x14e   : > { %12178 = vmatmul.mubr.msk.bf16.gmra.mrb[4].mxu0 %vm4722_vm15, %v11294_v60  ;;  %v11299_v60 = vcombine.low %v12934_v23, %v14377_v37  ;;  %v3348_v23 = vrot.slane %v12936_v55, 5  ;;  %v14441_v55 = vld [vmem:[%s17698_s2 + $0x10] sm:$0xf] }
 0x14f   : > { %12181 = vmatprep.mubr.msk.bf16.mxu0 %vm4722_vm15, %v11295_v27  ;;  %v11301_v27 = vcombine.low %v14009_v42, %v14034_v1  ;;  %v5912_v29 = vsel %vm4771_vm10, %v14441_v55, 0 }
 0x150   : > { %v3349_v59 = vsel %vm14301_vm5, %v3347_v30, %v3348_v23  ;;  %v3376_v23 = vrot.slane %v12940_v39, 5 }
 0x156   : > { %12182 = vmatmul.mubr.msk.bf16.gmra.mrb[8].mxu0 %vm4722_vm15, %v11296_v18  ;;  %v332_v18 = vsel %vm13339_vm7, 0, %v331_v57 }
 0x157   : > { %12185 = vmatprep.mubr.msk.bf16.mxu0 %vm4722_vm15, %v11297_v31  ;;  %333 = vst [vmem:[#allocation2 + $0xc0] sm:$0x1] %v332_v18  ;;  %v388_v31 = vsel %vm13119_vm2, 0, %v387_v33  ;;  %v5619_v18 = vsel %vm4771_vm10, %v14308_v10, 0  ;;  %v3279_v33 = vld [vmem:[#allocation2 + $0x24] sm:$0xe] }
 0x158   : > { %389 = vst [vmem:[#allocation2 + $0xc8] sm:$0x1] %v388_v31  ;;  %v12939_v31 = vld [vmem:[#allocation2 + $0x2c] sm:$0x1]  ;;  %v11214_v10 = vrot.slane %v3279_v33, 9 }
 0x15e   : > { %12186 = vmatmul.mubr.msk.bf16.gmra.mrb[12].mxu0 %vm4722_vm15, %v11298_v36  ;;  %v2269_v42 = vld [vmem:[#allocation2 + $0xc0] sm:$0xf] }
 0x15f   : > { %12189 = vmatprep.mubr.msk.bf16.mxu0 %vm4722_vm15, %v11299_v60  ;;  %v2270_v36 = vsel %vm13482_vm12, %v14194_v8, %v2269_v42  ;;  %v11211_v60 = vrot.slane %v3276_v62, 9  ;;  %v2273_v8 = vld [vmem:[#allocation2 + $0xc8] sm:$0x1]  ;;  %v3369_v62 = vrot.slane %v12939_v31, 5  ;;  %v3284_v31 = vld [vmem:[#allocation2 + $0x60] sm:$0xe] }
 0x160   : > { %2271 = vst [vmem:[#allocation2 + $0xc0] sm:$0xf] %v2270_v36  ;;  %v2274_v17 = vsel %vm13470_vm11, %v2133_v11, %v2273_v8  ;;  %v3280_v36 = vld [vmem:[#allocation2 + $0x30] sm:$0xe]  ;;  %v3367_v8 = vsel %vm14301_vm5, %v11214_v10, %v3366_v56 }
 0x161   : > { %v3346_v50 = vsel %vm14301_vm5, %v11211_v60, %v3345_v28  ;;  %2275 = vst [vmem:[#allocation2 + $0xc8] sm:$0x1] %v2274_v17  ;;  %v3373_v28 = vrot.slane %v14361_v13, 5  ;;  %v3368_v60 = vrot.slane %v3366_v56, 4  ;;  %v11215_v30 = vrot.slane %v3280_v36, 9 }
 0x162   : > { %v11323_v44 = vcombine.low %v3346_v50, %v3349_v59 }
 0x163   : > { %v3375_v13 = vrot.slane %v3373_v28, 4  ;;  %v3370_v50 = vsel %vm14301_vm5, %v3368_v60, %v3369_v62  ;;  %v12944_v62 = vld [vmem:[#allocation2 + $0x68] sm:$0x1] }
 0x164   : > { %v11326_v17 = vcombine.low %v3367_v8, %v3370_v50  ;;  %v3404_v36 = vrot.slane %v12944_v62, 5 }
 0x165   : > { %v3377_v59 = vsel %vm14301_vm5, %v3375_v13, %v3376_v23  ;;  %v12945_v13 = vld [vmem:[#allocation2 + $0x70] sm:$0xf] }
 0x166   : > { %12190 = vmatmul.mubr.msk.bf16.gmra.mrb[16].mxu0 %vm4722_vm15, %v11300_v41  ;;  %v3362_v41 = vrot.slane %v12937_v35, 5  ;;  %v3408_v50 = vrot.slane %v12945_v13, 5  ;;  %v14576_v13 = vld [vmem:[#allocation2 + $0x64] sm:$0xf] }
 0x167   : > { %12193 = vmatprep.mubr.msk.bf16.mxu0 %vm4722_vm15, %v11301_v27  ;;  %17780 = vst [vmem:[#allocation14_spill] sm:$0xff] %v14576_v13 }
 0x168   : > { %v3363_v57 = vsel %vm14301_vm5, %v3361_v32, %v3362_v41  ;;  %v3282_v41 = vld [vmem:[#allocation2 + $0x48] sm:$0xe] }
 0x16e   : > { %12194 = vmatmul.mubr.msk.bf16.gmra.mrb[20].mxu0 %vm4722_vm15, %v11302_v45 }
 0x16f   : > { %12197 = vmatprep.mubr.msk.bf16.mxu0 %vm4722_vm15, %v11303_v49  ;;  %v3352_v49 = vrot.slane %v14288_v20, 5  ;;  %v12938_v20 = vld [vmem:[#allocation2 + $0x14] sm:$0x1] }
 0x170   : > { %v3355_v27 = vrot.slane %v12938_v20, 5  ;;  %v12942_v20 = vld [vmem:[#allocation2 + $0x50] sm:$0x1] }
 0x171   : > { %v3354_v43 = vrot.slane %v3352_v49, 4 }
 0x173   : > { %v3356_v25 = vsel %vm14301_vm5, %v3354_v43, %v3355_v27  ;;  %v3387_v43 = vrot.slane %v14369_v3, 5  ;;  %v3390_v27 = vrot.slane %v12942_v20, 5  ;;  %v3410_v20 = vrot.slane %v3408_v50, 4 }
 0x176   : > { %12198 = vmatmul.mubr.msk.bf16.gmra.mrb[24].mxu0 %vm4722_vm15, %v11304_v61  ;;  %v3278_v61 = vld [vmem:[#allocation2 + $0x18] sm:$0xe] }
 0x177   : > { %12201 = vmatprep.mubr.msk.bf16.mxu0 %vm4722_vm15, %v11305_v51  ;;  %v3277_v51 = vld [vmem:[#allocation2 + $0xc] sm:$0xe]  ;;  %v11213_v63 = vrot.slane %v3278_v61, 9 }
 0x178   : > { %v11212_v11 = vrot.slane %v3277_v51, 9  ;;  %v12941_v51 = vld [vmem:[#allocation2 + $0x44] sm:$0x1] }
 0x179   : > { %v3360_v45 = vsel %vm14301_vm5, %v11213_v63, %v3359_v6  ;;  %v3281_v6 = vld [vmem:[#allocation2 + $0x3c] sm:$0xe]  ;;  %v3383_v35 = vrot.slane %v12941_v51, 5  ;;  %v2834_v51 = vld [vmem:[#allocation2 + $0xc0] sm:$0xf] }
 0x17a   : > { %v3353_v15 = vsel %vm14301_vm5, %v11212_v11, %v3352_v49  ;;  %v11325_v42 = vcombine.low %v3360_v45, %v3363_v57  ;;  %v3380_v49 = vrot.slane %v14366_v47, 5  ;;  %v11216_v63 = vrot.slane %v3281_v6, 9  ;;  %v12946_v6 = vld [vmem:[#allocation2 + $0x74] sm:$0x1] }
 0x17b   : > { %v11217_v47 = vrot.slane %v3282_v41, 9  ;;  %v3389_v11 = vrot.slane %v3387_v43, 4  ;;  %v3401_v45 = vrot.slane %v14377_v37, 5 }
 0x17c   : > { %v3382_v32 = vrot.slane %v3380_v49, 4  ;;  %v3381_v57 = vsel %vm14301_vm5, %v11216_v63, %v3380_v49  ;;  %v3285_v49 = vld [vmem:[#allocation2 + $0x6c] sm:$0xe] }
 0x17d   : > { %v3391_v3 = vsel %vm14301_vm5, %v3389_v11, %v3390_v27  ;;  %v3403_v10 = vrot.slane %v3401_v45, 4  ;;  %v11220_v41 = vrot.slane %v3285_v49, 9  ;;  %v14584_v49 = vld [vmem:[#allocation2 + $0x6c] sm:$0xf] }
 0x17e   : > { %12202 = vmatmul.mubr.msk.bf16.gmra.mrb[28].mxu0 %vm4722_vm15, %v11306_v0  ;;  %v11324_v0 = vcombine.low %v3353_v15, %v3356_v25  ;;  %v3384_v25 = vsel %vm14301_vm5, %v3382_v32, %v3383_v35  ;;  %v3394_v15 = vrot.slane %v14374_v48, 5  ;;  %v11219_v48 = vrot.slane %v3284_v31, 9 }
 0x17f   : > { %12207 = vmatprep.mubr.msk.bf16.mxu0 %vm4722_vm15, %v11323_v44  ;;  %v3374_v44 = vsel %vm14301_vm5, %v11215_v30, %v3373_v28  ;;  %v11328_v56 = vcombine.low %v3381_v57, %v3384_v25  ;;  %v12943_v28 = vld [vmem:[#allocation2 + $0x5c] sm:$0x1]  ;;  %v3405_v37 = vsel %vm14301_vm5, %v3403_v10, %v3404_v36  ;;  %v3418_v35 = vrot.slane %v14050_v21, 5  ;;  %v2838_v25 = vld [vmem:[#allocation2 + $0xc8] sm:$0x1] }
 0x180   : > { %v11327_v61 = vcombine.low %v3374_v44, %v3377_v59  ;;  %v3396_v23 = vrot.slane %v3394_v15, 4  ;;  %v3402_v8 = vsel %vm14301_vm5, %v11219_v48, %v3401_v45  ;;  %v3422_v57 = vrot.slane %v14072_v24, 5  ;;  %v14564_v48 = vld [vmem:[#allocation2 + $0x58] sm:$0xf]  ;;  %v14566_v10 = vld [vmem:[#allocation2 + $0x48] sm:$0xf] }
 0x181   : > { %v11331_v44 = vcombine.low %v3402_v8, %v3405_v37  ;;  %v14570_v37 = vld [vmem:[#allocation2 + $0x54] sm:$0xf] }
 0x186   : > { %12208 = vmatmul.mubr.msk.bf16.vlgmr.msra.gmra.mrb[0].mxu0 %vm4722_vm15, %v11324_v0  ;;  %v3388_v0 = vsel %vm14301_vm5, %v11217_v47, %v3387_v43  ;;  %v3411_v43 = vrot.slane %v12946_v6, 5  ;;  %v14592_v6 = vld [vmem:[#allocation2 + $0x88] sm:$0xf] }
 0x187   : > { %12240 = vmatpush3.bf16.msra.mxu0 %v5619_v18  ;;  %12211 = vmatprep.mubr.msk.bf16.mxu0 %vm4722_vm15, %v11325_v42  ;;  %v3283_v18 = vld [vmem:[#allocation2 + $0x54] sm:$0xe]  ;;  %v11329_v33 = vcombine.low %v3388_v0, %v3391_v3  ;;  %v3397_v42 = vrot.slane %v12943_v28, 5  ;;  %v3409_v3 = vsel %vm14301_vm5, %v11220_v41, %v3408_v50  ;;  %v3287_v0 = vld [vmem:[#allocation2 + $0x84] sm:$0xe] }
 0x188   : > { %12703 = vmatprep.subr.msk.bf16.mxu0 %vm4771_vm10, %v14441_v55  ;;  %v11218_v39 = vrot.slane %v3283_v18, 9  ;;  %v3412_v11 = vsel %vm14301_vm5, %v3410_v20, %v3411_v43  ;;  %v11222_v28 = vrot.slane %v3287_v0, 9  ;;  %v14556_v55 = vld [vmem:[#allocation2 + $0x3c] sm:$0xf]  ;;  %v14578_v50 = vld [vmem:[#allocation2 + $0x70] sm:$0xf] }
 0x189   : > { %v3398_v60 = vsel %vm14301_vm5, %v3396_v23, %v3397_v42  ;;  %v3424_v42 = vrot.slane %v3422_v57, 4  ;;  %v14562_v23 = vld [vmem:[#allocation2 + $0x4c] sm:$0xf]  ;;  %v14594_v43 = vld [vmem:[#allocation2 + $0x78] sm:$0xf] }
 0x18a   : > { %v3395_v30 = vsel %vm14301_vm5, %v11218_v39, %v3394_v15  ;;  %v3423_v31 = vsel %vm14301_vm5, %v11222_v28, %v3422_v57  ;;  %v11359_v39 = vcombine.low %v14556_v55, %v14550_v40 }
 0x18b   : > { %v11330_v59 = vcombine.low %v3395_v30, %v3398_v60  ;;  %v11360_v60 = vcombine.low %v14566_v10, %v14562_v23  ;;  %v11361_v30 = vcombine.low %v14570_v37, %v14564_v48 }
 0x18e   : > { %12212 = vmatmul.mubr.msk.bf16.gmra.mrb[4].mxu0 %vm4722_vm15, %v11326_v17  ;;  %v3415_v17 = vrot.slane %v14034_v1, 5 }
 0x18f   : > { %12215 = vmatprep.mubr.msk.bf16.mxu0 %vm4722_vm15, %v11327_v61  ;;  %v3286_v61 = vld [vmem:[#allocation2 + $0x78] sm:$0xe] }
 0x190   : > { %v11221_v63 = vrot.slane %v3286_v61, 9  ;;  %v3417_v32 = vrot.slane %v3415_v17, 4 }
 0x192   : > { %v3419_v21 = vsel %vm14301_vm5, %v3417_v32, %v3418_v35  ;;  %v3416_v19 = vsel %vm14301_vm5, %v11221_v63, %v3415_v17  ;;  %v11363_v17 = vcombine.low %v14584_v49, %v14578_v50  ;;  %v14605_v63 = vld [vmem:[#allocation2 + $0x94] sm:$0xf]  ;;  %v14607_v32 = vld [vmem:[#allocation2 + $0x1c] sm:$0xf] }
 0x193   : > { %v11333_v45 = vcombine.low %v3416_v19, %v3419_v21  ;;  %17781 = vst [vmem:[#allocation15_spill] sm:$0xff] %v14607_v32  ;;  %v4096_v21 = vld [vmem:[#allocation2 + $0x20] sm:$0x1] }
 0x196   : > { %12216 = vmatmul.mubr.msk.bf16.gmra.mrb[8].mxu0 %vm4722_vm15, %v11328_v56  ;;  %v11332_v56 = vcombine.low %v3409_v3, %v3412_v11  ;;  %v14610_v11 = vld [vmem:[#allocation2 + $0xa0] sm:$0xf] }
 0x197   : > { %12219 = vmatprep.mubr.msk.bf16.mxu0 %vm4722_vm15, %v11329_v33  ;;  %v3425_v33 = vrot.slane %v14107_v34, 5  ;;  %v3455_v34 = vld [vmem:[#allocation2 + $0xc] sm:$0xf] }
 0x198   : > { %v11355_v36 = vcombine.low %v3455_v34, %v14517_v12  ;;  %v3504_v41 = vshrl.u32 %v3455_v34, 16  ;;  %v3507_v20 = vshll.u32 %v3455_v34, 16 }
 0x199   : > { %v3426_v24 = vsel %vm14301_vm5, %v3424_v42, %v3425_v33  ;;  %v4562_v33 = vrot.slane %v14607_v32, 5 }
 0x19a   : > { %v2671_v27 = vpop.permute.xlu1 %2670  ;;  %v11334_v62 = vcombine.low %v3423_v31, %v3426_v24  ;;  %v14613_v3 = vrot.slane %v3504_v41, 4  ;;  %v14615_v57 = vrot.slane %v3507_v20, 5  ;;  %v4565_v31 = vrot.slane %v4096_v21, 5 }
 0x19b   : > { %v2835_v47 = vsel %vm13699_vm14, %v2671_v27, %v2834_v51  ;;  %v2673_v1 = vpop.permute.xlu0 %2672  ;;  %v14598_v51 = vld [vmem:[#allocation2 + $0x84] sm:$0xf] }
 0x19c   : > { %2836 = vst [vmem:[#allocation2 + $0xc0] sm:$0xf] %v2835_v47  ;;  %2837 = vst.msk [vmem:[#allocation2 + $0xc4] sm:$0xf] %vm2724_vm8, %v2673_v1  ;;  %v11365_v35 = vcombine.low %v14598_v51, %v14592_v6  ;;  %v4496_v47 = vld [vmem:[#allocation2 + $0x18] sm:$0xe] }
 0x19d   : > { %v3517_v1 = vshrl.u32 %v14517_v12, 16 }
 0x19e   : > { %12220 = vmatmul.mubr.msk.bf16.gmra.mrb[12].mxu0 %vm4722_vm15, %v11330_v59  ;;  %v2675_v15 = vpop.permute.xlu1 %2674  ;;  %v14580_v59 = vld [vmem:[#allocation2 + $0x60] sm:$0xf] }
 0x19f   : > { %12223 = vmatprep.mubr.msk.bf16.mxu0 %vm4722_vm15, %v11331_v44  ;;  %v2839_v18 = vsel %vm13693_vm13, %v2675_v15, %v2838_v25  ;;  %v11362_v8 = vcombine.low %v14580_v59, %v14576_v13  ;;  %v14590_v44 = vld [vmem:[#allocation2 + $0x7c] sm:$0xf]  ;;  %v3513_v25 = vshll.u32 %v14517_v12, 16  ;;  %v3672_v32 = vshrl.u32 %v14580_v59, 16 }
 0x1a0   : > { %2840 = vst [vmem:[#allocation2 + $0xc8] sm:$0x1] %v2839_v18  ;;  %v11364_v61 = vcombine.low %v14594_v43, %v14590_v44  ;;  %v14624_v18 = vld [vmem:[#allocation2 + $0x9c] sm:$0xf] }
 0x1a1   : > { %v11367_v24 = vcombine.low %v14624_v18, %v14610_v11  ;;  %v14633_v34 = vrot.slane %v3513_v25, 5  ;;  %v3561_v25 = vshll.u32 %v14527_v22, 16 }
 0x1a6   : > { %12224 = vmatmul.mubr.msk.bf16.gmra.mrb[16].mxu0 %vm4722_vm15, %v11332_v56  ;;  %v14618_v56 = vld [vmem:[#allocation2 + $0x90] sm:$0xf] }
 0x1a7   : > { %12227 = vmatprep.mubr.msk.bf16.mxu0 %vm4722_vm15, %v11333_v45  ;;  %v11366_v0 = vcombine.low %v14618_v56, %v14605_v63  ;;  %v11243_v45 = vrot.slane %v4496_v47, 9  ;;  %v14665_v47 = vld [vmem:[#allocation2 + $0xb8] sm:$0xf] }
 0x1ae   : > { %12228 = vmatmul.mubr.msk.bf16.gmra.mrb[20].mxu0 %vm4722_vm15, %v11334_v62  ;;  %v3576_v62 = vshrl.u32 %v14552_v5, 16 }
 0x1af   : > { %12231 = vmatprep.mubr.msk.bf16.mxu0 %vm4722_vm15, %v11335_v52  ;;  %v14529_v52 = vld [vmem:[#allocation2 + $0x18] sm:$0xf] }
 0x1b0   : > { %v11356_v16 = vcombine.low %v14529_v52, %v14525_v46  ;;  %v3528_v27 = vshrl.u32 %v14529_v52, 16  ;;  %v3531_v15 = vshll.u32 %v14529_v52, 16  ;;  %v4564_v52 = vrot.slane %v4562_v33, 4 }
 0x1b2   : > { %v14620_v19 = vrot.slane %v3528_v27, 4  ;;  %v14663_v27 = vrot.slane %v3576_v62, 4 }
 0x1b6   : > { %12232 = vmatmul.mubr.msk.bf16.gmra.mrb[24].mxu0 %vm4722_vm15, %v11336_v53  ;;  %v14535_v53 = vld [vmem:[#allocation2 + $0x24] sm:$0xf] }
 0x1b7   : > { %12235 = vmatprep.mubr.msk.bf16.mxu0 %vm4722_vm15, %v11337_v7  ;;  %v11357_v58 = vcombine.low %v14535_v53, %v14527_v22  ;;  %v14548_v7 = vld [vmem:[#allocation2 + $0x34] sm:$0xf]  ;;  %v3552_v28 = vshrl.u32 %v14535_v53, 16  ;;  %v3555_v42 = vshll.u32 %v14535_v53, 16  ;;  %v3579_v53 = vshll.u32 %v14552_v5, 16 }
 0x1b9   : > { %v14661_v20 = vrot.slane %v3555_v42, 5  ;;  %v14669_v21 = vrot.slane %v3579_v53, 5  ;;  %v14680_v42 = vld [vmem:[#allocation2 + $0xb4] sm:$0xf] }
 0x1be   : > { %12236 = vmatmul.mubr.msk.bf16.gmra.mrb[28].mxu0 %vm4722_vm15, %v11338_v54  ;;  %v11358_v54 = vcombine.low %v14552_v5, %v14548_v7  ;;  %v3603_v5 = vshll.u32 %v14556_v55, 16 }
 0x1bf   : > { %12241 = vmatprep.mubr.msk.bf16.mxu0 %vm4722_vm15, %v11355_v36  ;;  %v3519_v36 = vrot.slane %v3517_v1, 4 }
 0x1c0   : > { %v14685_v62 = vrot.slane %v3603_v5, 5 }
 0x1c1   : > { %v3520_v1 = vor.u32 %v3519_v36, %v14633_v34  ;;  %v11369_v36 = vcombine.low %v14680_v42, %v14665_v47 }
 0x1c3   : > { %v3521_v41 = vrot.slane %v3520_v1, 4 }
 0x1c6   : > { %12242 = vmatmul.mubr.msk.bf16.vlgmr.msra.gmra.mrb[0].mxu0 %vm4722_vm15, %v11356_v16  ;;  %v14635_v16 = vrot.slane %v3531_v15, 5  ;;  %v3624_v15 = vshrl.u32 %v14566_v10, 16 }
 0x1c7   : > { %12274 = vmatpush3.bf16.msra.mxu0 %v5912_v29  ;;  %12245 = vmatprep.mubr.msk.bf16.mxu0 %vm4722_vm15, %v11357_v58  ;;  %v3541_v29 = vshrl.u32 %v14525_v46, 16  ;;  %v3565_v58 = vshrl.u32 %v14527_v22, 16 }
 0x1c8   : > { %12704 = vmatprep.subr.msk.bf16.mxu0 %vm4771_vm10, %v14542_v26  ;;  %v14699_v5 = vrot.slane %v3624_v15, 4  ;;  %v3534_v2 = vor.u32 %v14635_v16, %v14620_v19 }
 0x1c9   : > { %v3543_v53 = vrot.slane %v3541_v29, 4 }
 0x1ce   : > { %12246 = vmatmul.mubr.msk.bf16.gmra.mrb[4].mxu0 %vm4722_vm15, %v11358_v54  ;;  %v14695_v54 = vld [vmem:[#allocation2 + $0x2c] sm:$0x1] }
 0x1cf   : > { %12249 = vmatprep.mubr.msk.bf16.mxu0 %vm4722_vm15, %v11359_v39  ;;  %v3600_v39 = vshrl.u32 %v14556_v55, 16  ;;  %v3613_v55 = vshrl.u32 %v14550_v40, 16  ;;  %17786 = vst [vmem:[#allocation20_spill] sm:$0xff] %v14695_v54  ;;  %v3571_v15 = vshll.u32 %v14695_v54, 16 }
 0x1d1   : > { %v3573_v16 = vrot.slane %v3571_v15, 5 }
 0x1d6   : > { %12250 = vmatmul.mubr.msk.bf16.gmra.mrb[8].mxu0 %vm4722_vm15, %v11360_v60  ;;  %v14643_v60 = vld [vmem:[#allocation2 + $0x14] sm:$0x1] }
 0x1d7   : > { %12253 = vmatprep.mubr.msk.bf16.mxu0 %vm4722_vm15, %v11361_v30  ;;  %v14647_v30 = vsel %vm14301_vm5, %v11243_v45, %v4562_v33  ;;  %v14674_v45 = vld [vmem:[#allocation2 + $0xa8] sm:$0xf]  ;;  %v14676_v33 = vrot.slane %v3600_v39, 4 }
 0x1d8   : > { %17782 = vst [vmem:[#allocation16_spill] sm:$0xff] %v14647_v30  ;;  %v14708_v30 = vld [vmem:[#allocation2 + $0xc0] sm:$0xf] }
 0x1de   : > { %12254 = vmatmul.mubr.msk.bf16.gmra.mrb[12].mxu0 %vm4722_vm15, %v11362_v8  ;;  %v14651_v8 = vsel %vm14301_vm5, %v4564_v52, %v4565_v31  ;;  %v3523_v31 = vshll.u32 %v14643_v60, 16 }
 0x1df   : > { %12257 = vmatprep.mubr.msk.bf16.mxu0 %vm4722_vm15, %v11363_v17  ;;  %17783 = vst [vmem:[#allocation17_spill] sm:$0xff] %v14651_v8  ;;  %v14653_v17 = vrot.slane %v3552_v28, 4  ;;  %v3648_v8 = vshrl.u32 %v14570_v37, 16 }
 0x1e1   : > { %v14721_v29 = vrot.slane %v3648_v8, 4 }
 0x1e6   : > { %12258 = vmatmul.mubr.msk.bf16.gmra.mrb[16].mxu0 %vm4722_vm15, %v11364_v61  ;;  %v14656_v61 = vld [vmem:[#allocation2 + $0xac] sm:$0xf] }
 0x1e7   : > { %12261 = vmatprep.mubr.msk.bf16.mxu0 %vm4722_vm15, %v11365_v35  ;;  %17784 = vst [vmem:[#allocation18_spill] sm:$0xff] %v14656_v61  ;;  %v3537_v35 = vshll.u32 %v14525_v46, 16  ;;  %v11368_v28 = vcombine.low %v14674_v45, %v14656_v61 }
 0x1e9   : > { %v14691_v52 = vrot.slane %v3537_v35, 5  ;;  %v3651_v35 = vshll.u32 %v14570_v37, 16 }
 0x1eb   : > { %v14727_v54 = vrot.slane %v3651_v35, 5 }
 0x1ee   : > { %12262 = vmatmul.mubr.msk.bf16.gmra.mrb[20].mxu0 %vm4722_vm15, %v11366_v0  ;;  %v3627_v0 = vshll.u32 %v14566_v10, 16  ;;  %v14689_v10 = vld [vmem:[#allocation2 + $0x20] sm:$0x1] }
 0x1ef   : > { %12265 = vmatprep.mubr.msk.bf16.mxu0 %vm4722_vm15, %v11367_v24  ;;  %v3510_v24 = vor.u32 %v14615_v57, %v14613_v3  ;;  %17785 = vst [vmem:[#allocation19_spill] sm:$0xff] %v14689_v10  ;;  %v14697_v3 = vrot.slane %v3561_v25, 5  ;;  %v3567_v57 = vrot.slane %v3565_v58, 4  ;;  %v3547_v1 = vshll.u32 %v14689_v10, 16  ;;  %v14710_v25 = vld [vmem:[#allocation2 + $0xc4] sm:$0xf] }
 0x1f0   : > { %v14701_v38 = vrot.slane %v3627_v0, 5  ;;  %v3544_v58 = vor.u32 %v3543_v53, %v14691_v52  ;;  %v3585_v0 = vshll.u32 %v14548_v7, 16  ;;  %v11370_v37 = vcombine.low %v14708_v30, %v14710_v25 }
 0x1f1   : > { %v3511_v39 = vrot.slane %v3510_v24, 4  ;;  %v3568_v24 = vor.u32 %v3567_v57, %v14697_v3  ;;  %v3675_v53 = vshll.u32 %v14580_v59, 16  ;;  %v3558_v57 = vor.u32 %v14661_v20, %v14653_v17 }
 0x1f2   : > { %v3545_v8 = vrot.slane %v3544_v58, 4  ;;  %v14736_v22 = vrot.slane %v3585_v0, 5  ;;  %v17787_v59 = vshrl.u32 %v14548_v7, 16  ;;  %v3685_v17 = vshrl.u32 %v14576_v13, 16 }
 0x1f3   : > { %v3516_v10 = vsel %vm13590_vm0, %v3511_v39, %v14633_v34  ;;  %v3569_v19 = vrot.slane %v3568_v24, 4  ;;  %v3615_v34 = vrot.slane %v3613_v55, 4  ;;  %v14743_v39 = vrot.slane %v3672_v32, 4 }
 0x1f4   : > { %v3591_v46 = vrot.slane %v17787_v59, 4  ;;  %v3696_v20 = vshrl.u32 %v14584_v49, 16  ;;  %v14750_v58 = vrot.slane %v3675_v53, 5  ;;  %v3699_v0 = vshll.u32 %v14584_v49, 16 }
 0x1f5   : > { %v3633_v24 = vshll.u32 %v14562_v23, 16  ;;  %v3657_v49 = vshll.u32 %v14564_v48, 16  ;;  %v6205_v59 = vsel %vm4771_vm10, %v14542_v26, 0 }
 0x1f6   : > { %12266 = vmatmul.mubr.msk.bf16.gmra.mrb[24].mxu0 %vm4722_vm15, %v11368_v28  ;;  %v3525_v28 = vrot.slane %v3523_v31, 5  ;;  %v3609_v31 = vshll.u32 %v14550_v40, 16  ;;  %v14734_v40 = vld [vmem:[#allocation2 + $0x38] sm:$0x1] }
 0x1f7   : > { %12269 = vmatprep.mubr.msk.bf16.mxu0 %vm4722_vm15, %v11369_v36  ;;  %v3595_v15 = vshll.u32 %v14734_v40, 16 }
 0x1f8   : > { %v3526_v36 = vsel %vm13590_vm0, %v3521_v41, %v3525_v28  ;;  %v3549_v41 = vrot.slane %v3547_v1, 5  ;;  %v14741_v35 = vrot.slane %v3609_v31, 5  ;;  %v14748_v1 = vld [vmem:[#allocation2 + $0x44] sm:$0x1] }
 0x1f9   : > { %v11387_v28 = vcombine.low %v3516_v10, %v3526_v36  ;;  %v3535_v10 = vrot.slane %v3534_v2, 4  ;;  %17788 = vst [vmem:[#allocation21_spill] sm:$0xff] %v14748_v1  ;;  %v3592_v36 = vor.u32 %v3591_v46, %v14736_v22  ;;  %v3574_v2 = vsel %vm13590_vm0, %v3569_v19, %v3573_v16 }
 0x1fa   : > { %v3550_v32 = vsel %vm13590_vm0, %v3545_v8, %v3549_v41  ;;  %v3616_v31 = vor.u32 %v3615_v34, %v14741_v35  ;;  %v3619_v53 = vshll.u32 %v14748_v1, 16  ;;  %v3582_v46 = vor.u32 %v14669_v21, %v14663_v27  ;;  %v14784_v27 = vld [vmem:[%s17698_s2 + $0x18] sm:$0xf] }
 0x1fb   : > { %v3606_v41 = vor.u32 %v14685_v62, %v14676_v33  ;;  %v3597_v16 = vrot.slane %v3595_v15, 5  ;;  %v3593_v55 = vrot.slane %v3592_v36, 4  ;;  %v14777_v1 = vrot.slane %v3633_v24, 5  ;;  %v14787_v33 = vld [vmem:[#allocation2 + $0x50] sm:$0x1] }
 0x1fc   : > { %v3617_v26 = vrot.slane %v3616_v31, 4  ;;  %v3621_v21 = vrot.slane %v3619_v53, 5  ;;  %v14789_v62 = vrot.slane %v3657_v49, 5  ;;  %v14793_v15 = vrot.slane %v3696_v20, 4 }
 0x1fd   : > { %v3583_v36 = vrot.slane %v3582_v46, 4  ;;  %v3607_v24 = vrot.slane %v3606_v41, 4  ;;  %v14799_v31 = vrot.slane %v3699_v0, 5  ;;  %v3733_v53 = vshrl.u32 %v14590_v44, 16 }
 0x1fe   : > { %12270 = vmatmul.mubr.msk.bf16.gmra.mrb[28].mxu0 %vm4722_vm15, %v11370_v37  ;;  %v3559_v37 = vrot.slane %v3558_v57, 4  ;;  %v3720_v57 = vshrl.u32 %v14594_v43, 16  ;;  %v3744_v49 = vshrl.u32 %v14598_v51, 16  ;;  %v3643_v41 = vshll.u32 %v14787_v33, 16 }
 0x1ff   : > { %12275 = vmatprep.mubr.msk.bf16.mxu0 %vm4722_vm15, %v11387_v28  ;;  %v3540_v28 = vsel %vm13590_vm0, %v3535_v10, %v14691_v52  ;;  %v17789_v52 = vshrl.u32 %v14562_v23, 16  ;;  %v3622_v0 = vsel %vm13590_vm0, %v3617_v26, %v3621_v21  ;;  %v3687_v21 = vrot.slane %v3685_v17, 4  ;;  %v14843_v17 = vld [vmem:[#allocation2 + $0x74] sm:$0x1] }
 0x200   : > { %v11388_v8 = vcombine.low %v3540_v28, %v3550_v32  ;;  %v3564_v19 = vsel %vm13590_vm0, %v3559_v37, %v14697_v3  ;;  %v17790_v3 = vshrl.u32 %v14564_v48, 16  ;;  %v3723_v32 = vshll.u32 %v14594_v43, 16 }
 0x201   : > { %v11389_v34 = vcombine.low %v3564_v19, %v3574_v2  ;;  %v3639_v10 = vrot.slane %v17789_v52, 4  ;;  %v14797_v2 = vld [vmem:[#allocation2 + $0x5c] sm:$0x1]  ;;  %v3681_v28 = vshll.u32 %v14576_v13, 16  ;;  %v14806_v20 = vrot.slane %v3720_v57, 4 }
 0x202   : > { %v3663_v37 = vrot.slane %v17790_v3, 4  ;;  %v3598_v43 = vsel %vm13590_vm0, %v3593_v55, %v3597_v16  ;;  %v3705_v19 = vshll.u32 %v14578_v50, 16  ;;  %v3588_v57 = vsel %vm13590_vm0, %v3583_v36, %v14736_v22  ;;  %v14832_v22 = vld [vmem:[#allocation2 + $0x68] sm:$0x1] }
 0x203   : > { %v3640_v46 = vor.u32 %v3639_v10, %v14777_v1  ;;  %v3612_v55 = vsel %vm13590_vm0, %v3607_v24, %v14741_v35  ;;  %v3630_v16 = vor.u32 %v14701_v38, %v14699_v5  ;;  %v11390_v52 = vcombine.low %v3588_v57, %v3598_v43 }
 0x204   : > { %v3654_v10 = vor.u32 %v14727_v54, %v14721_v29  ;;  %v14829_v26 = vrot.slane %v3681_v28, 5  ;;  %v3747_v3 = vshll.u32 %v14598_v51, 16  ;;  %v3645_v13 = vrot.slane %v3643_v41, 5 }
 0x205   : > { %v14835_v24 = vrot.slane %v3705_v19, 5  ;;  %v17791_v38 = vshrl.u32 %v14578_v50, 16  ;;  %v14839_v54 = vrot.slane %v3744_v49, 4  ;;  %v3757_v29 = vshrl.u32 %v14592_v6, 16 }
 0x206   : > { %12276 = vmatmul.mubr.msk.bf16.vlgmr.msra.gmra.mrb[0].mxu0 %vm4722_vm15, %v11388_v8  ;;  %v3664_v8 = vor.u32 %v3663_v37, %v14789_v62  ;;  %v11391_v37 = vcombine.low %v3612_v55, %v3622_v0  ;;  %v3631_v51 = vrot.slane %v3630_v16, 4  ;;  %v3729_v28 = vshll.u32 %v14590_v44, 16 }
 0x207   : > { %12308 = vmatpush3.bf16.msra.mxu0 %v6205_v59  ;;  %12279 = vmatprep.mubr.msk.bf16.mxu0 %vm4722_vm15, %v11389_v34  ;;  %v3667_v59 = vshll.u32 %v14797_v2, 16  ;;  %v14817_v34 = vrot.slane %v3723_v32, 5  ;;  %v3641_v32 = vrot.slane %v3640_v46, 4  ;;  %v3711_v5 = vrot.slane %v17791_v38, 4 }
 0x208   : > { %12705 = vmatprep.subr.msk.bf16.mxu0 %vm4771_vm10, %v14784_v27  ;;  %v3665_v35 = vrot.slane %v3664_v8, 4  ;;  %v3768_v43 = vshrl.u32 %v14618_v56, 16  ;;  %v3655_v46 = vrot.slane %v3654_v10, 4  ;;  %v3688_v41 = vor.u32 %v3687_v21, %v14829_v26 }
 0x209   : > { %v3669_v36 = vrot.slane %v3667_v59, 5  ;;  %v3691_v0 = vshll.u32 %v14832_v22, 16  ;;  %v3749_v8 = vrot.slane %v3747_v3, 5  ;;  %v3771_v49 = vshll.u32 %v14618_v56, 16 }
 0x20a   : > { %v3646_v59 = vsel %vm13590_vm0, %v3641_v32, %v3645_v13  ;;  %v3678_v19 = vor.u32 %v14750_v58, %v14743_v39  ;;  %v3712_v55 = vor.u32 %v3711_v5, %v14835_v24  ;;  %v3715_v16 = vshll.u32 %v14843_v17, 16  ;;  %v14869_v32 = vld [vmem:[#allocation2 + $0x80] sm:$0x1] }
 0x20b   : > { %v3670_v57 = vsel %vm13590_vm0, %v3665_v35, %v3669_v36  ;;  %v3636_v10 = vsel %vm13590_vm0, %v3631_v51, %v14777_v1  ;;  %v3702_v56 = vor.u32 %v14799_v31, %v14793_v15  ;;  %v14864_v13 = vrot.slane %v3729_v28, 5 }
 0x20c   : > { %v3735_v21 = vrot.slane %v3733_v53, 4  ;;  %v11392_v39 = vcombine.low %v3636_v10, %v3646_v59  ;;  %v3660_v58 = vsel %vm13590_vm0, %v3655_v46, %v14789_v62  ;;  %v3689_v3 = vrot.slane %v3688_v41, 4  ;;  %v14881_v41 = vld [vmem:[#allocation2 + $0x8c] sm:$0x1] }
 0x20d   : > { %v3781_v35 = vshrl.u32 %v14605_v63, 16  ;;  %v3792_v36 = vshrl.u32 %v14624_v18, 16  ;;  %v11393_v1 = vcombine.low %v3660_v58, %v3670_v57  ;;  %v3679_v38 = vrot.slane %v3678_v19, 4 }
 0x20e   : > { %12280 = vmatmul.mubr.msk.bf16.gmra.mrb[4].mxu0 %vm4722_vm15, %v11390_v52  ;;  %v3753_v52 = vshll.u32 %v14592_v6, 16  ;;  %v3713_v15 = vrot.slane %v3712_v55, 4  ;;  %v3717_v31 = vrot.slane %v3715_v16, 5  ;;  %v3759_v5 = vrot.slane %v3757_v29, 4 }
 0x20f   : > { %12283 = vmatprep.mubr.msk.bf16.mxu0 %vm4722_vm15, %v11391_v37  ;;  %v3693_v37 = vrot.slane %v3691_v0, 5  ;;  %v14876_v51 = vrot.slane %v3768_v43, 4  ;;  %v3703_v62 = vrot.slane %v3702_v56, 4  ;;  %v3736_v28 = vor.u32 %v3735_v21, %v14864_v13 }
 0x210   : > { %v14874_v53 = vrot.slane %v3753_v52, 5  ;;  %v3739_v46 = vshll.u32 %v14869_v32, 16  ;;  %v3805_v0 = vshrl.u32 %v14610_v11, 16  ;;  %v3777_v19 = vshll.u32 %v14605_v63, 16 }
 0x211   : > { %v3694_v59 = vsel %vm13590_vm0, %v3689_v3, %v3693_v37  ;;  %v3801_v29 = vshll.u32 %v14610_v11, 16  ;;  %v3773_v43 = vrot.slane %v3771_v49, 5  ;;  %v3795_v57 = vshll.u32 %v14624_v18, 16 }
 0x212   : > { %v3684_v55 = vsel %vm13590_vm0, %v3679_v38, %v14829_v26  ;;  %v3726_v16 = vor.u32 %v14817_v34, %v14806_v20  ;;  %v3718_v52 = vsel %vm13590_vm0, %v3713_v15, %v3717_v31  ;;  %v3750_v10 = vor.u32 %v3749_v8, %v14839_v54  ;;  %v14902_v26 = vld [vmem:[#allocation2 + $0x98] sm:$0x1]  ;;  %v14906_v34 = vld [vmem:[#allocation2 + $0xa4] sm:$0x1] }
 0x213   : > { %v3760_v56 = vor.u32 %v3759_v5, %v14874_v53  ;;  %v3763_v21 = vshll.u32 %v14881_v41, 16  ;;  %v3708_v18 = vsel %vm13590_vm0, %v3703_v62, %v14835_v24  ;;  %v3737_v49 = vrot.slane %v3736_v28, 4 }
 0x214   : > { %v3741_v58 = vrot.slane %v3739_v46, 5  ;;  %v14904_v3 = vrot.slane %v3777_v19, 5  ;;  %v3783_v20 = vrot.slane %v3781_v35, 4  ;;  %v14908_v37 = vrot.slane %v3801_v29, 5 }
 0x215   : > { %v3807_v54 = vrot.slane %v3805_v0, 4  ;;  %v3794_v8 = vrot.slane %v3792_v36, 4  ;;  %v11395_v38 = vcombine.low %v3708_v18, %v3718_v52  ;;  %v3727_v15 = vrot.slane %v3726_v16, 4 }
 0x216   : > { %12284 = vmatmul.mubr.msk.bf16.gmra.mrb[8].mxu0 %vm4722_vm15, %v11392_v39  ;;  %v11394_v39 = vcombine.low %v3684_v55, %v3694_v59  ;;  %v3819_v31 = vshll.u32 %v14674_v45, 16  ;;  %v3751_v24 = vrot.slane %v3750_v10, 4  ;;  %v3761_v5 = vrot.slane %v3760_v56, 4 }
 0x217   : > { %12287 = vmatprep.mubr.msk.bf16.mxu0 %vm4722_vm15, %v11393_v1  ;;  %v3816_v1 = vshrl.u32 %v14674_v45, 16  ;;  %v3765_v62 = vrot.slane %v3763_v21, 5  ;;  %v3797_v28 = vrot.slane %v3795_v57, 5  ;;  %v3829_v35 = vshrl.u32 %v14656_v61, 16 }
 0x218   : > { %v3787_v46 = vshll.u32 %v14902_v26, 16  ;;  %v3811_v36 = vshll.u32 %v14906_v34, 16  ;;  %v3742_v0 = vsel %vm13590_vm0, %v3737_v49, %v3741_v58  ;;  %v3784_v59 = vor.u32 %v3783_v20, %v14904_v3 }
 0x219   : > { %v3808_v45 = vor.u32 %v3807_v54, %v14908_v37  ;;  %v3825_v19 = vshll.u32 %v14656_v61, 16  ;;  %v3840_v29 = vshrl.u32 %v14680_v42, 16  ;;  %v3843_v57 = vshll.u32 %v14680_v42, 16 }
 0x21a   : > { %v3853_v55 = vshrl.u32 %v14665_v47, 16  ;;  %v3732_v16 = vsel %vm13590_vm0, %v3727_v15, %v14864_v13  ;;  %v3756_v52 = vsel %vm13590_vm0, %v3751_v24, %v14874_v53  ;;  %v3766_v10 = vsel %vm13590_vm0, %v3761_v5, %v3765_v62  ;;  %v14935_v15 = vld [vmem:[#allocation2 + $0xb0] sm:$0x1] }
 0x21b   : > { %v3774_v56 = vor.u32 %v3773_v43, %v14876_v51  ;;  %v3849_v21 = vshll.u32 %v14665_v47, 16  ;;  %v3789_v18 = vrot.slane %v3787_v46, 5  ;;  %v3798_v42 = vor.u32 %v3797_v28, %v3794_v8  ;;  %v14939_v28 = vld [vmem:[#allocation2 + $0xbc] sm:$0x1] }
 0x21c   : > { %v3813_v49 = vrot.slane %v3811_v36, 5  ;;  %v3785_v58 = vrot.slane %v3784_v59, 4  ;;  %v3809_v20 = vrot.slane %v3808_v45, 4  ;;  %v3827_v54 = vrot.slane %v3825_v19, 5 }
 0x21d   : > { %v11397_v13 = vcombine.low %v3756_v52, %v3766_v10  ;;  %v3818_v61 = vrot.slane %v3816_v1, 4  ;;  %v3821_v53 = vrot.slane %v3819_v31, 5  ;;  %v3851_v24 = vrot.slane %v3849_v21, 5 }
 0x21e   : > { %12288 = vmatmul.mubr.msk.bf16.gmra.mrb[12].mxu0 %vm4722_vm15, %v11394_v39  ;;  %v11396_v39 = vcombine.low %v3732_v16, %v3742_v0  ;;  %v3855_v5 = vrot.slane %v3853_v55, 4  ;;  %v3842_v51 = vrot.slane %v3840_v29, 4  ;;  %v3845_v43 = vrot.slane %v3843_v57, 5 }
 0x21f   : > { %12291 = vmatprep.mubr.msk.bf16.mxu0 %vm4722_vm15, %v11395_v38  ;;  %v3831_v38 = vrot.slane %v3829_v35, 4  ;;  %v3775_v62 = vrot.slane %v3774_v56, 4  ;;  %v3799_v8 = vrot.slane %v3798_v42, 4  ;;  %v3790_v35 = vsel %vm13590_vm0, %v3785_v58, %v3789_v18 }
 0x220   : > { %v3814_v46 = vsel %vm13590_vm0, %v3809_v20, %v3813_v49  ;;  %v3835_v31 = vshll.u32 %v14935_v15, 16  ;;  %v3864_v36 = vshrl.u32 %v14708_v30, 16  ;;  %v3867_v0 = vshll.u32 %v14708_v30, 16 }
 0x221   : > { %v3832_v1 = vor.u32 %v3831_v38, %v3827_v54  ;;  %v3877_v59 = vshrl.u32 %v14710_v25, 16  ;;  %v3873_v45 = vshll.u32 %v14710_v25, 16  ;;  %v3856_v19 = vor.u32 %v3855_v5, %v3851_v24  ;;  %v14958_v38 = vld [vmem:[#allocation2 + $0xc8] sm:$0x1] }
 0x222   : > { %v3859_v29 = vshll.u32 %v14939_v28, 16  ;;  %v3780_v57 = vsel %vm13590_vm0, %v3775_v62, %v14904_v3  ;;  %v3804_v55 = vsel %vm13590_vm0, %v3799_v8, %v14908_v37  ;;  %v3822_v16 = vor.u32 %v3821_v53, %v3818_v61 }
 0x223   : > { %v3846_v52 = vor.u32 %v3845_v43, %v3842_v51  ;;  %v11398_v10 = vcombine.low %v3780_v57, %v3790_v35  ;;  %v11399_v56 = vcombine.low %v3804_v55, %v3814_v46  ;;  %v3833_v30 = vrot.slane %v3832_v1, 4  ;;  %v17792_v55 = vld [vmem:[#allocation11_spill] sm:$0xff] }
 0x224   : > { %v3837_v21 = vrot.slane %v3835_v31, 5  ;;  %v3869_v18 = vrot.slane %v3867_v0, 5  ;;  %v3875_v42 = vrot.slane %v3873_v45, 5  ;;  %v3879_v49 = vrot.slane %v3877_v59, 4  ;;  %v3887_v59 = vld [vmem:[#allocation2 + $0xc] sm:$0xe] }
 0x225   : > { %v3857_v58 = vrot.slane %v3856_v19, 4  ;;  %v3861_v20 = vrot.slane %v3859_v29, 5  ;;  %v3823_v3 = vrot.slane %v3822_v16, 4  ;;  %v3847_v37 = vrot.slane %v3846_v52, 4  ;;  %v334_v45 = vld [vmem:[#allocation2 + $0xcc] sm:$0x1] }
 0x226   : > { %12292 = vmatmul.mubr.msk.bf16.gmra.mrb[16].mxu0 %vm4722_vm15, %v11396_v39  ;;  %v3866_v39 = vrot.slane %v3864_v36, 4  ;;  %v3838_v61 = vsel %vm13590_vm0, %v3833_v30, %v3837_v21  ;;  %v3880_v53 = vor.u32 %v3879_v49, %v3875_v42  ;;  %v3883_v5 = vshll.u32 %v14958_v38, 16  ;;  %v17795_v49 = vld [vmem:[#allocation20_spill] sm:$0xff] }
 0x227   : > { %12295 = vmatprep.mubr.msk.bf16.mxu0 %vm4722_vm15, %v11397_v13  ;;  %v3862_v51 = vsel %vm13590_vm0, %v3857_v58, %v3861_v20  ;;  %v3953_v43 = vrot.slane %v14517_v12, 5  ;;  %v3828_v62 = vsel %vm13590_vm0, %v3823_v3, %v3827_v54  ;;  %v3852_v35 = vsel %vm13590_vm0, %v3847_v37, %v3851_v24 }
 0x228   : > { %v3870_v13 = vor.u32 %v3869_v18, %v3866_v39  ;;  %v11400_v8 = vcombine.low %v3828_v62, %v3838_v61  ;;  %v11401_v46 = vcombine.low %v3852_v35, %v3862_v51  ;;  %v3881_v31 = vrot.slane %v3880_v53, 4  ;;  %v17794_v39 = vld [vmem:[#allocation19_spill] sm:$0xff] }
 0x229   : > { %v3885_v36 = vrot.slane %v3883_v5, 5  ;;  %v3955_v0 = vrot.slane %v3953_v43, 4  ;;  %v3956_v12 = vrot.slane %v14643_v60, 5  ;;  %v335_v54 = vsel %vm13339_vm7, 0, %v334_v45  ;;  %v3890_v35 = vld [vmem:[#allocation2 + $0x30] sm:$0xe] }
 0x22a   : > { %v3871_v1 = vrot.slane %v3870_v13, 4  ;;  %336 = vst [vmem:[#allocation2 + $0xcc] sm:$0x1] %v335_v54  ;;  %v11227_v29 = vrot.slane %v3887_v59, 9  ;;  %v3960_v16 = vrot.slane %v17792_v55, 5  ;;  %v3963_v18 = vrot.slane %v17794_v39, 5 }
 0x22b   : > { %v3886_v24 = vsel %vm13590_vm0, %v3881_v31, %v3885_v36  ;;  %v3957_v57 = vsel %vm14301_vm5, %v3955_v0, %v3956_v12  ;;  %v3970_v58 = vrot.slane %v17795_v49, 5  ;;  %v3974_v51 = vrot.slane %v14548_v7, 5  ;;  %v3891_v0 = vld [vmem:[#allocation2 + $0x3c] sm:$0xe]  ;;  %v17797_v7 = vld [vmem:[#allocation21_spill] sm:$0xff] }
 0x22c   : > { %v3876_v19 = vsel %vm13590_vm0, %v3871_v1, %v3875_v42  ;;  %v3954_v60 = vsel %vm14301_vm5, %v11227_v29, %v3953_v43  ;;  %v3889_v42 = vld [vmem:[#allocation2 + $0x24] sm:$0xe]  ;;  %v3962_v3 = vrot.slane %v3960_v16, 4  ;;  %v6514_v62 = vsel %vm4771_vm10, %v14784_v27, 0  ;;  %v15006_v59 = vld [vmem:[%s17698_s2 + $0x1c] sm:$0xf] }
 0x22d   : > { %v11402_v52 = vcombine.low %v3876_v19, %v3886_v24  ;;  %v11419_v21 = vcombine.low %v3954_v60, %v3957_v57  ;;  %v11229_v37 = vrot.slane %v3889_v42, 9  ;;  %v3977_v36 = vrot.slane %v14734_v40, 5 }
 0x22e   : > { %12296 = vmatmul.mubr.msk.bf16.gmra.mrb[20].mxu0 %vm4722_vm15, %v11398_v10  ;;  %v3888_v10 = vld [vmem:[#allocation2 + $0x18] sm:$0xe]  ;;  %v3964_v13 = vsel %vm14301_vm5, %v3962_v3, %v3963_v18  ;;  %v3984_v45 = vrot.slane %v17797_v7, 5  ;;  %v11230_v27 = vrot.slane %v3890_v35, 9  ;;  %v3976_v12 = vrot.slane %v3974_v51, 4 }
 0x22f   : > { %12299 = vmatprep.mubr.msk.bf16.mxu0 %vm4722_vm15, %v11399_v56  ;;  %v17793_v56 = vld [vmem:[#allocation12_spill] sm:$0xff]  ;;  %v11228_v20 = vrot.slane %v3888_v10, 9  ;;  %v11231_v54 = vrot.slane %v3891_v0, 9  ;;  %v3988_v57 = vrot.slane %v14562_v23, 5  ;;  %v3995_v60 = vrot.slane %v14564_v48, 5 }
 0x230   : > { %v3967_v30 = vrot.slane %v17793_v56, 5  ;;  %v3978_v40 = vsel %vm14301_vm5, %v3976_v12, %v3977_v36  ;;  %v3975_v29 = vsel %vm14301_vm5, %v11230_v27, %v3974_v51  ;;  %v3991_v56 = vrot.slane %v14787_v33, 5  ;;  %v3896_v36 = vld [vmem:[#allocation2 + $0x78] sm:$0xe]  ;;  %v3897_v27 = vld [vmem:[#allocation2 + $0x84] sm:$0xe] }
 0x231   : > { %v3961_v5 = vsel %vm14301_vm5, %v11228_v20, %v3960_v16  ;;  %v11422_v55 = vcombine.low %v3975_v29, %v3978_v40  ;;  %v3990_v18 = vrot.slane %v3988_v57, 4  ;;  %v3997_v42 = vrot.slane %v3995_v60, 4 }
 0x232   : > { %v3969_v61 = vrot.slane %v3967_v30, 4  ;;  %v11420_v43 = vcombine.low %v3961_v5, %v3964_v13  ;;  %v3895_v5 = vld [vmem:[#allocation2 + $0x6c] sm:$0xe]  ;;  %v4012_v51 = vrot.slane %v14843_v17, 5  ;;  %v4023_v0 = vrot.slane %v14592_v6, 5 }
 0x233   : > { %v3992_v49 = vsel %vm14301_vm5, %v3990_v18, %v3991_v56  ;;  %v4026_v12 = vrot.slane %v14881_v41, 5  ;;  %v4030_v29 = vrot.slane %v14605_v63, 5  ;;  %v4040_v56 = vrot.slane %v14906_v34, 5 }
 0x234   : > { %v3971_v53 = vsel %vm14301_vm5, %v3969_v61, %v3970_v58  ;;  %v17798_v58 = vld [vmem:[#allocation14_spill] sm:$0xff]  ;;  %v4009_v61 = vrot.slane %v14578_v50, 5  ;;  %v4025_v40 = vrot.slane %v4023_v0, 4 }
 0x235   : > { %v4002_v20 = vrot.slane %v17798_v58, 5 }
 0x236   : > { %12300 = vmatmul.mubr.msk.bf16.gmra.mrb[24].mxu0 %vm4722_vm15, %v11400_v8  ;;  %v3968_v8 = vsel %vm14301_vm5, %v11229_v37, %v3967_v30  ;;  %v3893_v30 = vld [vmem:[#allocation2 + $0x54] sm:$0xe]  ;;  %v3894_v37 = vld [vmem:[#allocation2 + $0x60] sm:$0xe]  ;;  %v4011_v35 = vrot.slane %v4009_v61, 4  ;;  %v4027_v6 = vsel %vm14301_vm5, %v4025_v40, %v4026_v12 }
 0x237   : > { %12303 = vmatprep.mubr.msk.bf16.mxu0 %vm4722_vm15, %v11401_v46  ;;  %v17796_v46 = vld [vmem:[#allocation13_spill] sm:$0xff]  ;;  %v11421_v31 = vcombine.low %v3968_v8, %v3971_v53  ;;  %v11233_v23 = vrot.slane %v3893_v30, 9  ;;  %v4005_v53 = vrot.slane %v14832_v22, 5  ;;  %v11235_v8 = vrot.slane %v3895_v5, 9 }
 0x238   : > { %v3981_v1 = vrot.slane %v17796_v46, 5  ;;  %v4013_v50 = vsel %vm14301_vm5, %v4011_v35, %v4012_v51  ;;  %v4058_v51 = vrot.slane %v14710_v25, 5  ;;  %v390_v25 = vld [vmem:[#allocation2 + $0xd4] sm:$0x1]  ;;  %v15111_v12 = vld [vmem:[#allocation2 + $0x24] sm:$0xf] }
 0x239   : > { %v4010_v17 = vsel %vm14301_vm5, %v11235_v8, %v4009_v61 }
 0x23a   : > { %v3983_v19 = vrot.slane %v3981_v1, 4  ;;  %v3982_v16 = vsel %vm14301_vm5, %v11231_v54, %v3981_v1  ;;  %v4016_v1 = vrot.slane %v14590_v44, 5  ;;  %v11427_v7 = vcombine.low %v4010_v17, %v4013_v50 }
 0x23b   : > { %v11236_v54 = vrot.slane %v3896_v36, 9  ;;  %v11237_v44 = vrot.slane %v3897_v27, 9  ;;  %v4061_v50 = vrot.slane %v14958_v38, 5  ;;  %v15109_v27 = vld [vmem:[#allocation2 + $0x34] sm:$0xf] }
 0x23c   : > { %v3985_v24 = vsel %vm14301_vm5, %v3983_v19, %v3984_v45  ;;  %v4019_v45 = vrot.slane %v14869_v32, 5  ;;  %v4018_v19 = vrot.slane %v4016_v1, 4 }
 0x23d   : > { %v11423_v10 = vcombine.low %v3982_v16, %v3985_v24  ;;  %v4017_v32 = vsel %vm14301_vm5, %v11236_v54, %v4016_v1  ;;  %v4024_v41 = vsel %vm14301_vm5, %v11237_v44, %v4023_v0  ;;  %v4037_v16 = vrot.slane %v14610_v11, 5  ;;  %v15101_v0 = vld [vmem:[#allocation2 + $0x18] sm:$0xf]  ;;  %v15117_v44 = vld [vmem:[#allocation2 + $0x30] sm:$0xf] }
 0x23e   : > { %12304 = vmatmul.mubr.msk.bf16.gmra.mrb[28].mxu0 %vm4722_vm15, %v11402_v52  ;;  %v3892_v52 = vld [vmem:[#allocation2 + $0x48] sm:$0xe]  ;;  %v4020_v24 = vsel %vm14301_vm5, %v4018_v19, %v4019_v45  ;;  %v391_v1 = vsel %vm13119_vm2, 0, %v390_v25  ;;  %v6807_v19 = vsel %vm4771_vm10, %v15006_v59, 0  ;;  %v11453_v40 = vcombine.low %v15117_v44, %v15109_v27 }
 0x23f   : > { %12309 = vmatprep.mubr.msk.bf16.mxu0 %vm4722_vm15, %v11419_v21  ;;  %v3998_v21 = vrot.slane %v14797_v2, 5  ;;  %v11232_v39 = vrot.slane %v3892_v52, 9  ;;  %v3996_v2 = vsel %vm14301_vm5, %v11233_v23, %v3995_v60  ;;  %v11429_v52 = vcombine.low %v4024_v41, %v4027_v6  ;;  %v17799_v23 = vld [vmem:[#allocation18_spill] sm:$0xff]  ;;  %392 = vst [vmem:[#allocation2 + $0xd4] sm:$0x1] %v391_v1 }
 0x240   : > { %v4033_v60 = vrot.slane %v14902_v26, 5  ;;  %v15107_v45 = vld [vmem:[#allocation2 + $0x28] sm:$0xf]  ;;  %v15130_v6 = vld [vmem:[#allocation2 + $0x40] sm:$0xf] }
 0x241   : > { %v3999_v48 = vsel %vm14301_vm5, %v3997_v42, %v3998_v21  ;;  %v3989_v33 = vsel %vm14301_vm5, %v11232_v39, %v3988_v57  ;;  %v11428_v57 = vcombine.low %v4017_v32, %v4020_v24  ;;  %v4032_v21 = vrot.slane %v4030_v29, 4  ;;  %v15124_v24 = vld [vmem:[%s17698_s2 + $0x20] sm:$0xf]  ;;  %17802 = vst [vmem:[#allocation11_spill] sm:$0xff] %v15130_v6  ;;  %v15134_v32 = vld [vmem:[#allocation2 + $0x3c] sm:$0xf] }
 0x242   : > { %v11424_v3 = vcombine.low %v3989_v33, %v3992_v49  ;;  %v11425_v13 = vcombine.low %v3996_v2, %v3999_v48  ;;  %v4039_v39 = vrot.slane %v4037_v16, 4  ;;  %v4044_v42 = vrot.slane %v17799_v23, 5  ;;  %v3900_v48 = vld [vmem:[#allocation2 + $0xa8] sm:$0xe]  ;;  %v15174_v23 = vld [vmem:[#allocation2 + $0x94] sm:$0xf] }
 0x243   : > { %v4034_v18 = vsel %vm14301_vm5, %v4032_v21, %v4033_v60  ;;  %v4051_v33 = vrot.slane %v14665_v47, 5  ;;  %v4054_v2 = vrot.slane %v14939_v28, 5  ;;  %v11452_v54 = vcombine.low %v15111_v12, %v15107_v45  ;;  %v15160_v21 = vld [vmem:[#allocation2 + $0x7c] sm:$0xf] }
 0x244   : > { %v4041_v11 = vsel %vm14301_vm5, %v4039_v39, %v4040_v56  ;;  %v4046_v61 = vrot.slane %v4044_v42, 4 }
 0x246   : > { %12310 = vmatmul.mubr.msk.bf16.vlgmr.msra.gmra.mrb[0].mxu0 %vm4722_vm15, %v11420_v43  ;;  %v11234_v43 = vrot.slane %v3894_v37, 9  ;;  %v11240_v37 = vrot.slane %v3900_v48, 9 }
 0x247   : > { %12342 = vmatpush3.bf16.msra.mxu0 %v6514_v62  ;;  %12313 = vmatprep.mubr.msk.bf16.mxu0 %vm4722_vm15, %v11421_v31  ;;  %v4004_v62 = vrot.slane %v4002_v20, 4 }
 0x248   : > { %12706 = vmatprep.subr.msk.bf16.mxu0 %vm4771_vm10, %v15006_v59  ;;  %v4003_v22 = vsel %vm14301_vm5, %v11234_v43, %v4002_v20  ;;  %v4047_v20 = vrot.slane %v14935_v15, 5  ;;  %v3902_v15 = vld [vmem:[#allocation2 + $0xc0] sm:$0xe]  ;;  %v4045_v43 = vsel %vm14301_vm5, %v11240_v37, %v4044_v42  ;;  %v15132_v59 = vld [vmem:[#allocation2 + $0x4c] sm:$0xf] }
 0x249   : > { %v4006_v46 = vsel %vm14301_vm5, %v4004_v62, %v4005_v53  ;;  %v4053_v53 = vrot.slane %v4051_v33, 4  ;;  %v11242_v35 = vrot.slane %v3902_v15, 9  ;;  %17803 = vst [vmem:[#allocation12_spill] sm:$0xff] %v15132_v59  ;;  %v15176_v42 = vld [vmem:[#allocation2 + $0x84] sm:$0xf] }
 0x24a   : > { %v11426_v31 = vcombine.low %v4003_v22, %v4006_v46  ;;  %v4048_v5 = vsel %vm14301_vm5, %v4046_v61, %v4047_v20  ;;  %v4060_v46 = vrot.slane %v4058_v51, 4  ;;  %v4116_v20 = vshll.u32 %v15101_v0, 16  ;;  %v15190_v37 = vld [vmem:[#allocation2 + $0xac] sm:$0xf] }
 0x24b   : > { %v4055_v47 = vsel %vm14301_vm5, %v4053_v53, %v4054_v2  ;;  %v11432_v62 = vcombine.low %v4045_v43, %v4048_v5  ;;  %v4140_v53 = vshll.u32 %v15111_v12, 16  ;;  %v15194_v5 = vld [vmem:[#allocation2 + $0x9c] sm:$0xf]  ;;  %v15200_v43 = vld [vmem:[#allocation2 + $0xa8] sm:$0xf] }
 0x24c   : > { %v4062_v17 = vsel %vm14301_vm5, %v4060_v46, %v4061_v50  ;;  %v4188_v46 = vshll.u32 %v15134_v32, 16 }
 0x24e   : > { %12314 = vmatmul.mubr.msk.bf16.gmra.mrb[4].mxu0 %vm4722_vm15, %v11422_v55  ;;  %v3898_v55 = vld [vmem:[#allocation2 + $0x90] sm:$0xe] }
 0x24f   : > { %12317 = vmatprep.mubr.msk.bf16.mxu0 %vm4722_vm15, %v11423_v10  ;;  %v3899_v10 = vld [vmem:[#allocation2 + $0x9c] sm:$0xe]  ;;  %v11238_v30 = vrot.slane %v3898_v55, 9  ;;  %v15144_v55 = vld [vmem:[#allocation2 + $0x58] sm:$0xf] }
 0x250   : > { %v11239_v63 = vrot.slane %v3899_v10, 9  ;;  %v15152_v10 = vld [vmem:[#allocation2 + $0x60] sm:$0xf] }
 0x251   : > { %v4031_v26 = vsel %vm14301_vm5, %v11238_v30, %v4030_v29  ;;  %v11454_v29 = vcombine.low %v15134_v32, %v15130_v6  ;;  %v15158_v30 = vld [vmem:[#allocation2 + $0x70] sm:$0xf] }
 0x252   : > { %v11430_v49 = vcombine.low %v4031_v26, %v4034_v18  ;;  %v4038_v34 = vsel %vm14301_vm5, %v11239_v63, %v4037_v16  ;;  %v15146_v16 = vld [vmem:[#allocation2 + $0x64] sm:$0xf]  ;;  %v15162_v63 = vld [vmem:[#allocation2 + $0x6c] sm:$0xf]  ;;  %v15166_v18 = vld [vmem:[#allocation2 + $0x78] sm:$0xf] }
 0x253   : > { %v11431_v58 = vcombine.low %v4038_v34, %v4041_v11  ;;  %v11457_v56 = vcombine.low %v15152_v10, %v15146_v16  ;;  %v11458_v39 = vcombine.low %v15162_v63, %v15158_v30  ;;  %v11459_v11 = vcombine.low %v15166_v18, %v15160_v21  ;;  %v15172_v26 = vld [vmem:[#allocation2 + $0x88] sm:$0xf]  ;;  %v15180_v34 = vld [vmem:[#allocation2 + $0x90] sm:$0xf] }
 0x254   : > { %v11461_v48 = vcombine.low %v15180_v34, %v15174_v23 }
 0x256   : > { %12318 = vmatmul.mubr.msk.bf16.gmra.mrb[8].mxu0 %vm4722_vm15, %v11424_v3  ;;  %v3901_v3 = vld [vmem:[#allocation2 + $0xb4] sm:$0xe] }
 0x257   : > { %12321 = vmatprep.mubr.msk.bf16.mxu0 %vm4722_vm15, %v11425_v13  ;;  %v11241_v13 = vrot.slane %v3901_v3, 9  ;;  %v12947_v3 = vld [vmem:[#allocation2 + $0x1c] sm:$0xf] }
 0x258   : > { %v4126_v2 = vshrl.u32 %v12947_v3, 16  ;;  %v4122_v61 = vshll.u32 %v12947_v3, 16 }
 0x259   : > { %v4052_v28 = vsel %vm14301_vm5, %v11241_v13, %v4051_v33  ;;  %v4113_v33 = vshrl.u32 %v15101_v0, 16  ;;  %v4137_v13 = vshrl.u32 %v15111_v12, 16  ;;  %v4170_v12 = vshll.u32 %v15109_v27, 16 }
 0x25a   : > { %v11433_v8 = vcombine.low %v4052_v28, %v4055_v47  ;;  %v4164_v47 = vshll.u32 %v15117_v44, 16  ;;  %v4185_v28 = vshrl.u32 %v15134_v32, 16  ;;  %v15207_v50 = vrot.slane %v4122_v61, 5  ;;  %v15227_v32 = vld [vmem:[#allocation2 + $0xb8] sm:$0xf] }
 0x25b   : > { %v4128_v25 = vrot.slane %v4126_v2, 4  ;;  %v15209_v1 = vrot.slane %v4137_v13, 4  ;;  %v15242_v2 = vld [vmem:[#allocation2 + $0xc0] sm:$0xf]  ;;  %v15244_v61 = vld [vmem:[#allocation2 + $0xc4] sm:$0xf] }
 0x25c   : > { %v15246_v13 = vrot.slane %v4170_v12, 5 }
 0x25e   : > { %12322 = vmatmul.mubr.msk.bf16.gmra.mrb[12].mxu0 %vm4722_vm15, %v11426_v31  ;;  %v4059_v31 = vsel %vm14301_vm5, %v11242_v35, %v4058_v51  ;;  %v4161_v51 = vshrl.u32 %v15117_v44, 16  ;;  %v4118_v35 = vrot.slane %v4116_v20, 5 }
 0x25f   : > { %12325 = vmatprep.mubr.msk.bf16.mxu0 %vm4722_vm15, %v11427_v7  ;;  %v11434_v36 = vcombine.low %v4059_v31, %v4062_v17  ;;  %v17801_v7 = vld [vmem:[#allocation15_spill] sm:$0xff]  ;;  %v15211_v31 = vrot.slane %v4140_v53, 5  ;;  %v4150_v17 = vshrl.u32 %v15107_v45, 16 }
 0x260   : > { %v11451_v38 = vcombine.low %v15101_v0, %v17801_v7  ;;  %v15216_v0 = vrot.slane %v4161_v51, 4  ;;  %v15218_v7 = vrot.slane %v4164_v47, 5 }
 0x266   : > { %12326 = vmatmul.mubr.msk.bf16.gmra.mrb[16].mxu0 %vm4722_vm15, %v11428_v57  ;;  %v15138_v57 = vld [vmem:[#allocation2 + $0x48] sm:$0xf] }
 0x267   : > { %12329 = vmatprep.mubr.msk.bf16.mxu0 %vm4722_vm15, %v11429_v52  ;;  %v11455_v41 = vcombine.low %v15138_v57, %v15132_v59  ;;  %v15148_v52 = vld [vmem:[#allocation2 + $0x54] sm:$0xf]  ;;  %v4209_v44 = vshrl.u32 %v15138_v57, 16 }
 0x268   : > { %v11456_v60 = vcombine.low %v15148_v52, %v15144_v55 }
 0x269   : > { %v15248_v51 = vrot.slane %v4209_v44, 4 }
 0x26e   : > { %12330 = vmatmul.mubr.msk.bf16.gmra.mrb[20].mxu0 %vm4722_vm15, %v11430_v49  ;;  %v11460_v49 = vcombine.low %v15176_v42, %v15172_v26 }
 0x26f   : > { %12333 = vmatprep.mubr.msk.bf16.mxu0 %vm4722_vm15, %v11431_v58  ;;  %v15187_v58 = vld [vmem:[#allocation2 + $0xa0] sm:$0xf] }
 0x270   : > { %v11462_v15 = vcombine.low %v15194_v5, %v15187_v58 }
 0x276   : > { %12334 = vmatmul.mubr.msk.bf16.gmra.mrb[24].mxu0 %vm4722_vm15, %v11432_v62  ;;  %v4115_v62 = vrot.slane %v4113_v33, 4 }
 0x277   : > { %12337 = vmatprep.mubr.msk.bf16.mxu0 %vm4722_vm15, %v11433_v8  ;;  %v11463_v8 = vcombine.low %v15200_v43, %v15190_v37 }
 0x278   : > { %v4119_v33 = vor.u32 %v4118_v35, %v4115_v62  ;;  %v11465_v62 = vcombine.low %v15242_v2, %v15244_v61  ;;  %v4257_v35 = vshrl.u32 %v15152_v10, 16 }
 0x27e   : > { %12338 = vmatmul.mubr.msk.bf16.gmra.mrb[28].mxu0 %vm4722_vm15, %v11434_v36  ;;  %v4146_v36 = vshll.u32 %v15107_v45, 16 }
 0x27f   : > { %12343 = vmatprep.mubr.msk.bf16.mxu0 %vm4722_vm15, %v11451_v38  ;;  %v4174_v38 = vshrl.u32 %v15109_v27, 16 }
 0x280   : > { %v15238_v20 = vrot.slane %v4146_v36, 5  ;;  %v15263_v36 = vld [vmem:[#allocation2 + $0xd0] sm:$0xf] }
 0x281   : > { %v4176_v53 = vrot.slane %v4174_v38, 4 }
 0x286   : > { %12344 = vmatmul.mubr.msk.bf16.vlgmr.msra.gmra.mrb[0].mxu0 %vm4722_vm15, %v11452_v54  ;;  %v15222_v54 = vrot.slane %v4185_v28, 4  ;;  %v15255_v28 = vld [vmem:[#allocation2 + $0x38] sm:$0x1] }
 0x287   : > { %12376 = vmatpush3.bf16.msra.mxu0 %v6807_v19  ;;  %12347 = vmatprep.mubr.msk.bf16.mxu0 %vm4722_vm15, %v11453_v40  ;;  %v4198_v19 = vshrl.u32 %v15130_v6, 16  ;;  %v4212_v40 = vshll.u32 %v15138_v57, 16  ;;  %v4152_v57 = vrot.slane %v4150_v17, 4  ;;  %17805 = vst [vmem:[#allocation20_spill] sm:$0xff] %v15255_v28  ;;  %v15261_v17 = vld [vmem:[#allocation2 + $0xcc] sm:$0xf] }
 0x288   : > { %12707 = vmatprep.subr.msk.bf16.mxu0 %vm4771_vm10, %v15124_v24 }
 0x289   : > { %v15250_v47 = vrot.slane %v4212_v40, 5  ;;  %v4153_v38 = vor.u32 %v4152_v57, %v15238_v20  ;;  %v4177_v40 = vor.u32 %v4176_v53, %v15246_v13  ;;  %v11466_v57 = vcombine.low %v15261_v17, %v15263_v36 }
 0x28a   : > { %v4143_v53 = vor.u32 %v15211_v31, %v15209_v1  ;;  %v4270_v1 = vshrl.u32 %v15146_v16, 16 }
 0x28b   : > { %v4154_v22 = vrot.slane %v4153_v38, 4 }
 0x28e   : > { %12348 = vmatmul.mubr.msk.bf16.gmra.mrb[4].mxu0 %vm4722_vm15, %v11454_v29  ;;  %v15229_v29 = vrot.slane %v4188_v46, 5 }
 0x28f   : > { %12351 = vmatprep.mubr.msk.bf16.mxu0 %vm4722_vm15, %v11455_v41  ;;  %v4222_v41 = vshrl.u32 %v15132_v59, 16 }
 0x296   : > { %12352 = vmatmul.mubr.msk.bf16.gmra.mrb[8].mxu0 %vm4722_vm15, %v11456_v60  ;;  %v4129_v60 = vor.u32 %v4128_v25, %v15207_v50 }
 0x297   : > { %12355 = vmatprep.mubr.msk.bf16.mxu0 %vm4722_vm15, %v11457_v56  ;;  %v12948_v56 = vld [vmem:[#allocation2 + $0x20] sm:$0x1] }
 0x298   : > { %v4130_v46 = vrot.slane %v4129_v60, 4  ;;  %v4194_v60 = vshll.u32 %v15130_v6, 16  ;;  %v4178_v6 = vrot.slane %v4177_v40, 4 }
 0x29e   : > { %12356 = vmatmul.mubr.msk.bf16.gmra.mrb[12].mxu0 %vm4722_vm15, %v11458_v39  ;;  %v4132_v39 = vshll.u32 %v12948_v56, 16  ;;  %v4180_v56 = vshll.u32 %v15255_v28, 16  ;;  %v15289_v28 = vld [vmem:[#allocation2 + $0x44] sm:$0x1] }
 0x29f   : > { %12359 = vmatprep.mubr.msk.bf16.mxu0 %vm4722_vm15, %v11459_v11  ;;  %v15233_v11 = vld [vmem:[#allocation2 + $0x2c] sm:$0x1] }
 0x2a0   : > { %17804 = vst [vmem:[#allocation19_spill] sm:$0xff] %v15233_v11  ;;  %v4134_v25 = vrot.slane %v4132_v39, 5  ;;  %v4156_v12 = vshll.u32 %v15233_v11, 16  ;;  %v4182_v14 = vrot.slane %v4180_v56, 5  ;;  %v15291_v11 = vrot.slane %v4194_v60, 5 }
 0x2a1   : > { %v4204_v56 = vshll.u32 %v15289_v28, 16 }
 0x2a2   : > { %v4183_v60 = vsel %vm13590_vm0, %v4178_v6, %v4182_v14  ;;  %v4191_v6 = vor.u32 %v15229_v29, %v15222_v54  ;;  %v4272_v29 = vrot.slane %v4270_v1, 4 }
 0x2a6   : > { %12360 = vmatmul.mubr.msk.bf16.gmra.mrb[16].mxu0 %vm4722_vm15, %v11460_v49  ;;  %v4233_v49 = vshrl.u32 %v15148_v52, 16 }
 0x2a7   : > { %12363 = vmatprep.mubr.msk.bf16.mxu0 %vm4722_vm15, %v11461_v48  ;;  %v15236_v48 = vld [vmem:[#allocation2 + $0xb4] sm:$0xf] }
 0x2a8   : > { %v11464_v3 = vcombine.low %v15236_v48, %v15227_v32  ;;  %v15267_v44 = vrot.slane %v4233_v49, 4  ;;  %v4135_v49 = vsel %vm13590_vm0, %v4130_v46, %v4134_v25  ;;  %v4200_v46 = vrot.slane %v4198_v19, 4  ;;  %v15294_v25 = vld [vmem:[#allocation2 + $0x50] sm:$0x1] }
 0x2ae   : > { %12364 = vmatmul.mubr.msk.bf16.gmra.mrb[20].mxu0 %vm4722_vm15, %v11462_v15  ;;  %v4236_v15 = vshll.u32 %v15148_v52, 16  ;;  %v4120_v52 = vrot.slane %v4119_v33, 4  ;;  %v4218_v33 = vshll.u32 %v15132_v59, 16  ;;  %v4158_v59 = vrot.slane %v4156_v12, 5  ;;  %v406_v12 = vld [vmem:[#allocation3 + $0x18] sm:$0x1] }
 0x2af   : > { %12367 = vmatprep.mubr.msk.bf16.mxu0 %vm4722_vm15, %v11463_v8  ;;  %v4167_v8 = vor.u32 %v15218_v7, %v15216_v0  ;;  %v15298_v7 = vrot.slane %v4257_v35, 4 }
 0x2b0   : > { %v15272_v39 = vrot.slane %v4236_v15, 5  ;;  %v4284_v15 = vshll.u32 %v15162_v63, 16  ;;  %v15296_v0 = vrot.slane %v4218_v33, 5  ;;  %v4159_v35 = vsel %vm13590_vm0, %v4154_v22, %v4158_v59 }
 0x2b1   : > { %v4168_v38 = vrot.slane %v4167_v8, 4  ;;  %v4201_v8 = vor.u32 %v4200_v46, %v15291_v11  ;;  %v4215_v46 = vor.u32 %v15250_v47, %v15248_v51  ;;  %v4318_v51 = vshrl.u32 %v15160_v21, 16  ;;  %v15347_v47 = vld [vmem:[#allocation2 + $0x68] sm:$0x1] }
 0x2b2   : > { %v15305_v19 = vrot.slane %v4284_v15, 5 }
 0x2b3   : > { %v4173_v14 = vsel %vm13590_vm0, %v4168_v38, %v15246_v13 }
 0x2b4   : > { %v11485_v15 = vcombine.low %v4173_v14, %v4183_v60  ;;  %v4329_v60 = vshrl.u32 %v15176_v42, 16  ;;  %v4314_v14 = vshll.u32 %v15160_v21, 16 }
 0x2b6   : > { %12368 = vmatmul.mubr.msk.bf16.gmra.mrb[24].mxu0 %vm4722_vm15, %v11464_v3  ;;  %v4260_v3 = vshll.u32 %v15152_v10, 16  ;;  %v4125_v10 = vsel %vm13590_vm0, %v4120_v52, %v15207_v50  ;;  %v4144_v52 = vrot.slane %v4143_v53, 4  ;;  %v4308_v53 = vshll.u32 %v15166_v18, 16 }
 0x2b7   : > { %12371 = vmatprep.mubr.msk.bf16.mxu0 %vm4722_vm15, %v11465_v62  ;;  %v4281_v62 = vshrl.u32 %v15162_v63, 16  ;;  %v11483_v31 = vcombine.low %v4125_v10, %v4135_v49  ;;  %v4224_v63 = vrot.slane %v4222_v41, 4  ;;  %v407_v41 = vsel %vm13339_vm7, 0, %v406_v12 }
 0x2b8   : > { %v15300_v50 = vrot.slane %v4260_v3, 5  ;;  %v4242_v3 = vshll.u32 %v15144_v55, 16  ;;  %408 = vst [vmem:[#allocation3 + $0x18] sm:$0x1] %v407_v41  ;;  %v4266_v49 = vshll.u32 %v15146_v16, 16  ;;  %v4149_v22 = vsel %vm13590_vm0, %v4144_v52, %v15238_v20 }
 0x2b9   : > { %v15303_v40 = vrot.slane %v4281_v62, 4  ;;  %v4305_v62 = vshrl.u32 %v15166_v18, 16  ;;  %v4225_v33 = vor.u32 %v4224_v63, %v15296_v0  ;;  %v11484_v59 = vcombine.low %v4149_v22, %v4159_v35  ;;  %v15334_v63 = vld [vmem:[#allocation2 + $0x5c] sm:$0x1] }
 0x2ba   : > { %v4206_v10 = vrot.slane %v4204_v56, 5  ;;  %v7100_v18 = vsel %vm4771_vm10, %v15124_v24, 0  ;;  %v15336_v20 = vrot.slane %v4242_v3, 5  ;;  %v17806_v52 = vshrl.u32 %v15144_v55, 16  ;;  %vm15726_vm10 = vmand %vm271_vm3, %vm337_vm1 }
 0x2bb   : > { %v4226_v38 = vrot.slane %v4225_v33, 4  ;;  %v15340_v54 = vrot.slane %v4266_v49, 5  ;;  %v4294_v56 = vshrl.u32 %v15158_v30, 16  ;;  %v15343_v41 = vrot.slane %v4305_v62, 4 }
 0x2bc   : > { %v4248_v13 = vrot.slane %v17806_v52, 4  ;;  %v4192_v24 = vrot.slane %v4191_v6, 4  ;;  %v15349_v35 = vrot.slane %v4308_v53, 5  ;;  %v4252_v1 = vshll.u32 %v15334_v63, 16 }
 0x2bd   : > { %v4332_v3 = vshll.u32 %v15176_v42, 16  ;;  %v4273_v53 = vor.u32 %v4272_v29, %v15340_v54  ;;  %v4276_v22 = vshll.u32 %v15347_v47, 16  ;;  %v4342_v6 = vshrl.u32 %v15172_v26, 16 }
 0x2be   : > { %12372 = vmatmul.mubr.msk.bf16.gmra.mrb[28].mxu0 %vm4722_vm15, %v11466_v57  ;;  %v4228_v57 = vshll.u32 %v15294_v25, 16  ;;  %v4249_v33 = vor.u32 %v4248_v13, %v15336_v20  ;;  %v4353_v42 = vshrl.u32 %v15180_v34, 16  ;;  %v4296_v29 = vrot.slane %v4294_v56, 4 }
 0x2bf   : > { %12377 = vmatprep.mubr.msk.bf16.mxu0 %vm4722_vm15, %v11483_v31  ;;  %v4202_v31 = vrot.slane %v4201_v8, 4  ;;  %v4216_v8 = vrot.slane %v4215_v46, 4  ;;  %v15380_v9 = vrot.slane %v4314_v14, 5 }
 0x2c0   : > { %v4230_v12 = vrot.slane %v4228_v57, 5  ;;  %v4290_v57 = vshll.u32 %v15158_v30, 16  ;;  %v4250_v13 = vrot.slane %v4249_v33, 4 }
 0x2c1   : > { %v4207_v62 = vsel %vm13590_vm0, %v4202_v31, %v4206_v10  ;;  %v4221_v46 = vsel %vm13590_vm0, %v4216_v8, %v15296_v0  ;;  %v4263_v31 = vor.u32 %v15300_v50, %v15298_v7  ;;  %v4356_v0 = vshll.u32 %v15180_v34, 16  ;;  %v15384_v7 = vld [vmem:[#allocation2 + $0x80] sm:$0x1] }
 0x2c2   : > { %v4231_v49 = vsel %vm13590_vm0, %v4226_v38, %v4230_v12  ;;  %v15376_v38 = vld [vmem:[#allocation2 + $0x74] sm:$0x1]  ;;  %v15378_v12 = vrot.slane %v4290_v57, 5  ;;  %v4366_v50 = vshrl.u32 %v15174_v23, 16  ;;  %v15390_v57 = vrot.slane %v4353_v42, 4 }
 0x2c3   : > { %v11487_v52 = vcombine.low %v4221_v46, %v4231_v49  ;;  %v4264_v56 = vrot.slane %v4263_v31, 4  ;;  %v4300_v33 = vshll.u32 %v15376_v38, 16  ;;  %v4358_v14 = vrot.slane %v4356_v0, 5  ;;  %v15420_v0 = vld [vmem:[#allocation2 + $0x98] sm:$0x1] }
 0x2c4   : > { %v4297_v34 = vor.u32 %v4296_v29, %v15378_v12  ;;  %v15412_v29 = vld [vmem:[#allocation2 + $0x8c] sm:$0x1] }
 0x2c5   : > { %v4302_v31 = vrot.slane %v4300_v33, 5  ;;  %v4348_v33 = vshll.u32 %v15412_v29, 16 }
 0x2c6   : > { %12378 = vmatmul.mubr.msk.bf16.vlgmr.msra.gmra.mrb[0].mxu0 %vm4722_vm15, %v11484_v59  ;;  %v4197_v59 = vsel %vm13590_vm0, %v4192_v24, %v15291_v11  ;;  %v4274_v11 = vrot.slane %v4273_v53, 4  ;;  %v4278_v24 = vrot.slane %v4276_v22, 5  ;;  %v4324_v53 = vshll.u32 %v15384_v7, 16 }
 0x2c7   : > { %12410 = vmatpush3.bf16.msra.mxu0 %v7100_v18  ;;  %12381 = vmatprep.mubr.msk.bf16.mxu0 %vm4722_vm15, %v11485_v15  ;;  %v4239_v15 = vor.u32 %v15272_v39, %v15267_v44  ;;  %v11486_v10 = vcombine.low %v4197_v59, %v4207_v62  ;;  %v4254_v18 = vrot.slane %v4252_v1, 5  ;;  %v4320_v44 = vrot.slane %v4318_v51, 4 }
 0x2c8   : > { %v4331_v39 = vrot.slane %v4329_v60, 4  ;;  %v4334_v62 = vrot.slane %v4332_v3, 5  ;;  %v4377_v1 = vshrl.u32 %v15194_v5, 16  ;;  %v4338_v60 = vshll.u32 %v15172_v26, 16 }
 0x2c9   : > { %v4240_v8 = vrot.slane %v4239_v15, 4  ;;  %v4255_v51 = vsel %vm13590_vm0, %v4250_v13, %v4254_v18  ;;  %v4279_v3 = vsel %vm13590_vm0, %v4274_v11, %v4278_v24  ;;  %v4321_v49 = vor.u32 %v4320_v44, %v15380_v9 }
 0x2ca   : > { %v4362_v22 = vshll.u32 %v15174_v23, 16  ;;  %v4287_v59 = vor.u32 %v15305_v19, %v15303_v40  ;;  %v4311_v15 = vor.u32 %v15349_v35, %v15343_v41  ;;  %v4269_v18 = vsel %vm13590_vm0, %v4264_v56, %v15340_v54 }
 0x2cb   : > { %v4245_v42 = vsel %vm13590_vm0, %v4240_v8, %v15336_v20  ;;  %v4298_v13 = vrot.slane %v4297_v34, 4  ;;  %v15414_v11 = vrot.slane %v4338_v60, 5  ;;  %v4344_v20 = vrot.slane %v4342_v6, 4 }
 0x2cc   : > { %v11488_v46 = vcombine.low %v4245_v42, %v4255_v51  ;;  %v4322_v24 = vrot.slane %v4321_v49, 4  ;;  %v4326_v40 = vrot.slane %v4324_v53, 5  ;;  %v15416_v19 = vrot.slane %v4362_v22, 5 }
 0x2cd   : > { %v4368_v41 = vrot.slane %v4366_v50, 4  ;;  %v4379_v35 = vrot.slane %v4377_v1, 4  ;;  %v4288_v44 = vrot.slane %v4287_v59, 4  ;;  %v4312_v54 = vrot.slane %v4311_v15, 4 }
 0x2ce   : > { %12382 = vmatmul.mubr.msk.bf16.gmra.mrb[4].mxu0 %vm4722_vm15, %v11486_v10  ;;  %v4380_v10 = vshll.u32 %v15194_v5, 16  ;;  %v4390_v5 = vshrl.u32 %v15187_v58, 16  ;;  %v4401_v56 = vshrl.u32 %v15200_v43, 16  ;;  %v4335_v6 = vor.u32 %v4334_v62, %v4331_v39 }
 0x2cf   : > { %12385 = vmatprep.mubr.msk.bf16.mxu0 %vm4722_vm15, %v11487_v52  ;;  %v11489_v52 = vcombine.low %v4269_v18, %v4279_v3  ;;  %v4414_v51 = vshrl.u32 %v15190_v37, 16  ;;  %v4303_v50 = vsel %vm13590_vm0, %v4298_v13, %v4302_v31  ;;  %v4345_v1 = vor.u32 %v4344_v20, %v15414_v11 }
 0x2d0   : > { %v4382_v8 = vrot.slane %v4380_v10, 5  ;;  %v4386_v34 = vshll.u32 %v15187_v58, 16  ;;  %v4327_v60 = vsel %vm13590_vm0, %v4322_v24, %v4326_v40  ;;  %v4369_v3 = vor.u32 %v4368_v41, %v15416_v19  ;;  %v15446_v24 = vld [vmem:[#allocation2 + $0xa4] sm:$0x1] }
 0x2d1   : > { %v4372_v49 = vshll.u32 %v15420_v0, 16  ;;  %v4410_v39 = vshll.u32 %v15190_v37, 16  ;;  %v4404_v62 = vshll.u32 %v15200_v43, 16  ;;  %v4425_v53 = vshrl.u32 %v15236_v48, 16 }
 0x2d2   : > { %v4293_v22 = vsel %vm13590_vm0, %v4288_v44, %v15378_v12  ;;  %v4317_v42 = vsel %vm13590_vm0, %v4312_v54, %v15380_v9  ;;  %v4336_v15 = vrot.slane %v4335_v6, 4  ;;  %v4350_v10 = vrot.slane %v4348_v33, 5 }
 0x2d3   : > { %v11490_v59 = vcombine.low %v4293_v22, %v4303_v50  ;;  %v11491_v18 = vcombine.low %v4317_v42, %v4327_v60  ;;  %v4346_v31 = vrot.slane %v4345_v1, 4  ;;  %v4392_v43 = vrot.slane %v4390_v5, 4 }
 0x2d4   : > { %v4370_v13 = vrot.slane %v4369_v3, 4  ;;  %v4374_v20 = vrot.slane %v4372_v49, 5  ;;  %v15448_v40 = vrot.slane %v4410_v39, 5  ;;  %v4416_v12 = vrot.slane %v4414_v51, 4 }
 0x2d5   : > { %v4403_v41 = vrot.slane %v4401_v56, 4  ;;  %v4428_v9 = vshll.u32 %v15236_v48, 16  ;;  %v4438_v44 = vshrl.u32 %v15227_v32, 16  ;;  %v15455_v54 = vrot.slane %v4425_v53, 4 }
 0x2d6   : > { %12386 = vmatmul.mubr.msk.bf16.gmra.mrb[8].mxu0 %vm4722_vm15, %v11488_v46  ;;  %v4359_v46 = vor.u32 %v4358_v14, %v15390_v57  ;;  %v15453_v57 = vld [vmem:[#allocation2 + $0xb0] sm:$0x1]  ;;  %v4406_v14 = vrot.slane %v4404_v62, 5  ;;  %v4383_v6 = vor.u32 %v4382_v8, %v4379_v35  ;;  %v4341_v33 = vsel %vm13590_vm0, %v4336_v15, %v15414_v11 }
 0x2d7   : > { %12389 = vmatprep.mubr.msk.bf16.mxu0 %vm4722_vm15, %v11489_v52  ;;  %v15444_v52 = vrot.slane %v4386_v34, 5  ;;  %v4351_v48 = vsel %vm13590_vm0, %v4346_v31, %v4350_v10  ;;  %v4396_v51 = vshll.u32 %v15446_v24, 16  ;;  %v4375_v50 = vsel %vm13590_vm0, %v4370_v13, %v4374_v20  ;;  %v15478_v13 = vld [vmem:[#allocation2 + $0xbc] sm:$0x1] }
 0x2d8   : > { %v4360_v5 = vrot.slane %v4359_v46, 4  ;;  %v4417_v1 = vor.u32 %v4416_v12, %v15448_v40  ;;  %v4420_v34 = vshll.u32 %v15453_v57, 16  ;;  %v4434_v35 = vshll.u32 %v15227_v32, 16 }
 0x2d9   : > { %v4393_v56 = vor.u32 %v4392_v43, %v15444_v52  ;;  %v4449_v8 = vshrl.u32 %v15242_v2, 16  ;;  %v4452_v11 = vshll.u32 %v15242_v2, 16  ;;  %v4462_v60 = vshrl.u32 %v15244_v61, 16 }
 0x2da   : > { %v4458_v3 = vshll.u32 %v15244_v61, 16  ;;  %v4430_v49 = vrot.slane %v4428_v9, 5  ;;  %v11492_v39 = vcombine.low %v4341_v33, %v4351_v48  ;;  %v4365_v62 = vsel %vm13590_vm0, %v4360_v5, %v15416_v19 }
 0x2db   : > { %v4384_v53 = vrot.slane %v4383_v6, 4  ;;  %v11493_v22 = vcombine.low %v4365_v62, %v4375_v50  ;;  %v4394_v42 = vrot.slane %v4393_v56, 4  ;;  %v4407_v15 = vor.u32 %v4406_v14, %v4403_v41  ;;  %v15484_v41 = vld [vmem:[#allocation2 + $0xc8] sm:$0x1] }
 0x2dc   : > { %v4418_v10 = vrot.slane %v4417_v1, 4  ;;  %v4422_v46 = vrot.slane %v4420_v34, 5  ;;  %v4440_v31 = vrot.slane %v4438_v44, 4  ;;  %v4451_v2 = vrot.slane %v4449_v8, 4 }
 0x2dd   : > { %v4454_v43 = vrot.slane %v4452_v11, 5  ;;  %v4460_v20 = vrot.slane %v4458_v3, 5  ;;  %v4464_v12 = vrot.slane %v4462_v60, 4  ;;  %v4473_v9 = vshrl.u32 %v15261_v17, 16 }
 0x2de   : > { %12390 = vmatmul.mubr.msk.bf16.gmra.mrb[12].mxu0 %vm4722_vm15, %v11490_v59  ;;  %v4398_v59 = vrot.slane %v4396_v51, 5  ;;  %v4476_v19 = vshll.u32 %v15261_v17, 16  ;;  %v4486_v5 = vshrl.u32 %v15263_v36, 16  ;;  %v4482_v44 = vshll.u32 %v15263_v36, 16 }
 0x2df   : > { %12393 = vmatprep.mubr.msk.bf16.mxu0 %vm4722_vm15, %v11491_v18  ;;  %v4436_v18 = vrot.slane %v4434_v35, 5  ;;  %v4389_v14 = vsel %vm13590_vm0, %v4384_v53, %v15444_v52  ;;  %v4408_v6 = vrot.slane %v4407_v15, 4  ;;  %v4431_v48 = vor.u32 %v4430_v49, %v15455_v54  ;;  %v15500_v54 = vld [vmem:[#allocation2 + $0xd4] sm:$0x1] }
 0x2e0   : > { %v4399_v33 = vsel %vm13590_vm0, %v4394_v42, %v4398_v59  ;;  %v4444_v17 = vshll.u32 %v15478_v13, 16  ;;  %v4423_v51 = vsel %vm13590_vm0, %v4418_v10, %v4422_v46  ;;  %v4455_v50 = vor.u32 %v4454_v43, %v4451_v2 }
 0x2e1   : > { %v4441_v56 = vor.u32 %v4440_v31, %v4436_v18  ;;  %v4465_v1 = vor.u32 %v4464_v12, %v4460_v20  ;;  %v4468_v34 = vshll.u32 %v15484_v41, 16  ;;  %v4475_v35 = vrot.slane %v4473_v9, 4 }
 0x2e2   : > { %v4478_v8 = vrot.slane %v4476_v19, 5  ;;  %v4484_v11 = vrot.slane %v4482_v44, 5  ;;  %v4488_v52 = vrot.slane %v4486_v5, 4  ;;  %v11494_v60 = vcombine.low %v4389_v14, %v4399_v33 }
 0x2e3   : > { %v4413_v3 = vsel %vm13590_vm0, %v4408_v6, %v15448_v40  ;;  %v4446_v62 = vrot.slane %v4444_v17, 5  ;;  %v4456_v53 = vrot.slane %v4455_v50, 4  ;;  %v4470_v42 = vrot.slane %v4468_v34, 5  ;;  %v17808_v50 = vld [vmem:[#allocation20_spill] sm:$0xff] }
 0x2e4   : > { %v11495_v49 = vcombine.low %v4413_v3, %v4423_v51  ;;  %v4432_v59 = vrot.slane %v4431_v48, 4  ;;  %v4479_v15 = vor.u32 %v4478_v8, %v4475_v35  ;;  %v4489_v10 = vor.u32 %v4488_v52, %v4484_v11  ;;  %v4497_v48 = vld [vmem:[#allocation2 + $0x24] sm:$0xe]  ;;  %v4498_v51 = vld [vmem:[#allocation2 + $0x30] sm:$0xe]  ;;  %v17809_v34 = vld [vmem:[#allocation16_spill] sm:$0xff] }
 0x2e5   : > { %v4492_v46 = vshll.u32 %v15500_v54, 16  ;;  %v4461_v31 = vsel %vm13590_vm0, %v4456_v53, %v4460_v20  ;;  %v4569_v33 = vrot.slane %v15107_v45, 5  ;;  %v17810_v35 = vld [vmem:[#allocation17_spill] sm:$0xff] }
 0x2e6   : > { %12394 = vmatmul.mubr.msk.bf16.gmra.mrb[16].mxu0 %vm4722_vm15, %v11492_v39  ;;  %v4442_v39 = vrot.slane %v4441_v56, 4  ;;  %v4437_v43 = vsel %vm13590_vm0, %v4432_v59, %v4436_v18  ;;  %v4480_v12 = vrot.slane %v4479_v15, 4  ;;  %v4490_v9 = vrot.slane %v4489_v10, 4  ;;  %v17807_v56 = vld [vmem:[#allocation19_spill] sm:$0xff]  ;;  %v4499_v59 = vld [vmem:[#allocation2 + $0x3c] sm:$0xe] }
 0x2e7   : > { %12397 = vmatprep.mubr.msk.bf16.mxu0 %vm4722_vm15, %v11493_v22  ;;  %v4466_v22 = vrot.slane %v4465_v1, 4  ;;  %v4494_v19 = vrot.slane %v4492_v46, 5  ;;  %v4576_v18 = vrot.slane %v15109_v27, 5  ;;  %v4572_v17 = vrot.slane %v17807_v56, 5  ;;  %v17814_v15 = vld [vmem:[#allocation12_spill] sm:$0xff] }
 0x2e8   : > { %v4447_v40 = vsel %vm13590_vm0, %v4442_v39, %v4446_v62  ;;  %v4485_v14 = vsel %vm13590_vm0, %v4480_v12, %v4484_v11  ;;  %v4579_v1 = vrot.slane %v17808_v50, 5  ;;  %v17811_v8 = vcombine.low %v17809_v34, %v17810_v35  ;;  %v17813_v62 = vld [vmem:[#allocation11_spill] sm:$0xff]  ;;  %v4502_v56 = vld [vmem:[#allocation2 + $0x60] sm:$0xe] }
 0x2e9   : > { %v4471_v2 = vsel %vm13590_vm0, %v4466_v22, %v4470_v42  ;;  %v11496_v5 = vcombine.low %v4437_v43, %v4447_v40  ;;  %v4495_v20 = vsel %vm13590_vm0, %v4490_v9, %v4494_v19  ;;  %v11244_v11 = vrot.slane %v4497_v48, 9 }
 0x2ea   : > { %v11497_v44 = vcombine.low %v4461_v31, %v4471_v2  ;;  %v11498_v6 = vcombine.low %v4485_v14, %v4495_v20  ;;  %v4571_v52 = vrot.slane %v4569_v33, 4  ;;  %v4578_v3 = vrot.slane %v4576_v18, 4  ;;  %v4500_v31 = vld [vmem:[#allocation2 + $0x48] sm:$0xe] }
 0x2eb   : > { %v4570_v39 = vsel %vm14301_vm5, %v11244_v11, %v4569_v33  ;;  %v4583_v53 = vrot.slane %v17813_v62, 5  ;;  %v4590_v10 = vrot.slane %v17814_v15, 5  ;;  %v4586_v40 = vrot.slane %v15289_v28, 5  ;;  %v4503_v11 = vld [vmem:[#allocation2 + $0x6c] sm:$0xe] }
 0x2ec   : > { %v4580_v27 = vsel %vm14301_vm5, %v4578_v3, %v4579_v1  ;;  %v4593_v2 = vrot.slane %v15294_v25, 5  ;;  %v11246_v43 = vrot.slane %v4499_v59, 9  ;;  %v11247_v9 = vrot.slane %v4500_v31, 9  ;;  %v4505_v15 = vld [vmem:[#allocation2 + $0x84] sm:$0xe] }
 0x2ed   : > { %v4585_v12 = vrot.slane %v4583_v53, 4  ;;  %v4592_v19 = vrot.slane %v4590_v10, 4  ;;  %v4597_v14 = vrot.slane %v15144_v55, 5  ;;  %v4604_v33 = vrot.slane %v15146_v16, 5  ;;  %v4506_v31 = vld [vmem:[#allocation2 + $0x90] sm:$0xe] }
 0x2ee   : > { %12398 = vmatmul.mubr.msk.bf16.gmra.mrb[20].mxu0 %vm4722_vm15, %v11494_v60  ;;  %v11245_v60 = vrot.slane %v4498_v51, 9  ;;  %v4584_v28 = vsel %vm14301_vm5, %v11246_v43, %v4583_v53  ;;  %v4591_v25 = vsel %vm14301_vm5, %v11247_v9, %v4590_v10  ;;  %v11249_v55 = vrot.slane %v4502_v56, 9 }
 0x2ef   : > { %12401 = vmatprep.mubr.msk.bf16.mxu0 %vm4722_vm15, %v11495_v49  ;;  %v4573_v49 = vsel %vm14301_vm5, %v4571_v52, %v4572_v17  ;;  %v4607_v17 = vrot.slane %v15347_v47, 5  ;;  %v4599_v50 = vrot.slane %v4597_v14, 4  ;;  %v4606_v1 = vrot.slane %v4604_v33, 4 }
 0x2f0   : > { %v11516_v22 = vcombine.low %v4570_v39, %v4573_v49  ;;  %v4577_v42 = vsel %vm14301_vm5, %v11245_v60, %v4576_v18  ;;  %v4600_v18 = vrot.slane %v15334_v63, 5  ;;  %v4611_v35 = vrot.slane %v15158_v30, 5  ;;  %v4504_v49 = vld [vmem:[#allocation2 + $0x78] sm:$0xe] }
 0x2f1   : > { %v11517_v46 = vcombine.low %v4577_v42, %v4580_v27  ;;  %v4608_v16 = vsel %vm14301_vm5, %v4606_v1, %v4607_v17  ;;  %v4605_v47 = vsel %vm14301_vm5, %v11249_v55, %v4604_v33  ;;  %v4618_v52 = vrot.slane %v15160_v21, 5 }
 0x2f2   : > { %v4601_v34 = vsel %vm14301_vm5, %v4599_v50, %v4600_v18  ;;  %v11521_v60 = vcombine.low %v4605_v47, %v4608_v16  ;;  %v4614_v3 = vrot.slane %v15376_v38, 5  ;;  %v4621_v27 = vrot.slane %v15384_v7, 5 }
 0x2f3   : > { %v11250_v39 = vrot.slane %v4503_v11, 9  ;;  %v4613_v62 = vrot.slane %v4611_v35, 4  ;;  %v11251_v30 = vrot.slane %v4504_v49, 9  ;;  %v4620_v53 = vrot.slane %v4618_v52, 4 }
 0x2f4   : > { %v4625_v42 = vrot.slane %v15172_v26, 5  ;;  %v4632_v10 = vrot.slane %v15174_v23, 5  ;;  %v11252_v43 = vrot.slane %v4505_v15, 9  ;;  %v11253_v26 = vrot.slane %v4506_v31, 9  ;;  %v457_v15 = vld [vmem:[#allocation3 + $0x14] sm:$0x1] }
 0x2f5   : > { %v4622_v21 = vsel %vm14301_vm5, %v4620_v53, %v4621_v27  ;;  %v4612_v38 = vsel %vm14301_vm5, %v11250_v39, %v4611_v35  ;;  %v4619_v7 = vsel %vm14301_vm5, %v11251_v30, %v4618_v52  ;;  %v4649_v33 = vrot.slane %v15453_v57, 5  ;;  %v4510_v57 = vld [vmem:[#allocation2 + $0xc0] sm:$0xe]  ;;  %v4511_v52 = vld [vmem:[#allocation2 + $0xcc] sm:$0xe] }
 0x2f6   : > { %12402 = vmatmul.mubr.msk.bf16.gmra.mrb[24].mxu0 %vm4722_vm15, %v11496_v5  ;;  %v4587_v5 = vsel %vm14301_vm5, %v4585_v12, %v4586_v40  ;;  %v4628_v40 = vrot.slane %v15412_v29, 5  ;;  %v4627_v12 = vrot.slane %v4625_v42, 4  ;;  %v4634_v9 = vrot.slane %v4632_v10, 4 }
 0x2f7   : > { %12405 = vmatprep.mubr.msk.bf16.mxu0 %vm4722_vm15, %v11497_v44  ;;  %v4594_v44 = vsel %vm14301_vm5, %v4592_v19, %v4593_v2  ;;  %v11518_v20 = vcombine.low %v4584_v28, %v4587_v5  ;;  %v4635_v2 = vrot.slane %v15420_v0, 5  ;;  %v4626_v29 = vsel %vm14301_vm5, %v11252_v43, %v4625_v42  ;;  %v4507_v28 = vld [vmem:[#allocation2 + $0x9c] sm:$0xe]  ;;  %v409_v43 = vld [vmem:[#allocation3 + $0x24] sm:$0x1] }
 0x2f8   : > { %v11519_v48 = vcombine.low %v4591_v25, %v4594_v44  ;;  %v4629_v19 = vsel %vm14301_vm5, %v4627_v12, %v4628_v40  ;;  %v4639_v5 = vrot.slane %v15187_v58, 5  ;;  %v4633_v0 = vsel %vm14301_vm5, %v11253_v26, %v4632_v10  ;;  %v412_v40 = vld [vmem:[#allocation3 + $0x30] sm:$0x1]  ;;  %v466_v26 = vld [vmem:[#allocation3 + $0x38] sm:$0x1] }
 0x2f9   : > { %v4636_v23 = vsel %vm14301_vm5, %v4634_v9, %v4635_v2  ;;  %v11524_v44 = vcombine.low %v4626_v29, %v4629_v19  ;;  %v4642_v25 = vrot.slane %v15446_v24, 5  ;;  %v4653_v50 = vrot.slane %v15227_v32, 5  ;;  %v463_v19 = vld [vmem:[#allocation3 + $0x2c] sm:$0x1] }
 0x2fa   : > { %v4641_v18 = vrot.slane %v4639_v5, 4  ;;  %v11257_v35 = vrot.slane %v4510_v57, 9  ;;  %v4667_v32 = vrot.slane %v15263_v36, 5  ;;  %v4670_v39 = vrot.slane %v15500_v54, 5  ;;  %v460_v54 = vld [vmem:[#allocation3 + $0x20] sm:$0x1] }
 0x2fb   : > { %v4655_v11 = vrot.slane %v4653_v50, 4  ;;  %v458_v10 = vsel %vm13119_vm2, 0, %v457_v15  ;;  %v413_v2 = vsel %vm13339_vm7, 0, %v412_v40  ;;  %v410_v12 = vsel %vm13339_vm7, 0, %v409_v43  ;;  %v484_v57 = vld [vmem:[#allocation3 + $0x80] sm:$0x1] }
 0x2fc   : > { %v4643_v17 = vsel %vm14301_vm5, %v4641_v18, %v4642_v25  ;;  %v4669_v27 = vrot.slane %v4667_v32, 4  ;;  %459 = vst [vmem:[#allocation3 + $0x14] sm:$0x1] %v458_v10  ;;  %414 = vst [vmem:[#allocation3 + $0x30] sm:$0x1] %v413_v2  ;;  %v467_v9 = vsel %vm13119_vm2, 0, %v466_v26 }
 0x2fd   : > { %411 = vst [vmem:[#allocation3 + $0x24] sm:$0x1] %v410_v12  ;;  %468 = vst [vmem:[#allocation3 + $0x38] sm:$0x1] %v467_v9  ;;  %v464_v29 = vsel %vm13119_vm2, 0, %v463_v19 }
 0x2fe   : > { %12406 = vmatmul.mubr.msk.bf16.gmra.mrb[28].mxu0 %vm4722_vm15, %v11498_v6  ;;  %v4501_v6 = vld [vmem:[#allocation2 + $0x54] sm:$0xe]  ;;  %v4671_v53 = vsel %vm14301_vm5, %v4669_v27, %v4670_v39  ;;  %465 = vst [vmem:[#allocation3 + $0x2c] sm:$0x1] %v464_v29  ;;  %v478_v18 = vld [vmem:[#allocation3 + $0x68] sm:$0x1] }
 0x2ff   : > { %12411 = vmatprep.mubr.msk.bf16.mxu0 %vm4722_vm15, %v17811_v8  ;;  %v11248_v51 = vrot.slane %v4501_v6, 9  ;;  %v4508_v6 = vld [vmem:[#allocation2 + $0xa8] sm:$0xe]  ;;  %v493_v39 = vld [vmem:[#allocation3 + $0xa4] sm:$0x1] }
 0x300   : > { %v11255_v58 = vrot.slane %v4508_v6, 9  ;;  %v424_v6 = vld [vmem:[#allocation3 + $0x60] sm:$0x1]  ;;  %v454_v10 = vld [vmem:[#allocation3 + $0x8] sm:$0x1] }
 0x301   : > { %v4598_v63 = vsel %vm14301_vm5, %v11248_v51, %v4597_v14  ;;  %v4646_v14 = vrot.slane %v15190_v37, 5  ;;  %v4660_v51 = vrot.slane %v15244_v61, 5  ;;  %v4663_v61 = vrot.slane %v15484_v41, 5  ;;  %v400_v15 = vld [vmem:[#allocation3] sm:$0x1] }
 0x302   : > { %v11520_v8 = vcombine.low %v4598_v63, %v4601_v34  ;;  %v4509_v34 = vld [vmem:[#allocation2 + $0xb4] sm:$0xe]  ;;  %v4656_v63 = vrot.slane %v15478_v13, 5  ;;  %v11258_v41 = vrot.slane %v4511_v52, 9  ;;  %v455_v40 = vsel %vm13119_vm2, 0, %v454_v10 }
 0x303   : > { %v4648_v56 = vrot.slane %v4646_v14, 4  ;;  %v4647_v1 = vsel %vm14301_vm5, %v11255_v58, %v4646_v14  ;;  %v11256_v47 = vrot.slane %v4509_v34, 9  ;;  %v481_v34 = vld [vmem:[#allocation3 + $0x74] sm:$0x1]  ;;  %456 = vst [vmem:[#allocation3 + $0x8] sm:$0x1] %v455_v40 }
 0x304   : > { %v4668_v36 = vsel %vm14301_vm5, %v11258_v41, %v4667_v32  ;;  %v487_v32 = vld [vmem:[#allocation3 + $0x8c] sm:$0x1]  ;;  %v496_v41 = vld [vmem:[#allocation3 + $0xb0] sm:$0x1]  ;;  %v7898_v2 = vld [vmem:[#allocation3 + $0x4] sm:$0xf] }
 0x305   : > { %v4650_v37 = vsel %vm14301_vm5, %v4648_v56, %v4649_v33  ;;  %v4654_v49 = vsel %vm14301_vm5, %v11256_v47, %v4653_v50  ;;  %v425_v33 = vsel %vm13339_vm7, 0, %v424_v6  ;;  %v479_v56 = vsel %vm13119_vm2, 0, %v478_v18  ;;  %v427_v50 = vld [vmem:[#allocation3 + $0x6c] sm:$0x1] }
 0x306   : > { %12412 = vmatmul.mubr.msk.bf16.vlgmr.msra.gmra.mrb[0].mxu0 %vm4722_vm15, %v11516_v22  ;;  %v4615_v22 = vsel %vm14301_vm5, %v4613_v62, %v4614_v3  ;;  %v11527_v16 = vcombine.low %v4647_v1, %v4650_v37  ;;  %v4661_v3 = vsel %vm14301_vm5, %v11257_v35, %v4660_v51  ;;  %426 = vst [vmem:[#allocation3 + $0x60] sm:$0x1] %v425_v33  ;;  %480 = vst [vmem:[#allocation3 + $0x68] sm:$0x1] %v479_v56  ;;  %v430_v37 = vld [vmem:[#allocation3 + $0x78] sm:$0x1] }
 0x307   : > { %12415 = vmatprep.mubr.msk.bf16.mxu0 %vm4722_vm15, %v11517_v46  ;;  %v11522_v59 = vcombine.low %v4612_v38, %v4615_v22  ;;  %v11523_v46 = vcombine.low %v4619_v7, %v4622_v21  ;;  %v11530_v22 = vcombine.low %v4668_v36, %v4671_v53  ;;  %v403_v21 = vld [vmem:[#allocation3 + $0xc] sm:$0x1]  ;;  %v461_v7 = vsel %vm13119_vm2, 0, %v460_v54  ;;  %v445_v53 = vld [vmem:[#allocation3 + $0xb4] sm:$0x1] }
 0x308   : > { %v404_v42 = vsel %vm13339_vm7, 0, %v403_v21  ;;  %462 = vst [vmem:[#allocation3 + $0x20] sm:$0x1] %v461_v7  ;;  %v485_v1 = vsel %vm13119_vm2, 0, %v484_v57  ;;  %v488_v52 = vsel %vm13119_vm2, 0, %v487_v32  ;;  %v497_v27 = vsel %vm13119_vm2, 0, %v496_v41 }
 0x309   : > { %405 = vst [vmem:[#allocation3 + $0xc] sm:$0x1] %v404_v42  ;;  %486 = vst [vmem:[#allocation3 + $0x80] sm:$0x1] %v485_v1  ;;  %v502_v21 = vld [vmem:[#allocation3 + $0xc8] sm:$0x1] }
 0x30a   : > { %489 = vst [vmem:[#allocation3 + $0x8c] sm:$0x1] %v488_v52  ;;  %498 = vst [vmem:[#allocation3 + $0xb0] sm:$0x1] %v497_v27  ;;  %v503_v42 = vsel %vm13119_vm2, 0, %v502_v21  ;;  %v7955_v43 = vshll.u32 %v7898_v2, 16 }
 0x30b   : > { %504 = vst [vmem:[#allocation3 + $0xc8] sm:$0x1] %v503_v42  ;;  %v499_v54 = vld [vmem:[#allocation3 + $0xbc] sm:$0x1]  ;;  %v7959_v12 = vshrl.u32 %v7898_v2, 16 }
 0x30c   : > { %v500_v7 = vsel %vm13119_vm2, 0, %v499_v54  ;;  %v15701_v9 = vrot.slane %v7955_v43, 5 }
 0x30d   : > { %501 = vst [vmem:[#allocation3 + $0xbc] sm:$0x1] %v500_v7  ;;  %v7961_v19 = vrot.slane %v7959_v12, 4 }
 0x30e   : > { %12416 = vmatmul.mubr.msk.bf16.gmra.mrb[4].mxu0 %vm4722_vm15, %v11518_v20  ;;  %v11525_v20 = vcombine.low %v4633_v0, %v4636_v23  ;;  %v418_v23 = vld [vmem:[#allocation3 + $0x48] sm:$0x1] }
 0x30f   : > { %12419 = vmatprep.mubr.msk.bf16.mxu0 %vm4722_vm15, %v11519_v48  ;;  %v11254_v48 = vrot.slane %v4507_v28, 9  ;;  %v472_v28 = vld [vmem:[#allocation3 + $0x50] sm:$0x1]  ;;  %v7796_v43 = vld [vmem:[#allocation3 + $0x20] sm:$0x1] }
 0x310   : > { %v473_v14 = vsel %vm13119_vm2, 0, %v472_v28  ;;  %v7785_v7 = vld [vmem:[#allocation3 + $0xc] sm:$0xf] }
 0x311   : > { %v4640_v24 = vsel %vm14301_vm5, %v11254_v48, %v4639_v5  ;;  %v419_v5 = vsel %vm13339_vm7, 0, %v418_v23  ;;  %474 = vst [vmem:[#allocation3 + $0x50] sm:$0x1] %v473_v14  ;;  %v421_v48 = vld [vmem:[#allocation3 + $0x54] sm:$0x1] }
 0x312   : > { %v11526_v55 = vcombine.low %v4640_v24, %v4643_v17  ;;  %420 = vst [vmem:[#allocation3 + $0x48] sm:$0x1] %v419_v5  ;;  %v422_v58 = vsel %vm13339_vm7, 0, %v421_v48  ;;  %v475_v17 = vld [vmem:[#allocation3 + $0x5c] sm:$0x1]  ;;  %v431_v24 = vsel %vm13339_vm7, 0, %v430_v37 }
 0x313   : > { %423 = vst [vmem:[#allocation3 + $0x54] sm:$0x1] %v422_v58  ;;  %432 = vst [vmem:[#allocation3 + $0x78] sm:$0x1] %v431_v24  ;;  %v7929_v5 = vld [vmem:[#allocation3 + $0x8] sm:$0x1] }
 0x316   : > { %12420 = vmatmul.mubr.msk.bf16.gmra.mrb[8].mxu0 %vm4722_vm15, %v11520_v8  ;;  %v4662_v8 = vrot.slane %v4660_v51, 4  ;;  %v476_v51 = vsel %vm13119_vm2, 0, %v475_v17 }
 0x317   : > { %12423 = vmatprep.mubr.msk.bf16.mxu0 %vm4722_vm15, %v11521_v60  ;;  %v4657_v60 = vsel %vm14301_vm5, %v4655_v11, %v4656_v63  ;;  %477 = vst [vmem:[#allocation3 + $0x5c] sm:$0x1] %v476_v51  ;;  %v482_v63 = vsel %vm13119_vm2, 0, %v481_v34 }
 0x318   : > { %v4664_v13 = vsel %vm14301_vm5, %v4662_v8, %v4663_v61  ;;  %v11528_v62 = vcombine.low %v4654_v49, %v4657_v60  ;;  %v433_v8 = vld [vmem:[#allocation3 + $0x84] sm:$0x1]  ;;  %v490_v61 = vld [vmem:[#allocation3 + $0x98] sm:$0x1]  ;;  %483 = vst [vmem:[#allocation3 + $0x74] sm:$0x1] %v482_v63 }
 0x319   : > { %v11529_v30 = vcombine.low %v4661_v3, %v4664_v13  ;;  %v434_v47 = vsel %vm13339_vm7, 0, %v433_v8  ;;  %v491_v11 = vsel %vm13119_vm2, 0, %v490_v61  ;;  %v442_v60 = vld [vmem:[#allocation3 + $0xa8] sm:$0x1]  ;;  %v439_v13 = vld [vmem:[#allocation3 + $0x9c] sm:$0x1] }
 0x31a   : > { %435 = vst [vmem:[#allocation3 + $0x84] sm:$0x1] %v434_v47  ;;  %492 = vst [vmem:[#allocation3 + $0x98] sm:$0x1] %v491_v11  ;;  %v443_v3 = vsel %vm13339_vm7, 0, %v442_v60  ;;  %v440_v49 = vsel %vm13339_vm7, 0, %v439_v13 }
 0x31b   : > { %444 = vst [vmem:[#allocation3 + $0xa8] sm:$0x1] %v443_v3  ;;  %441 = vst [vmem:[#allocation3 + $0x9c] sm:$0x1] %v440_v49 }
 0x31e   : > { %12424 = vmatmul.mubr.msk.bf16.gmra.mrb[12].mxu0 %vm4722_vm15, %v11522_v59 }
 0x31f   : > { %12427 = vmatprep.mubr.msk.bf16.mxu0 %vm4722_vm15, %v11523_v46  ;;  %v9722_v46 = vld [vmem:[%s17700_s4] sm:$0xf] }
 0x320   : > { %v15638_v31 = vcombine.low %v9722_v46, %v9722_v46  ;;  %v401_v46 = vsel %vm13339_vm7, 0, %v400_v15 }
 0x321   : > { %402 = vst [vmem:[#allocation3] sm:$0x1] %v401_v46 }
 0x322   : > { %17817 = vst [vmem:[#allocation13_spill] sm:$0xff] %v15638_v31  ;;  %9726 = vrot.lane.b32.xlu0 %v15638_v31, %s13021_s11  ;;  %10024 = vrot.lane.b32.xlu1 %v15638_v31, %s13022_s14  ;;  %s11166_s11 = sshll.u32 %s257_s10, 4 }
 0x323   : > { %s259_s13 = scalar_lea.vmem [#allocation4], %s11166_s11 }
 0x324   : > { %s11091_s14 = sshll.u32 %s259_s13, 4  ;;  %s17656_s14 = int_to_ptr.vmem [resolvable:$true] %s11091_s14 }
 0x326   : > { %12428 = vmatmul.mubr.msk.bf16.gmra.mrb[16].mxu0 %vm4722_vm15, %v11524_v44  ;;  %v415_v44 = vld [vmem:[#allocation3 + $0x3c] sm:$0x1]  ;;  %10168 = vrot.lane.b32.xlu0 %v15638_v31, %s13023_s15 }
 0x327   : > { %12431 = vmatprep.mubr.msk.bf16.mxu0 %vm4722_vm15, %v11525_v20  ;;  %v416_v0 = vsel %vm13339_vm7, 0, %v415_v44  ;;  %v469_v20 = vld [vmem:[#allocation3 + $0x44] sm:$0x1]  ;;  %v15706_v44 = vld [vmem:[%s17699_s3] ss:$0 sm:$0xff] }
 0x328   : > { %417 = vst [vmem:[#allocation3 + $0x3c] sm:$0x1] %v416_v0  ;;  %v470_v25 = vsel %vm13119_vm2, 0, %v469_v20  ;;  %v7897_v26 = vld [vmem:[#allocation3] sm:$0xf]  ;;  %v7962_v0 = vor.u32 %v7961_v19, %v15701_v9  ;;  %v7965_v20 = vshll.u32 %v7929_v5, 16 }
 0x329   : > { %471 = vst [vmem:[#allocation3 + $0x44] sm:$0x1] %v470_v25  ;;  %v7946_v23 = vshrl.u32 %v7897_v26, 16  ;;  %v7949_v29 = vshll.u32 %v7897_v26, 16  ;;  %v7789_v5 = vld [vmem:[#allocation3 + $0x14] sm:$0x1] }
 0x32a   : > { %v15711_v58 = vrot.slane %v7962_v0, 4  ;;  %v15714_v24 = vrot.slane %v7965_v20, 5 }
 0x32b   : > { %v7948_v28 = vrot.slane %v7946_v23, 4  ;;  %v7951_v14 = vrot.slane %v7949_v29, 5 }
 0x32c   : > { %v7968_v61 = vsel %vm13590_vm0, %v15711_v58, %v15714_v24 }
 0x32d   : > { %v7952_v51 = vor.u32 %v7951_v14, %v7948_v28 }
 0x32e   : > { %12432 = vmatmul.mubr.msk.bf16.gmra.mrb[20].mxu0 %vm4722_vm15, %v11526_v55  ;;  %v428_v55 = vsel %vm13339_vm7, 0, %v427_v50 }
 0x32f   : > { %12435 = vmatprep.mubr.msk.bf16.mxu0 %vm4722_vm15, %v11527_v16  ;;  %429 = vst [vmem:[#allocation3 + $0x6c] sm:$0x1] %v428_v55  ;;  %v436_v16 = vld [vmem:[#allocation3 + $0x90] sm:$0x1]  ;;  %v15717_v8 = vrot.slane %v7952_v51, 4 }
 0x330   : > { %v437_v35 = vsel %vm13339_vm7, 0, %v436_v16 }
 0x331   : > { %438 = vst [vmem:[#allocation3 + $0x90] sm:$0x1] %v437_v35 }
 0x336   : > { %12436 = vmatmul.mubr.msk.bf16.gmra.mrb[24].mxu0 %vm4722_vm15, %v11528_v62  ;;  %v494_v62 = vsel %vm13119_vm2, 0, %v493_v39 }
 0x337   : > { %12439 = vmatprep.mubr.msk.bf16.mxu0 %vm4722_vm15, %v11529_v30  ;;  %v448_v30 = vld [vmem:[#allocation3 + $0xc0] sm:$0x1]  ;;  %495 = vst [vmem:[#allocation3 + $0xa4] sm:$0x1] %v494_v62  ;;  %v7792_v62 = vld [vmem:[#allocation3 + $0x18] sm:$0xf] }
 0x338   : > { %v449_v36 = vsel %vm13339_vm7, 0, %v448_v30 }
 0x339   : > { %450 = vst [vmem:[#allocation3 + $0xc0] sm:$0x1] %v449_v36 }
 0x33e   : > { %12440 = vmatmul.mubr.msk.bf16.gmra.mrb[28].mxu0 %vm4722_vm15, %v11530_v22  ;;  %v446_v22 = vsel %vm13339_vm7, 0, %v445_v53 }
 0x33f   : > { %447 = vst [vmem:[#allocation3 + $0xb4] sm:$0x1] %v446_v22 }
 0x3d9   : > { %v12413_v25 = vpop.f32.mrb[0].mxu0 }
 0x3da   : > { %v7304_v6 = vadd.f32 %v12413_v25, %v15706_v44  ;;  %v7136_v33 = vpop.f32.mrb[1].mxu0 }
 0x3db   : > { %v7302_v48 = vadd.f32 %v15706_v44, %v7136_v33  ;;  %v12414_v18 = vpop.f32.mrb[2].mxu0 }
 0x3dc   : > { %v7336_v56 = vmax.f32 %v7304_v6, 0.0  ;;  %v7305_v17 = vadd.f32 %v12414_v18, %v15706_v44  ;;  %v7139_v37 = vpop.f32.mrb[3].mxu0 }
 0x3dd   : > { %v7334_v50 = vmax.f32 %v7302_v48, 0.0  ;;  %v7303_v57 = vadd.f32 %v15706_v44, %v7139_v37 }
 0x3de   : > { %v11791_v55 = vpack.c.bf16 %v7336_v56, %v7336_v56  ;;  %v7337_v1 = vmax.f32 %v7305_v17, 0.0  ;;  %v7958_v56 = vsel %vm13590_vm0, %v15717_v8, %v15701_v9 }
 0x3df   : > { %v11789_v34 = vpack.c.bf16 %v7334_v50, %v7334_v50  ;;  %v7335_v16 = vmax.f32 %v7303_v57, 0.0 }
 0x3e0   : > { %v7480_v63 = vshrl.u32 %v11791_v55, 16  ;;  %v11792_v35 = vpack.c.bf16 %v7337_v1, %v7337_v1  ;;  %v7483_v47 = vshll.u32 %v11791_v55, 16 }
 0x3e1   : > { %v7463_v11 = vshrl.u32 %v11789_v34, 16  ;;  %v7466_v32 = vshll.u32 %v11789_v34, 16  ;;  %v11790_v52 = vpack.c.bf16 %v7335_v16, %v7335_v16  ;;  %v12417_v60 = vpop.f32.mrb[4].mxu0 }
 0x3e2   : > { %v7482_v3 = vrot.slane %v7480_v63, 7  ;;  %v7488_v13 = vshrl.u32 %v11792_v35, 16  ;;  %v7491_v49 = vshll.u32 %v11792_v35, 16  ;;  %v7308_v41 = vadd.f32 %v12417_v60, %v15706_v44  ;;  %v7152_v27 = vpop.f32.mrb[5].mxu0  ;;  %v7806_v63 = vld [vmem:[#allocation3 + $0x30] sm:$0xf] }
 0x3e3   : > { %v7465_v30 = vrot.slane %v7463_v11, 7  ;;  %v7471_v36 = vshrl.u32 %v11790_v52, 16  ;;  %v7474_v53 = vshll.u32 %v11790_v52, 16  ;;  %v7306_v22 = vadd.f32 %v15706_v44, %v7152_v27  ;;  %v12418_v21 = vpop.f32.mrb[6].mxu0 }
 0x3e4   : > { %v7485_v42 = vor.u32 %v7483_v47, %v7482_v3  ;;  %v7486_v54 = vrot.slane %v7482_v3, 4  ;;  %v7490_v15 = vrot.slane %v7488_v13, 7  ;;  %v7340_v10 = vmax.f32 %v7308_v41, 0.0  ;;  %v7155_v46 = vpop.f32.mrb[7].mxu0  ;;  %v7799_v3 = vld [vmem:[#allocation3 + $0x24] sm:$0xf] }
 0x3e5   : > { %v7468_v40 = vor.u32 %v7466_v32, %v7465_v30  ;;  %v7469_v2 = vrot.slane %v7465_v30, 4  ;;  %v7473_v12 = vrot.slane %v7471_v36, 7  ;;  %v7338_v26 = vmax.f32 %v7306_v22, 0.0 }
 0x3e6   : > { %v7793_v19 = vsel %vm15726_vm10, %v7485_v42, %v7792_v62  ;;  %v7493_v23 = vor.u32 %v7491_v49, %v7490_v15  ;;  %v7495_v29 = vrot.slane %v7490_v15, 4  ;;  %v11795_v0 = vpack.c.bf16 %v7340_v10, %v7340_v10 }
 0x3e7   : > { %7794 = vst [vmem:[#allocation3 + $0x18] sm:$0xf] %v7793_v19  ;;  %v7786_v28 = vsel %vm15726_vm10, %v7468_v40, %v7785_v7  ;;  %v7476_v14 = vor.u32 %v7474_v53, %v7473_v12  ;;  %v7478_v20 = vrot.slane %v7473_v12, 4  ;;  %v11793_v25 = vpack.c.bf16 %v7338_v26, %v7338_v26  ;;  %v7810_v40 = vld [vmem:[#allocation3 + $0x38] sm:$0x1] }
 0x3e8   : > { %7787 = vst [vmem:[#allocation3 + $0xc] sm:$0xf] %v7786_v28  ;;  %v7494_v33 = vsel %vm13161_vm6, %v7486_v54, %v7493_v23  ;;  %v7797_v48 = vsel %vm13339_vm7, %v7495_v29, %v7796_v43  ;;  %v7514_v18 = vshrl.u32 %v11795_v0, 16  ;;  %v7517_v51 = vshll.u32 %v11795_v0, 16 }
 0x3e9   : > { %7795 = vst.msk [vmem:[#allocation3 + $0x1c] sm:$0xf] %vm271_vm3, %v7494_v33  ;;  %7798 = vst [vmem:[#allocation3 + $0x20] sm:$0x1] %v7797_v48  ;;  %v7477_v17 = vsel %vm13161_vm6, %v7469_v2, %v7476_v14  ;;  %v7790_v37 = vsel %vm13339_vm7, %v7478_v20, %v7789_v5  ;;  %v7497_v50 = vshrl.u32 %v11793_v25, 16  ;;  %v12421_v57 = vpop.f32.mrb[8].mxu0  ;;  %v7309_v1 = vadd.f32 %v12418_v21, %v15706_v44 }
 0x3ea   : > { %7788 = vst.msk [vmem:[#allocation3 + $0x10] sm:$0xf] %vm271_vm3, %v7477_v17  ;;  %7791 = vst [vmem:[#allocation3 + $0x14] sm:$0x1] %v7790_v37  ;;  %v15749_v55 = vrot.slane %v7514_v18, 7  ;;  %v7307_v9 = vadd.f32 %v15706_v44, %v7155_v46  ;;  %v7312_v34 = vadd.f32 %v12421_v57, %v15706_v44  ;;  %v7168_v16 = vpop.f32.mrb[9].mxu0  ;;  %v15762_v32 = vcombine.low %v7958_v56, %v7968_v61 }
 0x3eb   : > { %v15754_v35 = vrot.slane %v7497_v50, 7  ;;  %v7500_v8 = vshll.u32 %v11793_v25, 16  ;;  %v7310_v47 = vadd.f32 %v15706_v44, %v7168_v16  ;;  %v12422_v11 = vpop.f32.mrb[10].mxu0  ;;  %v7341_v13 = vmax.f32 %v7309_v1, 0.0  ;;  %v7803_v2 = vld [vmem:[#allocation3 + $0x2c] sm:$0x1]  ;;  %v15780_v1 = vpop.permute.xlu0 %9726 }
 0x3ec   : > { %v7519_v52 = vor.u32 %v7517_v51, %v15749_v55  ;;  %v7520_v60 = vrot.slane %v15749_v55, 4  ;;  %v7339_v49 = vmax.f32 %v7307_v9, 0.0  ;;  %v7171_v41 = vpop.f32.mrb[11].mxu0  ;;  %v7344_v30 = vmax.f32 %v7312_v34, 0.0  ;;  %v7820_v25 = vld [vmem:[#allocation3 + $0x48] sm:$0xf]  ;;  %11991 = vmatprep.mubr.msk.bf16.mxu1 %vm4722_vm15, %v15780_v1 }
 0x3ed   : > { %v7502_v27 = vor.u32 %v7500_v8, %v15754_v35  ;;  %v7503_v62 = vrot.slane %v15754_v35, 4  ;;  %v7342_v36 = vmax.f32 %v7310_v47, 0.0  ;;  %v11796_v58 = vpack.c.bf16 %v7341_v13, %v7341_v13  ;;  %v7813_v57 = vld [vmem:[#allocation3 + $0x3c] sm:$0xf] }
 0x3ee   : > { %v7807_v53 = vsel %vm15726_vm10, %v7519_v52, %v7806_v63  ;;  %v11794_v24 = vpack.c.bf16 %v7339_v49, %v7339_v49  ;;  %v7313_v61 = vadd.f32 %v12422_v11, %v15706_v44  ;;  %v11799_v21 = vpack.c.bf16 %v7344_v30, %v7344_v30 }
 0x3ef   : > { %7808 = vst [vmem:[#allocation3 + $0x30] sm:$0xf] %v7807_v53  ;;  %v7800_v22 = vsel %vm15726_vm10, %v7502_v27, %v7799_v3  ;;  %v11797_v42 = vpack.c.bf16 %v7342_v36, %v7342_v36  ;;  %v7311_v54 = vadd.f32 %v15706_v44, %v7171_v41  ;;  %v7522_v7 = vshrl.u32 %v11796_v58, 16 }
 0x3f0   : > { %7801 = vst [vmem:[#allocation3 + $0x24] sm:$0xf] %v7800_v22  ;;  %v7525_v15 = vshll.u32 %v11796_v58, 16  ;;  %v7505_v10 = vshrl.u32 %v11794_v24, 16  ;;  %v7508_v46 = vshll.u32 %v11794_v24, 16  ;;  %v7548_v43 = vshrl.u32 %v11799_v21, 16 }
 0x3f1   : > { %v7551_v12 = vshll.u32 %v11799_v21, 16  ;;  %v7531_v26 = vshrl.u32 %v11797_v42, 16  ;;  %v7534_v19 = vshll.u32 %v11797_v42, 16  ;;  %v12425_v23 = vpop.f32.mrb[12].mxu0  ;;  %v7524_v29 = vrot.slane %v7522_v7, 7 }
 0x3f2   : > { %v7507_v5 = vrot.slane %v7505_v10, 7  ;;  %v7345_v0 = vmax.f32 %v7313_v61, 0.0  ;;  %v7343_v28 = vmax.f32 %v7311_v54, 0.0  ;;  %v7184_v14 = vpop.f32.mrb[13].mxu0  ;;  %v15774_v20 = vrot.slane %v7548_v43, 7 }
 0x3f3   : > { %v15776_v33 = vrot.slane %v7531_v26, 7  ;;  %v7316_v48 = vadd.f32 %v12425_v23, %v15706_v44  ;;  %v7314_v18 = vadd.f32 %v15706_v44, %v7184_v14  ;;  %v12426_v56 = vpop.f32.mrb[14].mxu0  ;;  %v7527_v17 = vor.u32 %v7525_v15, %v7524_v29  ;;  %v7824_v61 = vld [vmem:[#allocation3 + $0x50] sm:$0x1] }
 0x3f4   : > { %v7529_v37 = vrot.slane %v7524_v29, 4  ;;  %v7510_v51 = vor.u32 %v7508_v46, %v7507_v5  ;;  %v7512_v50 = vrot.slane %v7507_v5, 4  ;;  %v7187_v55 = vpop.f32.mrb[15].mxu0  ;;  %v7553_v9 = vor.u32 %v7551_v12, %v15774_v20  ;;  %v7817_v46 = vld [vmem:[#allocation3 + $0x44] sm:$0x1] }
 0x3f5   : > { %v7554_v34 = vrot.slane %v15774_v20, 4  ;;  %v7536_v16 = vor.u32 %v7534_v19, %v15776_v33  ;;  %v7537_v63 = vrot.slane %v15776_v33, 4  ;;  %v7528_v35 = vsel %vm13161_vm6, %v7520_v60, %v7527_v17 }
 0x3f6   : > { %v7811_v8 = vsel %vm13339_vm7, %v7529_v37, %v7810_v40  ;;  %v7511_v47 = vsel %vm13161_vm6, %v7503_v62, %v7510_v51  ;;  %v7804_v11 = vsel %vm13339_vm7, %v7512_v50, %v7803_v2  ;;  %7809 = vst.msk [vmem:[#allocation3 + $0x34] sm:$0xf] %vm271_vm3, %v7528_v35  ;;  %v7821_v52 = vsel %vm15726_vm10, %v7553_v9, %v7820_v25  ;;  %v7834_v51 = vld [vmem:[#allocation3 + $0x60] sm:$0xf]  ;;  %v7827_v50 = vld [vmem:[#allocation3 + $0x54] sm:$0xf] }
 0x3f7   : > { %7812 = vst [vmem:[#allocation3 + $0x38] sm:$0x1] %v7811_v8  ;;  %7802 = vst.msk [vmem:[#allocation3 + $0x28] sm:$0xf] %vm271_vm3, %v7511_v47  ;;  %v7814_v60 = vsel %vm15726_vm10, %v7536_v16, %v7813_v57  ;;  %v11800_v3 = vpack.c.bf16 %v7345_v0, %v7345_v0  ;;  %v11798_v13 = vpack.c.bf16 %v7343_v28, %v7343_v28  ;;  %v7348_v49 = vmax.f32 %v7316_v48, 0.0 }
 0x3f8   : > { %7805 = vst [vmem:[#allocation3 + $0x2c] sm:$0x1] %v7804_v11  ;;  %7822 = vst [vmem:[#allocation3 + $0x48] sm:$0xf] %v7821_v52  ;;  %v7346_v41 = vmax.f32 %v7314_v18, 0.0  ;;  %v7317_v27 = vadd.f32 %v12426_v56, %v15706_v44  ;;  %v7315_v62 = vadd.f32 %v15706_v44, %v7187_v55 }
 0x3f9   : > { %7815 = vst [vmem:[#allocation3 + $0x3c] sm:$0xf] %v7814_v60  ;;  %v7556_v30 = vshrl.u32 %v11800_v3, 16  ;;  %v7559_v36 = vshll.u32 %v11800_v3, 16  ;;  %v7539_v53 = vshrl.u32 %v11798_v13, 16  ;;  %v7542_v58 = vshll.u32 %v11798_v13, 16 }
 0x3fa   : > { %v12429_v24 = vpop.f32.mrb[16].mxu0  ;;  %v11803_v22 = vpack.c.bf16 %v7348_v49, %v7348_v49  ;;  %v11801_v21 = vpack.c.bf16 %v7346_v41, %v7346_v41  ;;  %v7349_v42 = vmax.f32 %v7317_v27, 0.0  ;;  %v7347_v54 = vmax.f32 %v7315_v62, 0.0 }
 0x3fb   : > { %v7200_v7 = vpop.f32.mrb[17].mxu0  ;;  %v7558_v15 = vrot.slane %v7556_v30, 7  ;;  %v7541_v10 = vrot.slane %v7539_v53, 7  ;;  %v7320_v40 = vadd.f32 %v12429_v24, %v15706_v44  ;;  %v7831_v53 = vld [vmem:[#allocation3 + $0x5c] sm:$0x1] }
 0x3fc   : > { %v7318_v2 = vadd.f32 %v15706_v44, %v7200_v7  ;;  %v12430_v43 = vpop.f32.mrb[18].mxu0  ;;  %v7582_v12 = vshrl.u32 %v11803_v22, 16  ;;  %v7585_v26 = vshll.u32 %v11803_v22, 16  ;;  %v7565_v19 = vshrl.u32 %v11801_v21, 16 }
 0x3fd   : > { %v7568_v23 = vshll.u32 %v11801_v21, 16  ;;  %v7203_v29 = vpop.f32.mrb[19].mxu0  ;;  %v7561_v5 = vor.u32 %v7559_v36, %v7558_v15  ;;  %v7563_v0 = vrot.slane %v7558_v15, 4  ;;  %v7544_v28 = vor.u32 %v7542_v58, %v7541_v10  ;;  %v7838_v36 = vld [vmem:[#allocation3 + $0x68] sm:$0x1] }
 0x3fe   : > { %v7546_v14 = vrot.slane %v7541_v10, 4  ;;  %v7584_v20 = vrot.slane %v7582_v12, 7  ;;  %v7567_v25 = vrot.slane %v7565_v19, 7  ;;  %v11804_v33 = vpack.c.bf16 %v7349_v42, %v7349_v42 }
 0x3ff   : > { %v11802_v48 = vpack.c.bf16 %v7347_v54, %v7347_v54  ;;  %v7562_v18 = vsel %vm13161_vm6, %v7554_v34, %v7561_v5  ;;  %v7825_v56 = vsel %vm13339_vm7, %v7563_v0, %v7824_v61  ;;  %v7545_v17 = vsel %vm13161_vm6, %v7537_v63, %v7544_v28 }
 0x400   : > { %v7818_v37 = vsel %vm13339_vm7, %v7546_v14, %v7817_v46  ;;  %7823 = vst.msk [vmem:[#allocation3 + $0x4c] sm:$0xf] %vm271_vm3, %v7562_v18  ;;  %7826 = vst [vmem:[#allocation3 + $0x50] sm:$0x1] %v7825_v56  ;;  %v7587_v57 = vor.u32 %v7585_v26, %v7584_v20  ;;  %v7588_v55 = vrot.slane %v7584_v20, 4  ;;  %v7570_v9 = vor.u32 %v7568_v23, %v7567_v25 }
 0x401   : > { %7816 = vst.msk [vmem:[#allocation3 + $0x40] sm:$0xf] %vm271_vm3, %v7545_v17  ;;  %7819 = vst [vmem:[#allocation3 + $0x44] sm:$0x1] %v7818_v37  ;;  %v7571_v34 = vrot.slane %v7567_v25, 4  ;;  %v7590_v16 = vshrl.u32 %v11804_v33, 16  ;;  %v7321_v27 = vadd.f32 %v12430_v43, %v15706_v44  ;;  %v7319_v62 = vadd.f32 %v15706_v44, %v7203_v29 }
 0x402   : > { %v7593_v35 = vshll.u32 %v11804_v33, 16  ;;  %v7573_v8 = vshrl.u32 %v11802_v48, 16  ;;  %v7576_v47 = vshll.u32 %v11802_v48, 16  ;;  %v12433_v63 = vpop.f32.mrb[20].mxu0  ;;  %v7835_v11 = vsel %vm15726_vm10, %v7587_v57, %v7834_v51  ;;  %v7848_v29 = vld [vmem:[#allocation3 + $0x78] sm:$0xf] }
 0x403   : > { %v7828_v52 = vsel %vm15726_vm10, %v7570_v9, %v7827_v50  ;;  %v7352_v60 = vmax.f32 %v7320_v40, 0.0  ;;  %v7350_v3 = vmax.f32 %v7318_v2, 0.0  ;;  %v7216_v13 = vpop.f32.mrb[21].mxu0  ;;  %7836 = vst [vmem:[#allocation3 + $0x60] sm:$0xf] %v7835_v11  ;;  %v7592_v49 = vrot.slane %v7590_v16, 7 }
 0x404   : > { %7829 = vst [vmem:[#allocation3 + $0x54] sm:$0xf] %v7828_v52  ;;  %v7575_v41 = vrot.slane %v7573_v8, 7  ;;  %v12434_v30 = vpop.f32.mrb[22].mxu0  ;;  %v7324_v61 = vadd.f32 %v12433_v63, %v15706_v44  ;;  %v7322_v22 = vadd.f32 %v15706_v44, %v7216_v13  ;;  %v7353_v0 = vmax.f32 %v7321_v27, 0.0 }
 0x405   : > { %v11807_v58 = vpack.c.bf16 %v7352_v60, %v7352_v60  ;;  %v11805_v24 = vpack.c.bf16 %v7350_v3, %v7350_v3  ;;  %v7219_v21 = vpop.f32.mrb[23].mxu0  ;;  %v7595_v42 = vor.u32 %v7593_v35, %v7592_v49  ;;  %v7597_v54 = vrot.slane %v7592_v49, 4  ;;  %v7841_v14 = vld [vmem:[#allocation3 + $0x6c] sm:$0xf] }
 0x406   : > { %v7578_v7 = vor.u32 %v7576_v47, %v7575_v41  ;;  %v7580_v15 = vrot.slane %v7575_v41, 4  ;;  %v7351_v28 = vmax.f32 %v7319_v62, 0.0  ;;  %v7356_v20 = vmax.f32 %v7324_v61, 0.0  ;;  %v7845_v61 = vld [vmem:[#allocation3 + $0x74] sm:$0x1] }
 0x407   : > { %v7616_v10 = vshrl.u32 %v11807_v58, 16  ;;  %v7619_v46 = vshll.u32 %v11807_v58, 16  ;;  %v7599_v40 = vshrl.u32 %v11805_v24, 16  ;;  %v7602_v2 = vshll.u32 %v11805_v24, 16 }
 0x408   : > { %v7596_v43 = vsel %vm13161_vm6, %v7588_v55, %v7595_v42  ;;  %v7839_v12 = vsel %vm13339_vm7, %v7597_v54, %v7838_v36  ;;  %v7579_v26 = vsel %vm13161_vm6, %v7571_v34, %v7578_v7  ;;  %v7832_v19 = vsel %vm13339_vm7, %v7580_v15, %v7831_v53  ;;  %v7852_v36 = vld [vmem:[#allocation3 + $0x80] sm:$0x1] }
 0x409   : > { %7837 = vst.msk [vmem:[#allocation3 + $0x64] sm:$0xf] %vm271_vm3, %v7596_v43  ;;  %7840 = vst [vmem:[#allocation3 + $0x68] sm:$0x1] %v7839_v12  ;;  %v7618_v23 = vrot.slane %v7616_v10, 7  ;;  %v7601_v5 = vrot.slane %v7599_v40, 7  ;;  %v7325_v33 = vadd.f32 %v12434_v30, %v15706_v44  ;;  %v7323_v48 = vadd.f32 %v15706_v44, %v7219_v21 }
 0x40a   : > { %7830 = vst.msk [vmem:[#allocation3 + $0x58] sm:$0xf] %vm271_vm3, %v7579_v26  ;;  %7833 = vst [vmem:[#allocation3 + $0x5c] sm:$0x1] %v7832_v19  ;;  %v7354_v25 = vmax.f32 %v7322_v22, 0.0  ;;  %v12437_v18 = vpop.f32.mrb[24].mxu0  ;;  %v11808_v57 = vpack.c.bf16 %v7353_v0, %v7353_v0  ;;  %v11806_v55 = vpack.c.bf16 %v7351_v28, %v7351_v28  ;;  %v11811_v9 = vpack.c.bf16 %v7356_v20, %v7356_v20 }
 0x40b   : > { %v7621_v56 = vor.u32 %v7619_v46, %v7618_v23  ;;  %v7622_v17 = vrot.slane %v7618_v23, 4  ;;  %v7604_v37 = vor.u32 %v7602_v2, %v7601_v5  ;;  %v7605_v51 = vrot.slane %v7601_v5, 4  ;;  %v7232_v50 = vpop.f32.mrb[25].mxu0  ;;  %v7862_v21 = vld [vmem:[#allocation3 + $0x90] sm:$0xf] }
 0x40c   : > { %v11809_v34 = vpack.c.bf16 %v7354_v25, %v7354_v25  ;;  %v12438_v16 = vpop.f32.mrb[26].mxu0  ;;  %v7357_v47 = vmax.f32 %v7325_v33, 0.0  ;;  %v7355_v63 = vmax.f32 %v7323_v48, 0.0  ;;  %v7624_v52 = vshrl.u32 %v11808_v57, 16  ;;  %v7855_v2 = vld [vmem:[#allocation3 + $0x84] sm:$0xf] }
 0x40d   : > { %v7849_v35 = vsel %vm15726_vm10, %v7621_v56, %v7848_v29  ;;  %v7842_v8 = vsel %vm15726_vm10, %v7604_v37, %v7841_v14  ;;  %v7235_v11 = vpop.f32.mrb[27].mxu0  ;;  %v7627_v60 = vshll.u32 %v11808_v57, 16  ;;  %v7607_v3 = vshrl.u32 %v11806_v55, 16 }
 0x40e   : > { %7850 = vst [vmem:[#allocation3 + $0x78] sm:$0xf] %v7849_v35  ;;  %7843 = vst [vmem:[#allocation3 + $0x6c] sm:$0xf] %v7842_v8  ;;  %v7610_v13 = vshll.u32 %v11806_v55, 16  ;;  %v7650_v49 = vshrl.u32 %v11811_v9, 16  ;;  %v11812_v58 = vpack.c.bf16 %v7357_v47, %v7357_v47  ;;  %v11810_v24 = vpack.c.bf16 %v7355_v63, %v7355_v63 }
 0x40f   : > { %v7653_v41 = vshll.u32 %v11811_v9, 16  ;;  %v7633_v27 = vshrl.u32 %v11809_v34, 16  ;;  %v7636_v62 = vshll.u32 %v11809_v34, 16  ;;  %v7626_v30 = vrot.slane %v7624_v52, 7  ;;  %v7866_v35 = vld [vmem:[#allocation3 + $0x98] sm:$0x1] }
 0x410   : > { %v7609_v53 = vrot.slane %v7607_v3, 7  ;;  %v7652_v22 = vrot.slane %v7650_v49, 7  ;;  %v7328_v54 = vadd.f32 %v12437_v18, %v15706_v44  ;;  %v7326_v7 = vadd.f32 %v15706_v44, %v7232_v50 }
 0x411   : > { %v7635_v42 = vrot.slane %v7633_v27, 7  ;;  %v7629_v15 = vor.u32 %v7627_v60, %v7626_v30  ;;  %v7631_v10 = vrot.slane %v7626_v30, 4  ;;  %v12441_v43 = vpop.f32.mrb[28].mxu0  ;;  %v7658_v48 = vshrl.u32 %v11812_v58, 16 }
 0x412   : > { %v7612_v46 = vor.u32 %v7610_v13, %v7609_v53  ;;  %v7614_v40 = vrot.slane %v7609_v53, 4  ;;  %v7655_v12 = vor.u32 %v7653_v41, %v7652_v22  ;;  %v7656_v26 = vrot.slane %v7652_v22, 4  ;;  %v7248_v29 = vpop.f32.mrb[29].mxu0  ;;  %v7859_v13 = vld [vmem:[#allocation3 + $0x8c] sm:$0x1] }
 0x413   : > { %v7638_v19 = vor.u32 %v7636_v62, %v7635_v42  ;;  %v7639_v23 = vrot.slane %v7635_v42, 4  ;;  %v7630_v5 = vsel %vm13161_vm6, %v7622_v17, %v7629_v15  ;;  %v7853_v0 = vsel %vm13339_vm7, %v7631_v10, %v7852_v36  ;;  %v15851_v20 = vpop.f32.mrb[30].mxu0  ;;  %v7876_v42 = vld [vmem:[#allocation3 + $0xa8] sm:$0xf] }
 0x414   : > { %v7613_v28 = vsel %vm13161_vm6, %v7605_v51, %v7612_v46  ;;  %v7846_v14 = vsel %vm13339_vm7, %v7614_v40, %v7845_v61  ;;  %7851 = vst.msk [vmem:[#allocation3 + $0x7c] sm:$0xf] %vm271_vm3, %v7630_v5  ;;  %7854 = vst [vmem:[#allocation3 + $0x80] sm:$0x1] %v7853_v0  ;;  %v7863_v25 = vsel %vm15726_vm10, %v7655_v12, %v7862_v21  ;;  %v7661_v18 = vshll.u32 %v11812_v58, 16  ;;  %v7251_v56 = vpop.f32.mrb[31].mxu0 }
 0x415   : > { %7844 = vst.msk [vmem:[#allocation3 + $0x70] sm:$0xf] %vm271_vm3, %v7613_v28  ;;  %7847 = vst [vmem:[#allocation3 + $0x74] sm:$0x1] %v7846_v14  ;;  %v7856_v33 = vsel %vm15726_vm10, %v7638_v19, %v7855_v2  ;;  %v7641_v17 = vshrl.u32 %v11810_v24, 16  ;;  %v7644_v37 = vshll.u32 %v11810_v24, 16  ;;  %v7329_v55 = vadd.f32 %v12438_v16, %v15706_v44 }
 0x416   : > { %7864 = vst [vmem:[#allocation3 + $0x90] sm:$0xf] %v7863_v25  ;;  %7857 = vst [vmem:[#allocation3 + $0x84] sm:$0xf] %v7856_v33  ;;  %v7360_v51 = vmax.f32 %v7328_v54, 0.0  ;;  %v7358_v50 = vmax.f32 %v7326_v7, 0.0  ;;  %v7327_v9 = vadd.f32 %v15706_v44, %v7235_v11  ;;  %v7332_v34 = vadd.f32 %v12441_v43, %v15706_v44 }
 0x417   : > { %v7660_v57 = vrot.slane %v7658_v48, 7  ;;  %v7643_v8 = vrot.slane %v7641_v17, 7  ;;  %v7330_v52 = vadd.f32 %v15706_v44, %v7248_v29  ;;  %v7361_v49 = vmax.f32 %v7329_v55, 0.0  ;;  %v7869_v2 = vld [vmem:[#allocation3 + $0x9c] sm:$0xf] }
 0x418   : > { %v11815_v47 = vpack.c.bf16 %v7360_v51, %v7360_v51  ;;  %v11813_v63 = vpack.c.bf16 %v7358_v50, %v7358_v50  ;;  %v7359_v41 = vmax.f32 %v7327_v9, 0.0  ;;  %v7364_v15 = vmax.f32 %v7332_v34, 0.0  ;;  %v7880_v33 = vld [vmem:[#allocation3 + $0xb0] sm:$0x1]  ;;  %v7873_v50 = vld [vmem:[#allocation3 + $0xa4] sm:$0x1] }
 0x419   : > { %v7663_v60 = vor.u32 %v7661_v18, %v7660_v57  ;;  %v7665_v3 = vrot.slane %v7660_v57, 4  ;;  %v7646_v27 = vor.u32 %v7644_v37, %v7643_v8  ;;  %v7648_v62 = vrot.slane %v7643_v8, 4 }
 0x41a   : > { %v7684_v30 = vshrl.u32 %v11815_v47, 16  ;;  %v7687_v36 = vshll.u32 %v11815_v47, 16  ;;  %v7667_v53 = vshrl.u32 %v11813_v63, 16  ;;  %v7670_v58 = vshll.u32 %v11813_v63, 16  ;;  %v15880_v47 = vld [vmem:[#allocation3 + $0x60] sm:$0xf] }
 0x41b   : > { %v7664_v16 = vsel %vm13161_vm6, %v7656_v26, %v7663_v60  ;;  %v7867_v11 = vsel %vm13339_vm7, %v7665_v3, %v7866_v35  ;;  %v7647_v24 = vsel %vm13161_vm6, %v7639_v23, %v7646_v27  ;;  %v7860_v61 = vsel %vm13339_vm7, %v7648_v62, %v7859_v13  ;;  %v7890_v3 = vld [vmem:[#allocation3 + $0xc0] sm:$0xf]  ;;  %v7883_v27 = vld [vmem:[#allocation3 + $0xb4] sm:$0xf] }
 0x41c   : > { %7865 = vst.msk [vmem:[#allocation3 + $0x94] sm:$0xf] %vm271_vm3, %v7664_v16  ;;  %7868 = vst [vmem:[#allocation3 + $0x98] sm:$0x1] %v7867_v11  ;;  %v7686_v22 = vrot.slane %v7684_v30, 7  ;;  %v11816_v21 = vpack.c.bf16 %v7361_v49, %v7361_v49  ;;  %v7669_v54 = vrot.slane %v7667_v53, 7  ;;  %v11814_v7 = vpack.c.bf16 %v7359_v41, %v7359_v41 }
 0x41d   : > { %7858 = vst.msk [vmem:[#allocation3 + $0x88] sm:$0xf] %vm271_vm3, %v7647_v24  ;;  %7861 = vst [vmem:[#allocation3 + $0x8c] sm:$0x1] %v7860_v61  ;;  %v7362_v10 = vmax.f32 %v7330_v52, 0.0  ;;  %v11819_v28 = vpack.c.bf16 %v7364_v15, %v7364_v15  ;;  %v7333_v18 = vadd.f32 %v15851_v20, %v15706_v44  ;;  %v7331_v17 = vadd.f32 %v15706_v44, %v7251_v56 }
 0x41e   : > { %v7689_v46 = vor.u32 %v7687_v36, %v7686_v22  ;;  %v7690_v40 = vrot.slane %v7686_v22, 4  ;;  %v7692_v43 = vshrl.u32 %v11816_v21, 16  ;;  %v7695_v12 = vshll.u32 %v11816_v21, 16  ;;  %v15899_v24 = vld [vmem:[#allocation3 + $0x68] sm:$0x1] }
 0x41f   : > { %v7672_v26 = vor.u32 %v7670_v58, %v7669_v54  ;;  %v7673_v19 = vrot.slane %v7669_v54, 4  ;;  %v7675_v23 = vshrl.u32 %v11814_v7, 16  ;;  %v7678_v29 = vshll.u32 %v11814_v7, 16  ;;  %v15897_v58 = vld [vmem:[#allocation3 + $0x64] sm:$0xf]  ;;  %17821 = vst [vmem:[#allocation21_spill] sm:$0xff] %v15899_v24 }
 0x420   : > { %v7877_v5 = vsel %vm15726_vm10, %v7689_v46, %v7876_v42  ;;  %v7694_v0 = vrot.slane %v7692_v43, 7  ;;  %v11817_v14 = vpack.c.bf16 %v7362_v10, %v7362_v10  ;;  %v7718_v57 = vshrl.u32 %v11819_v28, 16  ;;  %v15904_v7 = vld [vmem:[#allocation3 + $0x6c] sm:$0xf] }
 0x421   : > { %7878 = vst [vmem:[#allocation3 + $0xa8] sm:$0xf] %v7877_v5  ;;  %v7870_v25 = vsel %vm15726_vm10, %v7672_v26, %v7869_v2  ;;  %v7677_v48 = vrot.slane %v7675_v23, 7  ;;  %v7721_v55 = vshll.u32 %v11819_v28, 16  ;;  %v7365_v44 = vmax.f32 %v7333_v18, 0.0 }
 0x422   : > { %7871 = vst [vmem:[#allocation3 + $0x9c] sm:$0xf] %v7870_v25  ;;  %v7697_v37 = vor.u32 %v7695_v12, %v7694_v0  ;;  %v7699_v51 = vrot.slane %v7694_v0, 4  ;;  %v7701_v35 = vshrl.u32 %v11817_v14, 16  ;;  %v7704_v8 = vshll.u32 %v11817_v14, 16 }
 0x423   : > { %v7680_v9 = vor.u32 %v7678_v29, %v7677_v48  ;;  %v7682_v34 = vrot.slane %v7677_v48, 4  ;;  %v7720_v52 = vrot.slane %v7718_v57, 7  ;;  %v7363_v49 = vmax.f32 %v7331_v17, 0.0  ;;  %v7894_v2 = vld [vmem:[#allocation3 + $0xc8] sm:$0x1] }
 0x424   : > { %v7698_v63 = vsel %vm13161_vm6, %v7690_v40, %v7697_v37  ;;  %v7881_v20 = vsel %vm13339_vm7, %v7699_v51, %v7880_v33  ;;  %v7703_v13 = vrot.slane %v7701_v35, 7  ;;  %v11820_v62 = vpack.c.bf16 %v7365_v44, %v7365_v44  ;;  %v7887_v29 = vld [vmem:[#allocation3 + $0xbc] sm:$0x1]  ;;  %v15912_v33 = vld [vmem:[#allocation3 + $0x70] sm:$0xf] }
 0x425   : > { %7879 = vst.msk [vmem:[#allocation3 + $0xac] sm:$0xf] %vm271_vm3, %v7698_v63  ;;  %7882 = vst [vmem:[#allocation3 + $0xb0] sm:$0x1] %v7881_v20  ;;  %v7681_v56 = vsel %vm13161_vm6, %v7673_v19, %v7680_v9  ;;  %v7874_v60 = vsel %vm13339_vm7, %v7682_v34, %v7873_v50  ;;  %v7723_v41 = vor.u32 %v7721_v55, %v7720_v52  ;;  %v8138_v30 = vshrl.u32 %v15880_v47, 16 }
 0x426   : > { %7872 = vst.msk [vmem:[#allocation3 + $0xa0] sm:$0xf] %vm271_vm3, %v7681_v56  ;;  %7875 = vst [vmem:[#allocation3 + $0xa4] sm:$0x1] %v7874_v60  ;;  %v15895_v36 = vsel %vm4722_vm15, %v15762_v32, 0  ;;  %v7724_v16 = vrot.slane %v7720_v52, 4  ;;  %v7706_v11 = vor.u32 %v7704_v8, %v7703_v13  ;;  %v11818_v53 = vpack.c.bf16 %v7363_v49, %v7363_v49 }
 0x427   : > { %v8141_v61 = vshll.u32 %v15880_v47, 16  ;;  %v7891_v22 = vsel %vm15726_vm10, %v7723_v41, %v7890_v3  ;;  %v7707_v21 = vrot.slane %v7703_v13, 4  ;;  %v7726_v42 = vshrl.u32 %v11820_v62, 16  ;;  %v15914_v51 = vld [vmem:[#allocation3 + $0x74] sm:$0x1] }
 0x428   : > { %v8140_v54 = vrot.slane %v8138_v30, 4  ;;  %7892 = vst [vmem:[#allocation3 + $0xc0] sm:$0xf] %v7891_v22  ;;  %v7884_v32 = vsel %vm15726_vm10, %v7706_v11, %v7883_v27  ;;  %v7729_v15 = vshll.u32 %v11820_v62, 16  ;;  %v7709_v10 = vshrl.u32 %v11818_v53, 16  ;;  %17822 = vst [vmem:[#allocation14_spill] sm:$0xff] %v15914_v51 }
 0x429   : > { %v8143_v46 = vrot.slane %v8141_v61, 5  ;;  %7885 = vst [vmem:[#allocation3 + $0xb4] sm:$0xf] %v7884_v32  ;;  %v7728_v40 = vrot.slane %v7726_v42, 7  ;;  %v8147_v43 = vshll.u32 %v15897_v58, 16  ;;  %v8151_v12 = vshrl.u32 %v15897_v58, 16 }
 0x42a   : > { %v8157_v26 = vshll.u32 %v15899_v24, 16  ;;  %v7711_v19 = vrot.slane %v7709_v10, 7  ;;  %v7712_v23 = vshll.u32 %v11818_v53, 16  ;;  %v8162_v0 = vshrl.u32 %v15904_v7, 16  ;;  %v15920_v34 = vld [vmem:[#allocation3 + $0xc] sm:$0xf] }
 0x42b   : > { %v8144_v5 = vor.u32 %v8143_v46, %v8140_v54  ;;  %v7731_v39 = vor.u32 %v7729_v15, %v7728_v40  ;;  %v7733_v28 = vrot.slane %v7728_v40, 4  ;;  %v8149_v14 = vrot.slane %v8147_v43, 5  ;;  %v15922_v35 = vld [vmem:[#allocation3 + $0x10] sm:$0xf]  ;;  %v15936_v13 = vld [vmem:[#allocation3 + $0x14] sm:$0x1] }
 0x42c   : > { %v8153_v25 = vrot.slane %v8151_v12, 4  ;;  %v7714_v48 = vor.u32 %v7712_v23, %v7711_v19  ;;  %v7716_v18 = vrot.slane %v7711_v19, 4  ;;  %v8159_v37 = vrot.slane %v8157_v26, 5  ;;  %17823 = vst [vmem:[#allocation18_spill] sm:$0xff] %v15936_v13  ;;  %v15943_v53 = vld [vmem:[#allocation3 + $0x78] sm:$0xf] }
 0x42d   : > { %v8145_v17 = vrot.slane %v8144_v5, 4  ;;  %v7732_v50 = vsel %vm13161_vm6, %v7724_v16, %v7731_v39  ;;  %v7895_v57 = vsel %vm13339_vm7, %v7733_v28, %v7894_v2  ;;  %v8164_v9 = vrot.slane %v8162_v0, 4  ;;  %v15945_v54 = vld [vmem:[#allocation3 + $0x7c] sm:$0xf] }
 0x42e   : > { %v8154_v55 = vor.u32 %v8153_v25, %v8149_v14  ;;  %7893 = vst.msk [vmem:[#allocation3 + $0xc4] sm:$0xf] %vm271_vm3, %v7732_v50  ;;  %7896 = vst [vmem:[#allocation3 + $0xc8] sm:$0x1] %v7895_v57  ;;  %v7715_v8 = vsel %vm13161_vm6, %v7707_v21, %v7714_v48  ;;  %v7888_v63 = vsel %vm13339_vm7, %v7716_v18, %v7887_v29  ;;  %v8165_v52 = vshll.u32 %v15904_v7, 16 }
 0x42f   : > { %v8150_v20 = vsel %vm13590_vm0, %v8145_v17, %v8149_v14  ;;  %7886 = vst.msk [vmem:[#allocation3 + $0xb8] sm:$0xf] %vm271_vm3, %v7715_v8  ;;  %7889 = vst [vmem:[#allocation3 + $0xbc] sm:$0x1] %v7888_v63  ;;  %v8171_v56 = vshll.u32 %v15912_v33, 16  ;;  %v8175_v60 = vshrl.u32 %v15912_v33, 16 }
 0x430   : > { %v8155_v44 = vrot.slane %v8154_v55, 4  ;;  %v8181_v3 = vshll.u32 %v15914_v51, 16  ;;  %v8167_v6 = vrot.slane %v8165_v52, 5  ;;  %v7970_v49 = vshrl.u32 %v15920_v34, 16  ;;  %v15953_v29 = vld [vmem:[#allocation3 + $0x80] sm:$0x1] }
 0x431   : > { %v7973_v41 = vshll.u32 %v15920_v34, 16  ;;  %v7979_v27 = vshll.u32 %v15922_v35, 16  ;;  %v8173_v30 = vrot.slane %v8171_v56, 5  ;;  %v8177_v16 = vrot.slane %v8175_v60, 4  ;;  %17824 = vst [vmem:[#allocation15_spill] sm:$0xff] %v15953_v29 }
 0x432   : > { %v8160_v62 = vsel %vm13590_vm0, %v8155_v44, %v8159_v37  ;;  %v8183_v11 = vrot.slane %v8181_v3, 5  ;;  %v8168_v22 = vor.u32 %v8167_v6, %v8164_v9  ;;  %v7972_v21 = vrot.slane %v7970_v49, 4  ;;  %v15958_v25 = vld [vmem:[#allocation3 + $0x18] sm:$0xf]  ;;  %v15963_v37 = vld [vmem:[#allocation3 + $0x1c] sm:$0xf] }
 0x433   : > { %v11637_v61 = vcombine.low %v8150_v20, %v8160_v62  ;;  %v7975_v42 = vrot.slane %v7973_v41, 5  ;;  %v8178_v32 = vor.u32 %v8177_v16, %v8173_v30  ;;  %v7981_v15 = vrot.slane %v7979_v27, 5  ;;  %v15968_v20 = vld [vmem:[#allocation3 + $0x20] sm:$0x1]  ;;  %v15975_v49 = vld [vmem:[#allocation3 + $0x84] sm:$0xf] }
 0x434   : > { %v7983_v10 = vshrl.u32 %v15922_v35, 16  ;;  %v7989_v46 = vshll.u32 %v15936_v13, 16  ;;  %v8169_v40 = vrot.slane %v8168_v22, 4  ;;  %v8186_v43 = vshrl.u32 %v15943_v53, 16  ;;  %v15979_v16 = vld [vmem:[#allocation3 + $0x88] sm:$0xf] }
 0x435   : > { %12708 = vmatprep.subr.msk.bf16.mxu1 %vm4722_vm15, %v11637_v61  ;;  %v7976_v2 = vor.u32 %v7975_v42, %v7972_v21  ;;  %v8189_v12 = vshll.u32 %v15943_v53, 16  ;;  %v8179_v26 = vrot.slane %v8178_v32, 4  ;;  %v8195_v5 = vshll.u32 %v15945_v54, 16 }
 0x436   : > { %11976 = vmatpush3.bf16.xpose.msra.mxu1 %v15895_v36  ;;  %v7985_v19 = vrot.slane %v7983_v10, 4  ;;  %v7991_v23 = vrot.slane %v7989_v46, 5  ;;  %v8174_v0 = vsel %vm13590_vm0, %v8169_v40, %v8173_v30  ;;  %v8188_v28 = vrot.slane %v8186_v43, 4  ;;  %v15985_v46 = vld [vmem:[#allocation3 + $0x24] sm:$0xf] }
 0x437   : > { %v7977_v39 = vrot.slane %v7976_v2, 4  ;;  %v8191_v14 = vrot.slane %v8189_v12, 5  ;;  %v8184_v48 = vsel %vm13590_vm0, %v8179_v26, %v8183_v11  ;;  %v8197_v36 = vrot.slane %v8195_v5, 5  ;;  %v15988_v43 = vld [vmem:[#allocation3 + $0x8c] sm:$0x1] }
 0x438   : > { %v7986_v18 = vor.u32 %v7985_v19, %v7981_v15  ;;  %v8199_v17 = vshrl.u32 %v15945_v54, 16  ;;  %v11638_v50 = vcombine.low %v8174_v0, %v8184_v48  ;;  %v8205_v9 = vshll.u32 %v15953_v29, 16 }
 0x439   : > { %v7982_v57 = vsel %vm13590_vm0, %v7977_v39, %v7981_v15  ;;  %v8192_v55 = vor.u32 %v8191_v14, %v8188_v28  ;;  %v7994_v52 = vshrl.u32 %v15958_v25, 16  ;;  %v7997_v44 = vshll.u32 %v15958_v25, 16  ;;  %v15994_v39 = vld [vmem:[#allocation3 + $0x28] sm:$0xf] }
 0x43a   : > { %v7987_v8 = vrot.slane %v7986_v18, 4  ;;  %v8201_v63 = vrot.slane %v8199_v17, 4  ;;  %12709 = vmatprep.subr.msk.bf16.mxu1 %vm4722_vm15, %v11638_v50  ;;  %v8207_v60 = vrot.slane %v8205_v9, 5  ;;  %v8003_v3 = vshll.u32 %v15963_v37, 16 }
 0x43b   : > { %v8193_v56 = vrot.slane %v8192_v55, 4  ;;  %v8007_v6 = vshrl.u32 %v15963_v37, 16  ;;  %v7996_v62 = vrot.slane %v7994_v52, 4  ;;  %v7999_v30 = vrot.slane %v7997_v44, 5  ;;  %v16008_v44 = vld [vmem:[#allocation3 + $0x90] sm:$0xf] }
 0x43c   : > { %v7992_v41 = vsel %vm13590_vm0, %v7987_v8, %v7991_v23  ;;  %v8202_v27 = vor.u32 %v8201_v63, %v8197_v36  ;;  %v8005_v22 = vrot.slane %v8003_v3, 5  ;;  %v8013_v15 = vshll.u32 %v15968_v20, 16  ;;  %v16004_v8 = vld [vmem:[#allocation3 + $0x2c] sm:$0x1] }
 0x43d   : > { %v11630_v11 = vcombine.low %v7982_v57, %v7992_v41  ;;  %v8198_v61 = vsel %vm13590_vm0, %v8193_v56, %v8197_v36  ;;  %v8009_v21 = vrot.slane %v8007_v6, 4  ;;  %v8000_v32 = vor.u32 %v7999_v30, %v7996_v62  ;;  %v16010_v41 = vld [vmem:[#allocation3 + $0x94] sm:$0xf] }
 0x43e   : > { %v8203_v42 = vrot.slane %v8202_v27, 4  ;;  %v8210_v10 = vshrl.u32 %v15975_v49, 16  ;;  %v8213_v12 = vshll.u32 %v15975_v49, 16  ;;  %v8219_v26 = vshll.u32 %v15979_v16, 16 }
 0x43f   : > { %v9783_v40 = vsel %vm4722_vm15, %v11630_v11, 0  ;;  %v8010_v2 = vor.u32 %v8009_v21, %v8005_v22  ;;  %v8001_v23 = vrot.slane %v8000_v32, 4  ;;  %v8015_v5 = vrot.slane %v8013_v15, 5 }
 0x440   : > { %11978 = vmatpush3.bf16.xpose.msra.mxu1 %v9783_v40  ;;  %v8208_v19 = vsel %vm13590_vm0, %v8203_v42, %v8207_v60  ;;  %v8212_v0 = vrot.slane %v8210_v10, 4  ;;  %v8215_v48 = vrot.slane %v8213_v12, 5  ;;  %v8221_v18 = vrot.slane %v8219_v26, 5  ;;  %v16019_v40 = vld [vmem:[#allocation3 + $0x98] sm:$0x1] }
 0x441   : > { %v11639_v28 = vcombine.low %v8198_v61, %v8208_v19  ;;  %v8011_v14 = vrot.slane %v8010_v2, 4  ;;  %v8006_v36 = vsel %vm13590_vm0, %v8001_v23, %v8005_v22  ;;  %v8223_v17 = vshrl.u32 %v15979_v16, 16  ;;  %v16022_v12 = vld [vmem:[#allocation3 + $0x30] sm:$0xf] }
 0x442   : > { %v8229_v50 = vshll.u32 %v15988_v43, 16  ;;  %v8018_v57 = vshrl.u32 %v15985_v46, 16  ;;  %v8216_v9 = vor.u32 %v8215_v48, %v8212_v0  ;;  %v8021_v63 = vshll.u32 %v15985_v46, 16 }
 0x443   : > { %12710 = vmatprep.subr.msk.bf16.mxu1 %vm4722_vm15, %v11639_v28  ;;  %v8016_v55 = vsel %vm13590_vm0, %v8011_v14, %v8015_v5  ;;  %v8027_v52 = vshll.u32 %v15994_v39, 16  ;;  %v8225_v60 = vrot.slane %v8223_v17, 4  ;;  %v8031_v11 = vshrl.u32 %v15994_v39, 16 }
 0x444   : > { %v11631_v56 = vcombine.low %v8006_v36, %v8016_v55  ;;  %v8231_v3 = vrot.slane %v8229_v50, 5  ;;  %v8020_v6 = vrot.slane %v8018_v57, 4  ;;  %v8217_v27 = vrot.slane %v8216_v9, 4  ;;  %v16029_v50 = vld [vmem:[#allocation3 + $0x34] sm:$0xf] }
 0x445   : > { %v8023_v62 = vrot.slane %v8021_v63, 5  ;;  %v8029_v30 = vrot.slane %v8027_v52, 5  ;;  %v8226_v22 = vor.u32 %v8225_v60, %v8221_v18  ;;  %v8037_v21 = vshll.u32 %v16004_v8, 16 }
 0x446   : > { %v9786_v61 = vsel %vm4722_vm15, %v11631_v56, 0  ;;  %v8234_v42 = vshrl.u32 %v16008_v44, 16  ;;  %v8222_v32 = vsel %vm13590_vm0, %v8217_v27, %v8221_v18  ;;  %v8033_v10 = vrot.slane %v8031_v11, 4  ;;  %v16034_v56 = vld [vmem:[#allocation3 + $0x38] sm:$0x1] }
 0x447   : > { %v8024_v15 = vor.u32 %v8023_v62, %v8020_v6  ;;  %v8237_v2 = vshll.u32 %v16008_v44, 16  ;;  %v8227_v26 = vrot.slane %v8226_v22, 4  ;;  %v8039_v19 = vrot.slane %v8037_v21, 5  ;;  %v16037_v62 = vld [vmem:[#allocation3 + $0x9c] sm:$0xf] }
 0x448   : > { %11980 = vmatpush3.bf16.xpose.msra.mxu1 %v9786_v61  ;;  %v8236_v23 = vrot.slane %v8234_v42, 4  ;;  %v8243_v5 = vshll.u32 %v16010_v41, 16  ;;  %v8034_v28 = vor.u32 %v8033_v10, %v8029_v30  ;;  %v8247_v48 = vshrl.u32 %v16010_v41, 16  ;;  %v16045_v10 = vld [vmem:[#allocation3 + $0xa0] sm:$0xf] }
 0x449   : > { %v8025_v0 = vrot.slane %v8024_v15, 4  ;;  %v8239_v14 = vrot.slane %v8237_v2, 5  ;;  %v8232_v18 = vsel %vm13590_vm0, %v8227_v26, %v8231_v3  ;;  %v8253_v17 = vshll.u32 %v16019_v40, 16 }
 0x44a   : > { %v8245_v36 = vrot.slane %v8243_v5, 5  ;;  %v8042_v57 = vshrl.u32 %v16022_v12, 16  ;;  %v11640_v55 = vcombine.low %v8222_v32, %v8232_v18  ;;  %v8035_v63 = vrot.slane %v8034_v28, 4  ;;  %v16049_v5 = vld [vmem:[#allocation3 + $0xa4] sm:$0x1] }
 0x44b   : > { %v8030_v9 = vsel %vm13590_vm0, %v8025_v0, %v8029_v30  ;;  %v8240_v52 = vor.u32 %v8239_v14, %v8236_v23  ;;  %v8249_v60 = vrot.slane %v8247_v48, 4  ;;  %v8255_v6 = vrot.slane %v8253_v17, 5 }
 0x44c   : > { %v8044_v27 = vrot.slane %v8042_v57, 4  ;;  %v8045_v3 = vshll.u32 %v16022_v12, 16  ;;  %12711 = vmatprep.subr.msk.bf16.mxu1 %vm4722_vm15, %v11640_v55  ;;  %v8040_v11 = vsel %vm13590_vm0, %v8035_v63, %v8039_v19  ;;  %v8051_v22 = vshll.u32 %v16029_v50, 16 }
 0x44d   : > { %v8241_v61 = vrot.slane %v8240_v52, 4  ;;  %v8055_v30 = vshrl.u32 %v16029_v50, 16  ;;  %v11632_v21 = vcombine.low %v8030_v9, %v8040_v11  ;;  %v8250_v42 = vor.u32 %v8249_v60, %v8245_v36  ;;  %v16055_v9 = vld [vmem:[#allocation3 + $0x3c] sm:$0xf] }
 0x44e   : > { %v8047_v32 = vrot.slane %v8045_v3, 5  ;;  %v8061_v15 = vshll.u32 %v16034_v56, 16  ;;  %v8053_v26 = vrot.slane %v8051_v22, 5  ;;  %v8258_v19 = vshrl.u32 %v16037_v62, 16  ;;  %v16061_v3 = vld [vmem:[#allocation3 + $0x40] sm:$0xf] }
 0x44f   : > { %v8246_v2 = vsel %vm13590_vm0, %v8241_v61, %v8245_v36  ;;  %v8057_v23 = vrot.slane %v8055_v30, 4  ;;  %v9789_v0 = vsel %vm4722_vm15, %v11632_v21, 0  ;;  %v8251_v28 = vrot.slane %v8250_v42, 4 }
 0x450   : > { %v8048_v14 = vor.u32 %v8047_v32, %v8044_v27  ;;  %v8063_v48 = vrot.slane %v8061_v15, 5  ;;  %11982 = vmatpush3.bf16.xpose.msra.mxu1 %v9789_v0  ;;  %v8260_v17 = vrot.slane %v8258_v19, 4  ;;  %v8261_v57 = vshll.u32 %v16037_v62, 16  ;;  %v16065_v32 = vld [vmem:[#allocation3 + $0x44] sm:$0x1] }
 0x451   : > { %v8058_v18 = vor.u32 %v8057_v23, %v8053_v26  ;;  %v8267_v55 = vshll.u32 %v16045_v10, 16  ;;  %v8256_v36 = vsel %vm13590_vm0, %v8251_v28, %v8255_v6  ;;  %v8271_v52 = vshrl.u32 %v16045_v10, 16  ;;  %17825 = vst [vmem:[#allocation19_spill] sm:$0xff] %v16065_v32  ;;  %v16073_v0 = vld [vmem:[#allocation3 + $0xa8] sm:$0xf] }
 0x452   : > { %v8049_v63 = vrot.slane %v8048_v14, 4  ;;  %v8277_v60 = vshll.u32 %v16049_v5, 16  ;;  %v11641_v27 = vcombine.low %v8246_v2, %v8256_v36  ;;  %v8263_v61 = vrot.slane %v8261_v57, 5 }
 0x453   : > { %v8059_v11 = vrot.slane %v8058_v18, 4  ;;  %v8269_v22 = vrot.slane %v8267_v55, 5  ;;  %v8273_v21 = vrot.slane %v8271_v52, 4  ;;  %v8066_v6 = vshrl.u32 %v16055_v9, 16  ;;  %v16077_v52 = vld [vmem:[#allocation3 + $0xac] sm:$0xf] }
 0x454   : > { %v8054_v30 = vsel %vm13590_vm0, %v8049_v63, %v8053_v26  ;;  %v8279_v42 = vrot.slane %v8277_v60, 5  ;;  %12712 = vmatprep.subr.msk.bf16.mxu1 %vm4722_vm15, %v11641_v27  ;;  %v8264_v23 = vor.u32 %v8263_v61, %v8260_v17  ;;  %v8069_v2 = vshll.u32 %v16055_v9, 16 }
 0x455   : > { %v8064_v15 = vsel %vm13590_vm0, %v8059_v11, %v8063_v48  ;;  %v8075_v19 = vshll.u32 %v16061_v3, 16  ;;  %v8274_v26 = vor.u32 %v8273_v21, %v8269_v22  ;;  %v8068_v14 = vrot.slane %v8066_v6, 4  ;;  %v16083_v21 = vld [vmem:[#allocation3 + $0xb0] sm:$0x1] }
 0x456   : > { %v11633_v28 = vcombine.low %v8054_v30, %v8064_v15  ;;  %v8079_v18 = vshrl.u32 %v16061_v3, 16  ;;  %v8265_v57 = vrot.slane %v8264_v23, 4  ;;  %v8071_v55 = vrot.slane %v8069_v2, 5  ;;  %17826 = vst [vmem:[#allocation20_spill] sm:$0xff] %v16083_v21  ;;  %v16086_v15 = vld [vmem:[#allocation3 + $0x48] sm:$0xf] }
 0x457   : > { %v8077_v36 = vrot.slane %v8075_v19, 5  ;;  %v8085_v63 = vshll.u32 %v16065_v32, 16  ;;  %v8275_v17 = vrot.slane %v8274_v26, 4  ;;  %v8282_v27 = vshrl.u32 %v16073_v0, 16 }
 0x458   : > { %v9792_v48 = vsel %vm4722_vm15, %v11633_v28, 0  ;;  %v8081_v60 = vrot.slane %v8079_v18, 4  ;;  %v8270_v11 = vsel %vm13590_vm0, %v8265_v57, %v8269_v22  ;;  %v8072_v61 = vor.u32 %v8071_v55, %v8068_v14  ;;  %v16092_v14 = vld [vmem:[#allocation3 + $0x4c] sm:$0xf] }
 0x459   : > { %11984 = vmatpush3.bf16.xpose.msra.mxu1 %v9792_v48  ;;  %v8087_v30 = vrot.slane %v8085_v63, 5  ;;  %v8285_v6 = vshll.u32 %v16073_v0, 16  ;;  %v8280_v23 = vsel %vm13590_vm0, %v8275_v17, %v8279_v42  ;;  %v8284_v19 = vrot.slane %v8282_v27, 4  ;;  %v16099_v27 = vld [vmem:[#allocation3 + $0x50] sm:$0x1] }
 0x45a   : > { %v8082_v2 = vor.u32 %v8081_v60, %v8077_v36  ;;  %v8291_v28 = vshll.u32 %v16077_v52, 16  ;;  %v11642_v26 = vcombine.low %v8270_v11, %v8280_v23  ;;  %v8073_v18 = vrot.slane %v8072_v61, 4  ;;  %17827 = vst [vmem:[#allocation16_spill] sm:$0xff] %v16099_v27  ;;  %v16102_v61 = vld [vmem:[#allocation3 + $0xb4] sm:$0xf] }
 0x45b   : > { %v8287_v48 = vrot.slane %v8285_v6, 5  ;;  %v8295_v22 = vshrl.u32 %v16077_v52, 16  ;;  %v8301_v63 = vshll.u32 %v16083_v21, 16  ;;  %v8090_v59 = vshrl.u32 %v16086_v15, 16 }
 0x45c   : > { %v8083_v57 = vrot.slane %v8082_v2, 4  ;;  %v8293_v55 = vrot.slane %v8291_v28, 5  ;;  %12713 = vmatprep.subr.msk.bf16.mxu1 %vm4722_vm15, %v11642_v26  ;;  %v8078_v42 = vsel %vm13590_vm0, %v8073_v18, %v8077_v36  ;;  %v8093_v11 = vshll.u32 %v16086_v15, 16 }
 0x45d   : > { %v8288_v17 = vor.u32 %v8287_v48, %v8284_v19  ;;  %v8297_v60 = vrot.slane %v8295_v22, 4  ;;  %v8303_v23 = vrot.slane %v8301_v63, 5  ;;  %v8092_v2 = vrot.slane %v8090_v59, 4  ;;  %v16109_v48 = vld [vmem:[#allocation3 + $0xb8] sm:$0xf] }
 0x45e   : > { %v8088_v6 = vsel %vm13590_vm0, %v8083_v57, %v8087_v30  ;;  %v8099_v28 = vshll.u32 %v16092_v14, 16  ;;  %v8095_v13 = vrot.slane %v8093_v11, 5  ;;  %v8103_v19 = vshrl.u32 %v16092_v14, 16  ;;  %v16115_v63 = vld [vmem:[#allocation3 + $0xbc] sm:$0x1] }
 0x45f   : > { %v11634_v38 = vcombine.low %v8078_v42, %v8088_v6  ;;  %v8289_v26 = vrot.slane %v8288_v17, 4  ;;  %v8298_v29 = vor.u32 %v8297_v60, %v8293_v55  ;;  %v8109_v18 = vshll.u32 %v16099_v27, 16  ;;  %17828 = vst [vmem:[#allocation17_spill] sm:$0xff] %v16115_v63  ;;  %v16118_v6 = vld [vmem:[#allocation3 + $0x54] sm:$0xf] }
 0x460   : > { %v8101_v36 = vrot.slane %v8099_v28, 5  ;;  %v8306_v22 = vshrl.u32 %v16102_v61, 16  ;;  %v8096_v57 = vor.u32 %v8095_v13, %v8092_v2  ;;  %v8105_v42 = vrot.slane %v8103_v19, 4  ;;  %v16129_v27 = vld [vmem:[#allocation3 + $0x5c] sm:$0x1] }
 0x461   : > { %v9795_v51 = vsel %vm4722_vm15, %v11634_v38, 0  ;;  %v8294_v59 = vsel %vm13590_vm0, %v8289_v26, %v8293_v55  ;;  %v8299_v30 = vrot.slane %v8298_v29, 4  ;;  %v8111_v17 = vrot.slane %v8109_v18, 5  ;;  %v16125_v26 = vld [vmem:[#allocation3 + $0x58] sm:$0xf] }
 0x462   : > { %11986 = vmatpush3.bf16.xpose.msra.mxu1 %v9795_v51  ;;  %v8308_v60 = vrot.slane %v8306_v22, 4  ;;  %v8309_v11 = vshll.u32 %v16102_v61, 16  ;;  %v8097_v24 = vrot.slane %v8096_v57, 4  ;;  %v8315_v38 = vshll.u32 %v16109_v48, 16 }
 0x463   : > { %v8304_v28 = vsel %vm13590_vm0, %v8299_v30, %v8303_v23  ;;  %v8319_v55 = vshrl.u32 %v16109_v48, 16  ;;  %v8106_v13 = vor.u32 %v8105_v42, %v8101_v36  ;;  %v8325_v51 = vshll.u32 %v16115_v63, 16 }
 0x464   : > { %v11643_v29 = vcombine.low %v8294_v59, %v8304_v28  ;;  %v8311_v2 = vrot.slane %v8309_v11, 5  ;;  %v8102_v19 = vsel %vm13590_vm0, %v8097_v24, %v8101_v36  ;;  %v8317_v18 = vrot.slane %v8315_v38, 5 }
 0x465   : > { %v8321_v22 = vrot.slane %v8319_v55, 4  ;;  %v8114_v23 = vshrl.u32 %v16118_v6, 16  ;;  %v8107_v30 = vrot.slane %v8106_v13, 4  ;;  %v8327_v59 = vrot.slane %v8325_v51, 5 }
 0x466   : > { %12714 = vmatprep.subr.msk.bf16.mxu1 %vm4722_vm15, %v11643_v29  ;;  %v8312_v57 = vor.u32 %v8311_v2, %v8308_v60  ;;  %v8117_v42 = vshll.u32 %v16118_v6, 16  ;;  %v8123_v63 = vshll.u32 %v16125_v26, 16  ;;  %v8127_v21 = vshrl.u32 %v16125_v26, 16 }
 0x467   : > { %v8322_v11 = vor.u32 %v8321_v22, %v8317_v18  ;;  %v8116_v28 = vrot.slane %v8114_v23, 4  ;;  %v8112_v24 = vsel %vm13590_vm0, %v8107_v30, %v8111_v17  ;;  %v8133_v55 = vshll.u32 %v16129_v27, 16 }
 0x468   : > { %v8313_v36 = vrot.slane %v8312_v57, 4  ;;  %v8119_v38 = vrot.slane %v8117_v42, 5  ;;  %v11635_v32 = vcombine.low %v8102_v19, %v8112_v24  ;;  %v8125_v13 = vrot.slane %v8123_v63, 5  ;;  %v8335_v24 = vld [vmem:[#allocation3 + $0x48] sm:$0xe] }
 0x469   : > { %v8323_v29 = vrot.slane %v8322_v11, 4  ;;  %v8129_v60 = vrot.slane %v8127_v21, 4  ;;  %v8135_v42 = vrot.slane %v8133_v55, 5  ;;  %v11648_v19 = vcombine.low %v15958_v25, %v15963_v37 }
 0x46a   : > { %v8120_v2 = vor.u32 %v8119_v38, %v8116_v28  ;;  %v9798_v51 = vsel %vm4722_vm15, %v11635_v32, 0  ;;  %v8318_v22 = vsel %vm13590_vm0, %v8313_v36, %v8317_v18  ;;  %v11657_v32 = vcombine.low %v15975_v49, %v15979_v16  ;;  %v8342_v36 = vld [vmem:[#allocation3 + $0x9c] sm:$0xe] }
 0x46b   : > { %v8328_v23 = vsel %vm13590_vm0, %v8323_v29, %v8327_v59  ;;  %v8130_v31 = vor.u32 %v8129_v60, %v8125_v13  ;;  %11988 = vmatpush3.bf16.xpose.msra.mxu1 %v9798_v51  ;;  %v11649_v21 = vcombine.low %v15985_v46, %v15994_v39  ;;  %v11654_v60 = vcombine.low %v15880_v47, %v15897_v58  ;;  %v12950_v51 = vld [vmem:[#allocation3] sm:$0xf] }
 0x46c   : > { %v11644_v17 = vcombine.low %v8318_v22, %v8328_v23  ;;  %v8121_v30 = vrot.slane %v8120_v2, 4  ;;  %v16175_v2 = vld [vmem:[#allocation3 + $0x4] sm:$0xf]  ;;  %v11647_v47 = vcombine.low %v15920_v34, %v15922_v35  ;;  %v11656_v34 = vcombine.low %v15943_v53, %v15945_v54 }
 0x46d   : > { %v8131_v57 = vrot.slane %v8130_v31, 4  ;;  %v11646_v22 = vcombine.low %v12950_v51, %v16175_v2  ;;  %v9942_v28 = vsel %vm4722_vm15, %v11648_v19, 0  ;;  %v8344_v31 = vld [vmem:[#allocation3 + $0xb4] sm:$0xe]  ;;  %v17837_v46 = vcombine.low %v16055_v9, %v16061_v3 }
 0x46e   : > { %12715 = vmatprep.subr.msk.bf16.mxu1 %vm4722_vm15, %v11644_v17  ;;  %v8126_v63 = vsel %vm13590_vm0, %v8121_v30, %v8125_v13  ;;  %v8331_v17 = vld [vmem:[#allocation3 + $0x18] sm:$0xe]  ;;  %v8409_v30 = vrot.slane %v15963_v37, 5  ;;  %v9939_v38 = vsel %vm4722_vm15, %v11647_v47, 0  ;;  %v8423_v47 = vrot.slane %v16029_v50, 5 }
 0x46f   : > { %v8136_v18 = vsel %vm13590_vm0, %v8131_v57, %v8135_v42  ;;  %v9936_v23 = vsel %vm4722_vm15, %v11646_v22, 0  ;;  %v11655_v57 = vcombine.low %v15904_v7, %v15912_v33  ;;  %v8340_v42 = vld [vmem:[#allocation3 + $0x84] sm:$0xe]  ;;  %v8437_v37 = vrot.slane %v16092_v14, 5 }
 0x470   : > { %v11636_v11 = vcombine.low %v8126_v63, %v8136_v18  ;;  %v16189_v63 = vld [vmem:[%s17700_s4] sm:$0xf]  ;;  %v11582_v18 = vrot.slane %v8331_v17, 9  ;;  %v8332_v7 = vld [vmem:[#allocation3 + $0x24] sm:$0xe] }
 0x471   : > { %v8341_v17 = vld [vmem:[#allocation3 + $0x90] sm:$0xe]  ;;  %v11583_v55 = vrot.slane %v8332_v7, 9 }
 0x472   : > { %v9801_v13 = vsel %vm4722_vm15, %v11636_v11, 0  ;;  %v8411_v11 = vrot.slane %v8409_v30, 4  ;;  %v16201_v51 = vsel %vm14301_vm5, %v11582_v18, %v8409_v30  ;;  %v8419_v18 = vrot.slane %v16004_v8, 5 }
 0x473   : > { %11990 = vmatpush3.bf16.xpose.msra.mxu1 %v9801_v13  ;;  %v8472_v13 = vrot.slane %v15979_v16, 5  ;;  %v11592_v7 = vrot.slane %v8341_v17, 9 }
 0x474   : > { %12716 = vmatprep.subr.msk.bf16.mxu1 %vm4722_vm15, %v11654_v60  ;;  %v8416_v60 = vrot.slane %v15994_v39, 5  ;;  %v9951_v39 = vsel %vm4722_vm15, %v17837_v46, 0  ;;  %v17843_v46 = vld [vmem:[#allocation14_spill] sm:$0xff] }
 0x475   : > { %v8474_v29 = vrot.slane %v8472_v13, 4 }
 0x476   : > { %v8418_v53 = vrot.slane %v8416_v60, 4 }
 0x478   : > { %v16230_v8 = vsel %vm14301_vm5, %v8418_v53, %v8419_v18  ;;  %v8486_v18 = vrot.slane %v16045_v10, 5 }
 0x47a   : > { %11992 = vmatmul.mubr.msk.bf16.vlgmr.msra.gmra.mrb[0].mxu1 %vm4722_vm15, %v15780_v1  ;;  %v8412_v1 = vrot.slane %v15968_v20, 5  ;;  %v8475_v20 = vrot.slane %v15988_v43, 5 }
 0x47b   : > { %11994 = vmatpush3.bf16.xpose.msra.mxu1 %v9936_v23  ;;  %12009 = vmatprep.mubr.msk.bf16.mxu1 %vm4722_vm15, %v16189_v63  ;;  %v11591_v23 = vrot.slane %v8340_v42, 9  ;;  %v8333_v42 = vld [vmem:[#allocation3 + $0x30] sm:$0xe] }
 0x47c   : > { %12717 = vmatprep.subr.msk.bf16.mxu1 %vm4722_vm15, %v11655_v57  ;;  %v16205_v22 = vsel %vm14301_vm5, %v8411_v11, %v8412_v1  ;;  %v8479_v11 = vrot.slane %v16010_v41, 5  ;;  %v16219_v43 = vsel %vm14301_vm5, %v8474_v29, %v8475_v20  ;;  %v16223_v1 = vsel %vm14301_vm5, %v11583_v55, %v8416_v60 }
 0x47d   : > { %v16213_v30 = vsel %vm14301_vm5, %v11591_v23, %v8472_v13  ;;  %v8482_v57 = vrot.slane %v16019_v40, 5  ;;  %v11584_v20 = vrot.slane %v8333_v42, 9  ;;  %v8425_v55 = vrot.slane %v8423_v47, 4  ;;  %v8334_v40 = vld [vmem:[#allocation3 + $0x3c] sm:$0xe]  ;;  %v17829_v42 = vld [vmem:[#allocation13_spill] sm:$0xff] }
 0x47e   : > { %v8481_v23 = vrot.slane %v8479_v11, 4  ;;  %v8426_v60 = vrot.slane %v16034_v56, 5  ;;  %v16238_v17 = vsel %vm14301_vm5, %v11592_v7, %v8479_v11  ;;  %v11593_v11 = vrot.slane %v8342_v36, 9  ;;  %v8343_v7 = vld [vmem:[#allocation3 + $0xa8] sm:$0xe]  ;;  %10328 = vrot.lane.b32.xlu1 %v17829_v42, %s13024_s18  ;;  %10472 = vrot.lane.b32.xlu0 %v17829_v42, %s13025_s19  ;;  %s11077_s18 = scalar_lea.sflag [#allocation5], %s257_s10 }
 0x47f   : > { %v16250_v56 = vsel %vm14301_vm5, %v11584_v20, %v8423_v47  ;;  %v8489_v29 = vrot.slane %v16049_v5, 5  ;;  %v11585_v20 = vrot.slane %v8334_v40, 9  ;;  %v11594_v5 = vrot.slane %v8343_v7, 9  ;;  %s12953_s19 = scalar_lea.vmem %s17656_s14, 256 }
 0x480   : > { %v16242_v53 = vsel %vm14301_vm5, %v8481_v23, %v8482_v57  ;;  %v8488_v23 = vrot.slane %v8486_v18, 4  ;;  %v16263_v47 = vsel %vm14301_vm5, %v11593_v11, %v8486_v18  ;;  %v17830_v57 = vld [vmem:[#allocation19_spill] sm:$0xff]  ;;  %v17831_v11 = vld [vmem:[#allocation20_spill] sm:$0xff]  ;;  %p12954_p11 = scmp.ne.s32.totalorder %s17656_s14, %s12953_s19 }
 0x481   : > { %v8433_v13 = vrot.slane %v17830_v57, 5  ;;  %v8496_v59 = vrot.slane %v17831_v11, 5  ;;  %v11595_v11 = vrot.slane %v8344_v31, 9 }
 0x482   : > { %v16268_v36 = vsel %vm14301_vm5, %v8488_v23, %v8489_v29  ;;  %v11586_v23 = vrot.slane %v8335_v24, 9  ;;  %v8444_v24 = vrot.slane %v16125_v26, 5  ;;  %10616 = vrot.lane.b32.xlu1 %v17829_v42, %s13026_s20  ;;  %10776 = vrot.lane.b32.xlu0 %v17829_v42, %s13027_s26  ;;  %p12955_p12 = pnand %p12954_p11, %p13103_p5  ;;  %s12957_s20 = sshll.u32 %s13029_s25, 4  ;;  %s12958_s20 = int_to_ptr.vmem [resolvable:$false] %s12957_s20 }
 0x483   : > { %11996 = vmatpush3.bf16.xpose.msra.mxu1 %v9939_v38  ;;  %v16254_v38 = vsel %vm14301_vm5, %v8425_v55, %v8426_v60  ;;  %v8493_v55 = vrot.slane %v16077_v52, 5  ;;  %v11676_v18 = vcombine.low %v16263_v47, %v16268_v36  ;;  %v16462_v47 = vld [vmem:[#allocation3 + $0x10] sm:$0xf]  ;;  %v16465_v36 = vld [vmem:[#allocation3 + $0xc] sm:$0xf]  ;;  %s12959_s26 = scalar_lea.vmem %s12958_s20, 512  ;;  %p12960_p0 = scmp.lt.s32.totalorder %s17656_s14, %s12958_s20 }
 0x484   : > { %12718 = vmatprep.subr.msk.bf16.mxu1 %vm4722_vm15, %v11656_v34  ;;  %v8430_v34 = vrot.slane %v16061_v3, 5  ;;  %v17840_v3 = vcombine.low %v16102_v61, %v16109_v48  ;;  %p12956_p13 = pneg %p12955_p12  ;;  %p12961_p1 = scmp.lt.s32.totalorder %s12959_s26, %s12953_s19 }
 0x485   : > { %v8495_v40 = vrot.slane %v8493_v55, 4  ;;  %v16288_v25 = vsel %vm14301_vm5, %v11594_v5, %v8493_v55  ;;  %v17832_v55 = vld [vmem:[#allocation16_spill] sm:$0xff] }
 0x486   : > { %v8432_v60 = vrot.slane %v8430_v34, 4  ;;  %v16280_v29 = vsel %vm14301_vm5, %v11585_v20, %v8430_v34  ;;  %v8500_v34 = vrot.slane %v16109_v48, 5  ;;  %v8336_v20 = vld [vmem:[#allocation3 + $0x54] sm:$0xe]  ;;  %v8440_v5 = vrot.slane %v17832_v55, 5  ;;  %10920 = vrot.lane.b32.xlu1 %v17829_v42, %s13028_s28  ;;  %p12962_p2 = por %p12961_p1, %p12960_p0 }
 0x487   : > { %v16295_v57 = vsel %vm14301_vm5, %v8495_v40, %v8496_v59  ;;  %v17833_v59 = vld [vmem:[#allocation17_spill] sm:$0xff]  ;;  %v11587_v49 = vrot.slane %v8336_v20, 9  ;;  %v8446_v55 = vrot.slane %v8444_v24, 4 }
 0x488   : > { %v16284_v7 = vsel %vm14301_vm5, %v8432_v60, %v8433_v13  ;;  %v8439_v60 = vrot.slane %v8437_v37, 4  ;;  %v8502_v19 = vrot.slane %v8500_v34, 4  ;;  %v8503_v40 = vrot.slane %v17833_v59, 5  ;;  %p12963_p3 = pnand %p12962_p2, %p12956_p13 }
 0x489   : > { %v16317_v31 = vsel %vm14301_vm5, %v11595_v11, %v8500_v34  ;;  %v17836_v59 = vcombine.low %v16037_v62, %v16045_v10  ;;  %v8329_v10 = vld [vmem:[#allocation3] sm:$0xe] }
 0x48a   : > { %v16313_v13 = vsel %vm14301_vm5, %v8439_v60, %v8440_v5  ;;  %v16330_v60 = vsel %vm14301_vm5, %v11587_v49, %v8444_v24  ;;  %v17835_v5 = vcombine.low %v16022_v12, %v16029_v50  ;;  %v8395_v12 = vrot.slane %v16175_v2, 5 }
 0x48b   : > { %11998 = vmatpush3.bf16.xpose.msra.mxu1 %v9942_v28  ;;  %v16309_v28 = vsel %vm14301_vm5, %v11586_v23, %v8437_v37  ;;  %v8447_v37 = vrot.slane %v16129_v27, 5  ;;  %v17834_v27 = vcombine.low %v16008_v44, %v16010_v41  ;;  %v17838_v44 = vcombine.low %v16073_v0, %v16077_v52  ;;  %v8337_v0 = vld [vmem:[#allocation3 + $0x60] sm:$0xe]  ;;  %v17841_v52 = vld [vmem:[#allocation21_spill] sm:$0xff] }
 0x48c   : > { %12719 = vmatprep.subr.msk.bf16.mxu1 %vm4722_vm15, %v11657_v32  ;;  %v11669_v16 = vcombine.low %v16309_v28, %v16313_v13  ;;  %v16323_v32 = vsel %vm14301_vm5, %v8502_v19, %v8503_v40  ;;  %v9945_v19 = vsel %vm4722_vm15, %v11649_v21, 0  ;;  %v9948_v11 = vsel %vm4722_vm15, %v17835_v5, 0  ;;  %v12952_v40 = vld [vmem:[#allocation3 + $0x8] sm:$0x1]  ;;  %v16479_v28 = vld [vmem:[#allocation3 + $0x1c] sm:$0xf] }
 0x48d   : > { %v11678_v23 = vcombine.low %v16317_v31, %v16323_v32  ;;  %v16334_v34 = vsel %vm14301_vm5, %v8446_v55, %v8447_v37  ;;  %v8451_v41 = vrot.slane %v15897_v58, 5  ;;  %v17839_v50 = vcombine.low %v16086_v15, %v16092_v14  ;;  %17854 = vst [vmem:[#allocation12_spill] sm:$0xff] %v16479_v28  ;;  %v16484_v31 = vld [vmem:[#allocation3 + $0x18] sm:$0xf]  ;;  %v16488_v32 = vld [vmem:[#allocation3 + $0x88] sm:$0xf] }
 0x48e   : > { %v11670_v20 = vcombine.low %v16330_v60, %v16334_v34  ;;  %v8454_v21 = vrot.slane %v17841_v52, 5  ;;  %v8398_v58 = vrot.slane %v12952_v40, 5  ;;  %v11580_v24 = vrot.slane %v8329_v10, 9  ;;  %v17844_v10 = vld [vmem:[#allocation18_spill] sm:$0xff] }
 0x48f   : > { %v9954_v62 = vsel %vm4722_vm15, %v17839_v50, 0  ;;  %v8453_v9 = vrot.slane %v8451_v41, 4  ;;  %v8397_v2 = vrot.slane %v8395_v12, 4  ;;  %v11588_v49 = vrot.slane %v8337_v0, 9  ;;  %v8330_v50 = vld [vmem:[#allocation3 + $0xc] sm:$0xe] }
 0x490   : > { %v8458_v14 = vrot.slane %v15912_v33, 5  ;;  %v8396_v61 = vsel %vm14301_vm5, %v11580_v24, %v8395_v12  ;;  %v17842_v37 = vcombine.low %v16118_v6, %v16125_v26  ;;  %v8465_v6 = vrot.slane %v15945_v54, 5  ;;  %v8339_v54 = vld [vmem:[#allocation3 + $0x78] sm:$0xe] }
 0x491   : > { %v8455_v15 = vsel %vm14301_vm5, %v8453_v9, %v8454_v21  ;;  %v8452_v55 = vsel %vm14301_vm5, %v11588_v49, %v8451_v41  ;;  %v8399_v48 = vsel %vm14301_vm5, %v8397_v2, %v8398_v58  ;;  %v8405_v9 = vrot.slane %v17844_v10, 5  ;;  %v17845_v58 = vld [vmem:[#allocation15_spill] sm:$0xff]  ;;  %v16524_v10 = vld [vmem:[#allocation3 + $0x40] sm:$0xf] }
 0x492   : > { %v8460_v5 = vrot.slane %v8458_v14, 4  ;;  %v11663_v33 = vcombine.low %v8396_v61, %v8399_v48  ;;  %v11581_v0 = vrot.slane %v8330_v50, 9  ;;  %v8467_v21 = vrot.slane %v8465_v6, 4  ;;  %v16519_v50 = vld [vmem:[#allocation3 + $0x9c] sm:$0xf] }
 0x493   : > { %12000 = vmatpush3.bf16.xpose.msra.mxu1 %v9945_v19  ;;  %v9957_v19 = vsel %vm4722_vm15, %v17842_v37, 0  ;;  %v8468_v24 = vrot.slane %v17845_v58, 5  ;;  %v11590_v49 = vrot.slane %v8339_v54, 9  ;;  %v17846_v61 = vcombine.low %v16201_v51, %v16205_v22 }
 0x494   : > { %12720 = vmatprep.subr.msk.bf16.mxu1 %vm4722_vm15, %v17834_v27  ;;  %v11671_v27 = vcombine.low %v8452_v55, %v8455_v15  ;;  %v10078_v26 = vsel %vm4722_vm15, %v11663_v33, 0  ;;  %v17847_v37 = vcombine.low %v16213_v30, %v16219_v43  ;;  %v17850_v51 = vcombine.low %v16250_v56, %v16254_v38 }
 0x495   : > { %v8466_v15 = vsel %vm14301_vm5, %v11590_v49, %v8465_v6  ;;  %v10084_v48 = vsel %vm4722_vm15, %v17846_v61, 0  ;;  %v17851_v30 = vcombine.low %v16280_v29, %v16284_v7  ;;  %v10099_v56 = vsel %vm4722_vm15, %v11670_v20, 0  ;;  %v16469_v29 = vld [vmem:[#allocation3 + $0x7c] sm:$0xf]  ;;  %v16471_v7 = vpop.permute.xlu0 %10168  ;;  %v16495_v20 = vld [vmem:[#allocation3 + $0x28] sm:$0xf] }
 0x496   : > { %v10090_v22 = vsel %vm4722_vm15, %v17850_v51, 0  ;;  %17853 = vst [vmem:[#allocation11_spill] sm:$0xff] %v16469_v29  ;;  %v8554_v49 = vshrl.u32 %v16465_v36, 16  ;;  %v8578_v51 = vshrl.u32 %v16484_v31, 16 }
 0x497   : > { %v10093_v43 = vsel %vm4722_vm15, %v17851_v30, 0  ;;  %v16562_v30 = vld [vmem:[#allocation3 + $0xb4] sm:$0xf] }
 0x49b   : > { %12002 = vmatpush3.bf16.xpose.msra.mxu1 %v9948_v11  ;;  %v8402_v11 = vrot.slane %v15922_v35, 5 }
 0x49c   : > { %12721 = vmatprep.subr.msk.bf16.mxu1 %vm4722_vm15, %v17836_v59  ;;  %v8338_v59 = vld [vmem:[#allocation3 + $0x6c] sm:$0xe] }
 0x49d   : > { %v8404_v12 = vrot.slane %v8402_v11, 4  ;;  %v8403_v40 = vsel %vm14301_vm5, %v11581_v0, %v8402_v11  ;;  %v16498_v11 = vld [vmem:[#allocation3 + $0x24] sm:$0xf]  ;;  %v16531_v0 = vld [vmem:[#allocation3 + $0xac] sm:$0xf] }
 0x49e   : > { %v11682_v33 = vcombine.low %v16498_v11, %v16495_v20 }
 0x49f   : > { %v8406_v52 = vsel %vm14301_vm5, %v8404_v12, %v8405_v9  ;;  %v16513_v12 = vld [vmem:[#allocation3 + $0x30] sm:$0xf]  ;;  %v16527_v9 = vld [vmem:[#allocation3 + $0x3c] sm:$0xf] }
 0x4a0   : > { %v11664_v2 = vcombine.low %v8403_v40, %v8406_v52  ;;  %v16533_v52 = vld [vmem:[#allocation3 + $0xa8] sm:$0xf]  ;;  %v16538_v40 = vld [vmem:[#allocation3 + $0x4c] sm:$0xf] }
 0x4a1   : > { %v11693_v54 = vcombine.low %v16533_v52, %v16531_v0 }
 0x4a3   : > { %12004 = vmatpush3.bf16.xpose.msra.mxu1 %v9951_v39  ;;  %v8461_v39 = vrot.slane %v17843_v46, 5  ;;  %v16505_v46 = vld [vmem:[#allocation3 + $0x90] sm:$0xf] }
 0x4a4   : > { %12722 = vmatprep.subr.msk.bf16.mxu1 %vm4722_vm15, %v17838_v44  ;;  %v11589_v44 = vrot.slane %v8338_v59, 9  ;;  %v16503_v59 = vld [vmem:[#allocation3 + $0x94] sm:$0xf] }
 0x4a5   : > { %v8462_v41 = vsel %vm14301_vm5, %v8460_v5, %v8461_v39  ;;  %v17849_v5 = vcombine.low %v16238_v17, %v16242_v53  ;;  %v16452_v17 = vld [vmem:[#allocation3 + $0x70] sm:$0xf]  ;;  %v16454_v53 = vld [vmem:[#allocation3 + $0x6c] sm:$0xf]  ;;  %17855 = vst [vmem:[#allocation8_spill] sm:$0xff] %v16503_v59  ;;  %v10244_v39 = vsel %vm4722_vm15, %v11682_v33, 0 }
 0x4a6   : > { %v8459_v35 = vsel %vm14301_vm5, %v11589_v44, %v8458_v14  ;;  %v10081_v14 = vsel %vm4722_vm15, %v11664_v2, 0  ;;  %v11688_v38 = vcombine.low %v16454_v53, %v16452_v17  ;;  %v11691_v44 = vcombine.low %v16505_v46, %v16503_v59  ;;  %v16543_v2 = vld [vmem:[#allocation3 + $0x48] sm:$0xf] }
 0x4a7   : > { %v8746_v58 = vshrl.u32 %v16454_v53, 16 }
 0x4a9   : > { %v16552_v61 = vrot.slane %v8746_v58, 4  ;;  %v16600_v58 = vld [vmem:[#allocation3 + $0xc4] sm:$0xf] }
 0x4aa   : > { %17858 = vst [vmem:[#allocation20_spill] sm:$0xff] %v16600_v58 }
 0x4ab   : > { %12006 = vmatpush3.bf16.xpose.msra.mxu1 %v9954_v62  ;;  %v10025_v62 = vpop.permute.xlu1 %10024 }
 0x4ac   : > { %12723 = vmatprep.subr.msk.bf16.mxu1 %vm4722_vm15, %v17840_v3  ;;  %v11672_v3 = vcombine.low %v8459_v35, %v8462_v41  ;;  %v16510_v41 = vld [vmem:[#allocation3 + $0x34] sm:$0xf] }
 0x4ad   : > { %17856 = vst [vmem:[#allocation13_spill] sm:$0xff] %v16510_v41  ;;  %v11683_v6 = vcombine.low %v16513_v12, %v16510_v41 }
 0x4b3   : > { %12008 = vmatpush3.bf16.xpose.msra.mxu1 %v9957_v19  ;;  %v17848_v19 = vcombine.low %v16223_v1, %v16230_v8  ;;  %v17852_v1 = vcombine.low %v16288_v25, %v16295_v57  ;;  %v10096_v8 = vsel %vm4722_vm15, %v11669_v16, 0  ;;  %v16473_v25 = vld [vmem:[#allocation3 + $0x78] sm:$0xf]  ;;  %v11681_v16 = vcombine.low %v16484_v31, %v16479_v28 }
 0x4b4   : > { %12724 = vmatprep.subr.msk.bf16.mxu1 %vm4722_vm15, %v11671_v27  ;;  %v11689_v13 = vcombine.low %v16473_v25, %v16469_v29 }
 0x4b5   : > { %v10087_v27 = vsel %vm4722_vm15, %v17848_v19, 0  ;;  %v10241_v60 = vsel %vm4722_vm15, %v11681_v16, 0  ;;  %v8770_v19 = vshrl.u32 %v16473_v25, 16  ;;  %v8602_v16 = vshrl.u32 %v16498_v11, 16 }
 0x4ba   : > { %12010 = vmatmul.mubr.msk.bf16.vlgmr.msra.gmra.mrb[4].mxu1 %vm4722_vm15, %v16189_v63  ;;  %v8469_v63 = vsel %vm14301_vm5, %v8467_v21, %v8468_v24  ;;  %v8749_v24 = vshll.u32 %v16454_v53, 16  ;;  %v8563_v53 = vshll.u32 %v16462_v47, 16 }
 0x4bb   : > { %12012 = vmatpush3.bf16.xpose.msra.mxu1 %v10078_v26  ;;  %12027 = vmatprep.mubr.msk.bf16.mxu1 %vm4722_vm15, %v10025_v62  ;;  %v11673_v55 = vcombine.low %v8466_v15, %v8469_v63  ;;  %v16517_v26 = vld [vmem:[#allocation3 + $0xa0] sm:$0xf]  ;;  %v11685_v63 = vcombine.low %v16543_v2, %v16538_v40  ;;  %v8759_v15 = vshrl.u32 %v16452_v17, 16 }
 0x4bc   : > { %12725 = vmatprep.subr.msk.bf16.mxu1 %vm4722_vm15, %v11672_v3  ;;  %v11692_v35 = vcombine.low %v16519_v50, %v16517_v26  ;;  %v11684_v3 = vcombine.low %v16527_v9, %v16524_v10 }
 0x4be   : > { %v10250_v21 = vsel %vm4722_vm15, %v11684_v3, 0 }
 0x4c3   : > { %12014 = vmatpush3.bf16.xpose.msra.mxu1 %v10081_v14  ;;  %v16549_v14 = vld [vmem:[#allocation3 + $0xb8] sm:$0xf] }
 0x4c4   : > { %12726 = vmatprep.subr.msk.bf16.mxu1 %vm4722_vm15, %v11673_v55  ;;  %v8755_v55 = vshll.u32 %v16452_v17, 16 }
 0x4cb   : > { %12016 = vmatpush3.bf16.xpose.msra.mxu1 %v10084_v48  ;;  %v16554_v48 = vrot.slane %v8749_v24, 5 }
 0x4cc   : > { %12727 = vmatprep.subr.msk.bf16.mxu1 %vm4722_vm15, %v17847_v37  ;;  %v8557_v37 = vshll.u32 %v16465_v36, 16 }
 0x4d3   : > { %12018 = vmatpush3.bf16.xpose.msra.mxu1 %v10087_v27  ;;  %v8567_v27 = vshrl.u32 %v16462_v47, 16 }
 0x4d4   : > { %12728 = vmatprep.subr.msk.bf16.mxu1 %vm4722_vm15, %v17849_v5  ;;  %v8773_v5 = vshll.u32 %v16473_v25, 16  ;;  %v8761_v25 = vrot.slane %v8759_v15, 4  ;;  %v16606_v15 = vrot.slane %v8602_v16, 4 }
 0x4d5   : > { %v8569_v3 = vrot.slane %v8567_v27, 4  ;;  %v8821_v27 = vshll.u32 %v16505_v46, 16 }
 0x4db   : > { %12020 = vmatpush3.bf16.xpose.msra.mxu1 %v10090_v22  ;;  %v8581_v22 = vshll.u32 %v16484_v31, 16 }
 0x4dc   : > { %12729 = vmatprep.subr.msk.bf16.mxu1 %vm4722_vm15, %v11676_v18  ;;  %v11680_v18 = vcombine.low %v16465_v36, %v16462_v47  ;;  %v16572_v36 = vld [vmem:[#allocation3 + $0x58] sm:$0xf] }
 0x4dd   : > { %17857 = vst [vmem:[#allocation19_spill] sm:$0xff] %v16572_v36  ;;  %v16585_v33 = vrot.slane %v8581_v22, 5 }
 0x4de   : > { %v10238_v57 = vsel %vm4722_vm15, %v11680_v18, 0  ;;  %v16574_v18 = vrot.slane %v8755_v55, 5  ;;  %v16636_v55 = vrot.slane %v8821_v27, 5  ;;  %v8803_v27 = vshll.u32 %v16488_v32, 16 }
 0x4e0   : > { %v8762_v24 = vor.u32 %v8761_v25, %v16574_v18 }
 0x4e3   : > { %12022 = vmatpush3.bf16.xpose.msra.mxu1 %v10093_v43  ;;  %v16564_v43 = vrot.slane %v8554_v49, 4  ;;  %v8779_v49 = vshll.u32 %v16469_v29, 16 }
 0x4e4   : > { %12730 = vmatprep.subr.msk.bf16.mxu1 %vm4722_vm15, %v17852_v1  ;;  %v10253_v1 = vsel %vm4722_vm15, %v11685_v63, 0 }
 0x4e5   : > { %v16628_v16 = vrot.slane %v8779_v49, 5 }
 0x4eb   : > { %12024 = vmatpush3.bf16.xpose.msra.mxu1 %v10096_v8  ;;  %v11694_v8 = vcombine.low %v16562_v30, %v16549_v14 }
 0x4ec   : > { %12731 = vmatprep.subr.msk.bf16.mxu1 %vm4722_vm15, %v11678_v23  ;;  %v16490_v23 = vld [vmem:[#allocation3 + $0x84] sm:$0xf] }
 0x4ed   : > { %v11690_v34 = vcombine.low %v16490_v23, %v16488_v32  ;;  %v8797_v31 = vshll.u32 %v16490_v23, 16 }
 0x4ef   : > { %v16604_v63 = vrot.slane %v8797_v31, 5  ;;  %v8763_v31 = vrot.slane %v8762_v24, 4 }
 0x4f3   : > { %12026 = vmatpush3.bf16.xpose.msra.mxu1 %v10099_v56  ;;  %v8783_v56 = vshrl.u32 %v16469_v29, 16 }
 0x4f4   : > { %12732 = vmatprep.subr.msk.bf16.mxu1 %vm4722_vm15, %v11688_v38  ;;  %v8794_v38 = vshrl.u32 %v16490_v23, 16  ;;  %v16593_v23 = vld [vmem:[#allocation3 + $0x74] sm:$0x1] }
 0x4f5   : > { %v8765_v22 = vshll.u32 %v16593_v23, 16 }
 0x4f7   : > { %v8767_v49 = vrot.slane %v8765_v22, 5 }
 0x4fa   : > { %12028 = vmatmul.mubr.msk.bf16.vlgmr.msra.gmra.mrb[8].mxu1 %vm4722_vm15, %v10025_v62  ;;  %v10247_v62 = vsel %vm4722_vm15, %v11683_v6, 0  ;;  %v16643_v6 = vld [vmem:[#allocation3 + $0x80] sm:$0x1] }
 0x4fb   : > { %12030 = vmatpush3.bf16.xpose.msra.mxu1 %v10238_v57  ;;  %12045 = vmatprep.mubr.msk.bf16.mxu1 %vm4722_vm15, %v16471_v7  ;;  %v8559_v57 = vrot.slane %v8557_v37, 5  ;;  %v8818_v37 = vshrl.u32 %v16505_v46, 16  ;;  %v16626_v46 = vld [vmem:[#allocation3 + $0x64] sm:$0xf] }
 0x4fc   : > { %12733 = vmatprep.subr.msk.bf16.mxu1 %vm4722_vm15, %v11689_v13  ;;  %v16576_v13 = vrot.slane %v8770_v19, 4  ;;  %v16610_v19 = vld [vmem:[#allocation3 + $0x14] sm:$0x1] }
 0x4fd   : > { %17859 = vst [vmem:[#allocation16_spill] sm:$0xff] %v16610_v19 }
 0x503   : > { %12032 = vmatpush3.bf16.xpose.msra.mxu1 %v10241_v60  ;;  %v16581_v60 = vrot.slane %v8773_v5, 5  ;;  %v16614_v5 = vld [vmem:[#allocation3 + $0xc0] sm:$0xf] }
 0x504   : > { %12734 = vmatprep.subr.msk.bf16.mxu1 %vm4722_vm15, %v11690_v34  ;;  %v16583_v34 = vrot.slane %v8578_v51, 4  ;;  %v8752_v51 = vor.u32 %v16554_v48, %v16552_v61  ;;  %v8785_v61 = vrot.slane %v8783_v56, 4  ;;  %v16630_v48 = vrot.slane %v8818_v37, 4 }
 0x506   : > { %v8753_v24 = vrot.slane %v8752_v51, 4 }
 0x50b   : > { %12034 = vmatpush3.bf16.xpose.msra.mxu1 %v10244_v39  ;;  %v8591_v39 = vshrl.u32 %v16479_v28, 16 }
 0x50c   : > { %12735 = vmatprep.subr.msk.bf16.mxu1 %vm4722_vm15, %v11691_v44  ;;  %v16588_v44 = vld [vmem:[#allocation3 + $0x54] sm:$0xf] }
 0x513   : > { %12036 = vmatpush3.bf16.xpose.msra.mxu1 %v10247_v62  ;;  %v11686_v62 = vcombine.low %v16588_v44, %v16572_v36 }
 0x514   : > { %12736 = vmatprep.subr.msk.bf16.mxu1 %vm4722_vm15, %v11692_v35  ;;  %v16595_v35 = vrot.slane %v8563_v53, 5 }
 0x516   : > { %v8570_v53 = vor.u32 %v8569_v3, %v16595_v35  ;;  %v8573_v3 = vshll.u32 %v16610_v19, 16 }
 0x518   : > { %v8571_v37 = vrot.slane %v8570_v53, 4  ;;  %v8575_v19 = vrot.slane %v8573_v3, 5  ;;  %v8776_v53 = vor.u32 %v16581_v60, %v16576_v13  ;;  %v16668_v3 = vrot.slane %v8803_v27, 5 }
 0x51b   : > { %12038 = vmatpush3.bf16.xpose.msra.mxu1 %v10250_v21  ;;  %v16597_v21 = vrot.slane %v8794_v38, 4  ;;  %v8587_v38 = vshll.u32 %v16479_v28, 16 }
 0x51c   : > { %12737 = vmatprep.subr.msk.bf16.mxu1 %vm4722_vm15, %v11693_v54  ;;  %v8605_v54 = vshll.u32 %v16498_v11, 16  ;;  %v8560_v11 = vor.u32 %v8559_v57, %v16564_v43  ;;  %v8768_v57 = vsel %vm13590_vm0, %v8763_v31, %v8767_v49  ;;  %v8758_v43 = vsel %vm13590_vm0, %v8753_v24, %v16574_v18 }
 0x51d   : > { %v16645_v28 = vrot.slane %v8587_v38, 5  ;;  %v8842_v38 = vshrl.u32 %v16519_v50, 16  ;;  %v8789_v31 = vshll.u32 %v16643_v6, 16  ;;  %v11705_v49 = vcombine.low %v8758_v43, %v8768_v57 }
 0x51e   : > { %v16624_v25 = vrot.slane %v8605_v54, 5  ;;  %v8629_v54 = vshll.u32 %v16513_v12, 16  ;;  %v8561_v22 = vrot.slane %v8560_v11, 4  ;;  %v8576_v11 = vsel %vm13590_vm0, %v8571_v37, %v8575_v19 }
 0x51f   : > { %v8611_v18 = vshll.u32 %v16495_v20, 16  ;;  %v8584_v37 = vor.u32 %v16585_v33, %v16583_v34  ;;  %v8791_v57 = vrot.slane %v8789_v31, 5  ;;  %v16683_v27 = vrot.slane %v8842_v38, 4 }
 0x520   : > { %v8566_v19 = vsel %vm13590_vm0, %v8561_v22, %v16595_v35  ;;  %v8827_v24 = vshll.u32 %v16503_v59, 16  ;;  %v8653_v38 = vshll.u32 %v16527_v9, 16 }
 0x521   : > { %v11697_v43 = vcombine.low %v8566_v19, %v8576_v11  ;;  %v16692_v33 = vrot.slane %v8611_v18, 5  ;;  %v8585_v11 = vrot.slane %v8584_v37, 4  ;;  %v8635_v37 = vshll.u32 %v16510_v41, 16 }
 0x523   : > { %12040 = vmatpush3.bf16.xpose.msra.mxu1 %v10253_v1  ;;  %v10256_v1 = vsel %vm4722_vm15, %v11686_v62, 0  ;;  %v8626_v62 = vshrl.u32 %v16513_v12, 16  ;;  %v8786_v12 = vor.u32 %v8785_v61, %v16628_v16 }
 0x524   : > { %12738 = vmatprep.subr.msk.bf16.mxu1 %vm4722_vm15, %v11694_v8  ;;  %v11695_v8 = vcombine.low %v16614_v5, %v16600_v58 }
 0x525   : > { %v16652_v51 = vrot.slane %v8626_v62, 4  ;;  %v16665_v62 = vld [vmem:[#allocation3 + $0x20] sm:$0x1]  ;;  %v8787_v60 = vrot.slane %v8786_v12, 4 }
 0x526   : > { %v8597_v12 = vshll.u32 %v16665_v62, 16 }
 0x527   : > { %v8792_v35 = vsel %vm13590_vm0, %v8787_v60, %v8791_v57  ;;  %v10382_v60 = vsel %vm4722_vm15, %v11697_v43, 0  ;;  %v16712_v57 = vrot.slane %v8827_v24, 5  ;;  %v8663_v43 = vshrl.u32 %v16524_v10, 16 }
 0x528   : > { %v8599_v19 = vrot.slane %v8597_v12, 5  ;;  %v8866_v24 = vshrl.u32 %v16533_v52, 16 }
 0x52b   : > { %12042 = vmatpush3.bf16.xpose.msra.mxu1 %v10256_v1  ;;  %v16639_v1 = vld [vmem:[#allocation3 + $0x60] sm:$0xf] }
 0x52c   : > { %12739 = vmatprep.subr.msk.bf16.mxu1 %vm4722_vm15, %v11695_v8  ;;  %v11687_v56 = vcombine.low %v16639_v1, %v16626_v46  ;;  %v8593_v8 = vrot.slane %v8591_v39, 4  ;;  %v8845_v39 = vshll.u32 %v16519_v50, 16  ;;  %v17860_v50 = vshrl.u32 %v16488_v32, 16 }
 0x52e   : > { %v10259_v61 = vsel %vm4722_vm15, %v11687_v56, 0  ;;  %v8594_v13 = vor.u32 %v8593_v8, %v16645_v28  ;;  %v8809_v29 = vrot.slane %v17860_v50, 4  ;;  %v8777_v56 = vrot.slane %v8776_v53, 4 }
 0x52f   : > { %v16680_v8 = vrot.slane %v8629_v54, 5  ;;  %v17861_v54 = vshrl.u32 %v16495_v20, 16  ;;  %v16696_v53 = vrot.slane %v8845_v39, 5 }
 0x530   : > { %v8595_v50 = vrot.slane %v8594_v13, 4  ;;  %v8810_v34 = vor.u32 %v8809_v29, %v16668_v3  ;;  %v8782_v31 = vsel %vm13590_vm0, %v8777_v56, %v16628_v16  ;;  %v16702_v13 = vpop.permute.xlu1 %10328  ;;  %v8800_v29 = vor.u32 %v16604_v63, %v16597_v21 }
 0x531   : > { %v8617_v22 = vrot.slane %v17861_v54, 4  ;;  %v11706_v39 = vcombine.low %v8782_v31, %v8792_v35  ;;  %v17862_v16 = vshrl.u32 %v16503_v59, 16  ;;  %v8869_v35 = vshll.u32 %v16533_v52, 16 }
 0x532   : > { %v8600_v21 = vsel %vm13590_vm0, %v8595_v50, %v8599_v19  ;;  %v8811_v63 = vrot.slane %v8810_v34, 4  ;;  %v8590_v54 = vsel %vm13590_vm0, %v8585_v11, %v16645_v28  ;;  %v8801_v31 = vrot.slane %v8800_v29, 4 }
 0x533   : > { %12044 = vmatpush3.bf16.xpose.msra.mxu1 %v10259_v61  ;;  %v8650_v61 = vshrl.u32 %v16527_v9, 16  ;;  %v16710_v9 = vld [vmem:[#allocation3 + $0x2c] sm:$0x1]  ;;  %v8833_v56 = vrot.slane %v17862_v16, 4  ;;  %v8618_v12 = vor.u32 %v8617_v22, %v16692_v33  ;;  %v8608_v34 = vor.u32 %v16624_v25, %v16606_v15 }
 0x534   : > { %12740 = vmatprep.subr.msk.bf16.mxu1 %vm4722_vm15, %v11705_v49  ;;  %v16686_v49 = vld [vmem:[#allocation3 + $0x8c] sm:$0x1]  ;;  %v8621_v22 = vshll.u32 %v16710_v9, 16  ;;  %v16737_v16 = vrot.slane %v8635_v37, 5  ;;  %v17864_v52 = vshrl.u32 %v16510_v41, 16  ;;  %v16741_v59 = vrot.slane %v8653_v38, 5 }
 0x535   : > { %v8813_v18 = vshll.u32 %v16686_v49, 16  ;;  %v8834_v19 = vor.u32 %v8833_v56, %v16712_v57  ;;  %v8619_v11 = vrot.slane %v8618_v12, 4  ;;  %v8851_v15 = vshll.u32 %v16517_v26, 16  ;;  %v16756_v12 = vld [vmem:[#allocation3 + $0x38] sm:$0x1] }
 0x536   : > { %v16746_v25 = vrot.slane %v8866_v24, 4  ;;  %v8879_v29 = vshrl.u32 %v16531_v0, 16  ;;  %v8806_v37 = vsel %vm13590_vm0, %v8801_v31, %v16668_v3  ;;  %v8609_v38 = vrot.slane %v8608_v34, 4 }
 0x537   : > { %v8815_v50 = vrot.slane %v8813_v18, 5  ;;  %v8674_v18 = vshrl.u32 %v16543_v2, 16  ;;  %v16762_v41 = vrot.slane %v8851_v15, 5  ;;  %v17865_v3 = vshrl.u32 %v16517_v26, 16 }
 0x538   : > { %v8659_v34 = vshll.u32 %v16524_v10, 16 }
 0x539   : > { %v8816_v28 = vsel %vm13590_vm0, %v8811_v63, %v8815_v50  ;;  %v8824_v63 = vor.u32 %v16636_v55, %v16630_v48  ;;  %v8835_v50 = vrot.slane %v8834_v19, 4  ;;  %v8857_v31 = vrot.slane %v17865_v3, 4 }
 0x53a   : > { %12046 = vmatmul.mubr.msk.bf16.vlgmr.msra.gmra.mrb[12].mxu1 %vm4722_vm15, %v16471_v7  ;;  %v16723_v7 = vrot.slane %v8650_v61, 4  ;;  %v11698_v61 = vcombine.low %v8590_v54, %v8600_v21  ;;  %v8623_v21 = vrot.slane %v8621_v22, 5  ;;  %v11707_v54 = vcombine.low %v8806_v37, %v8816_v28 }
 0x53b   : > { %12048 = vmatpush3.bf16.xpose.msra.mxu1 %v10382_v60  ;;  %12063 = vmatprep.mubr.msk.bf16.mxu1 %vm4722_vm15, %v16702_v13  ;;  %v16734_v60 = vld [vmem:[#allocation3 + $0x98] sm:$0x1]  ;;  %v16767_v55 = vrot.slane %v8869_v35, 5  ;;  %v8632_v22 = vor.u32 %v16680_v8, %v16652_v51  ;;  %v16773_v19 = vrot.slane %v8674_v18, 4  ;;  %v8614_v28 = vsel %vm13590_vm0, %v8609_v38, %v16692_v33 }
 0x53c   : > { %12741 = vmatprep.subr.msk.bf16.mxu1 %vm4722_vm15, %v11706_v39  ;;  %17863 = vst [vmem:[#allocation17_spill] sm:$0xff] %v16734_v60  ;;  %v8641_v39 = vrot.slane %v17864_v52, 4  ;;  %v8837_v56 = vshll.u32 %v16734_v60, 16  ;;  %v10385_v24 = vsel %vm4722_vm15, %v11698_v61, 0  ;;  %v8624_v60 = vsel %vm13590_vm0, %v8619_v11, %v8623_v21 }
 0x53d   : > { %v8645_v61 = vshll.u32 %v16756_v12, 16  ;;  %v8825_v11 = vrot.slane %v8824_v63, 4  ;;  %v8687_v35 = vshrl.u32 %v16538_v40, 16  ;;  %v11699_v15 = vcombine.low %v8614_v28, %v8624_v60 }
 0x53e   : > { %v8642_v52 = vor.u32 %v8641_v39, %v16737_v16  ;;  %v8839_v48 = vrot.slane %v8837_v56, 5  ;;  %v8677_v39 = vshll.u32 %v16543_v2, 16  ;;  %v16783_v56 = vld [vmem:[#allocation3 + $0xa4] sm:$0x1]  ;;  %v8858_v18 = vor.u32 %v8857_v31, %v16762_v41 }
 0x53f   : > { %v16786_v2 = vrot.slane %v8659_v34, 5  ;;  %v8665_v37 = vrot.slane %v8663_v43, 4  ;;  %v8875_v33 = vshll.u32 %v16531_v0, 16  ;;  %v8698_v38 = vshrl.u32 %v16588_v44, 16  ;;  %v16802_v34 = vld [vmem:[#allocation3 + $0x44] sm:$0x1] }
 0x540   : > { %v8840_v51 = vsel %vm13590_vm0, %v8835_v50, %v8839_v48  ;;  %v8643_v8 = vrot.slane %v8642_v52, 4  ;;  %v8633_v21 = vrot.slane %v8632_v22, 4  ;;  %v8647_v63 = vrot.slane %v8645_v61, 5 }
 0x541   : > { %v8848_v60 = vor.u32 %v16696_v53, %v16683_v27  ;;  %v8830_v50 = vsel %vm13590_vm0, %v8825_v11, %v16712_v57  ;;  %v8861_v52 = vshll.u32 %v16783_v56, 16  ;;  %v10388_v43 = vsel %vm4722_vm15, %v11699_v15, 0 }
 0x542   : > { %v11708_v3 = vcombine.low %v8830_v50, %v8840_v51  ;;  %v8648_v31 = vsel %vm13590_vm0, %v8643_v8, %v8647_v63  ;;  %v8683_v27 = vshll.u32 %v16538_v40, 16  ;;  %v8859_v53 = vrot.slane %v8858_v18, 4 }
 0x543   : > { %12050 = vmatpush3.bf16.xpose.msra.mxu1 %v10385_v24  ;;  %v16792_v24 = vrot.slane %v8677_v39, 5  ;;  %v16806_v48 = vrot.slane %v8875_v33, 5  ;;  %v8881_v22 = vrot.slane %v8879_v29, 4  ;;  %v8890_v57 = vshrl.u32 %v16562_v30, 16 }
 0x544   : > { %12742 = vmatprep.subr.msk.bf16.mxu1 %vm4722_vm15, %v11707_v54  ;;  %v8701_v54 = vshll.u32 %v16588_v44, 16  ;;  %v8666_v44 = vor.u32 %v8665_v37, %v16786_v2  ;;  %v8638_v61 = vsel %vm13590_vm0, %v8633_v21, %v16737_v16  ;;  %v8849_v39 = vrot.slane %v8848_v60, 4  ;;  %v16821_v37 = vld [vmem:[#allocation3 + $0xb0] sm:$0x1] }
 0x545   : > { %v8656_v28 = vor.u32 %v16741_v59, %v16723_v7  ;;  %v8903_v11 = vshrl.u32 %v16549_v14, 16  ;;  %v11700_v51 = vcombine.low %v8638_v61, %v8648_v31  ;;  %v8863_v8 = vrot.slane %v8861_v52, 5 }
 0x546   : > { %v8669_v29 = vshll.u32 %v16802_v34, 16  ;;  %v16823_v33 = vrot.slane %v8683_v27, 5  ;;  %v8689_v63 = vrot.slane %v8687_v35, 4  ;;  %v8899_v16 = vshll.u32 %v16549_v14, 16 }
 0x547   : > { %v8893_v21 = vshll.u32 %v16562_v30, 16  ;;  %v8864_v7 = vsel %vm13590_vm0, %v8859_v53, %v8863_v8  ;;  %v8667_v60 = vrot.slane %v8666_v44, 4  ;;  %v8882_v50 = vor.u32 %v8881_v22, %v16806_v48  ;;  %v16841_v44 = vld [vmem:[#allocation3 + $0x50] sm:$0x1] }
 0x548   : > { %v16830_v52 = vrot.slane %v8698_v38, 4  ;;  %v8854_v35 = vsel %vm13590_vm0, %v8849_v39, %v16762_v41  ;;  %v8657_v31 = vrot.slane %v8656_v28, 4  ;;  %v10391_v27 = vsel %vm4722_vm15, %v11700_v51, 0 }
 0x549   : > { %v8671_v30 = vrot.slane %v8669_v29, 5  ;;  %v8872_v61 = vor.u32 %v16767_v55, %v16746_v25  ;;  %v8885_v53 = vshll.u32 %v16821_v37, 16  ;;  %v11709_v38 = vcombine.low %v8854_v35, %v8864_v7 }
 0x54a   : > { %v16844_v22 = vrot.slane %v8899_v16, 5  ;;  %v8905_v8 = vrot.slane %v8903_v11, 4  ;;  %v8883_v39 = vrot.slane %v8882_v50, 4  ;;  %v8707_v28 = vshll.u32 %v16572_v36, 16 }
 0x54b   : > { %12052 = vmatpush3.bf16.xpose.msra.mxu1 %v10388_v43  ;;  %v16832_v43 = vrot.slane %v8701_v54, 5  ;;  %v8690_v54 = vor.u32 %v8689_v63, %v16823_v33  ;;  %v8672_v41 = vsel %vm13590_vm0, %v8667_v60, %v8671_v30  ;;  %v8892_v25 = vrot.slane %v8890_v57, 4  ;;  %v16858_v60 = vld [vmem:[#allocation3 + $0xbc] sm:$0x1] }
 0x54c   : > { %12743 = vmatprep.subr.msk.bf16.mxu1 %vm4722_vm15, %v11708_v3  ;;  %v8895_v55 = vrot.slane %v8893_v21, 5  ;;  %v8722_v51 = vshrl.u32 %v16639_v1, 16  ;;  %v8693_v29 = vshll.u32 %v16841_v44, 16  ;;  %v8662_v11 = vsel %vm13590_vm0, %v8657_v31, %v16786_v2  ;;  %17866 = vst [vmem:[#allocation21_spill] sm:$0xff] %v16858_v60 }
 0x54d   : > { %v16816_v15 = vpop.f32.mrb[0].mxu1  ;;  %v8873_v63 = vrot.slane %v8872_v61, 4  ;;  %v8887_v16 = vrot.slane %v8885_v53, 5  ;;  %v8680_v7 = vor.u32 %v16792_v24, %v16773_v19  ;;  %v8927_v57 = vshrl.u32 %v16600_v58, 16 }
 0x54e   : > { %v16819_v18 = vpop.f32.mrb[1].mxu1  ;;  %v11701_v21 = vcombine.low %v8662_v11, %v8672_v41  ;;  %v8691_v50 = vrot.slane %v8690_v54, 4  ;;  %v8923_v2 = vshll.u32 %v16600_v58, 16  ;;  %v8914_v31 = vshrl.u32 %v16614_v5, 16  ;;  %v16875_v11 = vld [vmem:[#allocation3 + $0x5c] sm:$0x1] }
 0x54f   : > { %v9865_v59 = vpop.f32.mrb[2].mxu1  ;;  %v8888_v35 = vsel %vm13590_vm0, %v8883_v39, %v8887_v16  ;;  %v8917_v61 = vshll.u32 %v16614_v5, 16  ;;  %v8695_v19 = vrot.slane %v8693_v29, 5  ;;  %v8909_v24 = vshll.u32 %v16858_v60, 16 }
 0x550   : > { %v9866_v3 = vpop.f32.mrb[3].mxu1  ;;  %v8711_v59 = vshrl.u32 %v16572_v36, 16  ;;  %v8735_v53 = vshrl.u32 %v16626_v46, 16  ;;  %v8681_v54 = vrot.slane %v8680_v7, 4  ;;  %v10394_v41 = vsel %vm4722_vm15, %v11701_v21, 0 }
 0x551   : > { %v8906_v3 = vor.u32 %v8905_v8, %v16844_v22  ;;  %v8896_v8 = vor.u32 %v8895_v55, %v8892_v25  ;;  %v8696_v39 = vsel %vm13590_vm0, %v8691_v50, %v8695_v19  ;;  %v8925_v29 = vrot.slane %v8923_v2, 5 }
 0x552   : > { %v8713_v30 = vrot.slane %v8711_v59, 4  ;;  %v8929_v16 = vrot.slane %v8927_v57, 4  ;;  %v8731_v58 = vshll.u32 %v16626_v46, 16  ;;  %v8916_v60 = vrot.slane %v8914_v31, 4 }
 0x553   : > { %12054 = vmatpush3.bf16.xpose.msra.mxu1 %v10391_v27  ;;  %v8709_v27 = vrot.slane %v8707_v28, 5  ;;  %v8907_v28 = vrot.slane %v8906_v3, 4  ;;  %v8919_v36 = vrot.slane %v8917_v61, 5  ;;  %v8911_v25 = vrot.slane %v8909_v24, 5  ;;  %v16888_v3 = vld [vmem:[#allocation3 + $0xc8] sm:$0x1] }
 0x554   : > { %12744 = vmatprep.subr.msk.bf16.mxu1 %vm4722_vm15, %v11709_v38  ;;  %v8878_v38 = vsel %vm13590_vm0, %v8873_v63, %v16806_v48  ;;  %v8725_v48 = vshll.u32 %v16639_v1, 16  ;;  %v8686_v55 = vsel %vm13590_vm0, %v8681_v54, %v16823_v33  ;;  %v8897_v63 = vrot.slane %v8896_v8, 4  ;;  %v16895_v8 = vld [vmem:[#allocation3 + $0x68] sm:$0x1] }
 0x555   : > { %v11710_v59 = vcombine.low %v8878_v38, %v8888_v35  ;;  %v8714_v5 = vor.u32 %v8713_v30, %v8709_v27  ;;  %v8704_v7 = vor.u32 %v16832_v43, %v16830_v52  ;;  %v8717_v21 = vshll.u32 %v16875_v11, 16 }
 0x556   : > { %v11702_v57 = vcombine.low %v8686_v55, %v8696_v39  ;;  %v8912_v50 = vsel %vm13590_vm0, %v8907_v28, %v8911_v25  ;;  %v8930_v35 = vor.u32 %v8929_v16, %v8925_v29  ;;  %v8733_v30 = vrot.slane %v8731_v58, 5 }
 0x557   : > { %v8715_v1 = vrot.slane %v8714_v5, 4  ;;  %v8737_v2 = vrot.slane %v8735_v53, 4  ;;  %v8724_v31 = vrot.slane %v8722_v51, 4  ;;  %v8727_v61 = vrot.slane %v8725_v48, 5 }
 0x558   : > { %v8920_v19 = vor.u32 %v8919_v36, %v8916_v60  ;;  %v8902_v33 = vsel %vm13590_vm0, %v8897_v63, %v16844_v22  ;;  %v8705_v52 = vrot.slane %v8704_v7, 4  ;;  %v8719_v43 = vrot.slane %v8717_v21, 5 }
 0x559   : > { %v8933_v24 = vshll.u32 %v16888_v3, 16  ;;  %v10397_v38 = vsel %vm4722_vm15, %v11702_v57, 0  ;;  %v11711_v54 = vcombine.low %v8902_v33, %v8912_v50  ;;  %v8931_v51 = vrot.slane %v8930_v35, 4  ;;  %v451_v50 = vld [vmem:[#allocation3 + $0xcc] sm:$0x1] }
 0x55a   : > { %v8720_v58 = vsel %vm13590_vm0, %v8715_v1, %v8719_v43  ;;  %v8738_v53 = vor.u32 %v8737_v2, %v8733_v30  ;;  %v8921_v36 = vrot.slane %v8920_v19, 4  ;;  %v8710_v22 = vsel %vm13590_vm0, %v8705_v52, %v8709_v27  ;;  %v8945_v1 = vld [vmem:[#allocation3 + $0x6c] sm:$0xe] }
 0x55b   : > { %12056 = vmatpush3.bf16.xpose.msra.mxu1 %v10394_v41  ;;  %v8935_v60 = vrot.slane %v8933_v24, 5  ;;  %v8728_v41 = vor.u32 %v8727_v61, %v8724_v31  ;;  %v11703_v39 = vcombine.low %v8710_v22, %v8720_v58  ;;  %v9059_v16 = vrot.slane %v16452_v17, 5  ;;  %v8937_v43 = vld [vmem:[#allocation3 + $0xc] sm:$0xe] }
 0x55c   : > { %12745 = vmatprep.subr.msk.bf16.mxu1 %vm4722_vm15, %v11710_v59  ;;  %v8741_v59 = vshll.u32 %v16895_v8, 16  ;;  %v8739_v5 = vrot.slane %v8738_v53, 4  ;;  %v8926_v48 = vsel %vm13590_vm0, %v8921_v36, %v8925_v29  ;;  %v9003_v57 = vrot.slane %v16462_v47, 5  ;;  %v17868_v47 = vld [vmem:[#allocation11_spill] sm:$0xff]  ;;  %v17870_v36 = vld [vmem:[#allocation12_spill] sm:$0xff] }
 0x55d   : > { %v8936_v28 = vsel %vm13590_vm0, %v8931_v51, %v8935_v60  ;;  %v8729_v25 = vrot.slane %v8728_v41, 4  ;;  %v10400_v63 = vsel %vm4722_vm15, %v11703_v39, 0  ;;  %v9061_v21 = vrot.slane %v9059_v16, 4  ;;  %v8946_v60 = vld [vmem:[#allocation3 + $0x78] sm:$0xe] }
 0x55e   : > { %v8743_v55 = vrot.slane %v8741_v59, 5  ;;  %v11712_v7 = vcombine.low %v8926_v48, %v8936_v28  ;;  %v452_v35 = vsel %vm13339_vm7, 0, %v451_v50  ;;  %v9062_v2 = vrot.slane %v16593_v23, 5 }
 0x55f   : > { %v8734_v29 = vsel %vm13590_vm0, %v8729_v25, %v8733_v30  ;;  %453 = vst [vmem:[#allocation3 + $0xcc] sm:$0x1] %v452_v35  ;;  %v11604_v61 = vrot.slane %v8945_v1, 9  ;;  %v9005_v33 = vrot.slane %v9003_v57, 4  ;;  %v9066_v52 = vrot.slane %v17868_v47, 5 }
 0x560   : > { %v8744_v27 = vsel %vm13590_vm0, %v8739_v5, %v8743_v55  ;;  %v9063_v19 = vsel %vm14301_vm5, %v9061_v21, %v9062_v2  ;;  %v11596_v23 = vrot.slane %v8937_v43, 9  ;;  %v9010_v22 = vrot.slane %v17870_v36, 5  ;;  %v8938_v25 = vld [vmem:[#allocation3 + $0x18] sm:$0xe]  ;;  %v16935_v55 = vpop.permute.xlu0 %10472 }
 0x561   : > { %v11704_v31 = vcombine.low %v8734_v29, %v8744_v27  ;;  %v9060_v24 = vsel %vm14301_vm5, %v11604_v61, %v9059_v16  ;;  %v9068_v53 = vrot.slane %v9066_v52, 4  ;;  %v9069_v59 = vrot.slane %v16643_v6, 5 }
 0x562   : > { %v11722_v30 = vcombine.low %v9060_v24, %v9063_v19  ;;  %v9004_v41 = vsel %vm14301_vm5, %v11596_v23, %v9003_v57  ;;  %v11605_v28 = vrot.slane %v8946_v60, 9  ;;  %v9012_v16 = vrot.slane %v9010_v22, 4  ;;  %v17873_v23 = vld [vmem:[#allocation17_spill] sm:$0xff] }
 0x563   : > { %12058 = vmatpush3.bf16.xpose.msra.mxu1 %v10397_v38  ;;  %v17869_v38 = vld [vmem:[#allocation16_spill] sm:$0xff]  ;;  %v10403_v58 = vsel %vm4722_vm15, %v11704_v31, 0  ;;  %v9070_v5 = vsel %vm14301_vm5, %v9068_v53, %v9069_v59  ;;  %v9073_v48 = vrot.slane %v16488_v32, 5  ;;  %v11597_v21 = vrot.slane %v8938_v25, 9 }
 0x564   : > { %12746 = vmatprep.subr.msk.bf16.mxu1 %vm4722_vm15, %v11711_v54  ;;  %v9006_v54 = vrot.slane %v17869_v38, 5  ;;  %v9017_v50 = vrot.slane %v16495_v20, 5  ;;  %v9076_v1 = vrot.slane %v16686_v49, 5  ;;  %v17871_v31 = vld [vmem:[#allocation8_spill] sm:$0xff]  ;;  %v17872_v38 = vld [vmem:[#allocation13_spill] sm:$0xff]  ;;  %v9087_v60 = vrot.slane %v16517_v26, 5 }
 0x565   : > { %v9075_v32 = vrot.slane %v9073_v48, 4  ;;  %v9080_v61 = vrot.slane %v17871_v31, 5  ;;  %v8939_v20 = vld [vmem:[#allocation3 + $0x24] sm:$0xe] }
 0x566   : > { %v9007_v51 = vsel %vm14301_vm5, %v9005_v33, %v9006_v54  ;;  %v9019_v2 = vrot.slane %v9017_v50, 4  ;;  %v9020_v33 = vrot.slane %v16710_v9, 5  ;;  %v11598_v43 = vrot.slane %v8939_v20, 9 }
 0x567   : > { %v11714_v39 = vcombine.low %v9004_v41, %v9007_v51  ;;  %v9077_v29 = vsel %vm14301_vm5, %v9075_v32, %v9076_v1  ;;  %v9082_v24 = vrot.slane %v9080_v61, 4  ;;  %v9024_v54 = vrot.slane %v17872_v38, 5  ;;  %v8940_v41 = vld [vmem:[#allocation3 + $0x30] sm:$0xe] }
 0x568   : > { %v9021_v49 = vsel %vm14301_vm5, %v9019_v2, %v9020_v33  ;;  %v9083_v51 = vrot.slane %v17873_v23, 5  ;;  %v9089_v25 = vrot.slane %v9087_v60, 4  ;;  %v17874_v23 = vld [vmem:[#allocation19_spill] sm:$0xff] }
 0x569   : > { %v10526_v6 = vsel %vm4722_vm15, %v11714_v39, 0  ;;  %v9027_v39 = vrot.slane %v16756_v12, 5  ;;  %v9090_v12 = vrot.slane %v16783_v56, 5 }
 0x56a   : > { %v9084_v36 = vsel %vm14301_vm5, %v9082_v24, %v9083_v51  ;;  %v9041_v24 = vrot.slane %v16841_v44, 5  ;;  %v9045_v51 = vrot.slane %v17874_v23, 5  ;;  %v17086_v23 = vld [vmem:[#allocation3 + $0x30] sm:$0xf] }
 0x56b   : > { %12060 = vmatpush3.bf16.xpose.msra.mxu1 %v10400_v63  ;;  %v9067_v63 = vsel %vm14301_vm5, %v11605_v28, %v9066_v52 }
 0x56c   : > { %12747 = vmatprep.subr.msk.bf16.mxu1 %vm4722_vm15, %v11712_v7  ;;  %v9013_v7 = vrot.slane %v16665_v62, 5  ;;  %v11723_v27 = vcombine.low %v9067_v63, %v9070_v5  ;;  %v8947_v62 = vld [vmem:[#allocation3 + $0x84] sm:$0xe]  ;;  %v9031_v63 = vrot.slane %v16524_v10, 5  ;;  %v9091_v10 = vsel %vm14301_vm5, %v9089_v25, %v9090_v12  ;;  %v8952_v12 = vld [vmem:[#allocation3 + $0xc0] sm:$0xe] }
 0x56d   : > { %v11606_v35 = vrot.slane %v8947_v62, 9 }
 0x56e   : > { %v9014_v57 = vsel %vm14301_vm5, %v9012_v16, %v9013_v7  ;;  %v11599_v16 = vrot.slane %v8940_v41, 9  ;;  %v9033_v62 = vrot.slane %v9031_v63, 4  ;;  %v9047_v41 = vrot.slane %v9045_v51, 4 }
 0x56f   : > { %v9074_v19 = vsel %vm14301_vm5, %v11606_v35, %v9073_v48  ;;  %v8949_v48 = vld [vmem:[#allocation3 + $0x9c] sm:$0xe] }
 0x570   : > { %v11724_v52 = vcombine.low %v9074_v19, %v9077_v29  ;;  %v9025_v7 = vsel %vm14301_vm5, %v11599_v16, %v9024_v54  ;;  %v9097_v19 = vrot.slane %v16821_v37, 5  ;;  %v9048_v16 = vrot.slane %v16875_v11, 5 }
 0x573   : > { %12062 = vmatpush3.bf16.xpose.msra.mxu1 %v10403_v58  ;;  %v8948_v58 = vld [vmem:[#allocation3 + $0x90] sm:$0xe] }
 0x574   : > { %12748 = vmatprep.subr.msk.bf16.mxu1 %vm4722_vm15, %v11722_v30  ;;  %v9018_v30 = vsel %vm14301_vm5, %v11598_v43, %v9017_v50  ;;  %v11607_v53 = vrot.slane %v8948_v58, 9  ;;  %v9101_v43 = vrot.slane %v16549_v14, 5  ;;  %v8951_v14 = vld [vmem:[#allocation3 + $0xb4] sm:$0xe] }
 0x575   : > { %v11716_v9 = vcombine.low %v9018_v30, %v9021_v49  ;;  %v8942_v49 = vld [vmem:[#allocation3 + $0x48] sm:$0xe] }
 0x576   : > { %v9081_v59 = vsel %vm14301_vm5, %v11607_v53, %v9080_v61  ;;  %v9038_v61 = vrot.slane %v16538_v40, 5  ;;  %v11601_v58 = vrot.slane %v8942_v49, 9  ;;  %v9103_v30 = vrot.slane %v9101_v43, 4  ;;  %v17875_v53 = vld [vmem:[#allocation21_spill] sm:$0xff] }
 0x577   : > { %v10532_v28 = vsel %vm4722_vm15, %v11716_v9, 0  ;;  %v11725_v5 = vcombine.low %v9081_v59, %v9084_v36  ;;  %v9104_v36 = vrot.slane %v17875_v53, 5  ;;  %v17876_v59 = vld [vmem:[#allocation20_spill] sm:$0xff] }
 0x578   : > { %v9039_v9 = vsel %vm14301_vm5, %v11601_v58, %v9038_v61 }
 0x57a   : > { %12064 = vmatmul.mubr.msk.bf16.vlgmr.msra.gmra.mrb[16].mxu1 %vm4722_vm15, %v16702_v13  ;;  %v9011_v13 = vsel %vm14301_vm5, %v11597_v21, %v9010_v22  ;;  %v9026_v22 = vrot.slane %v9024_v54, 4 }
 0x57b   : > { %12066 = vmatpush3.bf16.xpose.msra.mxu1 %v10526_v6  ;;  %12081 = vmatprep.mubr.msk.bf16.mxu1 %vm4722_vm15, %v16935_v55  ;;  %v11715_v17 = vcombine.low %v9011_v13, %v9014_v57  ;;  %v11608_v57 = vrot.slane %v8949_v48, 9  ;;  %v9094_v13 = vrot.slane %v16531_v0, 5  ;;  %v8950_v0 = vld [vmem:[#allocation3 + $0xa8] sm:$0xe] }
 0x57c   : > { %12749 = vmatprep.subr.msk.bf16.mxu1 %vm4722_vm15, %v11723_v27  ;;  %v9028_v42 = vsel %vm14301_vm5, %v9026_v22, %v9027_v39  ;;  %v11609_v33 = vrot.slane %v8950_v0, 9  ;;  %v11610_v22 = vrot.slane %v8951_v14, 9  ;;  %v9108_v39 = vrot.slane %v17876_v59, 5  ;;  %v17090_v14 = vld [vmem:[#allocation3 + $0xa0] sm:$0xf] }
 0x57d   : > { %v10529_v47 = vsel %vm4722_vm15, %v11715_v17, 0  ;;  %v11717_v21 = vcombine.low %v9025_v7, %v9028_v42  ;;  %v8941_v17 = vld [vmem:[#allocation3 + $0x3c] sm:$0xe]  ;;  %v9088_v56 = vsel %vm14301_vm5, %v11608_v57, %v9087_v60  ;;  %v9096_v31 = vrot.slane %v9094_v13, 4 }
 0x57e   : > { %v11726_v29 = vcombine.low %v9088_v56, %v9091_v10  ;;  %v9095_v40 = vsel %vm14301_vm5, %v11609_v33, %v9094_v13  ;;  %v9105_v60 = vsel %vm14301_vm5, %v9103_v30, %v9104_v36  ;;  %v9052_v7 = vrot.slane %v16626_v46, 5  ;;  %v17056_v33 = vld [vmem:[#allocation3 + $0x88] sm:$0xf]  ;;  %v17083_v30 = vld [vmem:[#allocation3 + $0x34] sm:$0xf] }
 0x57f   : > { %v10535_v35 = vsel %vm4722_vm15, %v11717_v21, 0  ;;  %v9111_v21 = vrot.slane %v16888_v3, 5  ;;  %v11611_v57 = vrot.slane %v8952_v12, 9  ;;  %v9055_v46 = vrot.slane %v16895_v8, 5  ;;  %v17042_v8 = vld [vmem:[#allocation3 + $0x7c] sm:$0xf] }
 0x580   : > { %v9054_v10 = vrot.slane %v9052_v7, 4  ;;  %17878 = vst [vmem:[#allocation14_spill] sm:$0xff] %v17056_v33  ;;  %v17126_v12 = vld [vmem:[#allocation3 + $0xb4] sm:$0xf] }
 0x581   : > { %v9109_v13 = vsel %vm14301_vm5, %v11611_v57, %v9108_v39 }
 0x582   : > { %v9056_v3 = vsel %vm14301_vm5, %v9054_v10, %v9055_v46  ;;  %v17139_v46 = vld [vmem:[#allocation3 + $0x54] sm:$0xf] }
 0x583   : > { %12068 = vmatpush3.bf16.xpose.msra.mxu1 %v10529_v47  ;;  %v9098_v47 = vsel %vm14301_vm5, %v9096_v31, %v9097_v19  ;;  %v17044_v31 = vld [vmem:[#allocation3 + $0x78] sm:$0xf] }
 0x584   : > { %12750 = vmatprep.subr.msk.bf16.mxu1 %vm4722_vm15, %v11724_v52  ;;  %v9040_v52 = vrot.slane %v9038_v61, 4  ;;  %v11727_v54 = vcombine.low %v9095_v40, %v9098_v47  ;;  %v11739_v0 = vcombine.low %v17044_v31, %v17042_v8  ;;  %v17052_v19 = vld [vmem:[#allocation3 + $0x18] sm:$0xf]  ;;  %v17058_v47 = vpop.permute.xlu1 %10616  ;;  %v17067_v40 = vld [vmem:[#allocation3 + $0x28] sm:$0xf]  ;;  %v9358_v57 = vshll.u32 %v17044_v31, 16 }
 0x585   : > { %17879 = vst [vmem:[#allocation18_spill] sm:$0xff] %v17067_v40  ;;  %v9163_v10 = vshrl.u32 %v17052_v19, 16 }
 0x586   : > { %v9042_v37 = vsel %vm14301_vm5, %v9040_v52, %v9041_v24  ;;  %v17060_v52 = vld [vmem:[#allocation3 + $0x84] sm:$0xf] }
 0x587   : > { %v11719_v44 = vcombine.low %v9039_v9, %v9042_v37  ;;  %v11740_v49 = vcombine.low %v17060_v52, %v17056_v33  ;;  %v17072_v24 = vld [vmem:[#allocation3 + $0x24] sm:$0xf]  ;;  %v17092_v9 = vld [vmem:[#allocation3 + $0x9c] sm:$0xf] }
 0x588   : > { %v11742_v36 = vcombine.low %v17092_v9, %v17090_v14 }
 0x589   : > { %v10541_v42 = vsel %vm4722_vm15, %v11719_v44, 0  ;;  %v17097_v44 = vld [vmem:[#allocation3 + $0x40] sm:$0xf] }
 0x58b   : > { %12070 = vmatpush3.bf16.xpose.msra.mxu1 %v10532_v28  ;;  %v8943_v28 = vld [vmem:[#allocation3 + $0x54] sm:$0xe] }
 0x58c   : > { %12751 = vmatprep.subr.msk.bf16.mxu1 %vm4722_vm15, %v11725_v5  ;;  %v9102_v5 = vsel %vm14301_vm5, %v11610_v22, %v9101_v43  ;;  %v11602_v25 = vrot.slane %v8943_v28, 9 }
 0x58d   : > { %v10017_v26 = vpop.f32.mrb[4].mxu1  ;;  %v11728_v48 = vcombine.low %v9102_v5, %v9105_v60  ;;  %v17100_v60 = vld [vmem:[#allocation3 + $0x3c] sm:$0xf] }
 0x58e   : > { %v16982_v6 = vadd.f32 %v10017_v26, %v16816_v15  ;;  %v10019_v27 = vpop.f32.mrb[5].mxu1  ;;  %v9034_v15 = vrot.slane %v16802_v34, 5  ;;  %v9110_v26 = vrot.slane %v9108_v39, 4  ;;  %v11734_v39 = vcombine.low %v17100_v60, %v17097_v44 }
 0x58f   : > { %v16985_v32 = vadd.f32 %v10019_v27, %v16819_v18  ;;  %v10021_v50 = vpop.f32.mrb[6].mxu1  ;;  %v11600_v18 = vrot.slane %v8941_v17, 9  ;;  %v9046_v27 = vsel %vm14301_vm5, %v11602_v25, %v9045_v51  ;;  %v11733_v51 = vcombine.low %v17086_v23, %v17083_v30 }
 0x590   : > { %v10022_v1 = vpop.f32.mrb[7].mxu1  ;;  %v9035_v2 = vsel %vm14301_vm5, %v9033_v62, %v9034_v15  ;;  %v9112_v50 = vsel %vm14301_vm5, %v9110_v26, %v9111_v21  ;;  %v8944_v62 = vld [vmem:[#allocation3 + $0x60] sm:$0xe]  ;;  %v505_v15 = vld [vmem:[#allocation3 + $0xd4] sm:$0x1]  ;;  %v10695_v25 = vsel %vm4722_vm15, %v11734_v39, 0 }
 0x591   : > { %v9032_v20 = vsel %vm14301_vm5, %v11600_v18, %v9031_v63  ;;  %v9049_v63 = vsel %vm14301_vm5, %v9047_v41, %v9048_v16  ;;  %v11729_v17 = vcombine.low %v9109_v13, %v9112_v50  ;;  %v11603_v56 = vrot.slane %v8944_v62, 9  ;;  %v17110_v16 = vld [vmem:[#allocation3 + $0xac] sm:$0xf]  ;;  %v17120_v26 = vld [vmem:[#allocation3 + $0x48] sm:$0xf] }
 0x592   : > { %v11718_v34 = vcombine.low %v9032_v20, %v9035_v2  ;;  %v11720_v11 = vcombine.low %v9046_v27, %v9049_v63  ;;  %v17049_v20 = vld [vmem:[#allocation3 + $0x1c] sm:$0xf]  ;;  %v10692_v53 = vsel %vm4722_vm15, %v11733_v51, 0  ;;  %v17133_v50 = vld [vmem:[#allocation3 + $0x58] sm:$0xf]  ;;  %v9166_v62 = vshll.u32 %v17052_v19, 16 }
 0x593   : > { %12072 = vmatpush3.bf16.xpose.msra.mxu1 %v10535_v35  ;;  %v9053_v18 = vsel %vm14301_vm5, %v11603_v56, %v9052_v7  ;;  %v17124_v7 = vld [vmem:[#allocation3 + $0xb8] sm:$0xf]  ;;  %v9379_v13 = vshrl.u32 %v17060_v52, 16  ;;  %v9364_v56 = vshll.u32 %v17042_v8, 16  ;;  %v9382_v35 = vshll.u32 %v17060_v52, 16 }
 0x594   : > { %12752 = vmatprep.subr.msk.bf16.mxu1 %vm4722_vm15, %v11726_v29  ;;  %v10538_v38 = vsel %vm4722_vm15, %v11718_v34, 0  ;;  %v10544_v1 = vsel %vm4722_vm15, %v11720_v11, 0  ;;  %v506_v29 = vsel %vm13119_vm2, 0, %v505_v15  ;;  %v11721_v2 = vcombine.low %v9053_v18, %v9056_v3  ;;  %v17151_v18 = vld [vmem:[#allocation3 + $0xc4] sm:$0xf] }
 0x595   : > { %507 = vst [vmem:[#allocation3 + $0xd4] sm:$0x1] %v506_v29  ;;  %v11731_v34 = vcombine.low %v17052_v19, %v17049_v20  ;;  %v11744_v21 = vcombine.low %v17126_v12, %v17124_v7  ;;  %v9355_v11 = vshrl.u32 %v17044_v31, 16  ;;  %v17147_v15 = vrot.slane %v9358_v57, 5  ;;  %v17179_v39 = vld [vmem:[#allocation3 + $0x64] sm:$0xf] }
 0x596   : > { %v10547_v61 = vsel %vm4722_vm15, %v11721_v2, 0  ;;  %v9187_v29 = vshrl.u32 %v17072_v24, 16  ;;  %v17153_v2 = vrot.slane %v9163_v10, 4  ;;  %v17155_v31 = vrot.slane %v9166_v62, 5 }
 0x597   : > { %v10686_v43 = vsel %vm4722_vm15, %v11731_v34, 0  ;;  %v17145_v3 = vrot.slane %v9355_v11, 4  ;;  %v17159_v19 = vrot.slane %v9379_v13, 4  ;;  %v9392_v34 = vshrl.u32 %v17056_v33, 16 }
 0x598   : > { %v9172_v52 = vshll.u32 %v17049_v20, 16  ;;  %v9427_v10 = vshrl.u32 %v17092_v9, 16 }
 0x59b   : > { %12074 = vmatpush3.bf16.xpose.msra.mxu1 %v10538_v38  ;;  %v11732_v38 = vcombine.low %v17072_v24, %v17067_v40 }
 0x59c   : > { %12753 = vmatprep.subr.msk.bf16.mxu1 %vm4722_vm15, %v11727_v54  ;;  %v17076_v54 = vld [vmem:[#allocation3 + $0x94] sm:$0xf] }
 0x59d   : > { %17880 = vst [vmem:[#allocation15_spill] sm:$0xff] %v17076_v54  ;;  %v10689_v58 = vsel %vm4722_vm15, %v11732_v38, 0 }
 0x5a3   : > { %12076 = vmatpush3.bf16.xpose.msra.mxu1 %v10541_v42 }
 0x5a4   : > { %12754 = vmatprep.subr.msk.bf16.mxu1 %vm4722_vm15, %v11728_v48  ;;  %v17112_v48 = vld [vmem:[#allocation3 + $0xa8] sm:$0xf] }
 0x5a5   : > { %v11743_v63 = vcombine.low %v17112_v48, %v17110_v16 }
 0x5ab   : > { %12078 = vmatpush3.bf16.xpose.msra.mxu1 %v10544_v1  ;;  %v9368_v1 = vshrl.u32 %v17042_v8, 16 }
 0x5ac   : > { %12755 = vmatprep.subr.msk.bf16.mxu1 %vm4722_vm15, %v11729_v17  ;;  %v11736_v17 = vcombine.low %v17139_v46, %v17133_v50 }
 0x5ad   : > { %v9370_v51 = vrot.slane %v9368_v1, 4 }
 0x5ae   : > { %v10701_v38 = vsel %vm4722_vm15, %v11736_v17, 0  ;;  %v9430_v17 = vshll.u32 %v17092_v9, 16  ;;  %v9235_v9 = vshrl.u32 %v17100_v60, 16 }
 0x5b3   : > { %12080 = vmatpush3.bf16.xpose.msra.mxu1 %v10547_v61  ;;  %v9176_v61 = vshrl.u32 %v17049_v20, 16 }
 0x5b4   : > { %12756 = vmatprep.subr.msk.bf16.mxu1 %vm4722_vm15, %v11739_v0  ;;  %v9190_v0 = vshll.u32 %v17072_v24, 16  ;;  %v17173_v24 = vrot.slane %v9187_v29, 4 }
 0x5b5   : > { %v9178_v11 = vrot.slane %v9176_v61, 4  ;;  %v9361_v61 = vor.u32 %v17147_v15, %v17145_v3  ;;  %v9196_v3 = vshll.u32 %v17067_v40, 16  ;;  %v17226_v15 = vrot.slane %v9430_v17, 5 }
 0x5ba   : > { %12082 = vmatmul.mubr.msk.bf16.vlgmr.msra.gmra.mrb[20].mxu1 %vm4722_vm15, %v16935_v55  ;;  %v17078_v55 = vld [vmem:[#allocation3 + $0x90] sm:$0xf] }
 0x5bb   : > { %12084 = vmatpush3.bf16.xpose.msra.mxu1 %v10686_v43  ;;  %12099 = vmatprep.mubr.msk.bf16.mxu1 %vm4722_vm15, %v17058_v47  ;;  %v11741_v37 = vcombine.low %v17078_v55, %v17076_v54  ;;  %v9403_v43 = vshrl.u32 %v17078_v55, 16 }
 0x5bc   : > { %12757 = vmatprep.subr.msk.bf16.mxu1 %vm4722_vm15, %v11740_v49  ;;  %v17163_v49 = vld [vmem:[#allocation3 + $0xc0] sm:$0xf] }
 0x5bd   : > { %v17195_v57 = vrot.slane %v9403_v43, 4  ;;  %v17213_v43 = vld [vmem:[#allocation3 + $0x20] sm:$0x1] }
 0x5be   : > { %17881 = vst [vmem:[#allocation9_spill] sm:$0xff] %v17213_v43 }
 0x5c3   : > { %12086 = vmatpush3.bf16.xpose.msra.mxu1 %v10689_v58  ;;  %v11745_v58 = vcombine.low %v17163_v49, %v17151_v18 }
 0x5c4   : > { %12758 = vmatprep.subr.msk.bf16.mxu1 %vm4722_vm15, %v11741_v37  ;;  %v17169_v37 = vrot.slane %v9364_v56, 5  ;;  %v9388_v56 = vshll.u32 %v17056_v33, 16  ;;  %v9238_v33 = vshll.u32 %v17100_v60, 16 }
 0x5cb   : > { %12088 = vmatpush3.bf16.xpose.msra.mxu1 %v10692_v53  ;;  %v17171_v53 = vrot.slane %v9382_v35, 5 }
 0x5cc   : > { %12759 = vmatprep.subr.msk.bf16.mxu1 %vm4722_vm15, %v11742_v36  ;;  %v9200_v36 = vshrl.u32 %v17067_v40, 16  ;;  %v17237_v40 = vrot.slane %v9235_v9, 4 }
 0x5cd   : > { %v10159_v22 = vpop.f32.mrb[8].mxu1 }
 0x5ce   : > { %v17103_v41 = vadd.f32 %v10159_v22, %v16982_v6  ;;  %v10161_v59 = vpop.f32.mrb[9].mxu1  ;;  %v17117_v6 = vld [vmem:[#allocation3 + $0x4c] sm:$0xf]  ;;  %v9406_v22 = vshll.u32 %v17078_v55, 16  ;;  %v17191_v55 = vld [vmem:[#allocation3 + $0xd0] sm:$0xf] }
 0x5cf   : > { %v17108_v28 = vadd.f32 %v10161_v59, %v16985_v32  ;;  %v10163_v5 = vpop.f32.mrb[10].mxu1  ;;  %v11735_v32 = vcombine.low %v17120_v26, %v17117_v6  ;;  %v17177_v59 = vld [vmem:[#allocation3 + $0x60] sm:$0xf] }
 0x5d0   : > { %v10164_v42 = vpop.f32.mrb[11].mxu1  ;;  %v17181_v5 = vrot.slane %v9190_v0, 5  ;;  %v11737_v62 = vcombine.low %v17177_v59, %v17179_v39  ;;  %v17201_v13 = vrot.slane %v9406_v22, 5 }
 0x5d1   : > { %v10698_v27 = vsel %vm4722_vm15, %v11735_v32, 0  ;;  %v17187_v32 = vld [vmem:[#allocation3 + $0x80] sm:$0x1]  ;;  %v17229_v42 = vrot.slane %v9388_v56, 5 }
 0x5d2   : > { %v9374_v0 = vshll.u32 %v17187_v32, 16  ;;  %v10704_v22 = vsel %vm4722_vm15, %v11737_v62, 0 }
 0x5d3   : > { %12090 = vmatpush3.bf16.xpose.msra.mxu1 %v10695_v25  ;;  %v9211_v25 = vshrl.u32 %v17086_v23, 16 }
 0x5d4   : > { %12760 = vmatprep.subr.msk.bf16.mxu1 %vm4722_vm15, %v11743_v63  ;;  %v9214_v63 = vshll.u32 %v17086_v23, 16  ;;  %v9371_v23 = vor.u32 %v9370_v51, %v17169_v37  ;;  %v17220_v51 = vrot.slane %v9427_v10, 4  ;;  %v9362_v10 = vrot.slane %v9361_v61, 4 }
 0x5d5   : > { %v17206_v35 = vrot.slane %v9211_v25, 4  ;;  %v17223_v25 = vld [vmem:[#allocation3 + $0x70] sm:$0xf]  ;;  %v9376_v62 = vrot.slane %v9374_v0, 5  ;;  %v9202_v61 = vrot.slane %v9200_v36, 4  ;;  %v9412_v0 = vshll.u32 %v17076_v54, 16 }
 0x5d6   : > { %v9372_v1 = vrot.slane %v9371_v23, 4  ;;  %v9169_v23 = vor.u32 %v17155_v31, %v17153_v2  ;;  %v9451_v2 = vshrl.u32 %v17112_v48, 16  ;;  %v9454_v31 = vshll.u32 %v17112_v48, 16 }
 0x5d8   : > { %v9377_v60 = vsel %vm13590_vm0, %v9372_v1, %v9376_v62  ;;  %v9367_v1 = vsel %vm13590_vm0, %v9362_v10, %v17169_v37  ;;  %v17882_v37 = vshrl.u32 %v17076_v54, 16 }
 0x5d9   : > { %v11756_v62 = vcombine.low %v9367_v1, %v9377_v60  ;;  %v17275_v60 = vrot.slane %v9451_v2, 4 }
 0x5da   : > { %v9418_v10 = vrot.slane %v17882_v37, 4 }
 0x5db   : > { %12092 = vmatpush3.bf16.xpose.msra.mxu1 %v10698_v27  ;;  %v17189_v27 = vld [vmem:[#allocation3 + $0xcc] sm:$0xf] }
 0x5dc   : > { %12761 = vmatprep.subr.msk.bf16.mxu1 %vm4722_vm15, %v11744_v21  ;;  %v17193_v21 = vrot.slane %v9172_v52, 5  ;;  %v11746_v29 = vcombine.low %v17189_v27, %v17191_v55  ;;  %v17215_v52 = vrot.slane %v9214_v63, 5  ;;  %v9182_v63 = vshll.u32 %v17213_v43, 16 }
 0x5dd   : > { %v17265_v43 = vrot.slane %v9412_v0, 5 }
 0x5de   : > { %v9184_v9 = vrot.slane %v9182_v63, 5  ;;  %v17262_v63 = vld [vmem:[#allocation3 + $0x2c] sm:$0x1] }
 0x5e3   : > { %12094 = vmatpush3.bf16.xpose.msra.mxu1 %v10701_v38  ;;  %v9394_v38 = vrot.slane %v9392_v34, 4  ;;  %v17244_v34 = vld [vmem:[#allocation3 + $0x8c] sm:$0x1] }
 0x5e4   : > { %12762 = vmatprep.subr.msk.bf16.mxu1 %vm4722_vm15, %v11745_v58  ;;  %v9179_v58 = vor.u32 %v9178_v11, %v17193_v21  ;;  %v17233_v11 = vld [vmem:[#allocation3 + $0x6c] sm:$0xf]  ;;  %v9398_v48 = vshll.u32 %v17244_v34, 16 }
 0x5e5   : > { %v11738_v56 = vcombine.low %v17233_v11, %v17223_v25  ;;  %v9395_v17 = vor.u32 %v9394_v38, %v17229_v42 }
 0x5e6   : > { %v9400_v37 = vrot.slane %v9398_v48, 5 }
 0x5e7   : > { %v10707_v36 = vsel %vm4722_vm15, %v11738_v56, 0  ;;  %v9396_v56 = vrot.slane %v9395_v17, 4  ;;  %v9436_v17 = vshll.u32 %v17090_v14, 16 }
 0x5eb   : > { %12096 = vmatpush3.bf16.xpose.msra.mxu1 %v10704_v22  ;;  %v9180_v22 = vrot.slane %v9179_v58, 4  ;;  %v9170_v58 = vrot.slane %v9169_v23, 4  ;;  %v9220_v23 = vshll.u32 %v17083_v30, 16 }
 0x5ec   : > { %12763 = vmatprep.subr.msk.bf16.mxu1 %vm4722_vm15, %v11746_v29  ;;  %v17246_v29 = vrot.slane %v9196_v3, 5  ;;  %v9385_v3 = vor.u32 %v17171_v53, %v17159_v19  ;;  %v17270_v19 = vrot.slane %v9238_v33, 5  ;;  %v9259_v53 = vshrl.u32 %v17120_v26, 16 }
 0x5ed   : > { %v9185_v45 = vsel %vm13590_vm0, %v9180_v22, %v9184_v9  ;;  %v9193_v22 = vor.u32 %v17181_v5, %v17173_v24  ;;  %v9206_v9 = vshll.u32 %v17262_v63, 16  ;;  %v17282_v33 = vrot.slane %v9454_v31, 5 }
 0x5ee   : > { %v9203_v38 = vor.u32 %v9202_v61, %v17246_v29  ;;  %v9175_v61 = vsel %vm13590_vm0, %v9170_v58, %v17193_v21  ;;  %v9386_v0 = vrot.slane %v9385_v3, 4  ;;  %v9419_v5 = vor.u32 %v9418_v10, %v17265_v43 }
 0x5ef   : > { %v11748_v1 = vcombine.low %v9175_v61, %v9185_v45  ;;  %v17288_v2 = vrot.slane %v9220_v23, 5  ;;  %v9262_v21 = vshll.u32 %v17120_v26, 16  ;;  %v9401_v45 = vsel %vm13590_vm0, %v9396_v56, %v9400_v37  ;;  %v17302_v23 = vpop.permute.xlu0 %10776  ;;  %v17305_v61 = vld [vmem:[#allocation3 + $0x38] sm:$0x1] }
 0x5f0   : > { %v9204_v24 = vrot.slane %v9203_v38, 4  ;;  %v9194_v31 = vrot.slane %v9193_v22, 4  ;;  %v9391_v3 = vsel %vm13590_vm0, %v9386_v0, %v17229_v42  ;;  %v9208_v48 = vrot.slane %v9206_v9, 5 }
 0x5f1   : > { %v9409_v38 = vor.u32 %v17201_v13, %v17195_v57  ;;  %v10830_v26 = vsel %vm4722_vm15, %v11748_v1, 0  ;;  %v17884_v56 = vshrl.u32 %v17090_v14, 16  ;;  %v9244_v37 = vshll.u32 %v17097_v44, 16 }
 0x5f2   : > { %v11757_v42 = vcombine.low %v9391_v3, %v9401_v45  ;;  %v9209_v57 = vsel %vm13590_vm0, %v9204_v24, %v9208_v48  ;;  %v9420_v13 = vrot.slane %v9419_v5, 4  ;;  %v17317_v9 = vrot.slane %v9259_v53, 4  ;;  %v17330_v5 = vld [vmem:[#allocation3 + $0xa4] sm:$0x1] }
 0x5f3   : > { %12098 = vmatpush3.bf16.xpose.msra.mxu1 %v10707_v36  ;;  %v17284_v36 = vld [vmem:[#allocation3 + $0x98] sm:$0x1]  ;;  %v9442_v22 = vrot.slane %v17884_v56, 4  ;;  %v9475_v1 = vshrl.u32 %v17126_v12, 16  ;;  %v9199_v56 = vsel %vm13590_vm0, %v9194_v31, %v17246_v29  ;;  %v9230_v53 = vshll.u32 %v17305_v61, 16  ;;  %17885 = vst [vmem:[#allocation11_spill] sm:$0xff] %v17330_v5 }
 0x5f4   : > { %12764 = vmatprep.subr.msk.bf16.mxu1 %vm4722_vm15, %v11756_v62  ;;  %v17883_v62 = vshrl.u32 %v17083_v30, 16  ;;  %v9422_v10 = vshll.u32 %v17284_v36, 16  ;;  %v17333_v3 = vrot.slane %v9244_v37, 5  ;;  %v17886_v29 = vshrl.u32 %v17097_v44, 16 }
 0x5f5   : > { %v17337_v48 = vrot.slane %v9262_v21, 5 }
 0x5f6   : > { %v9226_v54 = vrot.slane %v17883_v62, 4  ;;  %v17307_v62 = vrot.slane %v9436_v17, 5  ;;  %v9478_v17 = vshll.u32 %v17126_v12, 16  ;;  %v9424_v24 = vrot.slane %v9422_v10, 5 }
 0x5f7   : > { %v11749_v12 = vcombine.low %v9199_v56, %v9209_v57  ;;  %v9250_v31 = vrot.slane %v17886_v29, 4  ;;  %v9232_v57 = vrot.slane %v9230_v53, 5 }
 0x5f8   : > { %v9227_v0 = vor.u32 %v9226_v54, %v17288_v2  ;;  %v9217_v54 = vor.u32 %v17215_v52, %v17206_v35  ;;  %v9443_v45 = vor.u32 %v9442_v22, %v17307_v62  ;;  %v9460_v35 = vshll.u32 %v17110_v16, 16 }
 0x5f9   : > { %v17342_v52 = vrot.slane %v9475_v1, 4  ;;  %v9446_v22 = vshll.u32 %v17330_v5, 16  ;;  %v10833_v1 = vsel %vm4722_vm15, %v11749_v12, 0  ;;  %v9251_v29 = vor.u32 %v9250_v31, %v17333_v3 }
 0x5fa   : > { %12100 = vmatmul.mubr.msk.bf16.vlgmr.msra.gmra.mrb[24].mxu1 %vm4722_vm15, %v17058_v47  ;;  %v9410_v47 = vrot.slane %v9409_v38, 4  ;;  %v9425_v38 = vsel %vm13590_vm0, %v9420_v13, %v9424_v24  ;;  %v9228_v10 = vrot.slane %v9227_v0, 4  ;;  %v9218_v21 = vrot.slane %v9217_v54, 4  ;;  %v17352_v0 = vld [vmem:[#allocation3 + $0x44] sm:$0x1] }
 0x5fb   : > { %12102 = vmatpush3.bf16.xpose.msra.mxu1 %v10830_v26  ;;  %12117 = vmatprep.mubr.msk.bf16.mxu1 %vm4722_vm15, %v17302_v23  ;;  %v9488_v26 = vshrl.u32 %v17124_v7, 16  ;;  %v9433_v13 = vor.u32 %v17226_v15, %v17220_v51  ;;  %v9444_v24 = vrot.slane %v9443_v45, 4  ;;  %v17358_v5 = vrot.slane %v9460_v35, 5 }
 0x5fc   : > { %12765 = vmatprep.subr.msk.bf16.mxu1 %vm4722_vm15, %v11757_v42  ;;  %v9283_v42 = vshrl.u32 %v17139_v46, 16  ;;  %v9415_v37 = vsel %vm13590_vm0, %v9410_v47, %v17265_v43  ;;  %v9233_v58 = vsel %vm13590_vm0, %v9228_v10, %v9232_v57  ;;  %v17887_v43 = vshrl.u32 %v17110_v16, 16 }
 0x5fd   : > { %v11758_v56 = vcombine.low %v9415_v37, %v9425_v38  ;;  %v9268_v54 = vshll.u32 %v17117_v6, 16  ;;  %v17363_v53 = vrot.slane %v9478_v17, 5  ;;  %v9286_v51 = vshll.u32 %v17139_v46, 16  ;;  %v17378_v37 = vld [vmem:[#allocation3 + $0xb0] sm:$0x1] }
 0x5fe   : > { %v9466_v47 = vrot.slane %v17887_v43, 4  ;;  %v9448_v15 = vrot.slane %v9446_v22, 5  ;;  %v9254_v12 = vshll.u32 %v17352_v0, 16  ;;  %v17367_v45 = vrot.slane %v9283_v42, 4 }
 0x5ff   : > { %v9223_v31 = vsel %vm13590_vm0, %v9218_v21, %v17288_v2  ;;  %v9434_v38 = vrot.slane %v9433_v13, 4  ;;  %v9241_v10 = vor.u32 %v17270_v19, %v17237_v40  ;;  %v9296_v17 = vshrl.u32 %v17133_v50, 16 }
 0x600   : > { %v11750_v35 = vcombine.low %v9223_v31, %v9233_v58  ;;  %v9449_v46 = vsel %vm13590_vm0, %v9444_v24, %v9448_v15  ;;  %v9252_v22 = vrot.slane %v9251_v29, 4  ;;  %v9467_v42 = vor.u32 %v9466_v47, %v17358_v5 }
 0x601   : > { %v17381_v57 = vrot.slane %v9268_v54, 5  ;;  %v9484_v21 = vshll.u32 %v17124_v7, 16  ;;  %v17386_v13 = vrot.slane %v9286_v51, 5  ;;  %v9499_v40 = vshrl.u32 %v17163_v49, 16 }
 0x602   : > { %v9502_v19 = vshll.u32 %v17163_v49, 16  ;;  %v9256_v58 = vrot.slane %v9254_v12, 5  ;;  %v9439_v24 = vsel %vm13590_vm0, %v9434_v38, %v17307_v62  ;;  %v9242_v29 = vrot.slane %v9241_v10, 4  ;;  %v17400_v49 = vld [vmem:[#allocation3 + $0x50] sm:$0x1] }
 0x603   : > { %12104 = vmatpush3.bf16.xpose.msra.mxu1 %v10833_v1  ;;  %v17888_v1 = vshrl.u32 %v17117_v6, 16  ;;  %v9470_v43 = vshll.u32 %v17378_v37, 16  ;;  %v10836_v47 = vsel %vm4722_vm15, %v11750_v35, 0  ;;  %v11759_v54 = vcombine.low %v9439_v24, %v9449_v46 }
 0x604   : > { %12766 = vmatprep.subr.msk.bf16.mxu1 %vm4722_vm15, %v11758_v56  ;;  %v9512_v56 = vshrl.u32 %v17151_v18, 16  ;;  %v9257_v51 = vsel %vm13590_vm0, %v9252_v22, %v9256_v58  ;;  %v9457_v15 = vor.u32 %v17282_v33, %v17275_v60  ;;  %v9468_v12 = vrot.slane %v9467_v42, 4 }
 0x605   : > { %v9274_v2 = vrot.slane %v17888_v1, 4  ;;  %v17403_v1 = vrot.slane %v9484_v21, 5  ;;  %v9490_v62 = vrot.slane %v9488_v26, 4  ;;  %v17405_v38 = vrot.slane %v9499_v40, 4  ;;  %v17419_v40 = vld [vmem:[#allocation3 + $0xbc] sm:$0x1] }
 0x606   : > { %v9307_v10 = vshrl.u32 %v17177_v59, 16  ;;  %v9310_v35 = vshll.u32 %v17177_v59, 16  ;;  %v9292_v46 = vshll.u32 %v17133_v50, 16  ;;  %v9247_v60 = vsel %vm13590_vm0, %v9242_v29, %v17333_v3 }
 0x607   : > { %v9275_v31 = vor.u32 %v9274_v2, %v17381_v57  ;;  %v9472_v33 = vrot.slane %v9470_v43, 5  ;;  %v9265_v22 = vor.u32 %v17337_v48, %v17317_v9  ;;  %v9278_v26 = vshll.u32 %v17400_v49, 16 }
 0x608   : > { %v17417_v42 = vrot.slane %v9502_v19, 5  ;;  %v11751_v21 = vcombine.low %v9247_v60, %v9257_v51  ;;  %v9458_v59 = vrot.slane %v9457_v15, 4  ;;  %v9481_v58 = vor.u32 %v17363_v53, %v17342_v52 }
 0x609   : > { %v9473_v29 = vsel %vm13590_vm0, %v9468_v12, %v9472_v33  ;;  %v9276_v9 = vrot.slane %v9275_v31, 4  ;;  %v9491_v48 = vor.u32 %v9490_v62, %v17403_v1  ;;  %v9508_v51 = vshll.u32 %v17151_v18, 16 }
 0x60a   : > { %v9320_v52 = vshrl.u32 %v17179_v39, 16  ;;  %v9266_v53 = vrot.slane %v9265_v22, 4  ;;  %v9280_v15 = vrot.slane %v9278_v26, 5  ;;  %v9494_v60 = vshll.u32 %v17419_v40, 16 }
 0x60b   : > { %12106 = vmatpush3.bf16.xpose.msra.mxu1 %v10836_v47  ;;  %v17432_v47 = vrot.slane %v9292_v46, 5  ;;  %v17437_v12 = vrot.slane %v9307_v10, 4  ;;  %v9331_v31 = vshrl.u32 %v17233_v11, 16  ;;  %v9463_v62 = vsel %vm13590_vm0, %v9458_v59, %v17358_v5 }
 0x60c   : > { %12767 = vmatprep.subr.msk.bf16.mxu1 %vm4722_vm15, %v11759_v54  ;;  %v9298_v54 = vrot.slane %v9296_v17, 4  ;;  %v17444_v17 = vld [vmem:[#allocation3 + $0x5c] sm:$0x1]  ;;  %v11760_v46 = vcombine.low %v9463_v62, %v9473_v29  ;;  %v9281_v33 = vsel %vm13590_vm0, %v9276_v9, %v9280_v15  ;;  %v9482_v22 = vrot.slane %v9481_v58, 4 }
 0x60d   : > { %v10319_v2 = vpop.f32.mrb[12].mxu1  ;;  %v9492_v26 = vrot.slane %v9491_v48, 4  ;;  %v9271_v5 = vsel %vm13590_vm0, %v9266_v53, %v17381_v57  ;;  %v9496_v59 = vrot.slane %v9494_v60, 5  ;;  %v9289_v29 = vor.u32 %v17386_v13, %v17367_v45 }
 0x60e   : > { %v17424_v24 = vadd.f32 %v10319_v2, %v17103_v41  ;;  %v10321_v3 = vpop.f32.mrb[13].mxu1  ;;  %v9299_v10 = vor.u32 %v9298_v54, %v17432_v47  ;;  %v17449_v2 = vrot.slane %v9508_v51, 5  ;;  %v9302_v58 = vshll.u32 %v17444_v17, 16 }
 0x60f   : > { %v17430_v19 = vadd.f32 %v10321_v3, %v17108_v28  ;;  %v10323_v43 = vpop.f32.mrb[14].mxu1  ;;  %v10839_v28 = vsel %vm4722_vm15, %v11751_v21, 0  ;;  %v9514_v3 = vrot.slane %v9512_v56, 4  ;;  %v9316_v21 = vshll.u32 %v17179_v39, 16 }
 0x610   : > { %v10324_v41 = vpop.f32.mrb[15].mxu1  ;;  %v9523_v9 = vshrl.u32 %v17189_v27, 16  ;;  %v9526_v48 = vshll.u32 %v17189_v27, 16  ;;  %v9536_v56 = vshrl.u32 %v17191_v55, 16  ;;  %v17462_v43 = vld [vmem:[#allocation3 + $0xc8] sm:$0x1]  ;;  %v9487_v57 = vsel %vm13590_vm0, %v9482_v22, %v17403_v1 }
 0x611   : > { %v9532_v54 = vshll.u32 %v17191_v55, 16  ;;  %v9312_v51 = vrot.slane %v9310_v35, 5  ;;  %v11752_v41 = vcombine.low %v9271_v5, %v9281_v33  ;;  %v9497_v45 = vsel %vm13590_vm0, %v9492_v26, %v9496_v59  ;;  %v17474_v5 = vld [vmem:[#allocation3 + $0x68] sm:$0x1] }
 0x612   : > { %v9300_v13 = vrot.slane %v9299_v10, 4  ;;  %v9515_v53 = vor.u32 %v9514_v3, %v17449_v2  ;;  %v9318_v15 = vrot.slane %v9316_v21, 5  ;;  %v9322_v27 = vrot.slane %v9320_v52, 4  ;;  %v17479_v21 = vld [vmem:[#allocation3 + $0xd4] sm:$0x1] }
 0x613   : > { %12108 = vmatpush3.bf16.xpose.msra.mxu1 %v10839_v28  ;;  %v9290_v60 = vrot.slane %v9289_v29, 4  ;;  %v9304_v28 = vrot.slane %v9302_v58, 5  ;;  %v9505_v62 = vor.u32 %v17417_v42, %v17405_v38  ;;  %v9518_v35 = vshll.u32 %v17462_v43, 16 }
 0x614   : > { %12768 = vmatprep.subr.msk.bf16.mxu1 %vm4722_vm15, %v11760_v46  ;;  %v9525_v46 = vrot.slane %v9523_v9, 4  ;;  %v9528_v33 = vrot.slane %v9526_v48, 5  ;;  %v9534_v1 = vrot.slane %v9532_v54, 5  ;;  %v9538_v22 = vrot.slane %v9536_v56, 4 }
 0x615   : > { %v9334_v26 = vshll.u32 %v17233_v11, 16  ;;  %v9344_v10 = vshrl.u32 %v17223_v25, 16  ;;  %v10842_v3 = vsel %vm4722_vm15, %v11752_v41, 0  ;;  %v11761_v52 = vcombine.low %v9487_v57, %v9497_v45 }
 0x616   : > { %v9305_v38 = vsel %vm13590_vm0, %v9300_v13, %v9304_v28  ;;  %v9516_v42 = vrot.slane %v9515_v53, 4  ;;  %v9323_v59 = vor.u32 %v9322_v27, %v9318_v15  ;;  %v9340_v29 = vshll.u32 %v17223_v25, 16 }
 0x617   : > { %v9295_v58 = vsel %vm13590_vm0, %v9290_v60, %v17432_v47  ;;  %v9506_v9 = vrot.slane %v9505_v62, 4  ;;  %v9520_v48 = vrot.slane %v9518_v35, 5  ;;  %v9313_v56 = vor.u32 %v9312_v51, %v17437_v12 }
 0x618   : > { %v9326_v54 = vshll.u32 %v17474_v5, 16  ;;  %v9529_v41 = vor.u32 %v9528_v33, %v9525_v46  ;;  %v9539_v57 = vor.u32 %v9538_v22, %v9534_v1  ;;  %v9542_v45 = vshll.u32 %v17479_v21, 16 }
 0x619   : > { %v11753_v13 = vcombine.low %v9295_v58, %v9305_v38  ;;  %v9521_v53 = vsel %vm13590_vm0, %v9516_v42, %v9520_v48  ;;  %v9324_v27 = vrot.slane %v9323_v59, 4  ;;  %v9342_v28 = vrot.slane %v9340_v29, 5  ;;  %v17499_v38 = vld [vmem:[#allocation3 + $0x74] sm:$0x1] }
 0x61a   : > { %v9333_v47 = vrot.slane %v9331_v31, 4  ;;  %v9336_v60 = vrot.slane %v9334_v26, 5  ;;  %v9511_v12 = vsel %vm13590_vm0, %v9506_v9, %v17449_v2  ;;  %v9314_v51 = vrot.slane %v9313_v56, 4 }
 0x61b   : > { %12110 = vmatpush3.bf16.xpose.msra.mxu1 %v10842_v3  ;;  %v9346_v3 = vrot.slane %v9344_v10, 4  ;;  %v9328_v62 = vrot.slane %v9326_v54, 5  ;;  %v9530_v35 = vrot.slane %v9529_v41, 4  ;;  %v9540_v46 = vrot.slane %v9539_v57, 4 }
 0x61c   : > { %12769 = vmatprep.subr.msk.bf16.mxu1 %vm4722_vm15, %v11761_v52  ;;  %v9544_v33 = vrot.slane %v9542_v45, 5  ;;  %v10845_v22 = vsel %vm4722_vm15, %v11753_v13, 0  ;;  %v11762_v52 = vcombine.low %v9511_v12, %v9521_v53  ;;  %v9337_v26 = vor.u32 %v9336_v60, %v9333_v47  ;;  %v9554_v45 = vld [vmem:[#allocation3 + $0x78] sm:$0xe]  ;;  %v17890_v12 = vld [vmem:[#allocation14_spill] sm:$0xff] }
 0x61d   : > { %v9329_v11 = vsel %vm13590_vm0, %v9324_v27, %v9328_v62  ;;  %v9347_v31 = vor.u32 %v9346_v3, %v9342_v28  ;;  %v9319_v2 = vsel %vm13590_vm0, %v9314_v51, %v9318_v15  ;;  %v9535_v10 = vsel %vm13590_vm0, %v9530_v35, %v9534_v1  ;;  %v9546_v62 = vld [vmem:[#allocation3 + $0x18] sm:$0xe]  ;;  %v17891_v35 = vld [vmem:[#allocation9_spill] sm:$0xff] }
 0x61e   : > { %v9545_v42 = vsel %vm13590_vm0, %v9540_v46, %v9544_v33  ;;  %v9350_v59 = vshll.u32 %v17499_v38, 16  ;;  %v11754_v29 = vcombine.low %v9319_v2, %v9329_v11  ;;  %v9668_v9 = vrot.slane %v17042_v8, 5 }
 0x61f   : > { %v9348_v58 = vrot.slane %v9347_v31, 4  ;;  %v11763_v48 = vcombine.low %v9535_v10, %v9545_v42  ;;  %v9338_v56 = vrot.slane %v9337_v26, 4  ;;  %v9612_v1 = vrot.slane %v17049_v20, 5  ;;  %v9555_v31 = vld [vmem:[#allocation3 + $0x84] sm:$0xe] }
 0x620   : > { %v9352_v54 = vrot.slane %v9350_v59, 5  ;;  %v10848_v41 = vsel %vm4722_vm15, %v11754_v29, 0  ;;  %v9670_v57 = vrot.slane %v9668_v9, 4  ;;  %v9671_v8 = vrot.slane %v17187_v32, 5 }
 0x621   : > { %v9343_v13 = vsel %vm13590_vm0, %v9338_v56, %v9342_v28  ;;  %v11620_v27 = vrot.slane %v9554_v45, 9  ;;  %v9614_v60 = vrot.slane %v9612_v1, 4  ;;  %v9675_v51 = vrot.slane %v17890_v12, 5  ;;  %v17537_v56 = vpop.permute.xlu1 %10920 }
 0x622   : > { %v9353_v15 = vsel %vm13590_vm0, %v9348_v58, %v9352_v54  ;;  %v9672_v47 = vsel %vm14301_vm5, %v9670_v57, %v9671_v8  ;;  %v9615_v46 = vrot.slane %v17891_v35, 5  ;;  %v11612_v28 = vrot.slane %v9546_v62, 9  ;;  %v17893_v58 = vld [vmem:[#allocation15_spill] sm:$0xff] }
 0x623   : > { %12112 = vmatpush3.bf16.xpose.msra.mxu1 %v10845_v22  ;;  %v11755_v53 = vcombine.low %v9343_v13, %v9353_v15  ;;  %v9669_v20 = vsel %vm14301_vm5, %v11620_v27, %v9668_v9  ;;  %v9677_v22 = vrot.slane %v9675_v51, 4  ;;  %v9678_v2 = vrot.slane %v17244_v34, 5 }
 0x624   : > { %12770 = vmatprep.subr.msk.bf16.mxu1 %vm4722_vm15, %v11762_v52  ;;  %v11773_v4 = vcombine.low %v9669_v20, %v9672_v47  ;;  %v9616_v32 = vsel %vm14301_vm5, %v9614_v60, %v9615_v46  ;;  %v17892_v52 = vld [vmem:[#allocation18_spill] sm:$0xff]  ;;  %v9613_v26 = vsel %vm14301_vm5, %v11612_v28, %v9612_v1  ;;  %v11621_v42 = vrot.slane %v9555_v31, 9 }
 0x625   : > { %v10851_v33 = vsel %vm4722_vm15, %v11755_v53, 0  ;;  %v9619_v11 = vrot.slane %v17892_v52, 5  ;;  %v11765_v10 = vcombine.low %v9613_v26, %v9616_v32  ;;  %v9679_v59 = vsel %vm14301_vm5, %v9677_v22, %v9678_v2  ;;  %v17894_v32 = vld [vmem:[#allocation11_spill] sm:$0xff] }
 0x626   : > { %v9682_v9 = vrot.slane %v17893_v58, 5  ;;  %v9676_v54 = vsel %vm14301_vm5, %v11621_v42, %v9675_v51  ;;  %v9626_v13 = vrot.slane %v17083_v30, 5  ;;  %v9685_v8 = vrot.slane %v17284_v36, 5  ;;  %v9548_v30 = vld [vmem:[#allocation3 + $0x30] sm:$0xe] }
 0x627   : > { %v9621_v29 = vrot.slane %v9619_v11, 4  ;;  %v10974_v34 = vsel %vm4722_vm15, %v11765_v10, 0  ;;  %v11774_v15 = vcombine.low %v9676_v54, %v9679_v59  ;;  %v9689_v12 = vrot.slane %v17090_v14, 5  ;;  %v9557_v14 = vld [vmem:[#allocation3 + $0x9c] sm:$0xe] }
 0x628   : > { %v9684_v45 = vrot.slane %v9682_v9, 4  ;;  %v9628_v60 = vrot.slane %v9626_v13, 4  ;;  %v9629_v62 = vrot.slane %v17305_v61, 5  ;;  %v11614_v46 = vrot.slane %v9548_v30, 9  ;;  %v9549_v2 = vld [vmem:[#allocation3 + $0x3c] sm:$0xe] }
 0x629   : > { %v9692_v22 = vrot.slane %v17894_v32, 5  ;;  %v11623_v52 = vrot.slane %v9557_v14, 9  ;;  %v9696_v26 = vrot.slane %v17110_v16, 5  ;;  %v9636_v10 = vrot.slane %v17352_v0, 5 }
 0x62a   : > { %v9686_v47 = vsel %vm14301_vm5, %v9684_v45, %v9685_v8  ;;  %v9630_v36 = vsel %vm14301_vm5, %v9628_v60, %v9629_v62  ;;  %v9627_v28 = vsel %vm14301_vm5, %v11614_v46, %v9626_v13  ;;  %v9640_v54 = vrot.slane %v17117_v6, 5 }
 0x62b   : > { %12114 = vmatpush3.bf16.xpose.msra.mxu1 %v10848_v41  ;;  %v9622_v41 = vrot.slane %v17262_v63, 5  ;;  %v9556_v63 = vld [vmem:[#allocation3 + $0x90] sm:$0xe]  ;;  %v11767_v61 = vcombine.low %v9627_v28, %v9630_v36  ;;  %v9699_v0 = vrot.slane %v17378_v37, 5  ;;  %v11064_v37 = vld [vmem:[%s17701_s5] sm:$0xff]  ;;  %v9647_v30 = vrot.slane %v17133_v50, 5 }
 0x62c   : > { %12771 = vmatprep.subr.msk.bf16.mxu1 %vm4722_vm15, %v11763_v48  ;;  %v9547_v48 = vld [vmem:[#allocation3 + $0x24] sm:$0xe]  ;;  %v11622_v27 = vrot.slane %v9556_v63, 9  ;;  %v9642_v63 = vrot.slane %v9640_v54, 4  ;;  %11067 = vperm.xlu0 %12831, %v11064_v37   ;;  %v9650_v14 = vrot.slane %v17444_v17, 5  ;;  %v9717_v17 = vrot.slane %v17191_v55, 5 }
 0x62d   : > { %v11613_v57 = vrot.slane %v9547_v48, 9  ;;  %v9623_v1 = vsel %vm14301_vm5, %v9621_v29, %v9622_v41  ;;  %v10980_v42 = vsel %vm4722_vm15, %v11767_v61, 0  ;;  %v11615_v29 = vrot.slane %v9549_v2, 9  ;;  %v9560_v61 = vld [vmem:[#allocation3 + $0xc0] sm:$0xe] }
 0x62e   : > { %v9683_v51 = vsel %vm14301_vm5, %v11622_v27, %v9682_v9  ;;  %v9558_v9 = vld [vmem:[#allocation3 + $0xa8] sm:$0xe]  ;;  %v9698_v48 = vrot.slane %v9696_v26, 4  ;;  %v9649_v36 = vrot.slane %v9647_v30, 4  ;;  %v11626_v2 = vrot.slane %v9560_v61, 9 }
 0x62f   : > { %v11775_v35 = vcombine.low %v9683_v51, %v9686_v47  ;;  %v9559_v51 = vld [vmem:[#allocation3 + $0xb4] sm:$0xe] }
 0x630   : > { %v9700_v6 = vsel %vm14301_vm5, %v9698_v48, %v9699_v0  ;;  %v9720_v48 = vrot.slane %v17479_v21, 5 }
 0x633   : > { %12116 = vmatpush3.bf16.xpose.msra.mxu1 %v10851_v33  ;;  %v9691_v33 = vrot.slane %v9689_v12, 4 }
 0x634   : > { %12772 = vmatprep.subr.msk.bf16.mxu1 %vm4722_vm15, %v11773_v4  ;;  %v9633_v4 = vrot.slane %v17097_v44, 5  ;;  %v9690_v44 = vsel %vm14301_vm5, %v11623_v52, %v9689_v12 }
 0x636   : > { %v9635_v31 = vrot.slane %v9633_v4, 4  ;;  %v9634_v41 = vsel %vm14301_vm5, %v11615_v29, %v9633_v4  ;;  %v9551_v4 = vld [vmem:[#allocation3 + $0x54] sm:$0xe]  ;;  %v9657_v29 = vrot.slane %v17474_v5, 5 }
 0x638   : > { %v9637_v58 = vsel %vm14301_vm5, %v9635_v31, %v9636_v10  ;;  %v9713_v31 = vrot.slane %v17462_v43, 5 }
 0x63a   : > { %12118 = vmatmul.mubr.msk.bf16.vlgmr.msra.gmra.mrb[28].mxu1 %vm4722_vm15, %v17302_v23  ;;  %v9620_v23 = vsel %vm14301_vm5, %v11613_v57, %v9619_v11  ;;  %v9693_v11 = vsel %vm14301_vm5, %v9691_v33, %v9692_v22  ;;  %v11768_v57 = vcombine.low %v9634_v41, %v9637_v58  ;;  %v9710_v33 = vrot.slane %v17151_v18, 5 }
 0x63b   : > { %12120 = vmatpush3.bf16.xpose.msra.mxu1 %v10974_v34  ;;  %12135 = vmatprep.mubr.msk.bf16.mxu1 %vm4722_vm15, %v17537_v56  ;;  %v11766_v53 = vcombine.low %v9620_v23, %v9623_v1  ;;  %v11776_v59 = vcombine.low %v9690_v44, %v9693_v11  ;;  %v11624_v1 = vrot.slane %v9558_v9, 9  ;;  %v9703_v23 = vrot.slane %v17124_v7, 5  ;;  %v9561_v44 = vld [vmem:[#allocation3 + $0xcc] sm:$0xe] }
 0x63c   : > { %12773 = vmatprep.subr.msk.bf16.mxu1 %vm4722_vm15, %v11774_v15  ;;  %v10983_v27 = vsel %vm4722_vm15, %v11768_v57, 0  ;;  %v11617_v22 = vrot.slane %v9551_v4, 9  ;;  %v9712_v52 = vrot.slane %v9710_v33, 4  ;;  %v9654_v11 = vrot.slane %v17179_v39, 5  ;;  %v9552_v39 = vld [vmem:[#allocation3 + $0x60] sm:$0xe] }
 0x63d   : > { %v10977_v20 = vsel %vm4722_vm15, %v11766_v53, 0  ;;  %v9697_v53 = vsel %vm14301_vm5, %v11624_v1, %v9696_v26  ;;  %v9705_v12 = vrot.slane %v9703_v23, 4  ;;  %v11627_v58 = vrot.slane %v9561_v44, 9 }
 0x63e   : > { %v11777_v47 = vcombine.low %v9697_v53, %v9700_v6  ;;  %v9648_v18 = vsel %vm14301_vm5, %v11617_v22, %v9647_v30  ;;  %v9714_v10 = vsel %vm14301_vm5, %v9712_v52, %v9713_v31  ;;  %v9719_v9 = vrot.slane %v9717_v17, 4 }
 0x63f   : > { %v9661_v41 = vrot.slane %v17223_v25, 5  ;;  %v9718_v5 = vsel %vm14301_vm5, %v11627_v58, %v9717_v17  ;;  %v9664_v6 = vrot.slane %v17499_v38, 5 }
 0x640   : > { %v9721_v21 = vsel %vm14301_vm5, %v9719_v9, %v9720_v48 }
 0x641   : > { %v9663_v57 = vrot.slane %v9661_v41, 4  ;;  %v11780_v1 = vcombine.low %v9718_v5, %v9721_v21 }
 0x643   : > { %12122 = vmatpush3.bf16.xpose.msra.mxu1 %v10977_v20  ;;  %v9706_v20 = vrot.slane %v17419_v40, 5  ;;  %v9651_v40 = vsel %vm14301_vm5, %v9649_v36, %v9650_v14 }
 0x644   : > { %12774 = vmatprep.subr.msk.bf16.mxu1 %vm4722_vm15, %v11775_v35  ;;  %v11625_v35 = vrot.slane %v9559_v51, 9  ;;  %v11770_v26 = vcombine.low %v9648_v18, %v9651_v40 }
 0x645   : > { %v9707_v46 = vsel %vm14301_vm5, %v9705_v12, %v9706_v20 }
 0x646   : > { %v9704_v50 = vsel %vm14301_vm5, %v11625_v35, %v9703_v23  ;;  %v10989_v43 = vsel %vm4722_vm15, %v11770_v26, 0  ;;  %v9665_v23 = vsel %vm14301_vm5, %v9663_v57, %v9664_v6 }
 0x647   : > { %v11778_v32 = vcombine.low %v9704_v50, %v9707_v46 }
 0x64b   : > { %12124 = vmatpush3.bf16.xpose.msra.mxu1 %v10980_v42  ;;  %v9656_v42 = vrot.slane %v9654_v11, 4 }
 0x64c   : > { %12775 = vmatprep.subr.msk.bf16.mxu1 %vm4722_vm15, %v11776_v59  ;;  %v9711_v59 = vsel %vm14301_vm5, %v11626_v2, %v9710_v33 }
 0x64d   : > { %v10463_v16 = vpop.f32.mrb[16].mxu1  ;;  %v11779_v55 = vcombine.low %v9711_v59, %v9714_v10 }
 0x64e   : > { %v17583_v34 = vadd.f32 %v10463_v16, %v17424_v24  ;;  %v10465_v15 = vpop.f32.mrb[17].mxu1  ;;  %v9550_v24 = vld [vmem:[#allocation3 + $0x48] sm:$0xe]  ;;  %v9658_v16 = vsel %vm14301_vm5, %v9656_v42, %v9657_v29 }
 0x64f   : > { %v17586_v45 = vadd.f32 %v10465_v15, %v17430_v19  ;;  %v10467_v13 = vpop.f32.mrb[18].mxu1  ;;  %v9643_v19 = vrot.slane %v17400_v49, 5  ;;  %v11616_v60 = vrot.slane %v9550_v24, 9 }
 0x650   : > { %v10468_v8 = vpop.f32.mrb[19].mxu1  ;;  %v9553_v13 = vld [vmem:[#allocation3 + $0x6c] sm:$0xe] }
 0x651   : > { %v9644_v7 = vsel %vm14301_vm5, %v9642_v63, %v9643_v19  ;;  %v9641_v62 = vsel %vm14301_vm5, %v11616_v60, %v9640_v54  ;;  %v11618_v54 = vrot.slane %v9552_v39, 9  ;;  %v11619_v25 = vrot.slane %v9553_v13, 9 }
 0x652   : > { %v11769_v49 = vcombine.low %v9641_v62, %v9644_v7 }
 0x653   : > { %12126 = vmatpush3.bf16.xpose.msra.mxu1 %v10983_v27  ;;  %v9655_v0 = vsel %vm14301_vm5, %v11618_v54, %v9654_v11  ;;  %v9662_v37 = vsel %vm14301_vm5, %v11619_v25, %v9661_v41 }
 0x654   : > { %12776 = vmatprep.subr.msk.bf16.mxu1 %vm4722_vm15, %v11777_v47  ;;  %v10986_v28 = vsel %vm4722_vm15, %v11769_v49, 0  ;;  %v11771_v15 = vcombine.low %v9655_v0, %v9658_v16  ;;  %v11772_v8 = vcombine.low %v9662_v37, %v9665_v23 }
 0x656   : > { %v10992_v63 = vsel %vm4722_vm15, %v11771_v15, 0  ;;  %v10995_v24 = vsel %vm4722_vm15, %v11772_v8, 0 }
 0x65b   : > { %12128 = vmatpush3.bf16.xpose.msra.mxu1 %v10986_v28 }
 0x65c   : > { %12777 = vmatprep.subr.msk.bf16.mxu1 %vm4722_vm15, %v11778_v32 }
 0x663   : > { %12130 = vmatpush3.bf16.xpose.msra.mxu1 %v10989_v43 }
 0x664   : > { %12778 = vmatprep.subr.msk.bf16.mxu1 %vm4722_vm15, %v11779_v55 }
 0x66b   : > { %12132 = vmatpush3.bf16.xpose.msra.mxu1 %v10992_v63 }
 0x66c   : > { %12779 = vmatprep.subr.msk.bf16.mxu1 %vm4722_vm15, %v11780_v1 }
 0x673   : > { %12134 = vmatpush3.bf16.xpose.msra.mxu1 %v10995_v24 }
 0x67a   : > { %12136 = vmatmul.mubr.msk.bf16.vlgmr.msra.gmra.mrb[32].mxu1 %vm4722_vm15, %v17537_v56 }
 0x68d   : > { %v10607_v38 = vpop.f32.mrb[20].mxu1 }
 0x68e   : > { %v10614_v53 = vadd.f32 %v10607_v38, %v17583_v34  ;;  %v10609_v19 = vpop.f32.mrb[21].mxu1 }
 0x68f   : > { %v10615_v27 = vadd.f32 %v10609_v19, %v17586_v45  ;;  %v10611_v47 = vpop.f32.mrb[22].mxu1 }
 0x690   : > { %v10612_v60 = vpop.f32.mrb[23].mxu1 }
 0x6ab   : > { %v11068_v33 = vpop.permute.xlu0 %11067 }
 0x6cd   : > { %v10767_v7 = vpop.f32.mrb[24].mxu1 }
 0x6ce   : > { %v10774_v12 = vadd.f32 %v10767_v7, %v10614_v53  ;;  %v10769_v3 = vpop.f32.mrb[25].mxu1 }
 0x6cf   : > { %v10775_v30 = vadd.f32 %v10769_v3, %v10615_v27  ;;  %v10771_v51 = vpop.f32.mrb[26].mxu1 }
 0x6d0   : > { %v10772_v62 = vpop.f32.mrb[27].mxu1 }
 0x70d   : > { %v10911_v20 = vpop.f32.mrb[28].mxu1 }
 0x70e   : > { %v10918_v49 = vadd.f32 %v10911_v20, %v10774_v12  ;;  %v10913_v35 = vpop.f32.mrb[29].mxu1 }
 0x70f   : > { %v10919_v56 = vadd.f32 %v10913_v35, %v10775_v30  ;;  %v10915_v46 = vpop.f32.mrb[30].mxu1 }
 0x710   : > { %v10916_v36 = vpop.f32.mrb[31].mxu1 }
 0x74d   : > { %v11055_v34 = vpop.f32.mrb[32].mxu1 }
 0x74e   : > { %v11062_v45 = vadd.f32 %v11055_v34, %v10918_v49  ;;  %v11057_v4 = vpop.f32.mrb[33].mxu1 }
 0x74f   : > { %v11063_v50 = vadd.f32 %v11057_v4, %v10919_v56  ;;  %v11059_v14 = vpop.f32.mrb[34].mxu1 }
 0x750   : > { %v11070_v28 = vadd.f32 %v11068_v33, %v11062_v45  ;;  %v11060_v32 = vpop.f32.mrb[35].mxu1 }
 0x751   : > { %v11071_v22 = vadd.f32 %v11068_v33, %v11063_v50 }
 0x752   : > { %v11072_v40 = vmax.f32 %v11070_v28, 0.0 }
 0x753   : > { %v11073_v61 = vmax.f32 %v11071_v22, 0.0 }
 0x754   : > { %11074 = vst [vmem:[%s259_s13] sm:$0xff] %v11072_v40 }
 0x755   : > { %11075 = vst [vmem:[%s259_s13 + $0x8] sm:$0xff] %v11073_v61 }
 0x756   : > { %12966 = shalt.err (!%p12963_p3)
}
 0x757   : > { %s12967_s28 = scalar_lea.hbm %s17654_s17, 256  ;;  %s12971_s10 = scalar_lea.hbm %s17702_s6, 512 }
 0x758   : > { %p12968_p4 = scmp.ne.s32.totalorder %s17654_s17, %s12967_s28  ;;  %p12972_p9 = scmp.lt.u32.totalorder %s17654_s17, %s17702_s6 }
 0x759   : > { %p12973_p10 = scmp.lt.u32.totalorder %s12971_s10, %s12967_s28  ;;  %p12975_p12 = scmp.lt.u32.totalorder %s12967_s28, %s17654_s17 }
 0x75a   : > { %p12969_p7 = pnand %p12968_p4, %p13103_p5 }
 0x75b   : > { %p12974_p11 = por %p12973_p10, %p12972_p9 }
 0x75c   : > { %p12970_p8 = pneg %p12969_p7 }
 0x75d   : > { %p12976_p13 = por %p12975_p12, %p12974_p11 }
 0x75f   : > { %p12977_p0 = pnand %p12976_p13, %p12970_p8 }
 0x761   : > { %12980 = shalt.err (!%p12977_p0)
}
 0x762   : > { %12780 = dma.vmem_to_hbm [thread:$0]  (%p13103_p5), %s17656_s14, 256, %s17654_s17, %s11077_s18  }
 0x763 PF: > { %p12786_p1 = scmp.ge.s32.totalorder %s13015_s24, 2  ;;  %s11103_s13 = sand.u32 1, %s13003_s21  }
 0x764   : > { %s11104_s15 = scalar_lea.sflag [#allocation5], %s11103_s13 }
 0x765   : > { %p12783_p2 = pnand %p12786_p1, %p13107_p6 }
 0x767   : > { %12998 = dma.done.wait (!%p12783_p2), %s11104_s15, 256  }
 0x768   : > { %13000 = vsyncadd (!%p12783_p2), %s11104_s15, 4294967040  ;;  %p16_p3 = scmp.ge.s32.totalorder %s13090_s27, 4   ;;  %s17895_s21 = smov %s13007_s22 }
 0x769   : > { %s17896_s22 = smov %s13011_s23  ;;  %s17897_s23 = smov %s13101_s30 }
 0x76a   : > { %s17898_s24 = smov %s13090_s27  ;;  %18 = sbr.rel (!%p16_p3) target bundleno = 3 (0x3), region = 88 }
 0x771   :  { %11109 = vsyncpa [#allocation5], 1 }
 0x772   :  { %11111 = vsyncpa [#allocation5 + $0x1], 1 }

</bundles_post_ra>
